<compile_context>
chip_gen: v6e
topology: v6e:2x2x1
jax: 0.10.0
libtpu: 0.0.40
codegen_flags: <defaults>
</compile_context>

<pallas_src>
import functools
import math

import jax
import jax.numpy as jnp
from jax import lax
from jax.experimental import pallas as pl
from jax.experimental.pallas import tpu as pltpu


# ---------------------------------------------------------------------------
# Fused kernel: input projection + LSTM recurrence + LayerNorm per (b, t) chunk
# ---------------------------------------------------------------------------
def _lstm_ln_kernel(x_ref, wih_ref, whh_ref, bias_ref, gamma_ref, beta_ref,
                    o_ref, h_ref, c_ref, *, hidden, tc, eps):
    H = hidden
    blk_b = o_ref.shape[0]
    D = x_ref.shape[-1]

    # Reset the recurrent state at the first time chunk of every batch block.
    @pl.when(pl.program_id(1) == 0)
    def _():
        h_ref[...] = jnp.zeros_like(h_ref)
        c_ref[...] = jnp.zeros_like(c_ref)

    # ---- fused input projection for the whole chunk (one big-M MXU matmul) --
    # (blk_b, Tc, D) -> (blk_b*Tc, D): Tc is a multiple of 8 (sublane tile), so
    # this reshape is a layout no-op.
    x2 = x_ref[...].reshape(blk_b * tc, D).astype(wih_ref.dtype)
    xp = jnp.dot(x2, wih_ref[...], preferred_element_type=jnp.float32)
    xp = xp + bias_ref[...].astype(jnp.float32)              # (blk_b*Tc, 4H)
    xp = xp.reshape(blk_b, tc, 4 * H)

    # Hoist LayerNorm parameter broadcasts out of the time loop.
    gamma = jnp.broadcast_to(gamma_ref[...].astype(jnp.float32), (blk_b, H))
    beta = jnp.broadcast_to(beta_ref[...].astype(jnp.float32), (blk_b, H))

    h = h_ref[...]                                           # (blk_b, H) f32
    c = c_ref[...]

    def sigm(v):                       # one EUP op instead of exp + divide
        return 0.5 * jnp.tanh(0.5 * v) + 0.5

    # Static unroll over the Tc timesteps of this chunk (tc is a small
    # compile-time constant).  Gate slices are lane-aligned when H % 128 == 0.
    for tt in range(tc):
        gates = xp[:, tt, :] + jnp.dot(
            h.astype(whh_ref.dtype), whh_ref[...],
            preferred_element_type=jnp.float32)              # (blk_b, 4H)
        i_g = sigm(gates[:, 0 * H:1 * H])
        f_g = sigm(gates[:, 1 * H:2 * H])
        g_g = jnp.tanh(gates[:, 2 * H:3 * H])
        o_g = sigm(gates[:, 3 * H:4 * H])
        c = f_g * c + i_g * g_g
        h = o_g * jnp.tanh(c)

        # TODO(synk): Dropout(p=0.3) is identity in eval/inference; training
        # mode would use pltpu.prng_seed + pltpu.stateful_bernoulli here.

        # LayerNorm over H (PyTorch semantics: biased variance, eps in rsqrt),
        # variance in a single reduction pass: E[h^2] - mu^2.
        mu = jnp.mean(h, axis=-1, keepdims=True)
        var = jnp.mean(h * h, axis=-1, keepdims=True) - mu * mu
        y = (h - mu) * lax.rsqrt(var + eps)
        o_ref[:, tt, :] = (y * gamma + beta).astype(o_ref.dtype)

    h_ref[...] = h
    c_ref[...] = c


# ---------------------------------------------------------------------------
# Wrapper
# ---------------------------------------------------------------------------
def lstm_layer(x, w_ih, w_hh, b_ih, b_hh, gamma, beta, *,
               eps=1e-5, matmul_dtype=jnp.bfloat16, blk_b=128, tc=8):
    """Forward of LSTM_Layer: LayerNorm(LSTM(x)[0]) with eval-mode dropout.

    x: (B, T, D) batch_first.  PyTorch param layout:
      w_ih (4H, D), w_hh (4H, H), b_ih/b_hh (4H,), gamma/beta (H,).
    """
    B, T, D = x.shape
    H = w_hh.shape[1]
    G = 4 * H
    assert w_ih.shape == (G, D) and w_hh.shape == (G, H)

    # Time-chunk size: multiple of 8 (sublane) so the in-kernel reshape is free.
    tc = max(8, (int(tc) // 8) * 8)
    blk_b = max(1, min(blk_b, B))
    if B // blk_b < 2 and B >= 16:
        # Keep >=2 batch blocks so the "parallel" grid axis can span both
        # TensorCores on v7x (time is a dependency chain and can't be split).
        blk_b = max(8, (B + 1) // 2)

    B_pad = pl.cdiv(B, blk_b) * blk_b
    T_pad = pl.cdiv(T, tc) * tc
    if (B_pad, T_pad) != (B, T):
        x = jnp.pad(x, ((0, B_pad - B), (0, T_pad - T), (0, 0)))

    # Weights in (K, N) layout; bf16 by default for MXU throughput (f32 acc).
    w_ih_t = jnp.transpose(w_ih).astype(matmul_dtype)        # (D, 4H)
    w_hh_t = jnp.transpose(w_hh).astype(matmul_dtype)        # (H, 4H)
    bias2d = (b_ih + b_hh).astype(jnp.float32).reshape(1, G)
    gamma2d = gamma.astype(jnp.float32).reshape(1, H)
    beta2d = beta.astype(jnp.float32).reshape(1, H)

    kernel = functools.partial(_lstm_ln_kernel, hidden=H, tc=tc, eps=eps)
    y = pl.pallas_call(
        kernel,
        out_shape=jax.ShapeDtypeStruct((B_pad, T_pad, H), x.dtype),
        grid=(B_pad // blk_b, T_pad // tc),                  # batch parallel, time arbitrary
        in_specs=[
            pl.BlockSpec((blk_b, tc, D), lambda b, t: (b, t, 0)),  # x chunk streamed
            pl.BlockSpec((D, G), lambda b, t: (0, 0)),             # W_ih^T resident
            pl.BlockSpec((H, G), lambda b, t: (0, 0)),             # W_hh^T resident
            pl.BlockSpec((1, G), lambda b, t: (0, 0)),             # fused bias resident
            pl.BlockSpec((1, H), lambda b, t: (0, 0)),             # gamma resident
            pl.BlockSpec((1, H), lambda b, t: (0, 0)),             # beta resident
        ],
        out_specs=pl.BlockSpec((blk_b, tc, H), lambda b, t: (b, t, 0)),
        scratch_shapes=[
            pltpu.VMEM((blk_b, H), jnp.float32),   # h_t (carried across time chunks)
            pltpu.VMEM((blk_b, H), jnp.float32),   # c_t
        ],
        compiler_params=pltpu.CompilerParams(
            dimension_semantics=("parallel", "arbitrary")),
        # No oversized vmem_limit_bytes: working set here (weights + one x/out
        # chunk double-buffered + h/c) is small; default scoped limit is safe
        # on v7x's 64 MiB physical VMEM.
    )(x, w_ih_t, w_hh_t, bias2d, gamma2d, beta2d)

    return y[:B, :T, :]


# ---------------------------------------------------------------------------
# Pure-JAX reference (mirrors PyTorch nn.LSTM + LayerNorm, eval-mode dropout)
# ---------------------------------------------------------------------------
def lstm_layer_ref(x, w_ih, w_hh, b_ih, b_hh, gamma, beta, eps=1e-5):
    B, T, D = x.shape
    H = w_hh.shape[1]

    def step(carry, x_t):
        h, c = carry
        g = x_t @ w_ih.T + b_ih + h @ w_hh.T + b_hh
        i_g = jax.nn.sigmoid(g[:, 0 * H:1 * H])
        f_g = jax.nn.sigmoid(g[:, 1 * H:2 * H])
        g_g = jnp.tanh(g[:, 2 * H:3 * H])
        o_g = jax.nn.sigmoid(g[:, 3 * H:4 * H])
        c = f_g * c + i_g * g_g
        h = o_g * jnp.tanh(c)
        return (h, c), h

    h0 = jnp.zeros((B, H), jnp.float32)
    c0 = jnp.zeros((B, H), jnp.float32)
    (_, _), hs = lax.scan(step, (h0, c0), jnp.swapaxes(x, 0, 1))
    hs = jnp.swapaxes(hs, 0, 1)                               # (B, T, H)

    mu = hs.mean(-1, keepdims=True)
    var = ((hs - mu) ** 2).mean(-1, keepdims=True)
    return (hs - mu) / jnp.sqrt(var + eps) * gamma + beta


if __name__ == "__main__":
    key = jax.random.PRNGKey(0)
    k_w_ih, k_w_hh, k_b_ih, k_b_hh, k_x = jax.random.split(key, 5)

    # Small shapes consistent with the module: (batch, seq, input_dim) -> emb_dim.
    batch, seq, input_dim, emb_dim = 8, 16, 32, 128

    bound = 1.0 / math.sqrt(emb_dim)   # nn.LSTM default init: U(-1/sqrt(H), 1/sqrt(H))
    w_ih = jax.random.uniform(k_w_ih, (4 * emb_dim, input_dim), jnp.float32,
                              minval=-bound, maxval=bound)
    w_hh = jax.random.uniform(k_w_hh, (4 * emb_dim, emb_dim), jnp.float32,
                              minval=-bound, maxval=bound)
    b_ih = jax.random.uniform(k_b_ih, (4 * emb_dim,), jnp.float32,
                              minval=-bound, maxval=bound)
    b_hh = jax.random.uniform(k_b_hh, (4 * emb_dim,), jnp.float32,
                              minval=-bound, maxval=bound)
    gamma = jnp.ones((emb_dim,), jnp.float32)
    beta = jnp.zeros((emb_dim,), jnp.float32)

    x = jax.random.normal(k_x, (batch, seq, input_dim), jnp.float32)
    y_ref = lstm_layer_ref(x, w_ih, w_hh, b_ih, b_hh, gamma, beta)

    # f32 matmul path: tight correctness check.
    y_f32 = lstm_layer(x, w_ih, w_hh, b_ih, b_hh, gamma, beta,
                       matmul_dtype=jnp.float32)
    jax.block_until_ready(y_f32)
    assert y_f32.shape == (batch, seq, emb_dim)
    assert jnp.allclose(y_f32, y_ref, atol=2e-2, rtol=2e-2), \
        f"f32 max abs err {jnp.max(jnp.abs(y_f32 - y_ref))}"

    # Default bf16-weight / f32-accumulate path (recommended for MXU throughput),
    # validated against the f32 reference with a looser tolerance.
    y_bf16 = lstm_layer(x, w_ih, w_hh, b_ih, b_hh, gamma, beta)
    jax.block_until_ready(y_bf16)
    assert y_bf16.shape == (batch, seq, emb_dim)
    assert bool(jnp.all(jnp.isfinite(y_bf16)))
    assert jnp.allclose(y_bf16, y_ref, atol=1e-1, rtol=1e-1), \
        f"bf16 max abs err {jnp.max(jnp.abs(y_bf16 - y_ref))}"

    print("KERNEL_OK")
</pallas_src>

<mosaic_0001>
module attributes {stable_mosaic.version = 11 : i64} {
  func.func @_lstm_ln_kernel(%arg0: i32, %arg1: i32, %arg2: memref<8x8x32xf32, #tpu.memory_space<vmem>>, %arg3: memref<32x512xf32, #tpu.memory_space<vmem>>, %arg4: memref<128x512xf32, #tpu.memory_space<vmem>>, %arg5: memref<1x512xf32, #tpu.memory_space<vmem>>, %arg6: memref<1x128xf32, #tpu.memory_space<vmem>>, %arg7: memref<1x128xf32, #tpu.memory_space<vmem>>, %arg8: memref<8x8x128xf32, #tpu.memory_space<vmem>>, %arg9: memref<8x128xf32, #tpu.memory_space<vmem>>, %arg10: memref<8x128xf32, #tpu.memory_space<vmem>>) attributes {dimension_semantics = [#tpu.dimension_semantics<parallel>, #tpu.dimension_semantics<arbitrary>], iteration_bounds = array<i64: 1, 2>, scalar_prefetch = 0 : i64, scratch_operands = 2 : i64, tpu.core_type = #tpu.core_type<tc>, window_params = [{transform_indices = @transform_0, window_bounds = array<i64: 8, 8, 32>}, {pipeline_mode = #tpu.pipeline_mode<synchronous>, transform_indices = @transform_1, window_bounds = array<i64: 32, 512>}, {pipeline_mode = #tpu.pipeline_mode<synchronous>, transform_indices = @transform_2, window_bounds = array<i64: 128, 512>}, {pipeline_mode = #tpu.pipeline_mode<synchronous>, transform_indices = @transform_3, window_bounds = array<i64: 1, 512>}, {pipeline_mode = #tpu.pipeline_mode<synchronous>, transform_indices = @transform_4, window_bounds = array<i64: 1, 128>}, {pipeline_mode = #tpu.pipeline_mode<synchronous>, transform_indices = @transform_5, window_bounds = array<i64: 1, 128>}, {transform_indices = @transform_6, window_bounds = array<i64: 8, 8, 128>}]} {
    %c0_i32 = arith.constant 0 : i32
    %0 = arith.cmpi eq, %arg1, %c0_i32 : i32
    %1 = arith.extui %0 : i1 to i32
    %c0_i32_0 = arith.constant 0 : i32
    %2 = arith.cmpi ne, %1, %c0_i32_0 : i32
    scf.if %2 {
      %cst_172 = arith.constant 0.000000e+00 : f32
      %493 = vector.broadcast %cst_172 : f32 to vector<8x128xf32>
      %c0_173 = arith.constant 0 : index
      %c0_174 = arith.constant 0 : index
      %494 = vector.load %arg9[%c0_173, %c0_174] : memref<8x128xf32, #tpu.memory_space<vmem>>, vector<8x128xf32>
      tpu.vector_store %arg9[%c0_173, %c0_174], %493 {strides = array<i32>} : memref<8x128xf32, #tpu.memory_space<vmem>>, vector<8x128xf32>,
      %cst_175 = arith.constant 0.000000e+00 : f32
      %495 = vector.broadcast %cst_175 : f32 to vector<8x128xf32>
      %c0_176 = arith.constant 0 : index
      %c0_177 = arith.constant 0 : index
      %496 = vector.load %arg10[%c0_176, %c0_177] : memref<8x128xf32, #tpu.memory_space<vmem>>, vector<8x128xf32>
      tpu.vector_store %arg10[%c0_176, %c0_177], %495 {strides = array<i32>} : memref<8x128xf32, #tpu.memory_space<vmem>>, vector<8x128xf32>,
    } else {
    }
    %c0 = arith.constant 0 : index
    %c0_1 = arith.constant 0 : index
    %c0_2 = arith.constant 0 : index
    %3 = vector.load %arg2[%c0, %c0_1, %c0_2] : memref<8x8x32xf32, #tpu.memory_space<vmem>>, vector<8x8x32xf32>
    %4 = vector.shape_cast %3 : vector<8x8x32xf32> to vector<64x32xf32>
    %c0_3 = arith.constant 0 : index
    %c0_4 = arith.constant 0 : index
    %5 = vector.load %arg3[%c0_3, %c0_4] : memref<32x512xf32, #tpu.memory_space<vmem>>, vector<32x512xf32>
    %cst = arith.constant dense<0.000000e+00> : vector<64x512xf32>
    %6 = tpu.matmul %4, %5, %cst {dimension_numbers = #tpu.dot_dimension_numbers<[1], [0], [0], [1], [0, 0, 1, 1], [], []>} : vector<64x32xf32>, vector<32x512xf32>, vector<64x512xf32> -> vector<64x512xf32>
    %c0_5 = arith.constant 0 : index
    %c0_6 = arith.constant 0 : index
    %7 = vector.load %arg5[%c0_5, %c0_6] : memref<1x512xf32, #tpu.memory_space<vmem>>, vector<1x512xf32>
    %8 = vector.broadcast %7 : vector<1x512xf32> to vector<64x512xf32>
    %9 = arith.addf %6, %8 : vector<64x512xf32>
    %10 = vector.shape_cast %9 : vector<64x512xf32> to vector<8x8x512xf32>
    %c0_7 = arith.constant 0 : index
    %c0_8 = arith.constant 0 : index
    %11 = vector.load %arg6[%c0_7, %c0_8] : memref<1x128xf32, #tpu.memory_space<vmem>>, vector<1x128xf32>
    %12 = vector.shape_cast %11 : vector<1x128xf32> to vector<1x128xf32>
    %13 = vector.broadcast %12 : vector<1x128xf32> to vector<8x128xf32>
    %c0_9 = arith.constant 0 : index
    %c0_10 = arith.constant 0 : index
    %14 = vector.load %arg7[%c0_9, %c0_10] : memref<1x128xf32, #tpu.memory_space<vmem>>, vector<1x128xf32>
    %15 = vector.shape_cast %14 : vector<1x128xf32> to vector<1x128xf32>
    %16 = vector.broadcast %15 : vector<1x128xf32> to vector<8x128xf32>
    %c0_11 = arith.constant 0 : index
    %c0_12 = arith.constant 0 : index
    %17 = vector.load %arg9[%c0_11, %c0_12] : memref<8x128xf32, #tpu.memory_space<vmem>>, vector<8x128xf32>
    %c0_13 = arith.constant 0 : index
    %c0_14 = arith.constant 0 : index
    %18 = vector.load %arg10[%c0_13, %c0_14] : memref<8x128xf32, #tpu.memory_space<vmem>>, vector<8x128xf32>
    %19 = vector.extract_strided_slice %10 {offsets = [0, 0, 0], sizes = [8, 1, 512], strides = [1, 1, 1]} : vector<8x8x512xf32> to vector<8x1x512xf32>
    %20 = vector.shape_cast %19 : vector<8x1x512xf32> to vector<8x512xf32>
    %c0_15 = arith.constant 0 : index
    %c0_16 = arith.constant 0 : index
    %21 = vector.load %arg4[%c0_15, %c0_16] : memref<128x512xf32, #tpu.memory_space<vmem>>, vector<128x512xf32>
    %cst_17 = arith.constant dense<0.000000e+00> : vector<8x512xf32>
    %22 = tpu.matmul %17, %21, %cst_17 {dimension_numbers = #tpu.dot_dimension_numbers<[1], [0], [0], [1], [0, 0, 1, 1], [], []>} : vector<8x128xf32>, vector<128x512xf32>, vector<8x512xf32> -> vector<8x512xf32>
    %23 = arith.addf %20, %22 : vector<8x512xf32>
    %24 = vector.extract_strided_slice %23 {offsets = [0, 0], sizes = [8, 128], strides = [1, 1]} : vector<8x512xf32> to vector<8x128xf32>
    %cst_18 = arith.constant 5.000000e-01 : f32
    %25 = vector.broadcast %cst_18 : f32 to vector<8x128xf32>
    %26 = arith.mulf %25, %24 : vector<8x128xf32>
    %27 = math.tanh %26 : vector<8x128xf32>
    %cst_19 = arith.constant 5.000000e-01 : f32
    %28 = vector.broadcast %cst_19 : f32 to vector<8x128xf32>
    %29 = arith.mulf %28, %27 : vector<8x128xf32>
    %cst_20 = arith.constant 5.000000e-01 : f32
    %30 = vector.broadcast %cst_20 : f32 to vector<8x128xf32>
    %31 = arith.addf %29, %30 : vector<8x128xf32>
    %32 = vector.extract_strided_slice %23 {offsets = [0, 128], sizes = [8, 128], strides = [1, 1]} : vector<8x512xf32> to vector<8x128xf32>
    %cst_21 = arith.constant 5.000000e-01 : f32
    %33 = vector.broadcast %cst_21 : f32 to vector<8x128xf32>
    %34 = arith.mulf %33, %32 : vector<8x128xf32>
    %35 = math.tanh %34 : vector<8x128xf32>
    %cst_22 = arith.constant 5.000000e-01 : f32
    %36 = vector.broadcast %cst_22 : f32 to vector<8x128xf32>
    %37 = arith.mulf %36, %35 : vector<8x128xf32>
    %cst_23 = arith.constant 5.000000e-01 : f32
    %38 = vector.broadcast %cst_23 : f32 to vector<8x128xf32>
    %39 = arith.addf %37, %38 : vector<8x128xf32>
    %40 = vector.extract_strided_slice %23 {offsets = [0, 256], sizes = [8, 128], strides = [1, 1]} : vector<8x512xf32> to vector<8x128xf32>
    %41 = math.tanh %40 : vector<8x128xf32>
    %42 = vector.extract_strided_slice %23 {offsets = [0, 384], sizes = [8, 128], strides = [1, 1]} : vector<8x512xf32> to vector<8x128xf32>
    %cst_24 = arith.constant 5.000000e-01 : f32
    %43 = vector.broadcast %cst_24 : f32 to vector<8x128xf32>
    %44 = arith.mulf %43, %42 : vector<8x128xf32>
    %45 = math.tanh %44 : vector<8x128xf32>
    %cst_25 = arith.constant 5.000000e-01 : f32
    %46 = vector.broadcast %cst_25 : f32 to vector<8x128xf32>
    %47 = arith.mulf %46, %45 : vector<8x128xf32>
    %cst_26 = arith.constant 5.000000e-01 : f32
    %48 = vector.broadcast %cst_26 : f32 to vector<8x128xf32>
    %49 = arith.addf %47, %48 : vector<8x128xf32>
    %50 = arith.mulf %39, %18 : vector<8x128xf32>
    %51 = arith.mulf %31, %41 : vector<8x128xf32>
    %52 = arith.addf %50, %51 : vector<8x128xf32>
    %53 = math.tanh %52 : vector<8x128xf32>
    %54 = arith.mulf %49, %53 : vector<8x128xf32>
    %cst_27 = arith.constant dense<0.000000e+00> : vector<8xf32>
    %55 = vector.multi_reduction <add>, %54, %cst_27 [1] : vector<8x128xf32> to vector<8xf32>
    %56 = vector.shape_cast %55 : vector<8xf32> to vector<8x1xf32>
    %cst_28 = arith.constant 1.280000e+02 : f32
    %57 = vector.broadcast %cst_28 : f32 to vector<8x1xf32>
    %58 = arith.divf %56, %57 : vector<8x1xf32>
    %59 = arith.mulf %54, %54 : vector<8x128xf32>
    %cst_29 = arith.constant dense<0.000000e+00> : vector<8xf32>
    %60 = vector.multi_reduction <add>, %59, %cst_29 [1] : vector<8x128xf32> to vector<8xf32>
    %61 = vector.shape_cast %60 : vector<8xf32> to vector<8x1xf32>
    %cst_30 = arith.constant 1.280000e+02 : f32
    %62 = vector.broadcast %cst_30 : f32 to vector<8x1xf32>
    %63 = arith.divf %61, %62 : vector<8x1xf32>
    %64 = arith.mulf %58, %58 : vector<8x1xf32>
    %65 = arith.subf %63, %64 : vector<8x1xf32>
    %66 = vector.broadcast %58 : vector<8x1xf32> to vector<8x128xf32>
    %67 = arith.subf %54, %66 : vector<8x128xf32>
    %cst_31 = arith.constant 9.99999974E-6 : f32
    %68 = vector.broadcast %cst_31 : f32 to vector<8x1xf32>
    %69 = arith.addf %65, %68 : vector<8x1xf32>
    %70 = math.rsqrt %69 : vector<8x1xf32>
    %71 = vector.broadcast %70 : vector<8x1xf32> to vector<8x128xf32>
    %72 = arith.mulf %67, %71 : vector<8x128xf32>
    %73 = arith.mulf %72, %13 : vector<8x128xf32>
    %74 = arith.addf %73, %16 : vector<8x128xf32>
    %c0_32 = arith.constant 0 : index
    %c0_33 = arith.constant 0 : index
    %c0_34 = arith.constant 0 : index
    %75 = vector.load %arg8[%c0_32, %c0_33, %c0_34] : memref<8x8x128xf32, #tpu.memory_space<vmem>>, vector<8x1x128xf32>
    %76 = vector.shape_cast %75 : vector<8x1x128xf32> to vector<8x128xf32>
    %77 = vector.shape_cast %74 : vector<8x128xf32> to vector<8x1x128xf32>
    tpu.vector_store %arg8[%c0_32, %c0_33, %c0_34], %77 {strides = array<i32>} : memref<8x8x128xf32, #tpu.memory_space<vmem>>, vector<8x1x128xf32>,
    %78 = vector.extract_strided_slice %10 {offsets = [0, 1, 0], sizes = [8, 1, 512], strides = [1, 1, 1]} : vector<8x8x512xf32> to vector<8x1x512xf32>
    %79 = vector.shape_cast %78 : vector<8x1x512xf32> to vector<8x512xf32>
    %c0_35 = arith.constant 0 : index
    %c0_36 = arith.constant 0 : index
    %80 = vector.load %arg4[%c0_35, %c0_36] : memref<128x512xf32, #tpu.memory_space<vmem>>, vector<128x512xf32>
    %cst_37 = arith.constant dense<0.000000e+00> : vector<8x512xf32>
    %81 = tpu.matmul %54, %80, %cst_37 {dimension_numbers = #tpu.dot_dimension_numbers<[1], [0], [0], [1], [0, 0, 1, 1], [], []>} : vector<8x128xf32>, vector<128x512xf32>, vector<8x512xf32> -> vector<8x512xf32>
    %82 = arith.addf %79, %81 : vector<8x512xf32>
    %83 = vector.extract_strided_slice %82 {offsets = [0, 0], sizes = [8, 128], strides = [1, 1]} : vector<8x512xf32> to vector<8x128xf32>
    %cst_38 = arith.constant 5.000000e-01 : f32
    %84 = vector.broadcast %cst_38 : f32 to vector<8x128xf32>
    %85 = arith.mulf %84, %83 : vector<8x128xf32>
    %86 = math.tanh %85 : vector<8x128xf32>
    %cst_39 = arith.constant 5.000000e-01 : f32
    %87 = vector.broadcast %cst_39 : f32 to vector<8x128xf32>
    %88 = arith.mulf %87, %86 : vector<8x128xf32>
    %cst_40 = arith.constant 5.000000e-01 : f32
    %89 = vector.broadcast %cst_40 : f32 to vector<8x128xf32>
    %90 = arith.addf %88, %89 : vector<8x128xf32>
    %91 = vector.extract_strided_slice %82 {offsets = [0, 128], sizes = [8, 128], strides = [1, 1]} : vector<8x512xf32> to vector<8x128xf32>
    %cst_41 = arith.constant 5.000000e-01 : f32
    %92 = vector.broadcast %cst_41 : f32 to vector<8x128xf32>
    %93 = arith.mulf %92, %91 : vector<8x128xf32>
    %94 = math.tanh %93 : vector<8x128xf32>
    %cst_42 = arith.constant 5.000000e-01 : f32
    %95 = vector.broadcast %cst_42 : f32 to vector<8x128xf32>
    %96 = arith.mulf %95, %94 : vector<8x128xf32>
    %cst_43 = arith.constant 5.000000e-01 : f32
    %97 = vector.broadcast %cst_43 : f32 to vector<8x128xf32>
    %98 = arith.addf %96, %97 : vector<8x128xf32>
    %99 = vector.extract_strided_slice %82 {offsets = [0, 256], sizes = [8, 128], strides = [1, 1]} : vector<8x512xf32> to vector<8x128xf32>
    %100 = math.tanh %99 : vector<8x128xf32>
    %101 = vector.extract_strided_slice %82 {offsets = [0, 384], sizes = [8, 128], strides = [1, 1]} : vector<8x512xf32> to vector<8x128xf32>
    %cst_44 = arith.constant 5.000000e-01 : f32
    %102 = vector.broadcast %cst_44 : f32 to vector<8x128xf32>
    %103 = arith.mulf %102, %101 : vector<8x128xf32>
    %104 = math.tanh %103 : vector<8x128xf32>
    %cst_45 = arith.constant 5.000000e-01 : f32
    %105 = vector.broadcast %cst_45 : f32 to vector<8x128xf32>
    %106 = arith.mulf %105, %104 : vector<8x128xf32>
    %cst_46 = arith.constant 5.000000e-01 : f32
    %107 = vector.broadcast %cst_46 : f32 to vector<8x128xf32>
    %108 = arith.addf %106, %107 : vector<8x128xf32>
    %109 = arith.mulf %98, %52 : vector<8x128xf32>
    %110 = arith.mulf %90, %100 : vector<8x128xf32>
    %111 = arith.addf %109, %110 : vector<8x128xf32>
    %112 = math.tanh %111 : vector<8x128xf32>
    %113 = arith.mulf %108, %112 : vector<8x128xf32>
    %cst_47 = arith.constant dense<0.000000e+00> : vector<8xf32>
    %114 = vector.multi_reduction <add>, %113, %cst_47 [1] : vector<8x128xf32> to vector<8xf32>
    %115 = vector.shape_cast %114 : vector<8xf32> to vector<8x1xf32>
    %cst_48 = arith.constant 1.280000e+02 : f32
    %116 = vector.broadcast %cst_48 : f32 to vector<8x1xf32>
    %117 = arith.divf %115, %116 : vector<8x1xf32>
    %118 = arith.mulf %113, %113 : vector<8x128xf32>
    %cst_49 = arith.constant dense<0.000000e+00> : vector<8xf32>
    %119 = vector.multi_reduction <add>, %118, %cst_49 [1] : vector<8x128xf32> to vector<8xf32>
    %120 = vector.shape_cast %119 : vector<8xf32> to vector<8x1xf32>
    %cst_50 = arith.constant 1.280000e+02 : f32
    %121 = vector.broadcast %cst_50 : f32 to vector<8x1xf32>
    %122 = arith.divf %120, %121 : vector<8x1xf32>
    %123 = arith.mulf %117, %117 : vector<8x1xf32>
    %124 = arith.subf %122, %123 : vector<8x1xf32>
    %125 = vector.broadcast %117 : vector<8x1xf32> to vector<8x128xf32>
    %126 = arith.subf %113, %125 : vector<8x128xf32>
    %cst_51 = arith.constant 9.99999974E-6 : f32
    %127 = vector.broadcast %cst_51 : f32 to vector<8x1xf32>
    %128 = arith.addf %124, %127 : vector<8x1xf32>
    %129 = math.rsqrt %128 : vector<8x1xf32>
    %130 = vector.broadcast %129 : vector<8x1xf32> to vector<8x128xf32>
    %131 = arith.mulf %126, %130 : vector<8x128xf32>
    %132 = arith.mulf %131, %13 : vector<8x128xf32>
    %133 = arith.addf %132, %16 : vector<8x128xf32>
    %c0_52 = arith.constant 0 : index
    %c1 = arith.constant 1 : index
    %c0_53 = arith.constant 0 : index
    %134 = vector.load %arg8[%c0_52, %c1, %c0_53] : memref<8x8x128xf32, #tpu.memory_space<vmem>>, vector<8x1x128xf32>
    %135 = vector.shape_cast %134 : vector<8x1x128xf32> to vector<8x128xf32>
    %136 = vector.shape_cast %133 : vector<8x128xf32> to vector<8x1x128xf32>
    tpu.vector_store %arg8[%c0_52, %c1, %c0_53], %136 {strides = array<i32>} : memref<8x8x128xf32, #tpu.memory_space<vmem>>, vector<8x1x128xf32>,
    %137 = vector.extract_strided_slice %10 {offsets = [0, 2, 0], sizes = [8, 1, 512], strides = [1, 1, 1]} : vector<8x8x512xf32> to vector<8x1x512xf32>
    %138 = vector.shape_cast %137 : vector<8x1x512xf32> to vector<8x512xf32>
    %c0_54 = arith.constant 0 : index
    %c0_55 = arith.constant 0 : index
    %139 = vector.load %arg4[%c0_54, %c0_55] : memref<128x512xf32, #tpu.memory_space<vmem>>, vector<128x512xf32>
    %cst_56 = arith.constant dense<0.000000e+00> : vector<8x512xf32>
    %140 = tpu.matmul %113, %139, %cst_56 {dimension_numbers = #tpu.dot_dimension_numbers<[1], [0], [0], [1], [0, 0, 1, 1], [], []>} : vector<8x128xf32>, vector<128x512xf32>, vector<8x512xf32> -> vector<8x512xf32>
    %141 = arith.addf %138, %140 : vector<8x512xf32>
    %142 = vector.extract_strided_slice %141 {offsets = [0, 0], sizes = [8, 128], strides = [1, 1]} : vector<8x512xf32> to vector<8x128xf32>
    %cst_57 = arith.constant 5.000000e-01 : f32
    %143 = vector.broadcast %cst_57 : f32 to vector<8x128xf32>
    %144 = arith.mulf %143, %142 : vector<8x128xf32>
    %145 = math.tanh %144 : vector<8x128xf32>
    %cst_58 = arith.constant 5.000000e-01 : f32
    %146 = vector.broadcast %cst_58 : f32 to vector<8x128xf32>
    %147 = arith.mulf %146, %145 : vector<8x128xf32>
    %cst_59 = arith.constant 5.000000e-01 : f32
    %148 = vector.broadcast %cst_59 : f32 to vector<8x128xf32>
    %149 = arith.addf %147, %148 : vector<8x128xf32>
    %150 = vector.extract_strided_slice %141 {offsets = [0, 128], sizes = [8, 128], strides = [1, 1]} : vector<8x512xf32> to vector<8x128xf32>
    %cst_60 = arith.constant 5.000000e-01 : f32
    %151 = vector.broadcast %cst_60 : f32 to vector<8x128xf32>
    %152 = arith.mulf %151, %150 : vector<8x128xf32>
    %153 = math.tanh %152 : vector<8x128xf32>
    %cst_61 = arith.constant 5.000000e-01 : f32
    %154 = vector.broadcast %cst_61 : f32 to vector<8x128xf32>
    %155 = arith.mulf %154, %153 : vector<8x128xf32>
    %cst_62 = arith.constant 5.000000e-01 : f32
    %156 = vector.broadcast %cst_62 : f32 to vector<8x128xf32>
    %157 = arith.addf %155, %156 : vector<8x128xf32>
    %158 = vector.extract_strided_slice %141 {offsets = [0, 256], sizes = [8, 128], strides = [1, 1]} : vector<8x512xf32> to vector<8x128xf32>
    %159 = math.tanh %158 : vector<8x128xf32>
    %160 = vector.extract_strided_slice %141 {offsets = [0, 384], sizes = [8, 128], strides = [1, 1]} : vector<8x512xf32> to vector<8x128xf32>
    %cst_63 = arith.constant 5.000000e-01 : f32
    %161 = vector.broadcast %cst_63 : f32 to vector<8x128xf32>
    %162 = arith.mulf %161, %160 : vector<8x128xf32>
    %163 = math.tanh %162 : vector<8x128xf32>
    %cst_64 = arith.constant 5.000000e-01 : f32
    %164 = vector.broadcast %cst_64 : f32 to vector<8x128xf32>
    %165 = arith.mulf %164, %163 : vector<8x128xf32>
    %cst_65 = arith.constant 5.000000e-01 : f32
    %166 = vector.broadcast %cst_65 : f32 to vector<8x128xf32>
    %167 = arith.addf %165, %166 : vector<8x128xf32>
    %168 = arith.mulf %157, %111 : vector<8x128xf32>
    %169 = arith.mulf %149, %159 : vector<8x128xf32>
    %170 = arith.addf %168, %169 : vector<8x128xf32>
    %171 = math.tanh %170 : vector<8x128xf32>
    %172 = arith.mulf %167, %171 : vector<8x128xf32>
    %cst_66 = arith.constant dense<0.000000e+00> : vector<8xf32>
    %173 = vector.multi_reduction <add>, %172, %cst_66 [1] : vector<8x128xf32> to vector<8xf32>
    %174 = vector.shape_cast %173 : vector<8xf32> to vector<8x1xf32>
    %cst_67 = arith.constant 1.280000e+02 : f32
    %175 = vector.broadcast %cst_67 : f32 to vector<8x1xf32>
    %176 = arith.divf %174, %175 : vector<8x1xf32>
    %177 = arith.mulf %172, %172 : vector<8x128xf32>
    %cst_68 = arith.constant dense<0.000000e+00> : vector<8xf32>
    %178 = vector.multi_reduction <add>, %177, %cst_68 [1] : vector<8x128xf32> to vector<8xf32>
    %179 = vector.shape_cast %178 : vector<8xf32> to vector<8x1xf32>
    %cst_69 = arith.constant 1.280000e+02 : f32
    %180 = vector.broadcast %cst_69 : f32 to vector<8x1xf32>
    %181 = arith.divf %179, %180 : vector<8x1xf32>
    %182 = arith.mulf %176, %176 : vector<8x1xf32>
    %183 = arith.subf %181, %182 : vector<8x1xf32>
    %184 = vector.broadcast %176 : vector<8x1xf32> to vector<8x128xf32>
    %185 = arith.subf %172, %184 : vector<8x128xf32>
    %cst_70 = arith.constant 9.99999974E-6 : f32
    %186 = vector.broadcast %cst_70 : f32 to vector<8x1xf32>
    %187 = arith.addf %183, %186 : vector<8x1xf32>
    %188 = math.rsqrt %187 : vector<8x1xf32>
    %189 = vector.broadcast %188 : vector<8x1xf32> to vector<8x128xf32>
    %190 = arith.mulf %185, %189 : vector<8x128xf32>
    %191 = arith.mulf %190, %13 : vector<8x128xf32>
    %192 = arith.addf %191, %16 : vector<8x128xf32>
    %c0_71 = arith.constant 0 : index
    %c2 = arith.constant 2 : index
    %c0_72 = arith.constant 0 : index
    %193 = vector.load %arg8[%c0_71, %c2, %c0_72] : memref<8x8x128xf32, #tpu.memory_space<vmem>>, vector<8x1x128xf32>
    %194 = vector.shape_cast %193 : vector<8x1x128xf32> to vector<8x128xf32>
    %195 = vector.shape_cast %192 : vector<8x128xf32> to vector<8x1x128xf32>
    tpu.vector_store %arg8[%c0_71, %c2, %c0_72], %195 {strides = array<i32>} : memref<8x8x128xf32, #tpu.memory_space<vmem>>, vector<8x1x128xf32>,
    %196 = vector.extract_strided_slice %10 {offsets = [0, 3, 0], sizes = [8, 1, 512], strides = [1, 1, 1]} : vector<8x8x512xf32> to vector<8x1x512xf32>
    %197 = vector.shape_cast %196 : vector<8x1x512xf32> to vector<8x512xf32>
    %c0_73 = arith.constant 0 : index
    %c0_74 = arith.constant 0 : index
    %198 = vector.load %arg4[%c0_73, %c0_74] : memref<128x512xf32, #tpu.memory_space<vmem>>, vector<128x512xf32>
    %cst_75 = arith.constant dense<0.000000e+00> : vector<8x512xf32>
    %199 = tpu.matmul %172, %198, %cst_75 {dimension_numbers = #tpu.dot_dimension_numbers<[1], [0], [0], [1], [0, 0, 1, 1], [], []>} : vector<8x128xf32>, vector<128x512xf32>, vector<8x512xf32> -> vector<8x512xf32>
    %200 = arith.addf %197, %199 : vector<8x512xf32>
    %201 = vector.extract_strided_slice %200 {offsets = [0, 0], sizes = [8, 128], strides = [1, 1]} : vector<8x512xf32> to vector<8x128xf32>
    %cst_76 = arith.constant 5.000000e-01 : f32
    %202 = vector.broadcast %cst_76 : f32 to vector<8x128xf32>
    %203 = arith.mulf %202, %201 : vector<8x128xf32>
    %204 = math.tanh %203 : vector<8x128xf32>
    %cst_77 = arith.constant 5.000000e-01 : f32
    %205 = vector.broadcast %cst_77 : f32 to vector<8x128xf32>
    %206 = arith.mulf %205, %204 : vector<8x128xf32>
    %cst_78 = arith.constant 5.000000e-01 : f32
    %207 = vector.broadcast %cst_78 : f32 to vector<8x128xf32>
    %208 = arith.addf %206, %207 : vector<8x128xf32>
    %209 = vector.extract_strided_slice %200 {offsets = [0, 128], sizes = [8, 128], strides = [1, 1]} : vector<8x512xf32> to vector<8x128xf32>
    %cst_79 = arith.constant 5.000000e-01 : f32
    %210 = vector.broadcast %cst_79 : f32 to vector<8x128xf32>
    %211 = arith.mulf %210, %209 : vector<8x128xf32>
    %212 = math.tanh %211 : vector<8x128xf32>
    %cst_80 = arith.constant 5.000000e-01 : f32
    %213 = vector.broadcast %cst_80 : f32 to vector<8x128xf32>
    %214 = arith.mulf %213, %212 : vector<8x128xf32>
    %cst_81 = arith.constant 5.000000e-01 : f32
    %215 = vector.broadcast %cst_81 : f32 to vector<8x128xf32>
    %216 = arith.addf %214, %215 : vector<8x128xf32>
    %217 = vector.extract_strided_slice %200 {offsets = [0, 256], sizes = [8, 128], strides = [1, 1]} : vector<8x512xf32> to vector<8x128xf32>
    %218 = math.tanh %217 : vector<8x128xf32>
    %219 = vector.extract_strided_slice %200 {offsets = [0, 384], sizes = [8, 128], strides = [1, 1]} : vector<8x512xf32> to vector<8x128xf32>
    %cst_82 = arith.constant 5.000000e-01 : f32
    %220 = vector.broadcast %cst_82 : f32 to vector<8x128xf32>
    %221 = arith.mulf %220, %219 : vector<8x128xf32>
    %222 = math.tanh %221 : vector<8x128xf32>
    %cst_83 = arith.constant 5.000000e-01 : f32
    %223 = vector.broadcast %cst_83 : f32 to vector<8x128xf32>
    %224 = arith.mulf %223, %222 : vector<8x128xf32>
    %cst_84 = arith.constant 5.000000e-01 : f32
    %225 = vector.broadcast %cst_84 : f32 to vector<8x128xf32>
    %226 = arith.addf %224, %225 : vector<8x128xf32>
    %227 = arith.mulf %216, %170 : vector<8x128xf32>
    %228 = arith.mulf %208, %218 : vector<8x128xf32>
    %229 = arith.addf %227, %228 : vector<8x128xf32>
    %230 = math.tanh %229 : vector<8x128xf32>
    %231 = arith.mulf %226, %230 : vector<8x128xf32>
    %cst_85 = arith.constant dense<0.000000e+00> : vector<8xf32>
    %232 = vector.multi_reduction <add>, %231, %cst_85 [1] : vector<8x128xf32> to vector<8xf32>
    %233 = vector.shape_cast %232 : vector<8xf32> to vector<8x1xf32>
    %cst_86 = arith.constant 1.280000e+02 : f32
    %234 = vector.broadcast %cst_86 : f32 to vector<8x1xf32>
    %235 = arith.divf %233, %234 : vector<8x1xf32>
    %236 = arith.mulf %231, %231 : vector<8x128xf32>
    %cst_87 = arith.constant dense<0.000000e+00> : vector<8xf32>
    %237 = vector.multi_reduction <add>, %236, %cst_87 [1] : vector<8x128xf32> to vector<8xf32>
    %238 = vector.shape_cast %237 : vector<8xf32> to vector<8x1xf32>
    %cst_88 = arith.constant 1.280000e+02 : f32
    %239 = vector.broadcast %cst_88 : f32 to vector<8x1xf32>
    %240 = arith.divf %238, %239 : vector<8x1xf32>
    %241 = arith.mulf %235, %235 : vector<8x1xf32>
    %242 = arith.subf %240, %241 : vector<8x1xf32>
    %243 = vector.broadcast %235 : vector<8x1xf32> to vector<8x128xf32>
    %244 = arith.subf %231, %243 : vector<8x128xf32>
    %cst_89 = arith.constant 9.99999974E-6 : f32
    %245 = vector.broadcast %cst_89 : f32 to vector<8x1xf32>
    %246 = arith.addf %242, %245 : vector<8x1xf32>
    %247 = math.rsqrt %246 : vector<8x1xf32>
    %248 = vector.broadcast %247 : vector<8x1xf32> to vector<8x128xf32>
    %249 = arith.mulf %244, %248 : vector<8x128xf32>
    %250 = arith.mulf %249, %13 : vector<8x128xf32>
    %251 = arith.addf %250, %16 : vector<8x128xf32>
    %c0_90 = arith.constant 0 : index
    %c3 = arith.constant 3 : index
    %c0_91 = arith.constant 0 : index
    %252 = vector.load %arg8[%c0_90, %c3, %c0_91] : memref<8x8x128xf32, #tpu.memory_space<vmem>>, vector<8x1x128xf32>
    %253 = vector.shape_cast %252 : vector<8x1x128xf32> to vector<8x128xf32>
    %254 = vector.shape_cast %251 : vector<8x128xf32> to vector<8x1x128xf32>
    tpu.vector_store %arg8[%c0_90, %c3, %c0_91], %254 {strides = array<i32>} : memref<8x8x128xf32, #tpu.memory_space<vmem>>, vector<8x1x128xf32>,
    %255 = vector.extract_strided_slice %10 {offsets = [0, 4, 0], sizes = [8, 1, 512], strides = [1, 1, 1]} : vector<8x8x512xf32> to vector<8x1x512xf32>
    %256 = vector.shape_cast %255 : vector<8x1x512xf32> to vector<8x512xf32>
    %c0_92 = arith.constant 0 : index
    %c0_93 = arith.constant 0 : index
    %257 = vector.load %arg4[%c0_92, %c0_93] : memref<128x512xf32, #tpu.memory_space<vmem>>, vector<128x512xf32>
    %cst_94 = arith.constant dense<0.000000e+00> : vector<8x512xf32>
    %258 = tpu.matmul %231, %257, %cst_94 {dimension_numbers = #tpu.dot_dimension_numbers<[1], [0], [0], [1], [0, 0, 1, 1], [], []>} : vector<8x128xf32>, vector<128x512xf32>, vector<8x512xf32> -> vector<8x512xf32>
    %259 = arith.addf %256, %258 : vector<8x512xf32>
    %260 = vector.extract_strided_slice %259 {offsets = [0, 0], sizes = [8, 128], strides = [1, 1]} : vector<8x512xf32> to vector<8x128xf32>
    %cst_95 = arith.constant 5.000000e-01 : f32
    %261 = vector.broadcast %cst_95 : f32 to vector<8x128xf32>
    %262 = arith.mulf %261, %260 : vector<8x128xf32>
    %263 = math.tanh %262 : vector<8x128xf32>
    %cst_96 = arith.constant 5.000000e-01 : f32
    %264 = vector.broadcast %cst_96 : f32 to vector<8x128xf32>
    %265 = arith.mulf %264, %263 : vector<8x128xf32>
    %cst_97 = arith.constant 5.000000e-01 : f32
    %266 = vector.broadcast %cst_97 : f32 to vector<8x128xf32>
    %267 = arith.addf %265, %266 : vector<8x128xf32>
    %268 = vector.extract_strided_slice %259 {offsets = [0, 128], sizes = [8, 128], strides = [1, 1]} : vector<8x512xf32> to vector<8x128xf32>
    %cst_98 = arith.constant 5.000000e-01 : f32
    %269 = vector.broadcast %cst_98 : f32 to vector<8x128xf32>
    %270 = arith.mulf %269, %268 : vector<8x128xf32>
    %271 = math.tanh %270 : vector<8x128xf32>
    %cst_99 = arith.constant 5.000000e-01 : f32
    %272 = vector.broadcast %cst_99 : f32 to vector<8x128xf32>
    %273 = arith.mulf %272, %271 : vector<8x128xf32>
    %cst_100 = arith.constant 5.000000e-01 : f32
    %274 = vector.broadcast %cst_100 : f32 to vector<8x128xf32>
    %275 = arith.addf %273, %274 : vector<8x128xf32>
    %276 = vector.extract_strided_slice %259 {offsets = [0, 256], sizes = [8, 128], strides = [1, 1]} : vector<8x512xf32> to vector<8x128xf32>
    %277 = math.tanh %276 : vector<8x128xf32>
    %278 = vector.extract_strided_slice %259 {offsets = [0, 384], sizes = [8, 128], strides = [1, 1]} : vector<8x512xf32> to vector<8x128xf32>
    %cst_101 = arith.constant 5.000000e-01 : f32
    %279 = vector.broadcast %cst_101 : f32 to vector<8x128xf32>
    %280 = arith.mulf %279, %278 : vector<8x128xf32>
    %281 = math.tanh %280 : vector<8x128xf32>
    %cst_102 = arith.constant 5.000000e-01 : f32
    %282 = vector.broadcast %cst_102 : f32 to vector<8x128xf32>
    %283 = arith.mulf %282, %281 : vector<8x128xf32>
    %cst_103 = arith.constant 5.000000e-01 : f32
    %284 = vector.broadcast %cst_103 : f32 to vector<8x128xf32>
    %285 = arith.addf %283, %284 : vector<8x128xf32>
    %286 = arith.mulf %275, %229 : vector<8x128xf32>
    %287 = arith.mulf %267, %277 : vector<8x128xf32>
    %288 = arith.addf %286, %287 : vector<8x128xf32>
    %289 = math.tanh %288 : vector<8x128xf32>
    %290 = arith.mulf %285, %289 : vector<8x128xf32>
    %cst_104 = arith.constant dense<0.000000e+00> : vector<8xf32>
    %291 = vector.multi_reduction <add>, %290, %cst_104 [1] : vector<8x128xf32> to vector<8xf32>
    %292 = vector.shape_cast %291 : vector<8xf32> to vector<8x1xf32>
    %cst_105 = arith.constant 1.280000e+02 : f32
    %293 = vector.broadcast %cst_105 : f32 to vector<8x1xf32>
    %294 = arith.divf %292, %293 : vector<8x1xf32>
    %295 = arith.mulf %290, %290 : vector<8x128xf32>
    %cst_106 = arith.constant dense<0.000000e+00> : vector<8xf32>
    %296 = vector.multi_reduction <add>, %295, %cst_106 [1] : vector<8x128xf32> to vector<8xf32>
    %297 = vector.shape_cast %296 : vector<8xf32> to vector<8x1xf32>
    %cst_107 = arith.constant 1.280000e+02 : f32
    %298 = vector.broadcast %cst_107 : f32 to vector<8x1xf32>
    %299 = arith.divf %297, %298 : vector<8x1xf32>
    %300 = arith.mulf %294, %294 : vector<8x1xf32>
    %301 = arith.subf %299, %300 : vector<8x1xf32>
    %302 = vector.broadcast %294 : vector<8x1xf32> to vector<8x128xf32>
    %303 = arith.subf %290, %302 : vector<8x128xf32>
    %cst_108 = arith.constant 9.99999974E-6 : f32
    %304 = vector.broadcast %cst_108 : f32 to vector<8x1xf32>
    %305 = arith.addf %301, %304 : vector<8x1xf32>
    %306 = math.rsqrt %305 : vector<8x1xf32>
    %307 = vector.broadcast %306 : vector<8x1xf32> to vector<8x128xf32>
    %308 = arith.mulf %303, %307 : vector<8x128xf32>
    %309 = arith.mulf %308, %13 : vector<8x128xf32>
    %310 = arith.addf %309, %16 : vector<8x128xf32>
    %c0_109 = arith.constant 0 : index
    %c4 = arith.constant 4 : index
    %c0_110 = arith.constant 0 : index
    %311 = vector.load %arg8[%c0_109, %c4, %c0_110] : memref<8x8x128xf32, #tpu.memory_space<vmem>>, vector<8x1x128xf32>
    %312 = vector.shape_cast %311 : vector<8x1x128xf32> to vector<8x128xf32>
    %313 = vector.shape_cast %310 : vector<8x128xf32> to vector<8x1x128xf32>
    tpu.vector_store %arg8[%c0_109, %c4, %c0_110], %313 {strides = array<i32>} : memref<8x8x128xf32, #tpu.memory_space<vmem>>, vector<8x1x128xf32>,
    %314 = vector.extract_strided_slice %10 {offsets = [0, 5, 0], sizes = [8, 1, 512], strides = [1, 1, 1]} : vector<8x8x512xf32> to vector<8x1x512xf32>
    %315 = vector.shape_cast %314 : vector<8x1x512xf32> to vector<8x512xf32>
    %c0_111 = arith.constant 0 : index
    %c0_112 = arith.constant 0 : index
    %316 = vector.load %arg4[%c0_111, %c0_112] : memref<128x512xf32, #tpu.memory_space<vmem>>, vector<128x512xf32>
    %cst_113 = arith.constant dense<0.000000e+00> : vector<8x512xf32>
    %317 = tpu.matmul %290, %316, %cst_113 {dimension_numbers = #tpu.dot_dimension_numbers<[1], [0], [0], [1], [0, 0, 1, 1], [], []>} : vector<8x128xf32>, vector<128x512xf32>, vector<8x512xf32> -> vector<8x512xf32>
    %318 = arith.addf %315, %317 : vector<8x512xf32>
    %319 = vector.extract_strided_slice %318 {offsets = [0, 0], sizes = [8, 128], strides = [1, 1]} : vector<8x512xf32> to vector<8x128xf32>
    %cst_114 = arith.constant 5.000000e-01 : f32
    %320 = vector.broadcast %cst_114 : f32 to vector<8x128xf32>
    %321 = arith.mulf %320, %319 : vector<8x128xf32>
    %322 = math.tanh %321 : vector<8x128xf32>
    %cst_115 = arith.constant 5.000000e-01 : f32
    %323 = vector.broadcast %cst_115 : f32 to vector<8x128xf32>
    %324 = arith.mulf %323, %322 : vector<8x128xf32>
    %cst_116 = arith.constant 5.000000e-01 : f32
    %325 = vector.broadcast %cst_116 : f32 to vector<8x128xf32>
    %326 = arith.addf %324, %325 : vector<8x128xf32>
    %327 = vector.extract_strided_slice %318 {offsets = [0, 128], sizes = [8, 128], strides = [1, 1]} : vector<8x512xf32> to vector<8x128xf32>
    %cst_117 = arith.constant 5.000000e-01 : f32
    %328 = vector.broadcast %cst_117 : f32 to vector<8x128xf32>
    %329 = arith.mulf %328, %327 : vector<8x128xf32>
    %330 = math.tanh %329 : vector<8x128xf32>
    %cst_118 = arith.constant 5.000000e-01 : f32
    %331 = vector.broadcast %cst_118 : f32 to vector<8x128xf32>
    %332 = arith.mulf %331, %330 : vector<8x128xf32>
    %cst_119 = arith.constant 5.000000e-01 : f32
    %333 = vector.broadcast %cst_119 : f32 to vector<8x128xf32>
    %334 = arith.addf %332, %333 : vector<8x128xf32>
    %335 = vector.extract_strided_slice %318 {offsets = [0, 256], sizes = [8, 128], strides = [1, 1]} : vector<8x512xf32> to vector<8x128xf32>
    %336 = math.tanh %335 : vector<8x128xf32>
    %337 = vector.extract_strided_slice %318 {offsets = [0, 384], sizes = [8, 128], strides = [1, 1]} : vector<8x512xf32> to vector<8x128xf32>
    %cst_120 = arith.constant 5.000000e-01 : f32
    %338 = vector.broadcast %cst_120 : f32 to vector<8x128xf32>
    %339 = arith.mulf %338, %337 : vector<8x128xf32>
    %340 = math.tanh %339 : vector<8x128xf32>
    %cst_121 = arith.constant 5.000000e-01 : f32
    %341 = vector.broadcast %cst_121 : f32 to vector<8x128xf32>
    %342 = arith.mulf %341, %340 : vector<8x128xf32>
    %cst_122 = arith.constant 5.000000e-01 : f32
    %343 = vector.broadcast %cst_122 : f32 to vector<8x128xf32>
    %344 = arith.addf %342, %343 : vector<8x128xf32>
    %345 = arith.mulf %334, %288 : vector<8x128xf32>
    %346 = arith.mulf %326, %336 : vector<8x128xf32>
    %347 = arith.addf %345, %346 : vector<8x128xf32>
    %348 = math.tanh %347 : vector<8x128xf32>
    %349 = arith.mulf %344, %348 : vector<8x128xf32>
    %cst_123 = arith.constant dense<0.000000e+00> : vector<8xf32>
    %350 = vector.multi_reduction <add>, %349, %cst_123 [1] : vector<8x128xf32> to vector<8xf32>
    %351 = vector.shape_cast %350 : vector<8xf32> to vector<8x1xf32>
    %cst_124 = arith.constant 1.280000e+02 : f32
    %352 = vector.broadcast %cst_124 : f32 to vector<8x1xf32>
    %353 = arith.divf %351, %352 : vector<8x1xf32>
    %354 = arith.mulf %349, %349 : vector<8x128xf32>
    %cst_125 = arith.constant dense<0.000000e+00> : vector<8xf32>
    %355 = vector.multi_reduction <add>, %354, %cst_125 [1] : vector<8x128xf32> to vector<8xf32>
    %356 = vector.shape_cast %355 : vector<8xf32> to vector<8x1xf32>
    %cst_126 = arith.constant 1.280000e+02 : f32
    %357 = vector.broadcast %cst_126 : f32 to vector<8x1xf32>
    %358 = arith.divf %356, %357 : vector<8x1xf32>
    %359 = arith.mulf %353, %353 : vector<8x1xf32>
    %360 = arith.subf %358, %359 : vector<8x1xf32>
    %361 = vector.broadcast %353 : vector<8x1xf32> to vector<8x128xf32>
    %362 = arith.subf %349, %361 : vector<8x128xf32>
    %cst_127 = arith.constant 9.99999974E-6 : f32
    %363 = vector.broadcast %cst_127 : f32 to vector<8x1xf32>
    %364 = arith.addf %360, %363 : vector<8x1xf32>
    %365 = math.rsqrt %364 : vector<8x1xf32>
    %366 = vector.broadcast %365 : vector<8x1xf32> to vector<8x128xf32>
    %367 = arith.mulf %362, %366 : vector<8x128xf32>
    %368 = arith.mulf %367, %13 : vector<8x128xf32>
    %369 = arith.addf %368, %16 : vector<8x128xf32>
    %c0_128 = arith.constant 0 : index
    %c5 = arith.constant 5 : index
    %c0_129 = arith.constant 0 : index
    %370 = vector.load %arg8[%c0_128, %c5, %c0_129] : memref<8x8x128xf32, #tpu.memory_space<vmem>>, vector<8x1x128xf32>
    %371 = vector.shape_cast %370 : vector<8x1x128xf32> to vector<8x128xf32>
    %372 = vector.shape_cast %369 : vector<8x128xf32> to vector<8x1x128xf32>
    tpu.vector_store %arg8[%c0_128, %c5, %c0_129], %372 {strides = array<i32>} : memref<8x8x128xf32, #tpu.memory_space<vmem>>, vector<8x1x128xf32>,
    %373 = vector.extract_strided_slice %10 {offsets = [0, 6, 0], sizes = [8, 1, 512], strides = [1, 1, 1]} : vector<8x8x512xf32> to vector<8x1x512xf32>
    %374 = vector.shape_cast %373 : vector<8x1x512xf32> to vector<8x512xf32>
    %c0_130 = arith.constant 0 : index
    %c0_131 = arith.constant 0 : index
    %375 = vector.load %arg4[%c0_130, %c0_131] : memref<128x512xf32, #tpu.memory_space<vmem>>, vector<128x512xf32>
    %cst_132 = arith.constant dense<0.000000e+00> : vector<8x512xf32>
    %376 = tpu.matmul %349, %375, %cst_132 {dimension_numbers = #tpu.dot_dimension_numbers<[1], [0], [0], [1], [0, 0, 1, 1], [], []>} : vector<8x128xf32>, vector<128x512xf32>, vector<8x512xf32> -> vector<8x512xf32>
    %377 = arith.addf %374, %376 : vector<8x512xf32>
    %378 = vector.extract_strided_slice %377 {offsets = [0, 0], sizes = [8, 128], strides = [1, 1]} : vector<8x512xf32> to vector<8x128xf32>
    %cst_133 = arith.constant 5.000000e-01 : f32
    %379 = vector.broadcast %cst_133 : f32 to vector<8x128xf32>
    %380 = arith.mulf %379, %378 : vector<8x128xf32>
    %381 = math.tanh %380 : vector<8x128xf32>
    %cst_134 = arith.constant 5.000000e-01 : f32
    %382 = vector.broadcast %cst_134 : f32 to vector<8x128xf32>
    %383 = arith.mulf %382, %381 : vector<8x128xf32>
    %cst_135 = arith.constant 5.000000e-01 : f32
    %384 = vector.broadcast %cst_135 : f32 to vector<8x128xf32>
    %385 = arith.addf %383, %384 : vector<8x128xf32>
    %386 = vector.extract_strided_slice %377 {offsets = [0, 128], sizes = [8, 128], strides = [1, 1]} : vector<8x512xf32> to vector<8x128xf32>
    %cst_136 = arith.constant 5.000000e-01 : f32
    %387 = vector.broadcast %cst_136 : f32 to vector<8x128xf32>
    %388 = arith.mulf %387, %386 : vector<8x128xf32>
    %389 = math.tanh %388 : vector<8x128xf32>
    %cst_137 = arith.constant 5.000000e-01 : f32
    %390 = vector.broadcast %cst_137 : f32 to vector<8x128xf32>
    %391 = arith.mulf %390, %389 : vector<8x128xf32>
    %cst_138 = arith.constant 5.000000e-01 : f32
    %392 = vector.broadcast %cst_138 : f32 to vector<8x128xf32>
    %393 = arith.addf %391, %392 : vector<8x128xf32>
    %394 = vector.extract_strided_slice %377 {offsets = [0, 256], sizes = [8, 128], strides = [1, 1]} : vector<8x512xf32> to vector<8x128xf32>
    %395 = math.tanh %394 : vector<8x128xf32>
    %396 = vector.extract_strided_slice %377 {offsets = [0, 384], sizes = [8, 128], strides = [1, 1]} : vector<8x512xf32> to vector<8x128xf32>
    %cst_139 = arith.constant 5.000000e-01 : f32
    %397 = vector.broadcast %cst_139 : f32 to vector<8x128xf32>
    %398 = arith.mulf %397, %396 : vector<8x128xf32>
    %399 = math.tanh %398 : vector<8x128xf32>
    %cst_140 = arith.constant 5.000000e-01 : f32
    %400 = vector.broadcast %cst_140 : f32 to vector<8x128xf32>
    %401 = arith.mulf %400, %399 : vector<8x128xf32>
    %cst_141 = arith.constant 5.000000e-01 : f32
    %402 = vector.broadcast %cst_141 : f32 to vector<8x128xf32>
    %403 = arith.addf %401, %402 : vector<8x128xf32>
    %404 = arith.mulf %393, %347 : vector<8x128xf32>
    %405 = arith.mulf %385, %395 : vector<8x128xf32>
    %406 = arith.addf %404, %405 : vector<8x128xf32>
    %407 = math.tanh %406 : vector<8x128xf32>
    %408 = arith.mulf %403, %407 : vector<8x128xf32>
    %cst_142 = arith.constant dense<0.000000e+00> : vector<8xf32>
    %409 = vector.multi_reduction <add>, %408, %cst_142 [1] : vector<8x128xf32> to vector<8xf32>
    %410 = vector.shape_cast %409 : vector<8xf32> to vector<8x1xf32>
    %cst_143 = arith.constant 1.280000e+02 : f32
    %411 = vector.broadcast %cst_143 : f32 to vector<8x1xf32>
    %412 = arith.divf %410, %411 : vector<8x1xf32>
    %413 = arith.mulf %408, %408 : vector<8x128xf32>
    %cst_144 = arith.constant dense<0.000000e+00> : vector<8xf32>
    %414 = vector.multi_reduction <add>, %413, %cst_144 [1] : vector<8x128xf32> to vector<8xf32>
    %415 = vector.shape_cast %414 : vector<8xf32> to vector<8x1xf32>
    %cst_145 = arith.constant 1.280000e+02 : f32
    %416 = vector.broadcast %cst_145 : f32 to vector<8x1xf32>
    %417 = arith.divf %415, %416 : vector<8x1xf32>
    %418 = arith.mulf %412, %412 : vector<8x1xf32>
    %419 = arith.subf %417, %418 : vector<8x1xf32>
    %420 = vector.broadcast %412 : vector<8x1xf32> to vector<8x128xf32>
    %421 = arith.subf %408, %420 : vector<8x128xf32>
    %cst_146 = arith.constant 9.99999974E-6 : f32
    %422 = vector.broadcast %cst_146 : f32 to vector<8x1xf32>
    %423 = arith.addf %419, %422 : vector<8x1xf32>
    %424 = math.rsqrt %423 : vector<8x1xf32>
    %425 = vector.broadcast %424 : vector<8x1xf32> to vector<8x128xf32>
    %426 = arith.mulf %421, %425 : vector<8x128xf32>
    %427 = arith.mulf %426, %13 : vector<8x128xf32>
    %428 = arith.addf %427, %16 : vector<8x128xf32>
    %c0_147 = arith.constant 0 : index
    %c6 = arith.constant 6 : index
    %c0_148 = arith.constant 0 : index
    %429 = vector.load %arg8[%c0_147, %c6, %c0_148] : memref<8x8x128xf32, #tpu.memory_space<vmem>>, vector<8x1x128xf32>
    %430 = vector.shape_cast %429 : vector<8x1x128xf32> to vector<8x128xf32>
    %431 = vector.shape_cast %428 : vector<8x128xf32> to vector<8x1x128xf32>
    tpu.vector_store %arg8[%c0_147, %c6, %c0_148], %431 {strides = array<i32>} : memref<8x8x128xf32, #tpu.memory_space<vmem>>, vector<8x1x128xf32>,
    %432 = vector.extract_strided_slice %10 {offsets = [0, 7, 0], sizes = [8, 1, 512], strides = [1, 1, 1]} : vector<8x8x512xf32> to vector<8x1x512xf32>
    %433 = vector.shape_cast %432 : vector<8x1x512xf32> to vector<8x512xf32>
    %c0_149 = arith.constant 0 : index
    %c0_150 = arith.constant 0 : index
    %434 = vector.load %arg4[%c0_149, %c0_150] : memref<128x512xf32, #tpu.memory_space<vmem>>, vector<128x512xf32>
    %cst_151 = arith.constant dense<0.000000e+00> : vector<8x512xf32>
    %435 = tpu.matmul %408, %434, %cst_151 {dimension_numbers = #tpu.dot_dimension_numbers<[1], [0], [0], [1], [0, 0, 1, 1], [], []>} : vector<8x128xf32>, vector<128x512xf32>, vector<8x512xf32> -> vector<8x512xf32>
    %436 = arith.addf %433, %435 : vector<8x512xf32>
    %437 = vector.extract_strided_slice %436 {offsets = [0, 0], sizes = [8, 128], strides = [1, 1]} : vector<8x512xf32> to vector<8x128xf32>
    %cst_152 = arith.constant 5.000000e-01 : f32
    %438 = vector.broadcast %cst_152 : f32 to vector<8x128xf32>
    %439 = arith.mulf %438, %437 : vector<8x128xf32>
    %440 = math.tanh %439 : vector<8x128xf32>
    %cst_153 = arith.constant 5.000000e-01 : f32
    %441 = vector.broadcast %cst_153 : f32 to vector<8x128xf32>
    %442 = arith.mulf %441, %440 : vector<8x128xf32>
    %cst_154 = arith.constant 5.000000e-01 : f32
    %443 = vector.broadcast %cst_154 : f32 to vector<8x128xf32>
    %444 = arith.addf %442, %443 : vector<8x128xf32>
    %445 = vector.extract_strided_slice %436 {offsets = [0, 128], sizes = [8, 128], strides = [1, 1]} : vector<8x512xf32> to vector<8x128xf32>
    %cst_155 = arith.constant 5.000000e-01 : f32
    %446 = vector.broadcast %cst_155 : f32 to vector<8x128xf32>
    %447 = arith.mulf %446, %445 : vector<8x128xf32>
    %448 = math.tanh %447 : vector<8x128xf32>
    %cst_156 = arith.constant 5.000000e-01 : f32
    %449 = vector.broadcast %cst_156 : f32 to vector<8x128xf32>
    %450 = arith.mulf %449, %448 : vector<8x128xf32>
    %cst_157 = arith.constant 5.000000e-01 : f32
    %451 = vector.broadcast %cst_157 : f32 to vector<8x128xf32>
    %452 = arith.addf %450, %451 : vector<8x128xf32>
    %453 = vector.extract_strided_slice %436 {offsets = [0, 256], sizes = [8, 128], strides = [1, 1]} : vector<8x512xf32> to vector<8x128xf32>
    %454 = math.tanh %453 : vector<8x128xf32>
    %455 = vector.extract_strided_slice %436 {offsets = [0, 384], sizes = [8, 128], strides = [1, 1]} : vector<8x512xf32> to vector<8x128xf32>
    %cst_158 = arith.constant 5.000000e-01 : f32
    %456 = vector.broadcast %cst_158 : f32 to vector<8x128xf32>
    %457 = arith.mulf %456, %455 : vector<8x128xf32>
    %458 = math.tanh %457 : vector<8x128xf32>
    %cst_159 = arith.constant 5.000000e-01 : f32
    %459 = vector.broadcast %cst_159 : f32 to vector<8x128xf32>
    %460 = arith.mulf %459, %458 : vector<8x128xf32>
    %cst_160 = arith.constant 5.000000e-01 : f32
    %461 = vector.broadcast %cst_160 : f32 to vector<8x128xf32>
    %462 = arith.addf %460, %461 : vector<8x128xf32>
    %463 = arith.mulf %452, %406 : vector<8x128xf32>
    %464 = arith.mulf %444, %454 : vector<8x128xf32>
    %465 = arith.addf %463, %464 : vector<8x128xf32>
    %466 = math.tanh %465 : vector<8x128xf32>
    %467 = arith.mulf %462, %466 : vector<8x128xf32>
    %cst_161 = arith.constant dense<0.000000e+00> : vector<8xf32>
    %468 = vector.multi_reduction <add>, %467, %cst_161 [1] : vector<8x128xf32> to vector<8xf32>
    %469 = vector.shape_cast %468 : vector<8xf32> to vector<8x1xf32>
    %cst_162 = arith.constant 1.280000e+02 : f32
    %470 = vector.broadcast %cst_162 : f32 to vector<8x1xf32>
    %471 = arith.divf %469, %470 : vector<8x1xf32>
    %472 = arith.mulf %467, %467 : vector<8x128xf32>
    %cst_163 = arith.constant dense<0.000000e+00> : vector<8xf32>
    %473 = vector.multi_reduction <add>, %472, %cst_163 [1] : vector<8x128xf32> to vector<8xf32>
    %474 = vector.shape_cast %473 : vector<8xf32> to vector<8x1xf32>
    %cst_164 = arith.constant 1.280000e+02 : f32
    %475 = vector.broadcast %cst_164 : f32 to vector<8x1xf32>
    %476 = arith.divf %474, %475 : vector<8x1xf32>
    %477 = arith.mulf %471, %471 : vector<8x1xf32>
    %478 = arith.subf %476, %477 : vector<8x1xf32>
    %479 = vector.broadcast %471 : vector<8x1xf32> to vector<8x128xf32>
    %480 = arith.subf %467, %479 : vector<8x128xf32>
    %cst_165 = arith.constant 9.99999974E-6 : f32
    %481 = vector.broadcast %cst_165 : f32 to vector<8x1xf32>
    %482 = arith.addf %478, %481 : vector<8x1xf32>
    %483 = math.rsqrt %482 : vector<8x1xf32>
    %484 = vector.broadcast %483 : vector<8x1xf32> to vector<8x128xf32>
    %485 = arith.mulf %480, %484 : vector<8x128xf32>
    %486 = arith.mulf %485, %13 : vector<8x128xf32>
    %487 = arith.addf %486, %16 : vector<8x128xf32>
    %c0_166 = arith.constant 0 : index
    %c7 = arith.constant 7 : index
    %c0_167 = arith.constant 0 : index
    %488 = vector.load %arg8[%c0_166, %c7, %c0_167] : memref<8x8x128xf32, #tpu.memory_space<vmem>>, vector<8x1x128xf32>
    %489 = vector.shape_cast %488 : vector<8x1x128xf32> to vector<8x128xf32>
    %490 = vector.shape_cast %487 : vector<8x128xf32> to vector<8x1x128xf32>
    tpu.vector_store %arg8[%c0_166, %c7, %c0_167], %490 {strides = array<i32>} : memref<8x8x128xf32, #tpu.memory_space<vmem>>, vector<8x1x128xf32>,
    %c0_168 = arith.constant 0 : index
    %c0_169 = arith.constant 0 : index
    %491 = vector.load %arg9[%c0_168, %c0_169] : memref<8x128xf32, #tpu.memory_space<vmem>>, vector<8x128xf32>
    tpu.vector_store %arg9[%c0_168, %c0_169], %467 {strides = array<i32>} : memref<8x128xf32, #tpu.memory_space<vmem>>, vector<8x128xf32>,
    %c0_170 = arith.constant 0 : index
    %c0_171 = arith.constant 0 : index
    %492 = vector.load %arg10[%c0_170, %c0_171] : memref<8x128xf32, #tpu.memory_space<vmem>>, vector<8x128xf32>
    tpu.vector_store %arg10[%c0_170, %c0_171], %465 {strides = array<i32>} : memref<8x128xf32, #tpu.memory_space<vmem>>, vector<8x128xf32>,
    return
  }
  func.func @transform_0(%arg0: i32, %arg1: i32) -> (i32, i32, i32) {
    %c0_i32 = arith.constant 0 : i32
    %c0_i32_0 = arith.constant 0 : i32
    return %arg0, %arg1, %c0_i32 : i32, i32, i32
  }
  func.func @transform_1(%arg0: i32, %arg1: i32) -> (i32, i32) {
    %c0_i32 = arith.constant 0 : i32
    %c0_i32_0 = arith.constant 0 : i32
    %c0_i32_1 = arith.constant 0 : i32
    return %c0_i32, %c0_i32_0 : i32, i32
  }
  func.func @transform_2(%arg0: i32, %arg1: i32) -> (i32, i32) {
    %c0_i32 = arith.constant 0 : i32
    %c0_i32_0 = arith.constant 0 : i32
    %c0_i32_1 = arith.constant 0 : i32
    return %c0_i32, %c0_i32_0 : i32, i32
  }
  func.func @transform_3(%arg0: i32, %arg1: i32) -> (i32, i32) {
    %c0_i32 = arith.constant 0 : i32
    %c0_i32_0 = arith.constant 0 : i32
    %c0_i32_1 = arith.constant 0 : i32
    return %c0_i32, %c0_i32_0 : i32, i32
  }
  func.func @transform_4(%arg0: i32, %arg1: i32) -> (i32, i32) {
    %c0_i32 = arith.constant 0 : i32
    %c0_i32_0 = arith.constant 0 : i32
    %c0_i32_1 = arith.constant 0 : i32
    return %c0_i32, %c0_i32_0 : i32, i32
  }
  func.func @transform_5(%arg0: i32, %arg1: i32) -> (i32, i32) {
    %c0_i32 = arith.constant 0 : i32
    %c0_i32_0 = arith.constant 0 : i32
    %c0_i32_1 = arith.constant 0 : i32
    return %c0_i32, %c0_i32_0 : i32, i32
  }
  func.func @transform_6(%arg0: i32, %arg1: i32) -> (i32, i32, i32) {
    %c0_i32 = arith.constant 0 : i32
    %c0_i32_0 = arith.constant 0 : i32
    return %arg0, %arg1, %c0_i32 : i32, i32, i32
  }
}

</mosaic_0001>

<bundles_post_ra>
// kernel: tpu_custom_call.1
= control target key start
LH: loop header
LB: loop body
LE: loop exit
PB: predicated region body
PF: predicated region fallthrough
CT: control target
= control target key end

     0   :  { %s9874_s0 = inlined_call_operand.hbm [shape: f32[8,16,32], index: 0, kind: input, shape index: {}]   ;;  %s9875_s1 = inlined_call_operand.hbm [shape: f32[32,512], index: 1, kind: input, shape index: {}]   ;;  %s9876_s2 = inlined_call_operand.hbm [shape: f32[128,512], index: 2, kind: input, shape index: {}]   ;;  %s9877_s3 = inlined_call_operand.vmem [shape: f32[1,512], index: 3, kind: input, shape index: {}]   ;;  %s9878_s4 = inlined_call_operand.vmem [shape: f32[1,128], index: 4, kind: input, shape index: {}]   ;;  %s9879_s5 = inlined_call_operand.vmem [shape: f32[1,128], index: 5, kind: input, shape index: {}]   ;;  %s9880_s6 = inlined_call_operand.hbm [shape: f32[8,16,128], index: 6, kind: output, shape index: {}]  }
   0x1   :  { %10135 = sst [smem:[#allocation103_spill]] %s9875_s1 }
   0x2   :  { %10136 = sst [smem:[#allocation104_spill]] %s9876_s2 }
   0x3   :  { %11 = vsyncpa [#allocation5], 0 }
   0x4   :  { %13 = vsyncpa [#allocation5 + $0x1], 0 }
   0x5   :  { %14 = vsyncpa [#allocation8], 0 }
   0x6   :  { %15 = vsyncpa [#allocation6], 0 }
   0x7   :  { %17 = vsyncpa [#allocation6 + $0x1], 0  ;;  %s6868_s21 = smov 0   ;;  %s6870_s22 = smov 0  }
   0x8   :  { %s6872_s23 = smov 0   ;;  %s6874_s24 = smov 0  }
   0x9   :  { %s6876_s25 = smov 0   ;;  %s6878_s26 = smov 0  }
   0xa LB: > { %10137 = sst [smem:[#allocation14_spill]] %s6817_s26  ;;  %s5848_s27 = sadd.s32 4294967295, %s6817_s26   ;;  %s6817_s26 = sphi %s6878_s26, %s23_s26   ;;  %s6813_s25 = sphi %s6876_s25, %s10707_s25   ;;  %s6809_s24 = sphi %s6874_s24, %s10706_s24   ;;  %s6805_s23 = sphi %s6872_s23, %s10705_s23   ;;  %s6801_s22 = sphi %s6870_s22, %s10704_s22   ;;  %s6797_s21 = sphi %s6868_s21, %s10703_s21  }
   0xb   : > { %s5849_s28 = sadd.s32 4294967294, %s6817_s26   ;;  %p51_p0 = scmp.ne.s32.totalorder %s6805_s23, %s6801_s22 }
   0xc   : > { %p52_p1 = scmp.eq.s32.totalorder %s6817_s26, 0  ;;  %p57_p2 = scmp.ne.s32.totalorder %s6801_s22, %s6797_s21 }
   0xd   : > { %p6905_p3 = scmp.eq.s32.totalorder %s5848_s27, 0  ;;  %p188_p5 = scmp.eq.s32.totalorder %s5848_s27, 1 }
   0xe   : > { %p6909_p4 = por %p52_p1, %p51_p0  ;;  %p194_p7 = scmp.eq.s32.totalorder %s5849_s28, 1 }
   0xf   : > { %s10138_s29 = scalar_select %p6905_p3, 1, 0 }
  0x10   : > { %p6915_p6 = por %p6905_p3, %p57_p2  ;;  %p6919_p8 = por %p188_p5, %p51_p0 }
  0x11   : > { %p5850_p9 = scmp.ge.s32.totalorder %s6817_s26, 1  ;;  %p6924_p10 = por %p194_p7, %p57_p2 }
  0x12   : > { %s10140_s7 = scalar_select %p6915_p6, 1, 0 }
  0x13   : > { %s10141_s8 = scalar_select %p6919_p8, 1, 0 }
  0x14   : > { %s10142_s9 = scalar_select %p6924_p10, 1, 0 }
  0x15   : > { %p201_p11 = scmp.lt.s32.totalorder %s6817_s26, 3  ;;  %s6819_s11 = smov [#allocation7]  }
  0x16   : > { %10143 = sst [smem:[#allocation15_spill]] %s10142_s9  ;;  %s213_s12 = sshll.u32 %s6819_s11, 4  ;;  %s214_s12 = int_to_ptr.vmem [resolvable:$true] %s213_s12 }
  0x17   : > { %p6929_p12 = pnand %p5850_p9, %p201_p11  ;;  %p5913_p1 = scmp.lt.s32.totalorder %s6817_s26, 2 }
  0x18   : > { %s6820_s15 = smov [#allocation9]   ;;  %s6664_s17 = scalar_lea.vmem %s214_s12, 2048 }
  0x19   : > { %p5896_p13 = pneg %p6929_p12  ;;  %p6945_p2 = pnand %p5913_p1, %p6909_p4 }
  0x1a   : > { %s226_s16 = sshll.u32 %s6820_s15, 4  ;;  %p6665_p9 = scmp.ne.s32.totalorder %s214_s12, %s6664_s17  ;;  %s227_s16 = int_to_ptr.vmem [resolvable:$true] %s226_s16 }
  0x1b   : > { %p6939_p5 = pnand %p5896_p13, %p6905_p3  ;;  %p6672_p0 = scmp.lt.s32.totalorder %s214_s12, %s214_s12 }
  0x1c   : > { %p6673_p10 = scmp.lt.s32.totalorder %s6664_s17, %s6664_s17 }
  0x1d   : > { %p6655_p7 = pneg %p6939_p5 }
  0x1e   : > { %p6674_p8 = por %p6673_p10, %p6672_p0 }
  0x1f   : > { %p6667_p11 = pnand %p6665_p9, %p6655_p7 }
  0x21   : > { %p6668_p13 = pneg %p6667_p11 }
  0x23   : > { %p6675_p3 = pnand %p6674_p8, %p6668_p13 }
  0x25   : > { %6678 = shalt.err (!%p6675_p3)
}
  0x26   : > { %s6821_s18 = smov 512   ;;  %s6822_s19 = smov 32  }
  0x27   : > { %s10147_s1 = sld [smem:[#allocation103_spill]]  ;;  %s6690_s28 = scalar_lea.vmem %s227_s16, 8192 }
  0x28   : > { %p6691_p4 = scmp.ne.s32.totalorder %s227_s16, %s6690_s28  ;;  %p6698_p11 = scmp.lt.s32.totalorder %s227_s16, %s227_s16 }
  0x29   : > { %p6699_p6 = scmp.lt.s32.totalorder %s6690_s28, %s6690_s28 }
  0x2a   : > { %p6693_p1 = pnand %p6691_p4, %p6655_p7 }
  0x2b   : > { %p6700_p10 = por %p6699_p6, %p6698_p11 }
  0x2c   : > { %p6694_p9 = pneg %p6693_p1 }
  0x2d   : > { %5899 = dma.hbm_to_vmem [thread:$0]  (!%p6939_p5), %s10147_s1, 2048, %s214_s12, [#allocation8], %s6821_s18, %s6821_s18, %s6822_s19  }
  0x2e   : > { %p6701_p8 = pnand %p6700_p10, %p6694_p9 }
  0x30   : > { %6704 = shalt.err (!%p6701_p8)
}
  0x31   : > { %s10148_s2 = sld [smem:[#allocation104_spill]]  ;;  %s44_s12 = sadd.s32 1, %s6805_s23 }
  0x32   : > { %s32_s15 = sadd.s32 1, %s6813_s25  ;;  %s249_s17 = sand.u32 1, %s6805_s23  }
  0x33   : > { %p33_p3 = scmp.ge.s32.totalorder %s32_s15, 2  ;;  %s5854_s20 = sshll.u32 %s249_s17, 6 }
  0x34   : > { %s5855_s27 = sshll.u32 %s6813_s25, 7  ;;  %s253_s1 = scalar_lea.vmem [#allocation4], %s5854_s20 }
  0x35   : > { %s10709_s15 = smov (%p33_p3, %s32_s15), 0  ;;  %s6976_s30 = scalar_lea.hbm %s9874_s0, %s5855_s27 }
  0x36   : > { %s40_s11 = ssub.s32 %s6813_s25, %s10709_s15  ;;  %s262_s26 = sshll.u32 %s253_s1, 4  ;;  %s263_s26 = int_to_ptr.vmem [resolvable:$true] %s262_s26 }
  0x37   : > { %5902 = dma.hbm_to_vmem [thread:$0]  (!%p6939_p5), %s10148_s2, 8192, %s227_s16, [#allocation8], %s6821_s18, %s6821_s18, %s6822_s19  }
  0x38   : > { %p42_p6 = scmp.eq.s32.totalorder %s40_s11, 0  ;;  %s250_s18 = scalar_lea.sflag [#allocation5], %s249_s17 }
  0x39   : > { %p6707_p0 = pneg %p6945_p2  ;;  %s6718_s19 = scalar_lea.vmem %s263_s26, 1024 }
  0x3a   : > { %s6981_s16 = scalar_select %p42_p6, %s6805_s23, %s44_s12  }
  0x3b   : > { %p6719_p5 = scmp.ne.s32.totalorder %s263_s26, %s6718_s19  ;;  %s6823_s2 = smov [#allocation4]  }
  0x3c   : > { %s6723_s9 = sshll.u32 %s6823_s2, 4  ;;  %s6724_s9 = int_to_ptr.vmem [resolvable:$false] %s6723_s9 }
  0x3d   : > { %p6721_p7 = pnand %p6719_p5, %p6707_p0  ;;  %s6725_s13 = scalar_lea.vmem %s6724_s9, 2048 }
  0x3e   : > { %p6726_p4 = scmp.lt.s32.totalorder %s263_s26, %s6724_s9  ;;  %p6727_p1 = scmp.lt.s32.totalorder %s6725_s13, %s6718_s19 }
  0x3f   : > { %p6722_p13 = pneg %p6721_p7 }
  0x40   : > { %p6728_p9 = por %p6727_p1, %p6726_p4 }
  0x42   : > { %p6729_p11 = pnand %p6728_p9, %p6722_p13 }
  0x44   : > { %6732 = shalt.err (!%p6729_p11)
}
  0x45   : > { %s6824_s1 = smov 256   ;;  %s6825_s12 = smov 128  }
  0x46   : > { %s6826_s17 = smov 8   ;;  %274 = sbr.rel (%p6929_p12) target bundleno = 2450 (0x992), region = 44 }
  0x47   : > { %5906 = dma.hbm_to_vmem [thread:$0]  (!%p6945_p2), %s6976_s30, 1024, %s263_s26, %s250_s18, %s6824_s1, %s6825_s12, %s6826_s17  }
  0x4b   : > { %s6991_s2 = sand.u32 1, %s6801_s22   ;;  %p10149_p10 = scmp.ne.s32.totalorder %s10140_s7, 0 }
  0x4c   : > { %s5857_s9 = sshll.u32 %s6991_s2, 6  ;;  %s277_s20 = scalar_lea.sflag [#allocation5], %s6991_s2 }
  0x4d   : > { %s6995_s27 = scalar_lea.vmem [#allocation4], %s5857_s9 }
  0x4e   : > { %6784 = dma.done.wait (%p10149_p10), %s277_s20, 1024  }
  0x4f   : > { %6786 = vsyncadd (%p10149_p10), %s277_s20, 4294966272  ;;  %p10150_p2 = scmp.ne.s32.totalorder %s10138_s29, 0 }
  0x51   : > { %6788 = dma.done.wait (%p10150_p2), [#allocation8], 10240  }
  0x52   : > { %6790 = vsyncadd (%p10150_p2), [#allocation8], 4294957056  ;;  %s7005_s26 = scalar_lea.vmem [#allocation10], %s5857_s9  ;;  %p5861_p12 = scmp.ne.s32.totalorder %s6809_s24, 0 }
  0x54   : > { %322 = sbr.rel (%p5861_p12) target bundleno = 91 (0x5b), region = 60 }
  0x59   : > { %v6827_v0 = vmov 0.0  }
  0x5a   : > { %323 = vst [vmem:[#allocation2] sm:$0xff] %v6827_v0  ;;  %324 = vst [vmem:[#allocation3] sm:$0xff] %v6827_v0 }
  0x5b PF: > { %v346_v1 = vld [vmem:[#allocation7 + $0x68] sm:$0xff]  ;;  %v348_v2 = vld [vmem:[#allocation7 + $0x78] sm:$0xff]  ;;  %v345_v3 = vld [vmem:[#allocation7 + $0x60] sm:$0xff]  ;;  %vm371_vm0 = vcmask 261120   ;;  %v9888_v18 = vmov 0.0   ;;  %vm1109_vm1 = vcmask 1041409  }
  0x5c   : > { %420 = vmatprep.subr.mxu0 %v346_v1  ;;  %533 = vmatprep.subr.mxu1 %v348_v2  ;;  %v347_v4 = vld [vmem:[#allocation7 + $0x70] sm:$0xff]  ;;  %v342_v5 = vld [vmem:[#allocation7 + $0x48] sm:$0xff]  ;;  %v344_v6 = vld [vmem:[#allocation7 + $0x58] sm:$0xff]  ;;  %vm1112_vm2 = vcmask 1042434   ;;  %vm1115_vm3 = vcmask 1043459   ;;  %vm1118_vm4 = vcmask 1044484  }
  0x5d   : > { %421 = vmatpush1.msra.mxu0 %v345_v3  ;;  %534 = vmatpush1.msra.mxu1 %v347_v4  ;;  %v341_v7 = vld [vmem:[#allocation7 + $0x40] sm:$0xff]  ;;  %v343_v8 = vld [vmem:[#allocation7 + $0x50] sm:$0xff]  ;;  %v338_v9 = vld [vmem:[#allocation7 + $0x28] sm:$0xff]  ;;  %vm1121_vm5 = vcmask 1045509   ;;  %vm1124_vm6 = vcmask 1046534   ;;  %vm1127_vm7 = vcmask 1047559  }
  0x5e   : > { %422 = vmatprep.subr.mxu0 %v342_v5  ;;  %535 = vmatprep.subr.mxu1 %v344_v6  ;;  %v340_v10 = vld [vmem:[#allocation7 + $0x38] sm:$0xff]  ;;  %v337_v11 = vld [vmem:[#allocation7 + $0x20] sm:$0xff]  ;;  %v339_v12 = vld [vmem:[#allocation7 + $0x30] sm:$0xff]  ;;  %vm1741_vm8 = vcmask 1040384   ;;  %vm1737_vm9 = vcmask 1047553   ;;  %vm2380_vm10 = vcmask 1041408  }
  0x5f   : > { %423 = vmatpush1.msra.mxu0 %v341_v7  ;;  %536 = vmatpush1.msra.mxu1 %v343_v8  ;;  %v334_v13 = vld [vmem:[#allocation7 + $0x8] sm:$0xff]  ;;  %v336_v14 = vld [vmem:[#allocation7 + $0x18] sm:$0xff]  ;;  %v333_v15 = vld [vmem:[#allocation7] sm:$0xff]  ;;  %vm2376_vm11 = vcmask 1047554   ;;  %vm3015_vm12 = vcmask 1047555   ;;  %vm3019_vm13 = vcmask 1042432  }
  0x60   : > { %424 = vmatprep.subr.mxu0 %v338_v9  ;;  %537 = vmatprep.subr.mxu1 %v340_v10  ;;  %v335_v16 = vld [vmem:[#allocation7 + $0x10] sm:$0xff]  ;;  %v325_v17 = vld [vmem:[%s6995_s27] sm:$0xff]  ;;  %v7010_v19 = vld [vmem:[#allocation9 + $0x1e8] sm:$0xff]  ;;  %vm3654_vm14 = vcmask 1047556   ;;  %vm3658_vm15 = vcmask 1043456   ;;  %s5881_s10 = sshll.u32 %s6809_s24, 7 }
  0x61   : > { %425 = vmatpush1.msra.mxu0 %v337_v11  ;;  %538 = vmatpush1.msra.mxu1 %v339_v12  ;;  %v7012_v20 = vld [vmem:[#allocation9 + $0x1f8] sm:$0xff]  ;;  %v7015_v21 = vld [vmem:[#allocation9 + $0x1e0] sm:$0xff]  ;;  %v7017_v22 = vld [vmem:[#allocation9 + $0x1f0] sm:$0xff]  ;;  %s5744_s14 = sshll.u32 %s7005_s26, 4  ;;  %s9809_s30 = scalar_lea.hbm %s9880_s6, %s5881_s10  ;;  %s9815_s14 = int_to_ptr.vmem [resolvable:$true] %s5744_s14 }
  0x62   : > { %426 = vmatprep.subr.mxu0 %v334_v13  ;;  %539 = vmatprep.subr.mxu1 %v336_v14  ;;  %v7021_v23 = vld [vmem:[#allocation9 + $0x1c8] sm:$0xff]  ;;  %v7023_v24 = vld [vmem:[#allocation9 + $0x1d8] sm:$0xff]  ;;  %v7029_v25 = vld [vmem:[#allocation9 + $0x1c0] sm:$0xff]  ;;  %s5729_s11 = scalar_lea.sflag [#allocation6], %s6991_s2  ;;  %s6733_s18 = scalar_lea.vmem %s9815_s14, 1024 }
  0x63   : > { %427 = vmatpush1.msra.mxu0 %v333_v15  ;;  %460 = vmatprep.mubr.f32.mxu0 %v9888_v18  ;;  %v7031_v26 = vld [vmem:[#allocation9 + $0x1d0] sm:$0xff]  ;;  %v326_v27 = vld [vmem:[%s6995_s27 + $0x8] sm:$0xff]  ;;  %v7040_v29 = vld [vmem:[#allocation9 + $0x1b8] sm:$0xff]  ;;  %p6734_p8 = scmp.ne.s32.totalorder %s9815_s14, %s6733_s18  ;;  %p10698_p3 = scmp.ne.s32.totalorder %s10141_s8, 0 }
  0x64   : > { %540 = vmatpush1.msra.mxu1 %v335_v16  ;;  %573 = vmatprep.mubr.f32.mxu1 %v9888_v18  ;;  %v7038_v28 = vld [vmem:[#allocation9 + $0x1a8] sm:$0xff]  ;;  %v7044_v30 = vld [vmem:[#allocation9 + $0x1a0] sm:$0xff]  ;;  %v7046_v31 = vld [vmem:[#allocation9 + $0x1b0] sm:$0xff]  ;;  %s6829_s19 = smov [#allocation10]  }
  0x65   : > { %5862 = vmatmul.mubr.msk.f32.vlgmr.msra.gmra.mxu0 %vm371_vm0, %v325_v17  ;;  %5870 = vmatmul.mubr.msk.f32.vlgmr.msra.gmra.mxu1 %vm371_vm0, %v325_v17  ;;  %v7050_v32 = vld [vmem:[#allocation9 + $0x188] sm:$0xff]  ;;  %v7052_v33 = vld [vmem:[#allocation9 + $0x198] sm:$0xff]  ;;  %v7058_v34 = vld [vmem:[#allocation9 + $0x180] sm:$0xff]  ;;  %p6735_p6 = pnand %p6734_p8, %p10698_p3  ;;  %s6737_s13 = sshll.u32 %s6829_s19, 4  ;;  %s6738_s13 = int_to_ptr.vmem [resolvable:$false] %s6737_s13 }
  0x66   : > { %702 = vmatprep.subr.mxu0 %v7010_v19  ;;  %773 = vmatprep.subr.mxu1 %v7012_v20  ;;  %v7060_v35 = vld [vmem:[#allocation9 + $0x190] sm:$0xff]  ;;  %v7067_v37 = vld [vmem:[#allocation9 + $0x168] sm:$0xff]  ;;  %v7069_v38 = vld [vmem:[#allocation9 + $0x178] sm:$0xff]  ;;  %s6739_s1 = scalar_lea.vmem %s6738_s13, 2048  ;;  %p6740_p5 = scmp.lt.s32.totalorder %s9815_s14, %s6738_s13 }
  0x67   : > { %703 = vmatpush1.msra.mxu0 %v7015_v21  ;;  %774 = vmatpush1.msra.mxu1 %v7017_v22  ;;  %v327_v36 = vld [vmem:[%s6995_s27 + $0x10] sm:$0xff]  ;;  %v7073_v39 = vld [vmem:[#allocation9 + $0x160] sm:$0xff]  ;;  %v7079_v41 = vld [vmem:[#allocation9 + $0x148] sm:$0xff]  ;;  %p6736_p0 = pneg %p6735_p6  ;;  %p6741_p7 = scmp.lt.s32.totalorder %s6739_s1, %s6733_s18 }
  0x68   : > { %704 = vmatprep.subr.mxu0 %v7021_v23  ;;  %775 = vmatprep.subr.mxu1 %v7023_v24  ;;  %v7075_v40 = vld [vmem:[#allocation9 + $0x170] sm:$0xff]  ;;  %v7081_v42 = vld [vmem:[#allocation9 + $0x158] sm:$0xff]  ;;  %v7087_v43 = vld [vmem:[#allocation9 + $0x140] sm:$0xff] }
  0x69   : > { %466 = vmatprep.mubr.f32.mxu0 %v9888_v18  ;;  %579 = vmatprep.mubr.f32.mxu1 %v9888_v18  ;;  %v7089_v44 = vld [vmem:[#allocation9 + $0x150] sm:$0xff]  ;;  %v328_v45 = vld [vmem:[%s6995_s27 + $0x18] sm:$0xff]  ;;  %v7096_v46 = vld [vmem:[#allocation9 + $0x128] sm:$0xff]  ;;  %p6742_p13 = por %p6741_p7, %p6740_p5 }
  0x6a   : > { %705 = vmatpush1.msra.mxu0 %v7029_v25  ;;  %776 = vmatpush1.msra.mxu1 %v7031_v26  ;;  %v7098_v47 = vld [vmem:[#allocation9 + $0x138] sm:$0xff]  ;;  %v7102_v48 = vld [vmem:[#allocation9 + $0x120] sm:$0xff]  ;;  %v7104_v49 = vld [vmem:[#allocation9 + $0x130] sm:$0xff] }
  0x6b   : > { %5863 = vmatmul.mubr.msk.f32.gmra.mxu0 %vm371_vm0, %v326_v27  ;;  %5871 = vmatmul.mubr.msk.f32.gmra.mxu1 %vm371_vm0, %v326_v27  ;;  %v7108_v50 = vld [vmem:[#allocation9 + $0x108] sm:$0xff]  ;;  %v7110_v51 = vld [vmem:[#allocation9 + $0x118] sm:$0xff]  ;;  %v7116_v52 = vld [vmem:[#allocation9 + $0x100] sm:$0xff]  ;;  %p6743_p4 = pnand %p6742_p13, %p6736_p0 }
  0x6c   : > { %706 = vmatprep.subr.mxu0 %v7038_v28  ;;  %777 = vmatprep.subr.mxu1 %v7040_v29  ;;  %v7118_v53 = vld [vmem:[#allocation9 + $0x110] sm:$0xff]  ;;  %v329_v54 = vld [vmem:[%s6995_s27 + $0x20] sm:$0xff]  ;;  %v7125_v55 = vld [vmem:[#allocation9 + $0xe8] sm:$0xff] }
  0x6d   : > { %707 = vmatpush1.msra.mxu0 %v7044_v30  ;;  %778 = vmatpush1.msra.mxu1 %v7046_v31  ;;  %v7127_v56 = vld [vmem:[#allocation9 + $0xf8] sm:$0xff]  ;;  %v7131_v57 = vld [vmem:[#allocation9 + $0xe0] sm:$0xff]  ;;  %v7133_v58 = vld [vmem:[#allocation9 + $0xf0] sm:$0xff] }
  0x6e   : > { %708 = vmatprep.subr.mxu0 %v7050_v32  ;;  %779 = vmatprep.subr.mxu1 %v7052_v33  ;;  %v7137_v59 = vld [vmem:[#allocation9 + $0xc8] sm:$0xff]  ;;  %v7139_v60 = vld [vmem:[#allocation9 + $0xd8] sm:$0xff]  ;;  %v7145_v61 = vld [vmem:[#allocation9 + $0xc0] sm:$0xff] }
  0x6f   : > { %472 = vmatprep.mubr.f32.mxu0 %v9888_v18  ;;  %585 = vmatprep.mubr.f32.mxu1 %v9888_v18  ;;  %v7147_v62 = vld [vmem:[#allocation9 + $0xd0] sm:$0xff]  ;;  %v330_v63 = vld [vmem:[%s6995_s27 + $0x28] sm:$0xff]  ;;  %v7156_v1 = vld [vmem:[#allocation9 + $0xb8] sm:$0xff] }
  0x70   : > { %709 = vmatpush1.msra.mxu0 %v7058_v34  ;;  %780 = vmatpush1.msra.mxu1 %v7060_v35  ;;  %v7154_v0 = vld [vmem:[#allocation9 + $0xa8] sm:$0xff]  ;;  %v7160_v2 = vld [vmem:[#allocation9 + $0xa0] sm:$0xff]  ;;  %v7162_v3 = vld [vmem:[#allocation9 + $0xb0] sm:$0xff] }
  0x71   : > { %5864 = vmatmul.mubr.msk.f32.gmra.mxu0 %vm371_vm0, %v327_v36  ;;  %5872 = vmatmul.mubr.msk.f32.gmra.mxu1 %vm371_vm0, %v327_v36  ;;  %v7166_v4 = vld [vmem:[#allocation9 + $0x88] sm:$0xff]  ;;  %v7168_v5 = vld [vmem:[#allocation9 + $0x98] sm:$0xff]  ;;  %v7174_v6 = vld [vmem:[#allocation9 + $0x80] sm:$0xff] }
  0x72   : > { %710 = vmatprep.subr.mxu0 %v7067_v37  ;;  %781 = vmatprep.subr.mxu1 %v7069_v38  ;;  %v7176_v7 = vld [vmem:[#allocation9 + $0x90] sm:$0xff]  ;;  %v7183_v9 = vld [vmem:[#allocation9 + $0x68] sm:$0xff]  ;;  %v7185_v10 = vld [vmem:[#allocation9 + $0x78] sm:$0xff] }
  0x73   : > { %711 = vmatpush1.msra.mxu0 %v7073_v39  ;;  %782 = vmatpush1.msra.mxu1 %v7075_v40  ;;  %v331_v8 = vld [vmem:[%s6995_s27 + $0x30] sm:$0xff]  ;;  %v7189_v11 = vld [vmem:[#allocation9 + $0x60] sm:$0xff]  ;;  %v7195_v13 = vld [vmem:[#allocation9 + $0x48] sm:$0xff] }
  0x74   : > { %712 = vmatprep.subr.mxu0 %v7079_v41  ;;  %783 = vmatprep.subr.mxu1 %v7081_v42  ;;  %v7191_v12 = vld [vmem:[#allocation9 + $0x70] sm:$0xff]  ;;  %v7197_v14 = vld [vmem:[#allocation9 + $0x58] sm:$0xff]  ;;  %v7203_v15 = vld [vmem:[#allocation9 + $0x40] sm:$0xff] }
  0x75   : > { %478 = vmatprep.mubr.f32.mxu0 %v9888_v18  ;;  %591 = vmatprep.mubr.f32.mxu1 %v9888_v18  ;;  %10151 = vst [vmem:[#allocation16_spill] sm:$0xff] %v7203_v15  ;;  %v7205_v16 = vld [vmem:[#allocation9 + $0x50] sm:$0xff]  ;;  %v332_v17 = vld [vmem:[%s6995_s27 + $0x38] sm:$0xff]  ;;  %v7212_v27 = vld [vmem:[#allocation9 + $0x28] sm:$0xff] }
  0x76   : > { %713 = vmatpush1.msra.mxu0 %v7087_v43  ;;  %784 = vmatpush1.msra.mxu1 %v7089_v44  ;;  %10152 = vst [vmem:[#allocation17_spill] sm:$0xff] %v7205_v16  ;;  %v7214_v36 = vld [vmem:[#allocation9 + $0x38] sm:$0xff] }
  0x77   : > { %5865 = vmatmul.mubr.msk.f32.gmra.mxu0 %vm371_vm0, %v328_v45  ;;  %5873 = vmatmul.mubr.msk.f32.gmra.mxu1 %vm371_vm0, %v328_v45  ;;  %v7218_v45 = vld [vmem:[#allocation9 + $0x20] sm:$0xff] }
  0x78   : > { %714 = vmatprep.subr.mxu0 %v7096_v46  ;;  %785 = vmatprep.subr.mxu1 %v7098_v47 }
  0x79   : > { %715 = vmatpush1.msra.mxu0 %v7102_v48  ;;  %786 = vmatpush1.msra.mxu1 %v7104_v49 }
  0x7a   : > { %716 = vmatprep.subr.mxu0 %v7108_v50  ;;  %787 = vmatprep.subr.mxu1 %v7110_v51 }
  0x7b   : > { %484 = vmatprep.mubr.f32.mxu0 %v9888_v18  ;;  %597 = vmatprep.mubr.f32.mxu1 %v9888_v18 }
  0x7c   : > { %717 = vmatpush1.msra.mxu0 %v7116_v52  ;;  %788 = vmatpush1.msra.mxu1 %v7118_v53 }
  0x7d   : > { %5866 = vmatmul.mubr.msk.f32.gmra.mxu0 %vm371_vm0, %v329_v54  ;;  %5874 = vmatmul.mubr.msk.f32.gmra.mxu1 %vm371_vm0, %v329_v54  ;;  %v7220_v54 = vld [vmem:[#allocation9 + $0x30] sm:$0xff] }
  0x7e   : > { %718 = vmatprep.subr.mxu0 %v7125_v55  ;;  %789 = vmatprep.subr.mxu1 %v7127_v56 }
  0x7f   : > { %719 = vmatpush1.msra.mxu0 %v7131_v57  ;;  %790 = vmatpush1.msra.mxu1 %v7133_v58 }
  0x80   : > { %720 = vmatprep.subr.mxu0 %v7137_v59  ;;  %791 = vmatprep.subr.mxu1 %v7139_v60 }
  0x81   : > { %490 = vmatprep.mubr.f32.mxu0 %v9888_v18  ;;  %603 = vmatprep.mubr.f32.mxu1 %v9888_v18 }
  0x82   : > { %721 = vmatpush1.msra.mxu0 %v7145_v61  ;;  %792 = vmatpush1.msra.mxu1 %v7147_v62 }
  0x83   : > { %5867 = vmatmul.mubr.msk.f32.gmra.mxu0 %vm371_vm0, %v330_v63  ;;  %5875 = vmatmul.mubr.msk.f32.gmra.mxu1 %vm371_vm0, %v330_v63  ;;  %v7224_v63 = vld [vmem:[#allocation9 + $0x8] sm:$0xff] }
  0x84   : > { %722 = vmatprep.subr.mxu0 %v7154_v0  ;;  %793 = vmatprep.subr.mxu1 %v7156_v1 }
  0x85   : > { %723 = vmatpush1.msra.mxu0 %v7160_v2  ;;  %794 = vmatpush1.msra.mxu1 %v7162_v3 }
  0x86   : > { %724 = vmatprep.subr.mxu0 %v7166_v4  ;;  %795 = vmatprep.subr.mxu1 %v7168_v5 }
  0x87   : > { %496 = vmatprep.mubr.f32.mxu0 %v9888_v18  ;;  %609 = vmatprep.mubr.f32.mxu1 %v9888_v18 }
  0x88   : > { %725 = vmatpush1.msra.mxu0 %v7174_v6  ;;  %796 = vmatpush1.msra.mxu1 %v7176_v7 }
  0x89   : > { %5868 = vmatmul.mubr.msk.f32.gmra.mxu0 %vm371_vm0, %v331_v8  ;;  %5876 = vmatmul.mubr.msk.f32.gmra.mxu1 %vm371_vm0, %v331_v8  ;;  %v7226_v8 = vld [vmem:[#allocation9 + $0x18] sm:$0xff] }
  0x8a   : > { %726 = vmatprep.subr.mxu0 %v7183_v9  ;;  %797 = vmatprep.subr.mxu1 %v7185_v10 }
  0x8b   : > { %727 = vmatpush1.msra.mxu0 %v7189_v11  ;;  %798 = vmatpush1.msra.mxu1 %v7191_v12 }
  0x8c   : > { %728 = vmatprep.subr.mxu0 %v7195_v13  ;;  %799 = vmatprep.subr.mxu1 %v7197_v14 }
  0x8d   : > { %502 = vmatprep.mubr.f32.mxu0 %v9888_v18  ;;  %615 = vmatprep.mubr.f32.mxu1 %v9888_v18  ;;  %v7230_v18 = vld [vmem:[#allocation9] sm:$0xff] }
  0x8e   : > { %729 = vmatpush1.msra.mxu0 %v7203_v15  ;;  %800 = vmatpush1.msra.mxu1 %v7205_v16  ;;  %v7234_v16 = vld [vmem:[#allocation9 + $0x10] sm:$0xff]  ;;  %v10153_v15 = vmov 0.0  }
  0x8f   : > { %5869 = vmatmul.mubr.msk.f32.gmra.mxu0 %vm371_vm0, %v332_v17  ;;  %5877 = vmatmul.mubr.msk.f32.gmra.mxu1 %vm371_vm0, %v332_v17  ;;  %v636_v17 = vld [vmem:[#allocation2] sm:$0xff]  ;;  %vm4293_vm0 = vcmask 1047557  }
  0x90   : > { %730 = vmatprep.subr.mxu0 %v7212_v27  ;;  %801 = vmatprep.subr.mxu1 %v7214_v36 }
  0x91   : > { %731 = vmatpush1.msra.mxu0 %v7218_v45  ;;  %802 = vmatpush1.msra.mxu1 %v7220_v54 }
  0x92   : > { %732 = vmatprep.subr.mxu0 %v7224_v63  ;;  %803 = vmatprep.subr.mxu1 %v7226_v8 }
  0x93   : > { %733 = vmatpush1.msra.mxu0 %v7230_v18  ;;  %766 = vmatprep.mubr.f32.mxu0 %v10153_v15 }
  0x94   : > { %804 = vmatpush1.msra.mxu1 %v7234_v16  ;;  %837 = vmatprep.mubr.f32.mxu1 %v10153_v15 }
  0x95   : > { %767 = vmatmul.mubr.f32.vlgmr.msra.gmra.mxu0 %v636_v17  ;;  %838 = vmatmul.mubr.f32.vlgmr.msra.gmra.mxu1 %v636_v17 }
  0x96   : > { %1308 = vmatprep.subr.mxu0 %v7010_v19  ;;  %1379 = vmatprep.subr.mxu1 %v7012_v20  ;;  %v10154_v19 = vld [vmem:[#allocation16_spill] sm:$0xff]  ;;  %v10155_v20 = vld [vmem:[#allocation17_spill] sm:$0xff] }
  0x97   : > { %1309 = vmatpush1.msra.mxu0 %v7015_v21  ;;  %1380 = vmatpush1.msra.mxu1 %v7017_v22 }
  0x98   : > { %1310 = vmatprep.subr.mxu0 %v7021_v23  ;;  %1381 = vmatprep.subr.mxu1 %v7023_v24 }
  0x99   : > { %1311 = vmatpush1.msra.mxu0 %v7029_v25  ;;  %1382 = vmatpush1.msra.mxu1 %v7031_v26 }
  0x9a   : > { %1312 = vmatprep.subr.mxu0 %v7038_v28  ;;  %1383 = vmatprep.subr.mxu1 %v7040_v29 }
  0x9b   : > { %1313 = vmatpush1.msra.mxu0 %v7044_v30  ;;  %1384 = vmatpush1.msra.mxu1 %v7046_v31 }
  0x9c   : > { %1314 = vmatprep.subr.mxu0 %v7050_v32  ;;  %1385 = vmatprep.subr.mxu1 %v7052_v33 }
  0x9d   : > { %1315 = vmatpush1.msra.mxu0 %v7058_v34  ;;  %1386 = vmatpush1.msra.mxu1 %v7060_v35 }
  0x9e   : > { %1316 = vmatprep.subr.mxu0 %v7067_v37  ;;  %1387 = vmatprep.subr.mxu1 %v7069_v38 }
  0x9f   : > { %1317 = vmatpush1.msra.mxu0 %v7073_v39  ;;  %1388 = vmatpush1.msra.mxu1 %v7075_v40 }
  0xa0   : > { %1318 = vmatprep.subr.mxu0 %v7079_v41  ;;  %1389 = vmatprep.subr.mxu1 %v7081_v42  ;;  %v351_v42 = vlaneseq }
  0xa1   : > { %1319 = vmatpush1.msra.mxu0 %v7087_v43  ;;  %1390 = vmatpush1.msra.mxu1 %v7089_v44 }
  0xa2   : > { %1320 = vmatprep.subr.mxu0 %v7096_v46  ;;  %1391 = vmatprep.subr.mxu1 %v7098_v47  ;;  %v352_v46 = vshrl.u32 %v351_v42, 7 }
  0xa3   : > { %1321 = vmatpush1.msra.mxu0 %v7102_v48  ;;  %1392 = vmatpush1.msra.mxu1 %v7104_v49 }
  0xa4   : > { %1322 = vmatprep.subr.mxu0 %v7108_v50  ;;  %1393 = vmatprep.subr.mxu1 %v7110_v51  ;;  %v353_v49 = vsub.s32 0, %v352_v46  ;;  %v361_v50 = vsub.s32 2, %v352_v46 }
  0xa5   : > { %1323 = vmatpush1.msra.mxu0 %v7116_v52  ;;  %1394 = vmatpush1.msra.mxu1 %v7118_v53  ;;  %v349_v53 = vld [vmem:[%s9877_s3] sm:$0xf] }
  0xa6   : > { %1324 = vmatprep.subr.mxu0 %v7125_v55  ;;  %1395 = vmatprep.subr.mxu1 %v7127_v56  ;;  %v357_v55 = vsub.s32 1, %v352_v46  ;;  %v365_v56 = vsub.s32 3, %v352_v46 }
  0xa7   : > { %1325 = vmatpush1.msra.mxu0 %v7131_v57  ;;  %1396 = vmatpush1.msra.mxu1 %v7133_v58  ;;  %v7331_v58 = vld [vmem:[#allocation3] sm:$0xff] }
  0xa8   : > { %1326 = vmatprep.subr.mxu0 %v7137_v59  ;;  %1397 = vmatprep.subr.mxu1 %v7139_v60  ;;  %v354_v59 = vrot.slane %v349_v53, %v353_v49  ;;  %v7333_v60 = vrot.slane %v349_v53, %v361_v50 }
  0xa9   : > { %1327 = vmatpush1.msra.mxu0 %v7145_v61  ;;  %1398 = vmatpush1.msra.mxu1 %v7147_v62  ;;  %v7337_v62 = vrot.slane %v349_v53, %v357_v55 }
  0xaa   : > { %1328 = vmatprep.subr.mxu0 %v7154_v0  ;;  %1399 = vmatprep.subr.mxu1 %v7156_v1  ;;  %v7339_v0 = vrot.slane %v349_v53, %v365_v56 }
  0xab   : > { %1329 = vmatpush1.msra.mxu0 %v7160_v2  ;;  %1400 = vmatpush1.msra.mxu1 %v7162_v3 }
  0xac   : > { %1330 = vmatprep.subr.mxu0 %v7166_v4  ;;  %1401 = vmatprep.subr.mxu1 %v7168_v5 }
  0xad   : > { %1331 = vmatpush1.msra.mxu0 %v7174_v6  ;;  %1402 = vmatpush1.msra.mxu1 %v7176_v7 }
  0xae   : > { %1332 = vmatprep.subr.mxu0 %v7183_v9  ;;  %1403 = vmatprep.subr.mxu1 %v7185_v10 }
  0xaf   : > { %1333 = vmatpush1.msra.mxu0 %v7189_v11  ;;  %1404 = vmatpush1.msra.mxu1 %v7191_v12 }
  0xb0   : > { %1334 = vmatprep.subr.mxu0 %v7195_v13  ;;  %1405 = vmatprep.subr.mxu1 %v7197_v14 }
  0xb1   : > { %1335 = vmatpush1.msra.mxu0 %v10154_v19  ;;  %1406 = vmatpush1.msra.mxu1 %v10155_v20 }
  0xb2   : > { %1336 = vmatprep.subr.mxu0 %v7212_v27  ;;  %1407 = vmatprep.subr.mxu1 %v7214_v36 }
  0xb3   : > { %1337 = vmatpush1.msra.mxu0 %v7218_v45  ;;  %1408 = vmatpush1.msra.mxu1 %v7220_v54 }
  0xb4   : > { %1338 = vmatprep.subr.mxu0 %v7224_v63  ;;  %1409 = vmatprep.subr.mxu1 %v7226_v8 }
  0xb5   : > { %1339 = vmatpush1.msra.mxu0 %v7230_v18  ;;  %1372 = vmatprep.mubr.f32.mxu0 %v10153_v15 }
  0xb6   : > { %1410 = vmatpush1.msra.mxu1 %v7234_v16  ;;  %1443 = vmatprep.mubr.f32.mxu1 %v10153_v15 }
 0x125   : > { %v462_v21 = vpop.f32.mrf.mxu0  ;;  %v575_v22 = vpop.f32.mrf.mxu1 }
 0x126   : > { %v7346_v7 = vadd.f32 %v462_v21, %v354_v59  ;;  %v7349_v9 = vadd.f32 %v575_v22, %v7333_v60 }
 0x127   : > { %v464_v23 = vpop.f32.mrf.mxu0  ;;  %v577_v24 = vpop.f32.mrf.mxu1 }
 0x128   : > { %10156 = vst [vmem:[#allocation16_spill] sm:$0xff] %v7349_v9  ;;  %v7356_v14 = vadd.f32 %v464_v23, %v7337_v62  ;;  %v7359_v16 = vadd.f32 %v577_v24, %v7339_v0 }
 0x12a   : > { %10157 = vst [vmem:[#allocation17_spill] sm:$0xff] %v7356_v14  ;;  %10158 = vst [vmem:[#allocation18_spill] sm:$0xff] %v7359_v16 }
 0x12b   : > { %v468_v25 = vpop.f32.mrf.mxu0  ;;  %v581_v26 = vpop.f32.mrf.mxu1 }
 0x12c   : > { %v7361_v27 = vadd.f32 %v468_v25, %v354_v59  ;;  %v7364_v36 = vadd.f32 %v581_v26, %v7333_v60 }
 0x12d   : > { %v470_v28 = vpop.f32.mrf.mxu0  ;;  %v583_v29 = vpop.f32.mrf.mxu1 }
 0x12e   : > { %10159 = vst [vmem:[#allocation19_spill] sm:$0xff] %v7361_v27  ;;  %10160 = vst [vmem:[#allocation20_spill] sm:$0xff] %v7364_v36  ;;  %v7367_v45 = vadd.f32 %v470_v28, %v7337_v62  ;;  %v7370_v54 = vadd.f32 %v583_v29, %v7339_v0 }
 0x130   : > { %10161 = vst [vmem:[#allocation21_spill] sm:$0xff] %v7367_v45  ;;  %10162 = vst [vmem:[#allocation22_spill] sm:$0xff] %v7370_v54 }
 0x131   : > { %v474_v30 = vpop.f32.mrf.mxu0  ;;  %v587_v31 = vpop.f32.mrf.mxu1 }
 0x132   : > { %v7372_v63 = vadd.f32 %v474_v30, %v354_v59  ;;  %v7375_v8 = vadd.f32 %v587_v31, %v7333_v60 }
 0x133   : > { %v476_v32 = vpop.f32.mrf.mxu0  ;;  %v589_v33 = vpop.f32.mrf.mxu1 }
 0x134   : > { %10163 = vst [vmem:[#allocation23_spill] sm:$0xff] %v7372_v63  ;;  %10164 = vst [vmem:[#allocation24_spill] sm:$0xff] %v7375_v8  ;;  %v7378_v17 = vadd.f32 %v476_v32, %v7337_v62  ;;  %v7381_v19 = vadd.f32 %v589_v33, %v7339_v0 }
 0x136   : > { %10165 = vst [vmem:[#allocation25_spill] sm:$0xff] %v7378_v17  ;;  %10166 = vst [vmem:[#allocation26_spill] sm:$0xff] %v7381_v19 }
 0x137   : > { %v480_v34 = vpop.f32.mrf.mxu0  ;;  %v593_v18 = vpop.f32.mrf.mxu1 }
 0x138   : > { %v7383_v20 = vadd.f32 %v480_v34, %v354_v59  ;;  %v7386_v21 = vadd.f32 %v593_v18, %v7333_v60 }
 0x139   : > { %v7308_v35 = vpop.f32.mrf.mxu0  ;;  %v7310_v37 = vpop.f32.mrf.mxu1 }
 0x13a   : > { %10167 = vst [vmem:[#allocation27_spill] sm:$0xff] %v7383_v20  ;;  %10168 = vst [vmem:[#allocation28_spill] sm:$0xff] %v7386_v21  ;;  %v7405_v50 = vadd.f32 %v7308_v35, %v7337_v62 }
 0x13c   : > { %10173 = vst [vmem:[#allocation33_spill] sm:$0xff] %v7405_v50 }
 0x13d   : > { %v486_v38 = vpop.f32.mrf.mxu0  ;;  %v7312_v39 = vpop.f32.mrf.mxu1 }
 0x13e   : > { %v7388_v22 = vadd.f32 %v486_v38, %v354_v59 }
 0x13f   : > { %v7314_v40 = vpop.f32.mrf.mxu0  ;;  %v7316_v41 = vpop.f32.mrf.mxu1 }
 0x140   : > { %10169 = vst [vmem:[#allocation29_spill] sm:$0xff] %v7388_v22 }
 0x143   : > { %v492_v43 = vpop.f32.mrf.mxu0  ;;  %v7318_v44 = vpop.f32.mrf.mxu1 }
 0x144   : > { %v7390_v23 = vadd.f32 %v492_v43, %v354_v59 }
 0x145   : > { %v7320_v47 = vpop.f32.mrf.mxu0  ;;  %v7322_v48 = vpop.f32.mrf.mxu1 }
 0x146   : > { %10170 = vst [vmem:[#allocation30_spill] sm:$0xff] %v7390_v23 }
 0x149   : > { %v498_v51 = vpop.f32.mrf.mxu0  ;;  %v7324_v52 = vpop.f32.mrf.mxu1 }
 0x14a   : > { %v7392_v24 = vadd.f32 %v498_v51, %v354_v59 }
 0x14b   : > { %v7329_v57 = vpop.f32.mrf.mxu0  ;;  %v7335_v61 = vpop.f32.mrf.mxu1 }
 0x14c   : > { %10171 = vst [vmem:[#allocation31_spill] sm:$0xff] %v7392_v24  ;;  %v7447_v12 = vadd.f32 %v7329_v57, %v7337_v62 }
 0x14e   : > { %10180 = vst [vmem:[#allocation40_spill] sm:$0xff] %v7447_v12 }
 0x14f   : > { %v504_v1 = vpop.f32.mrf.mxu0  ;;  %v617_v10 = vpop.f32.mrf.mxu1 }
 0x150   : > { %v7394_v25 = vadd.f32 %v504_v1, %v354_v59 }
 0x151   : > { %v7351_v11 = vpop.f32.mrf.mxu0  ;;  %v7396_v26 = vpop.f32.mrf.mxu1 }
 0x152   : > { %10172 = vst [vmem:[#allocation32_spill] sm:$0xff] %v7394_v25 }
 0x155   : > { %v768_v28 = vpop.f32.mrf.mxu0  ;;  %v839_v56 = vpop.f32.mrf.mxu1 }
 0x156   : > { %v848_v29 = vrot.slane %v768_v28, 1  ;;  %v852_v30 = vrot.slane %v768_v28, 2  ;;  %v856_v31 = vrot.slane %v768_v28, 3  ;;  %v860_v32 = vrot.slane %v768_v28, 4 }
 0x157   : > { %v864_v33 = vrot.slane %v768_v28, 5  ;;  %v868_v34 = vrot.slane %v768_v28, 6  ;;  %v872_v42 = vrot.slane %v768_v28, 7  ;;  %v908_v18 = vadd.f32 %v768_v28, %v7346_v7 }
 0x158   : > { %v912_v38 = vadd.f32 %v848_v29, %v7361_v27  ;;  %v916_v43 = vadd.f32 %v852_v30, %v7372_v63  ;;  %v920_v46 = vadd.f32 %v856_v31, %v7383_v20  ;;  %v924_v49 = vadd.f32 %v860_v32, %v7388_v22 }
 0x159   : > { %v928_v51 = vadd.f32 %v864_v33, %v7390_v23  ;;  %v932_v53 = vadd.f32 %v868_v34, %v7392_v24  ;;  %v940_v55 = vmul.f32 0.5, %v908_v18  ;;  %v936_v59 = vadd.f32 %v872_v42, %v7394_v25 }
 0x15a   : > { %v941_v1 = vmul.f32 0.5, %v912_v38  ;;  %v942_v28 = vmul.f32 0.5, %v916_v43  ;;  %v943_v29 = vmul.f32 0.5, %v920_v46  ;;  %v7412_v30 = vadd.f32 %v7312_v39, %v7333_v60  ;;  %v770_v46 = vpop.f32.mrf.mxu0 }
 0x15b   : > { %v7416_v31 = vadd.f32 %v7314_v40, %v7337_v62  ;;  %v944_v35 = vmul.f32 0.5, %v924_v49  ;;  %5977 = vtanh.f32 %v940_v55  ;;  %v7420_v32 = vadd.f32 %v7318_v44, %v7333_v60 }
 0x15c   : > { %10174 = vst [vmem:[#allocation34_spill] sm:$0xff] %v7412_v30  ;;  %v945_v33 = vmul.f32 0.5, %v928_v51  ;;  %5979 = vtanh.f32 %v941_v1  ;;  %v850_v34 = vrot.slane %v839_v56, 1  ;;  %v7424_v42 = vadd.f32 %v7320_v47, %v7337_v62 }
 0x15d   : > { %10175 = vst [vmem:[#allocation35_spill] sm:$0xff] %v7416_v31  ;;  %10176 = vst [vmem:[#allocation36_spill] sm:$0xff] %v7420_v32  ;;  %v946_v18 = vmul.f32 0.5, %v932_v53  ;;  %5981 = vtanh.f32 %v942_v28  ;;  %v854_v39 = vrot.slane %v839_v56, 2  ;;  %v7428_v40 = vadd.f32 %v7324_v52, %v7333_v60 }
 0x15e   : > { %10177 = vst [vmem:[#allocation37_spill] sm:$0xff] %v7424_v42  ;;  %v947_v38 = vmul.f32 0.5, %v936_v59  ;;  %5983 = vtanh.f32 %v943_v29  ;;  %v858_v43 = vrot.slane %v839_v56, 3  ;;  %v7431_v44 = vadd.f32 %v617_v10, %v7333_v60 }
 0x15f   : > { %10178 = vst [vmem:[#allocation38_spill] sm:$0xff] %v7428_v40  ;;  %5985 = vtanh.f32 %v944_v35  ;;  %v862_v49 = vrot.slane %v839_v56, 4  ;;  %v910_v51 = vadd.f32 %v839_v56, %v7349_v9  ;;  %v866_v47 = vrot.slane %v839_v56, 5 }
 0x160   : > { %10179 = vst [vmem:[#allocation39_spill] sm:$0xff] %v7431_v44  ;;  %5987 = vtanh.f32 %v945_v33  ;;  %v870_v53 = vrot.slane %v839_v56, 6  ;;  %v914_v55 = vadd.f32 %v850_v34, %v7364_v36  ;;  %v918_v52 = vadd.f32 %v854_v39, %v7375_v8 }
 0x161   : > { %5989 = vtanh.f32 %v946_v18  ;;  %v849_v1 = vrot.slane %v770_v46, 1  ;;  %v853_v59 = vrot.slane %v770_v46, 2  ;;  %v874_v28 = vrot.slane %v839_v56, 7 }
 0x162   : > { %5991 = vtanh.f32 %v947_v38  ;;  %v922_v29 = vadd.f32 %v858_v43, %v7386_v21  ;;  %v857_v60 = vrot.slane %v770_v46, 3  ;;  %v926_v10 = vadd.f32 %v862_v49, %v7412_v30 }
 0x163   : > { %5993 = vtanh.f32 %v910_v51  ;;  %v861_v35 = vrot.slane %v770_v46, 4  ;;  %v909_v33 = vadd.f32 %v770_v46, %v7356_v14  ;;  %v930_v13 = vadd.f32 %v866_v47, %v7420_v32 }
 0x164   : > { %5995 = vtanh.f32 %v914_v55  ;;  %v865_v34 = vrot.slane %v770_v46, 5  ;;  %v913_v18 = vadd.f32 %v849_v1, %v7367_v45  ;;  %v934_v39 = vadd.f32 %v870_v53, %v7428_v40 }
 0x165   : > { %5997 = vtanh.f32 %v918_v52  ;;  %v869_v38 = vrot.slane %v770_v46, 6  ;;  %v917_v56 = vadd.f32 %v853_v59, %v7378_v17  ;;  %v938_v43 = vadd.f32 %v874_v28, %v7431_v44 }
 0x166   : > { %5999 = vtanh.f32 %v922_v29  ;;  %v873_v49 = vrot.slane %v770_v46, 7  ;;  %v921_v51 = vadd.f32 %v857_v60, %v7405_v50  ;;  %v925_v47 = vadd.f32 %v861_v35, %v7416_v31  ;;  %v7460_v60 = vpop.f32.mrf.mxu1 }
 0x167   : > { %6001 = vtanh.f32 %v926_v10  ;;  %v972_v55 = vmul.f32 0.5, %v909_v33  ;;  %v7452_v53 = vadd.f32 %v7351_v11, %v7337_v62  ;;  %v929_v52 = vadd.f32 %v865_v34, %v7424_v42 }
 0x168   : > { %v5978_v1 = vpop.eup %5977  ;;  %6003 = vtanh.f32 %v930_v13  ;;  %v973_v59 = vmul.f32 0.5, %v913_v18  ;;  %v7457_v28 = vadd.f32 %v7310_v37, %v7339_v0  ;;  %v933_v57 = vadd.f32 %v869_v38, %v7447_v12 }
 0x169   : > { %10181 = vst [vmem:[#allocation41_spill] sm:$0xff] %v7452_v53  ;;  %v5980_v46 = vpop.eup %5979  ;;  %6005 = vtanh.f32 %v934_v39  ;;  %v974_v29 = vmul.f32 0.5, %v917_v56  ;;  %v7464_v62 = vadd.f32 %v7316_v41, %v7339_v0  ;;  %v937_v11 = vadd.f32 %v873_v49, %v7452_v53 }
 0x16a   : > { %10182 = vst [vmem:[#allocation42_spill] sm:$0xff] %v7457_v28  ;;  %v5982_v10 = vpop.eup %5981  ;;  %6007 = vtanh.f32 %v938_v43  ;;  %v975_v13 = vmul.f32 0.5, %v921_v51  ;;  %v7469_v37 = vadd.f32 %v7322_v48, %v7339_v0  ;;  %v7473_v33 = vadd.f32 %v7335_v61, %v7339_v0 }
 0x16b   : > { %10183 = vst [vmem:[#allocation43_spill] sm:$0xff] %v7464_v62  ;;  %v5984_v35 = vpop.eup %5983  ;;  %v976_v34 = vmul.f32 0.5, %v925_v47  ;;  %6009 = vtanh.f32 %v972_v55  ;;  %v956_v39 = vmul.f32 0.5, %v5978_v1  ;;  %v977_v38 = vmul.f32 0.5, %v929_v52 }
 0x16c   : > { %10184 = vst [vmem:[#allocation44_spill] sm:$0xff] %v7469_v37  ;;  %10185 = vst [vmem:[#allocation45_spill] sm:$0xff] %v7473_v33  ;;  %v5986_v18 = vpop.eup %5985  ;;  %6011 = vtanh.f32 %v973_v59  ;;  %v851_v41 = vrot.slane %v7460_v60, 1  ;;  %v7478_v43 = vadd.f32 %v7396_v26, %v7339_v0  ;;  %v978_v49 = vmul.f32 0.5, %v933_v57 }
 0x16d   : > { %v5988_v56 = vpop.eup %5987  ;;  %6013 = vtanh.f32 %v974_v29  ;;  %v855_v48 = vrot.slane %v7460_v60, 2  ;;  %v957_v61 = vmul.f32 0.5, %v5980_v46  ;;  %v979_v6 = vmul.f32 0.5, %v937_v11 }
 0x16e   : > { %10186 = vst [vmem:[#allocation46_spill] sm:$0xff] %v7478_v43  ;;  %v5990_v51 = vpop.eup %5989  ;;  %6015 = vtanh.f32 %v975_v13  ;;  %v859_v47 = vrot.slane %v7460_v60, 3  ;;  %v863_v1 = vrot.slane %v7460_v60, 4  ;;  %v867_v52 = vrot.slane %v7460_v60, 5 }
 0x16f   : > { %v5992_v55 = vpop.eup %5991  ;;  %6017 = vtanh.f32 %v976_v34  ;;  %v911_v0 = vadd.f32 %v7460_v60, %v7359_v16  ;;  %v958_v59 = vmul.f32 0.5, %v5982_v10  ;;  %v964_v57 = vadd.f32 0.5, %v956_v39 }
 0x170   : > { %v5994_v26 = vpop.eup %5993  ;;  %6019 = vtanh.f32 %v977_v38  ;;  %v915_v29 = vadd.f32 %v851_v41, %v7370_v54  ;;  %v959_v11 = vmul.f32 0.5, %v5984_v35  ;;  %v871_v13 = vrot.slane %v7460_v60, 6 }
 0x171   : > { %v5996_v46 = vpop.eup %5995  ;;  %6021 = vtanh.f32 %v978_v49  ;;  %v919_v34 = vadd.f32 %v855_v48, %v7381_v19  ;;  %v960_v4 = vmul.f32 0.5, %v5986_v18  ;;  %v961_v3 = vmul.f32 0.5, %v5988_v56 }
 0x172   : > { %v5998_v5 = vpop.eup %5997  ;;  %6023 = vtanh.f32 %v979_v6  ;;  %v923_v2 = vadd.f32 %v859_v47, %v7457_v28  ;;  %v962_v53 = vmul.f32 0.5, %v5990_v51  ;;  %v965_v10 = vadd.f32 0.5, %v957_v61 }
 0x173   : > { %v6000_v16 = vpop.eup %5999  ;;  %v927_v39 = vadd.f32 %v863_v1, %v7464_v62  ;;  %v1012_v38 = vmul.f32 0.5, %v911_v0  ;;  %v963_v54 = vmul.f32 0.5, %v5992_v55  ;;  %v931_v35 = vadd.f32 %v867_v52, %v7469_v37 }
 0x174   : > { %v6002_v41 = vpop.eup %6001  ;;  %v1013_v49 = vmul.f32 0.5, %v915_v29  ;;  %v875_v12 = vrot.slane %v7460_v60, 7  ;;  %v966_v19 = vadd.f32 0.5, %v958_v59  ;;  %v967_v18 = vadd.f32 0.5, %v959_v11 }
 0x175   : > { %v6004_v48 = vpop.eup %6003  ;;  %v1014_v56 = vmul.f32 0.5, %v919_v34  ;;  %v935_v6 = vadd.f32 %v871_v13, %v7473_v33  ;;  %v968_v51 = vadd.f32 0.5, %v960_v4  ;;  %v969_v61 = vadd.f32 0.5, %v961_v3 }
 0x176   : > { %v7494_v47 = vpop.eup %6005  ;;  %v1015_v28 = vmul.f32 0.5, %v923_v2  ;;  %v939_v1 = vadd.f32 %v875_v12, %v7478_v43  ;;  %v970_v55 = vadd.f32 0.5, %v962_v53  ;;  %v1068_v52 = vmul.f32 %v5994_v26, %v964_v57 }
 0x177   : > { %v7497_v0 = vpop.eup %6007  ;;  %v1016_v29 = vmul.f32 0.5, %v927_v39  ;;  %6025 = vtanh.f32 %v1012_v38  ;;  %v971_v37 = vadd.f32 0.5, %v963_v54  ;;  %v1069_v59 = vmul.f32 %v5996_v46, %v965_v10 }
 0x178   : > { %v6010_v60 = vpop.eup %6009  ;;  %6027 = vtanh.f32 %v1013_v49  ;;  %v1017_v11 = vmul.f32 0.5, %v931_v35  ;;  %v1070_v33 = vmul.f32 %v5998_v5, %v966_v19  ;;  %v1018_v4 = vmul.f32 0.5, %v935_v6 }
 0x179   : > { %v6012_v34 = vpop.eup %6011  ;;  %v988_v13 = vmul.f32 0.5, %v6010_v60  ;;  %6029 = vtanh.f32 %v1014_v56  ;;  %v1071_v62 = vmul.f32 %v6000_v16, %v967_v18  ;;  %v1019_v12 = vmul.f32 0.5, %v939_v1 }
 0x17a   : > { %v6014_v3 = vpop.eup %6013  ;;  %v989_v2 = vmul.f32 0.5, %v6012_v34  ;;  %6031 = vtanh.f32 %v1015_v28  ;;  %v1072_v57 = vmul.f32 %v6002_v41, %v968_v51  ;;  %v1073_v10 = vmul.f32 %v6004_v48, %v969_v61 }
 0x17b   : > { %v6016_v43 = vpop.eup %6015  ;;  %v990_v53 = vmul.f32 0.5, %v6014_v3  ;;  %v996_v26 = vadd.f32 0.5, %v988_v13  ;;  %6033 = vtanh.f32 %v1016_v29  ;;  %v10187_v18 = vrot.slane %v7331_v58, 1 }
 0x17c   : > { %v6018_v39 = vpop.eup %6017  ;;  %v991_v54 = vmul.f32 0.5, %v6016_v43  ;;  %v997_v46 = vadd.f32 0.5, %v989_v2  ;;  %6035 = vtanh.f32 %v1017_v11  ;;  %v10188_v43 = vrot.slane %v7331_v58, 2 }
 0x17d   : > { %v6020_v38 = vpop.eup %6019  ;;  %v992_v35 = vmul.f32 0.5, %v6018_v39  ;;  %v998_v5 = vadd.f32 0.5, %v990_v53  ;;  %v1060_v19 = vmul.f32 %v996_v26, %v7331_v58  ;;  %6037 = vtanh.f32 %v1018_v4 }
 0x17e   : > { %v6022_v49 = vpop.eup %6021  ;;  %v993_v16 = vmul.f32 0.5, %v6020_v38  ;;  %v999_v28 = vadd.f32 0.5, %v991_v54  ;;  %v1061_v56 = vmul.f32 %v10187_v18, %v997_v46  ;;  %6039 = vtanh.f32 %v1019_v12 }
 0x17f   : > { %v6024_v41 = vpop.eup %6023  ;;  %v994_v6 = vmul.f32 0.5, %v6022_v49  ;;  %v1000_v51 = vadd.f32 0.5, %v992_v35  ;;  %v1062_v48 = vmul.f32 %v10188_v43, %v998_v5  ;;  %v7504_v61 = vadd.f32 %v1068_v52, %v1060_v19 }
 0x180   : > { %v995_v1 = vmul.f32 0.5, %v6024_v41  ;;  %v1001_v29 = vadd.f32 0.5, %v993_v16  ;;  %v10189_v60 = vrot.slane %v7331_v58, 3  ;;  %v7508_v34 = vadd.f32 %v1069_v59, %v1061_v56 }
 0x181   : > { %v1002_v13 = vadd.f32 0.5, %v994_v6  ;;  %v10190_v4 = vrot.slane %v7331_v58, 4  ;;  %v7512_v2 = vadd.f32 %v1070_v33, %v1062_v48  ;;  %6041 = vtanh.f32 %v7504_v61 }
 0x182   : > { %v1063_v11 = vmul.f32 %v10189_v60, %v999_v28  ;;  %v1003_v12 = vadd.f32 0.5, %v995_v1  ;;  %v10191_v53 = vrot.slane %v7331_v58, 5  ;;  %6043 = vtanh.f32 %v7508_v34 }
 0x183   : > { %v1064_v3 = vmul.f32 %v10190_v4, %v1000_v51  ;;  %v10192_v39 = vrot.slane %v7331_v58, 6  ;;  %6045 = vtanh.f32 %v7512_v2  ;;  %v1074_v33 = vmul.f32 %v7494_v47, %v970_v55 }
 0x184   : > { %v1065_v52 = vmul.f32 %v10191_v53, %v1001_v29  ;;  %v7517_v26 = vadd.f32 %v1071_v62, %v1063_v11  ;;  %v6026_v46 = vpop.eup %6025  ;;  %v10193_v62 = vrot.slane %v7331_v58, 7  ;;  %v1075_v19 = vmul.f32 %v7497_v0, %v971_v37 }
 0x185   : > { %v1066_v59 = vmul.f32 %v10192_v39, %v1002_v13  ;;  %v7522_v54 = vadd.f32 %v1072_v57, %v1064_v3  ;;  %v6028_v35 = vpop.eup %6027 }
 0x186   : > { %v7526_v38 = vadd.f32 %v1073_v10, %v1065_v52  ;;  %6047 = vtanh.f32 %v7517_v26  ;;  %v1067_v5 = vmul.f32 %v10193_v62, %v1003_v12  ;;  %v6030_v16 = vpop.eup %6029  ;;  %v1028_v10 = vmul.f32 0.5, %v6026_v46 }
 0x187   : > { %v7532_v49 = vadd.f32 %v1074_v33, %v1066_v59  ;;  %6049 = vtanh.f32 %v7522_v54  ;;  %v6032_v57 = vpop.eup %6031  ;;  %v1029_v18 = vmul.f32 0.5, %v6028_v35  ;;  %v1030_v0 = vmul.f32 0.5, %v6030_v16 }
 0x188   : > { %v7535_v28 = vadd.f32 %v1075_v19, %v1067_v5  ;;  %6051 = vtanh.f32 %v7526_v38  ;;  %v6034_v47 = vpop.eup %6033  ;;  %v1031_v56 = vmul.f32 0.5, %v6032_v57  ;;  %v1036_v51 = vadd.f32 0.5, %v1028_v10 }
 0x189   : > { %6053 = vtanh.f32 %v7532_v49  ;;  %v6036_v55 = vpop.eup %6035  ;;  %v1032_v41 = vmul.f32 0.5, %v6034_v47  ;;  %v1037_v1 = vadd.f32 0.5, %v1029_v18  ;;  %v1038_v11 = vadd.f32 0.5, %v1030_v0 }
 0x18a   : > { %6055 = vtanh.f32 %v7535_v28  ;;  %v6038_v58 = vpop.eup %6037  ;;  %v1033_v6 = vmul.f32 0.5, %v6036_v55  ;;  %v1039_v3 = vadd.f32 0.5, %v1031_v56 }
 0x18b   : > { %v6040_v37 = vpop.eup %6039  ;;  %v1034_v48 = vmul.f32 0.5, %v6038_v58  ;;  %v1040_v52 = vadd.f32 0.5, %v1032_v41 }
 0x18c   : > { %v1035_v60 = vmul.f32 0.5, %v6040_v37  ;;  %v1041_v39 = vadd.f32 0.5, %v1033_v6 }
 0x18d   : > { %v1042_v33 = vadd.f32 0.5, %v1034_v48 }
 0x18e   : > { %v6042_v43 = vpop.eup %6041  ;;  %v1043_v19 = vadd.f32 0.5, %v1035_v60 }
 0x18f   : > { %v6044_v29 = vpop.eup %6043  ;;  %v7540_v13 = vmul.f32 %v6042_v43, %v1036_v51 }
 0x190   : > { %v6046_v4 = vpop.eup %6045  ;;  %v7542_v12 = vmul.f32 %v6044_v29, %v1037_v1 }
 0x191   : > { %v7544_v59 = vmul.f32 %v6046_v4, %v1038_v11  ;;  %v1134_v57 = vmul.f32 %v7540_v13, %v7540_v13 }
 0x192   : > { %v1108_v35 = vrot.slane %v7542_v12, 7  ;;  %v1135_v62 = vmul.f32 %v7542_v12, %v7542_v12 }
 0x193   : > { %v6048_v53 = vpop.eup %6047  ;;  %v1111_v16 = vrot.slane %v7544_v59, 6  ;;  %v1136_v47 = vmul.f32 %v7544_v59, %v7544_v59 }
 0x194   : > { %v7546_v46 = vmul.f32 %v6048_v53, %v1039_v3  ;;  %v6050_v5 = vpop.eup %6049  ;;  %v1110_v58 = vsel %vm1109_vm1, %v1108_v35, %v7540_v13  ;;  %v1150_v6 = vrot.slane %v1135_v62, 7 }
 0x195   : > { %v6052_v55 = vpop.eup %6051  ;;  %v7556_v10 = vmul.f32 %v6050_v5, %v1040_v52  ;;  %v1113_v41 = vsel %vm1112_vm2, %v1111_v16, %v1110_v58  ;;  %v1152_v51 = vrot.slane %v1136_v47, 6 }
 0x196   : > { %v1114_v18 = vrot.slane %v7546_v46, 5  ;;  %v1137_v37 = vmul.f32 %v7546_v46, %v7546_v46  ;;  %v6054_v0 = vpop.eup %6053  ;;  %v7563_v56 = vmul.f32 %v6052_v55, %v1041_v39  ;;  %v1151_v53 = vsel %vm1109_vm1, %v1150_v6, %v1134_v57 }
 0x197   : > { %v6056_v43 = vpop.eup %6055  ;;  %v7566_v48 = vmul.f32 %v6054_v0, %v1042_v33  ;;  %v1117_v29 = vrot.slane %v7556_v10, 4  ;;  %v1138_v60 = vmul.f32 %v7556_v10, %v7556_v10  ;;  %v1153_v35 = vsel %vm1112_vm2, %v1152_v51, %v1151_v53  ;;  %v7610_v53 = vld [vmem:[#allocation9 + $0x1d8] sm:$0xff] }
 0x198   : > { %v1116_v1 = vsel %vm1115_vm3, %v1114_v18, %v1113_v41  ;;  %v7572_v11 = vmul.f32 %v6056_v43, %v1043_v19  ;;  %v1120_v4 = vrot.slane %v7563_v56, 3  ;;  %v1139_v3 = vmul.f32 %v7563_v56, %v7563_v56 }
 0x199   : > { %v1119_v52 = vsel %vm1118_vm4, %v1117_v29, %v1116_v1  ;;  %v1123_v39 = vrot.slane %v7566_v48, 2  ;;  %v1140_v33 = vmul.f32 %v7566_v48, %v7566_v48  ;;  %v1154_v16 = vrot.slane %v1137_v37, 5  ;;  %v7596_v1 = vld [vmem:[#allocation9 + $0x1e8] sm:$0xff]  ;;  %v7598_v29 = vld [vmem:[#allocation9 + $0x1f8] sm:$0xff] }
 0x19a   : > { %v1122_v62 = vsel %vm1121_vm5, %v1120_v4, %v1119_v52  ;;  %v1126_v5 = vrot.slane %v7572_v11, 1  ;;  %v1141_v19 = vmul.f32 %v7572_v11, %v7572_v11  ;;  %v1156_v57 = vrot.slane %v1138_v60, 4  ;;  %1947 = vmatprep.subr.mxu0 %v7596_v1  ;;  %2018 = vmatprep.subr.mxu1 %v7598_v29  ;;  %v7602_v60 = vld [vmem:[#allocation9 + $0x1e0] sm:$0xff]  ;;  %v7604_v4 = vld [vmem:[#allocation9 + $0x1f0] sm:$0xff] }
 0x19b   : > { %v1125_v47 = vsel %vm1124_vm6, %v1123_v39, %v1122_v62  ;;  %v1155_v58 = vsel %vm1115_vm3, %v1154_v16, %v1153_v35  ;;  %v1158_v18 = vrot.slane %v1139_v3, 3  ;;  %v1160_v41 = vrot.slane %v1140_v33, 2  ;;  %v7608_v3 = vld [vmem:[#allocation9 + $0x1c8] sm:$0xff]  ;;  %v7614_v52 = vld [vmem:[#allocation9 + $0x1c0] sm:$0xff]  ;;  %v7616_v39 = vld [vmem:[#allocation9 + $0x1d0] sm:$0xff] }
 0x19c   : > { %v1128_v55 = vsel %vm1127_vm7, %v1126_v5, %v1125_v47  ;;  %v1157_v0 = vsel %vm1118_vm4, %v1156_v57, %v1155_v58  ;;  %v1162_v51 = vrot.slane %v1141_v19, 1  ;;  %v7620_v33 = vld [vmem:[#allocation9 + $0x1a8] sm:$0xff]  ;;  %v7622_v35 = vld [vmem:[#allocation9 + $0x1b8] sm:$0xff]  ;;  %v7626_v62 = vld [vmem:[#allocation9 + $0x1a0] sm:$0xff] }
 0x19d   : > { %1130 = vadd.xlane.f32.xlu0 %v1128_v55  ;;  %1373 = vmatmul.mubr.f32.vlgmr.msra.gmra.mxu0 %v1128_v55  ;;  %v1159_v6 = vsel %vm1121_vm5, %v1158_v18, %v1157_v0  ;;  %10194 = vst [vmem:[#allocation47_spill] sm:$0xff] %v7620_v33  ;;  %10195 = vst [vmem:[#allocation48_spill] sm:$0xff] %v7622_v35  ;;  %v7628_v5 = vld [vmem:[#allocation9 + $0x1b0] sm:$0xff]  ;;  %v7632_v19 = vld [vmem:[#allocation9 + $0x188] sm:$0xff] }
 0x19e   : > { %1444 = vmatmul.mubr.f32.vlgmr.msra.gmra.mxu1 %v1128_v55  ;;  %2011 = vmatprep.mubr.f32.mxu0 %v10153_v15  ;;  %v1161_v37 = vsel %vm1124_vm6, %v1160_v41, %v1159_v6  ;;  %10196 = vst [vmem:[#allocation49_spill] sm:$0xff] %v7626_v62  ;;  %10197 = vst [vmem:[#allocation50_spill] sm:$0xff] %v7628_v5  ;;  %v7634_v16 = vld [vmem:[#allocation9 + $0x198] sm:$0xff]  ;;  %v7636_v47 = vld [vmem:[#allocation9 + $0x180] sm:$0xff] }
 0x19f   : > { %2082 = vmatprep.mubr.f32.mxu1 %v10153_v15  ;;  %v1163_v43 = vsel %vm1127_vm7, %v1162_v51, %v1161_v37  ;;  %1948 = vmatpush1.msra.mxu0 %v7602_v60  ;;  %10198 = vst [vmem:[#allocation51_spill] sm:$0xff] %v7632_v19  ;;  %10199 = vst [vmem:[#allocation52_spill] sm:$0xff] %v7634_v16  ;;  %v7640_v57 = vld [vmem:[#allocation9 + $0x190] sm:$0xff]  ;;  %v7642_v55 = vld [vmem:[#allocation9 + $0x168] sm:$0xff] }
 0x1a0   : > { %2019 = vmatpush1.msra.mxu1 %v7604_v4  ;;  %1949 = vmatprep.subr.mxu0 %v7608_v3  ;;  %10200 = vst [vmem:[#allocation53_spill] sm:$0xff] %v7636_v47  ;;  %10201 = vst [vmem:[#allocation54_spill] sm:$0xff] %v7640_v57  ;;  %v7644_v58 = vld [vmem:[#allocation9 + $0x178] sm:$0xff]  ;;  %v7648_v18 = vld [vmem:[#allocation9 + $0x160] sm:$0xff] }
 0x1a1   : > { %1165 = vadd.xlane.f32.xlu0 %v1163_v43  ;;  %2020 = vmatprep.subr.mxu1 %v7610_v53  ;;  %10202 = vst [vmem:[#allocation55_spill] sm:$0xff] %v7642_v55  ;;  %10203 = vst [vmem:[#allocation56_spill] sm:$0xff] %v7644_v58  ;;  %v7650_v0 = vld [vmem:[#allocation9 + $0x170] sm:$0xff]  ;;  %v7652_v41 = vld [vmem:[#allocation9 + $0x148] sm:$0xff] }
 0x1a2   : > { %1950 = vmatpush1.msra.mxu0 %v7614_v52  ;;  %2021 = vmatpush1.msra.mxu1 %v7616_v39  ;;  %10204 = vst [vmem:[#allocation57_spill] sm:$0xff] %v7648_v18  ;;  %10205 = vst [vmem:[#allocation58_spill] sm:$0xff] %v7650_v0  ;;  %v7656_v6 = vld [vmem:[#allocation9 + $0x158] sm:$0xff]  ;;  %v7658_v51 = vld [vmem:[#allocation9 + $0x140] sm:$0xff] }
 0x1a3   : > { %1951 = vmatprep.subr.mxu0 %v7620_v33  ;;  %2022 = vmatprep.subr.mxu1 %v7622_v35  ;;  %10206 = vst [vmem:[#allocation59_spill] sm:$0xff] %v7652_v41  ;;  %10207 = vst [vmem:[#allocation60_spill] sm:$0xff] %v7656_v6  ;;  %v7660_v37 = vld [vmem:[#allocation9 + $0x150] sm:$0xff]  ;;  %v7664_v43 = vld [vmem:[#allocation9 + $0x128] sm:$0xff] }
 0x1a4   : > { %1952 = vmatpush1.msra.mxu0 %v7626_v62  ;;  %2023 = vmatpush1.msra.mxu1 %v7628_v5  ;;  %10208 = vst [vmem:[#allocation61_spill] sm:$0xff] %v7658_v51  ;;  %10209 = vst [vmem:[#allocation62_spill] sm:$0xff] %v7660_v37  ;;  %v7666_v15 = vld [vmem:[#allocation9 + $0x138] sm:$0xff]  ;;  %v7813_v62 = vld [vmem:[%s9878_s4] ss:$0 sm:$0xff] }
 0x1a5   : > { %1953 = vmatprep.subr.mxu0 %v7632_v19  ;;  %2024 = vmatprep.subr.mxu1 %v7634_v16  ;;  %10210 = vst [vmem:[#allocation63_spill] sm:$0xff] %v7664_v43  ;;  %10211 = vst [vmem:[#allocation64_spill] sm:$0xff] %v7666_v15  ;;  %v7770_v16 = vld [vmem:[#allocation9 + $0x20] sm:$0xff]  ;;  %v7778_v19 = vld [vmem:[#allocation9 + $0x18] sm:$0xff] }
 0x1a6   : > { %1954 = vmatpush1.msra.mxu0 %v7636_v47  ;;  %2025 = vmatpush1.msra.mxu1 %v7640_v57  ;;  %v7676_v57 = vld [vmem:[#allocation9 + $0x108] sm:$0xff]  ;;  %v7742_v47 = vld [vmem:[#allocation9 + $0x60] sm:$0xff]  ;;  %10244 = vst [vmem:[#allocation97_spill] sm:$0xff] %v7770_v16  ;;  %10247 = vst [vmem:[#allocation100_spill] sm:$0xff] %v7778_v19 }
 0x1a7   : > { %1955 = vmatprep.subr.mxu0 %v7642_v55  ;;  %2026 = vmatprep.subr.mxu1 %v7644_v58  ;;  %v7670_v55 = vld [vmem:[#allocation9 + $0x120] sm:$0xff]  ;;  %v7672_v58 = vld [vmem:[#allocation9 + $0x130] sm:$0xff]  ;;  %10214 = vst [vmem:[#allocation67_spill] sm:$0xff] %v7676_v57  ;;  %10236 = vst [vmem:[#allocation89_spill] sm:$0xff] %v7742_v47 }
 0x1a8   : > { %1956 = vmatpush1.msra.mxu0 %v7648_v18  ;;  %2027 = vmatpush1.msra.mxu1 %v7650_v0  ;;  %10212 = vst [vmem:[#allocation65_spill] sm:$0xff] %v7670_v55  ;;  %10213 = vst [vmem:[#allocation66_spill] sm:$0xff] %v7672_v58  ;;  %v7678_v18 = vld [vmem:[#allocation9 + $0x118] sm:$0xff]  ;;  %v7682_v0 = vld [vmem:[#allocation9 + $0x100] sm:$0xff] }
 0x1a9   : > { %1957 = vmatprep.subr.mxu0 %v7652_v41  ;;  %2028 = vmatprep.subr.mxu1 %v7656_v6  ;;  %10215 = vst [vmem:[#allocation68_spill] sm:$0xff] %v7678_v18  ;;  %10216 = vst [vmem:[#allocation69_spill] sm:$0xff] %v7682_v0  ;;  %v7684_v41 = vld [vmem:[#allocation9 + $0x110] sm:$0xff]  ;;  %v7688_v6 = vld [vmem:[#allocation9 + $0xe8] sm:$0xff] }
 0x1aa   : > { %1958 = vmatpush1.msra.mxu0 %v7658_v51  ;;  %2029 = vmatpush1.msra.mxu1 %v7660_v37  ;;  %10217 = vst [vmem:[#allocation70_spill] sm:$0xff] %v7684_v41  ;;  %10218 = vst [vmem:[#allocation71_spill] sm:$0xff] %v7688_v6  ;;  %v7690_v51 = vld [vmem:[#allocation9 + $0xf8] sm:$0xff]  ;;  %v7694_v37 = vld [vmem:[#allocation9 + $0xe0] sm:$0xff] }
 0x1ab   : > { %1959 = vmatprep.subr.mxu0 %v7664_v43  ;;  %2030 = vmatprep.subr.mxu1 %v7666_v15  ;;  %10219 = vst [vmem:[#allocation72_spill] sm:$0xff] %v7690_v51  ;;  %10220 = vst [vmem:[#allocation73_spill] sm:$0xff] %v7694_v37  ;;  %v7696_v43 = vld [vmem:[#allocation9 + $0xf0] sm:$0xff]  ;;  %v7700_v15 = vld [vmem:[#allocation9 + $0xc8] sm:$0xff] }
 0x1ac   : > { %1960 = vmatpush1.msra.mxu0 %v7670_v55  ;;  %2031 = vmatpush1.msra.mxu1 %v7672_v58  ;;  %10221 = vst [vmem:[#allocation74_spill] sm:$0xff] %v7696_v43  ;;  %10222 = vst [vmem:[#allocation75_spill] sm:$0xff] %v7700_v15  ;;  %v7702_v55 = vld [vmem:[#allocation9 + $0xd8] sm:$0xff]  ;;  %v7706_v58 = vld [vmem:[#allocation9 + $0xc0] sm:$0xff] }
 0x1ad   : > { %1961 = vmatprep.subr.mxu0 %v7676_v57  ;;  %2032 = vmatprep.subr.mxu1 %v7678_v18  ;;  %10223 = vst [vmem:[#allocation76_spill] sm:$0xff] %v7702_v55  ;;  %10224 = vst [vmem:[#allocation77_spill] sm:$0xff] %v7706_v58  ;;  %v7708_v57 = vld [vmem:[#allocation9 + $0xd0] sm:$0xff]  ;;  %v7712_v18 = vld [vmem:[#allocation9 + $0xa8] sm:$0xff] }
 0x1ae   : > { %1962 = vmatpush1.msra.mxu0 %v7682_v0  ;;  %2033 = vmatpush1.msra.mxu1 %v7684_v41  ;;  %10225 = vst [vmem:[#allocation78_spill] sm:$0xff] %v7708_v57  ;;  %10226 = vst [vmem:[#allocation79_spill] sm:$0xff] %v7712_v18  ;;  %v7714_v0 = vld [vmem:[#allocation9 + $0xb8] sm:$0xff]  ;;  %v7718_v41 = vld [vmem:[#allocation9 + $0xa0] sm:$0xff] }
 0x1af   : > { %1963 = vmatprep.subr.mxu0 %v7688_v6  ;;  %2034 = vmatprep.subr.mxu1 %v7690_v51  ;;  %10227 = vst [vmem:[#allocation80_spill] sm:$0xff] %v7714_v0  ;;  %10228 = vst [vmem:[#allocation81_spill] sm:$0xff] %v7718_v41  ;;  %v7720_v6 = vld [vmem:[#allocation9 + $0xb0] sm:$0xff]  ;;  %v7724_v51 = vld [vmem:[#allocation9 + $0x88] sm:$0xff] }
 0x1b0   : > { %1964 = vmatpush1.msra.mxu0 %v7694_v37  ;;  %2035 = vmatpush1.msra.mxu1 %v7696_v43  ;;  %10229 = vst [vmem:[#allocation82_spill] sm:$0xff] %v7720_v6  ;;  %10230 = vst [vmem:[#allocation83_spill] sm:$0xff] %v7724_v51  ;;  %v7726_v37 = vld [vmem:[#allocation9 + $0x98] sm:$0xff] }
 0x1b1   : > { %1965 = vmatprep.subr.mxu0 %v7700_v15  ;;  %2036 = vmatprep.subr.mxu1 %v7702_v55  ;;  %10231 = vst [vmem:[#allocation84_spill] sm:$0xff] %v7726_v37  ;;  %v7730_v15 = vld [vmem:[#allocation9 + $0x80] sm:$0xff]  ;;  %v7732_v55 = vld [vmem:[#allocation9 + $0x90] sm:$0xff] }
 0x1b2   : > { %1966 = vmatpush1.msra.mxu0 %v7706_v58  ;;  %2037 = vmatpush1.msra.mxu1 %v7708_v57  ;;  %10232 = vst [vmem:[#allocation85_spill] sm:$0xff] %v7730_v15  ;;  %10233 = vst [vmem:[#allocation86_spill] sm:$0xff] %v7732_v55  ;;  %v7736_v58 = vld [vmem:[#allocation9 + $0x68] sm:$0xff]  ;;  %v7738_v57 = vld [vmem:[#allocation9 + $0x78] sm:$0xff] }
 0x1b3   : > { %1967 = vmatprep.subr.mxu0 %v7712_v18  ;;  %2038 = vmatprep.subr.mxu1 %v7714_v0  ;;  %10234 = vst [vmem:[#allocation87_spill] sm:$0xff] %v7736_v58  ;;  %10235 = vst [vmem:[#allocation88_spill] sm:$0xff] %v7738_v57  ;;  %v7748_v0 = vld [vmem:[#allocation9 + $0x70] sm:$0xff] }
 0x1b4   : > { %1968 = vmatpush1.msra.mxu0 %v7718_v41  ;;  %2039 = vmatpush1.msra.mxu1 %v7720_v6  ;;  %10237 = vst [vmem:[#allocation90_spill] sm:$0xff] %v7748_v0  ;;  %v7752_v6 = vld [vmem:[#allocation9 + $0x48] sm:$0xff] }
 0x1b5   : > { %1969 = vmatprep.subr.mxu0 %v7724_v51  ;;  %2040 = vmatprep.subr.mxu1 %v7726_v37  ;;  %10238 = vst [vmem:[#allocation91_spill] sm:$0xff] %v7752_v6  ;;  %v7754_v51 = vld [vmem:[#allocation9 + $0x58] sm:$0xff]  ;;  %v7757_v37 = vld [vmem:[#allocation9 + $0x40] sm:$0xff] }
 0x1b6   : > { %1970 = vmatpush1.msra.mxu0 %v7730_v15  ;;  %2041 = vmatpush1.msra.mxu1 %v7732_v55  ;;  %10239 = vst [vmem:[#allocation92_spill] sm:$0xff] %v7754_v51  ;;  %10240 = vst [vmem:[#allocation93_spill] sm:$0xff] %v7757_v37  ;;  %v7762_v55 = vld [vmem:[#allocation9 + $0x28] sm:$0xff]  ;;  %v7764_v15 = vld [vmem:[#allocation9 + $0x38] sm:$0xff] }
 0x1b7   : > { %1971 = vmatprep.subr.mxu0 %v7736_v58  ;;  %2042 = vmatprep.subr.mxu1 %v7738_v57  ;;  %10242 = vst [vmem:[#allocation95_spill] sm:$0xff] %v7762_v55  ;;  %10243 = vst [vmem:[#allocation96_spill] sm:$0xff] %v7764_v15 }
 0x1b8   : > { %1972 = vmatpush1.msra.mxu0 %v7742_v47  ;;  %2043 = vmatpush1.msra.mxu1 %v7748_v0  ;;  %v7772_v47 = vld [vmem:[#allocation9 + $0x30] sm:$0xff]  ;;  %v7776_v0 = vld [vmem:[#allocation9 + $0x8] sm:$0xff] }
 0x1b9   : > { %1973 = vmatprep.subr.mxu0 %v7752_v6  ;;  %2044 = vmatprep.subr.mxu1 %v7754_v51  ;;  %10245 = vst [vmem:[#allocation98_spill] sm:$0xff] %v7772_v47  ;;  %10246 = vst [vmem:[#allocation99_spill] sm:$0xff] %v7776_v0  ;;  %v7784_v51 = vld [vmem:[#allocation9 + $0x10] sm:$0xff] }
 0x1ba   : > { %1974 = vmatpush1.msra.mxu0 %v7757_v37  ;;  %10249 = vst [vmem:[#allocation102_spill] sm:$0xff] %v7784_v51 }
 0x1bb   : > { %1975 = vmatprep.subr.mxu0 %v7762_v55 }
 0x1bc   : > { %1976 = vmatpush1.msra.mxu0 %v7770_v16 }
 0x1bd   : > { %1977 = vmatprep.subr.mxu0 %v7776_v0 }
 0x226   : > { %v1131_v43 = vpop.xlane.xlu0 %1130 }
 0x227   : > { %v7744_v18 = vmul.f32 0.0078125, %v1131_v43  ;;  %v7759_v43 = vld [vmem:[#allocation9 + $0x50] sm:$0xff] }
 0x228   : > { %10241 = vst [vmem:[#allocation94_spill] sm:$0xff] %v7759_v43  ;;  %2045 = vmatpush1.msra.mxu1 %v7759_v43 }
 0x229   : > { %v1168_v58 = vmul.f32 %v7744_v18, %v7744_v18  ;;  %2046 = vmatprep.subr.mxu1 %v7764_v15  ;;  %v1175_v0 = vrot.slane %v7744_v18, 5 }
 0x22a   : > { %v1166_v41 = vpop.xlane.xlu0 %1165  ;;  %2047 = vmatpush1.msra.mxu1 %v7772_v47  ;;  %v1173_v47 = vrot.slane %v7744_v18, 3 }
 0x22b   : > { %v1167_v57 = vmul.f32 0.0078125, %v1166_v41  ;;  %v7782_v41 = vld [vmem:[#allocation9] sm:$0xff]  ;;  %2048 = vmatprep.subr.mxu1 %v7778_v19  ;;  %v1176_v19 = vrot.slane %v7744_v18, 6  ;;  %v1191_v55 = vsub.f32 %v7563_v56, %v1175_v0 }
 0x22c   : > { %10248 = vst [vmem:[#allocation101_spill] sm:$0xff] %v7782_v41  ;;  %1978 = vmatpush1.msra.mxu0 %v7782_v41  ;;  %2049 = vmatpush1.msra.mxu1 %v7784_v51  ;;  %v1177_v41 = vrot.slane %v7744_v18, 7  ;;  %v1189_v51 = vsub.f32 %v7546_v46, %v1173_v47 }
 0x22d   : > { %v1169_v5 = vsub.f32 %v1167_v57, %v1168_v58  ;;  %2586 = vmatprep.subr.mxu0 %v7596_v1  ;;  %2657 = vmatprep.subr.mxu1 %v7598_v29  ;;  %v1171_v57 = vrot.slane %v7744_v18, 1  ;;  %v1172_v58 = vrot.slane %v7744_v18, 2  ;;  %v1192_v43 = vsub.f32 %v7566_v48, %v1176_v19 }
 0x22e   : > { %v1193_v6 = vsub.f32 %v7572_v11, %v1177_v41 }
 0x22f   : > { %v1194_v37 = vadd.f32 1e-05, %v1169_v5  ;;  %v1174_v5 = vrot.slane %v7744_v18, 4  ;;  %v1187_v1 = vsub.f32 %v7542_v12, %v1171_v57  ;;  %v1188_v29 = vsub.f32 %v7544_v59, %v1172_v58 }
 0x231   : > { %6057 = vrsqrt.f32 %v1194_v37  ;;  %v1186_v37 = vsub.f32 %v7540_v13, %v7744_v18  ;;  %v1190_v15 = vsub.f32 %v7556_v10, %v1174_v5  ;;  %v7818_v10 = vld [vmem:[%s9879_s5] ss:$0 sm:$0xff] }
 0x23e   : > { %v6058_v16 = vpop.eup %6057 }
 0x23f   : > { %v1197_v13 = vrot.slane %v6058_v16, 1  ;;  %v1198_v12 = vrot.slane %v6058_v16, 2  ;;  %v1199_v18 = vrot.slane %v6058_v16, 3  ;;  %v1200_v59 = vrot.slane %v6058_v16, 4 }
 0x240   : > { %v1201_v57 = vrot.slane %v6058_v16, 5  ;;  %v1202_v46 = vrot.slane %v6058_v16, 6  ;;  %v1203_v47 = vrot.slane %v6058_v16, 7  ;;  %v1212_v58 = vmul.f32 %v6058_v16, %v1186_v37 }
 0x241   : > { %v1213_v56 = vmul.f32 %v1197_v13, %v1187_v1  ;;  %v1214_v48 = vmul.f32 %v1198_v12, %v1188_v29  ;;  %v1215_v11 = vmul.f32 %v1199_v18, %v1189_v51  ;;  %v1216_v19 = vmul.f32 %v1200_v59, %v1190_v15 }
 0x242   : > { %v1217_v0 = vmul.f32 %v1201_v57, %v1191_v55  ;;  %v1218_v41 = vmul.f32 %v1202_v46, %v1192_v43  ;;  %v1219_v5 = vmul.f32 %v1203_v47, %v1193_v6  ;;  %v1220_v35 = vmul.f32 %v7813_v62, %v1212_v58 }
 0x243   : > { %v1221_v33 = vmul.f32 %v7813_v62, %v1213_v56  ;;  %v1222_v16 = vmul.f32 %v7813_v62, %v1214_v48  ;;  %v1223_v37 = vmul.f32 %v7813_v62, %v1215_v11  ;;  %v1224_v1 = vmul.f32 %v7813_v62, %v1216_v19 }
 0x244   : > { %v1225_v15 = vmul.f32 %v7813_v62, %v1217_v0  ;;  %v1226_v55 = vmul.f32 %v7813_v62, %v1218_v41  ;;  %v1227_v6 = vmul.f32 %v7813_v62, %v1219_v5  ;;  %v1228_v51 = vadd.f32 %v7818_v10, %v1220_v35 }
 0x245   : > { %v1229_v43 = vadd.f32 %v7818_v10, %v1221_v33  ;;  %v1230_v29 = vadd.f32 %v7818_v10, %v1222_v16  ;;  %v1231_v13 = vadd.f32 %v7818_v10, %v1223_v37  ;;  %v1232_v12 = vadd.f32 %v7818_v10, %v1224_v1 }
 0x246   : > { %v1233_v18 = vadd.f32 %v7818_v10, %v1225_v15  ;;  %v1234_v59 = vadd.f32 %v7818_v10, %v1226_v55  ;;  %v1235_v57 = vadd.f32 %v7818_v10, %v1227_v6  ;;  %1236 = vst [vmem:[%s7005_s26] sm:$0x1] %v1228_v51 }
 0x247   : > { %1237 = vst [vmem:[%s7005_s26 + $0x8] sm:$0x1] %v1229_v43  ;;  %1238 = vst [vmem:[%s7005_s26 + $0x10] sm:$0x1] %v1230_v29 }
 0x248   : > { %1239 = vst [vmem:[%s7005_s26 + $0x18] sm:$0x1] %v1231_v13  ;;  %1240 = vst [vmem:[%s7005_s26 + $0x20] sm:$0x1] %v1232_v12 }
 0x249   : > { %1241 = vst [vmem:[%s7005_s26 + $0x28] sm:$0x1] %v1233_v18  ;;  %1242 = vst [vmem:[%s7005_s26 + $0x30] sm:$0x1] %v1234_v59 }
 0x24a   : > { %1243 = vst [vmem:[%s7005_s26 + $0x38] sm:$0x1] %v1235_v57 }
 0x25d   : > { %v1374_v33 = vpop.f32.mrf.mxu0 }
 0x25e   : > { %v1454_v35 = vrot.slane %v1374_v33, 7  ;;  %v1458_v46 = vrot.slane %v1374_v33, 1  ;;  %v1462_v47 = vrot.slane %v1374_v33, 2  ;;  %v1466_v58 = vrot.slane %v1374_v33, 3  ;;  %v1445_v55 = vpop.f32.mrf.mxu1 }
 0x25f   : > { %v1470_v56 = vrot.slane %v1374_v33, 4  ;;  %v1474_v48 = vrot.slane %v1374_v33, 5  ;;  %v1478_v11 = vrot.slane %v1374_v33, 6  ;;  %v1518_v19 = vadd.f32 %v1374_v33, %v7361_v27 }
 0x260   : > { %v1514_v0 = vadd.f32 %v1454_v35, %v7346_v7  ;;  %v1522_v41 = vadd.f32 %v1458_v46, %v7372_v63  ;;  %v1526_v5 = vadd.f32 %v1462_v47, %v7383_v20  ;;  %v1530_v16 = vadd.f32 %v1466_v58, %v7388_v22  ;;  %v1376_v46 = vpop.f32.mrf.mxu0 }
 0x261   : > { %v1534_v37 = vadd.f32 %v1470_v56, %v7390_v23  ;;  %v1538_v1 = vadd.f32 %v1474_v48, %v7392_v24  ;;  %v1547_v15 = vmul.f32 0.5, %v1518_v19  ;;  %v1542_v6 = vadd.f32 %v1478_v11, %v7394_v25 }
 0x262   : > { %v1546_v51 = vmul.f32 0.5, %v1514_v0  ;;  %v1548_v43 = vmul.f32 0.5, %v1522_v41  ;;  %v1549_v29 = vmul.f32 0.5, %v1526_v5  ;;  %v1550_v13 = vmul.f32 0.5, %v1530_v16 }
 0x263   : > { %6059 = vtanh.f32 %v1547_v15  ;;  %v1551_v12 = vmul.f32 0.5, %v1534_v37  ;;  %v1456_v18 = vrot.slane %v1445_v55, 7  ;;  %v1552_v59 = vmul.f32 0.5, %v1538_v1 }
 0x264   : > { %6061 = vtanh.f32 %v1546_v51  ;;  %v1460_v57 = vrot.slane %v1445_v55, 1  ;;  %v1553_v33 = vmul.f32 0.5, %v1542_v6  ;;  %v1464_v35 = vrot.slane %v1445_v55, 2 }
 0x265   : > { %6063 = vtanh.f32 %v1548_v43  ;;  %v1468_v47 = vrot.slane %v1445_v55, 3  ;;  %v1516_v58 = vadd.f32 %v1456_v18, %v7349_v9  ;;  %v1472_v48 = vrot.slane %v1445_v55, 4 }
 0x266   : > { %6065 = vtanh.f32 %v1549_v29  ;;  %v1476_v11 = vrot.slane %v1445_v55, 5  ;;  %v1520_v19 = vadd.f32 %v1445_v55, %v7364_v36  ;;  %v1524_v0 = vadd.f32 %v1460_v57, %v7375_v8 }
 0x267   : > { %6067 = vtanh.f32 %v1550_v13  ;;  %v1455_v41 = vrot.slane %v1376_v46, 7  ;;  %v1459_v5 = vrot.slane %v1376_v46, 1  ;;  %v1480_v16 = vrot.slane %v1445_v55, 6 }
 0x268   : > { %6069 = vtanh.f32 %v1551_v12  ;;  %v1528_v37 = vadd.f32 %v1464_v35, %v7386_v21  ;;  %v1463_v1 = vrot.slane %v1376_v46, 2  ;;  %v1532_v15 = vadd.f32 %v1468_v47, %v7412_v30 }
 0x269   : > { %6071 = vtanh.f32 %v1552_v59  ;;  %v1467_v6 = vrot.slane %v1376_v46, 3  ;;  %v1515_v51 = vadd.f32 %v1455_v41, %v7356_v14  ;;  %v1536_v43 = vadd.f32 %v1472_v48, %v7420_v32  ;;  %v7869_v41 = vpop.f32.mrf.mxu1 }
 0x26a   : > { %6073 = vtanh.f32 %v1553_v33  ;;  %v1471_v29 = vrot.slane %v1376_v46, 4  ;;  %v1519_v13 = vadd.f32 %v1376_v46, %v7367_v45  ;;  %v1540_v12 = vadd.f32 %v1476_v11, %v7428_v40 }
 0x26b   : > { %6075 = vtanh.f32 %v1516_v58  ;;  %v1475_v18 = vrot.slane %v1376_v46, 5  ;;  %v1523_v55 = vadd.f32 %v1459_v5, %v7378_v17  ;;  %v1544_v59 = vadd.f32 %v1480_v16, %v7431_v44  ;;  %v10255_v17 = vld [vmem:[#allocation42_spill] sm:$0xff] }
 0x26c   : > { %6077 = vtanh.f32 %v1520_v19  ;;  %v1479_v57 = vrot.slane %v1376_v46, 6  ;;  %v1527_v33 = vadd.f32 %v1463_v1, %v7405_v50  ;;  %v1531_v47 = vadd.f32 %v1467_v6, %v7416_v31  ;;  %v10250_v46 = vld [vmem:[#allocation40_spill] sm:$0xff]  ;;  %v10251_v6 = vld [vmem:[#allocation41_spill] sm:$0xff] }
 0x26d   : > { %6079 = vtanh.f32 %v1524_v0  ;;  %v1578_v58 = vmul.f32 0.5, %v1515_v51  ;;  %v1535_v11 = vadd.f32 %v1471_v29, %v7424_v42  ;;  %v1579_v19 = vmul.f32 0.5, %v1519_v13 }
 0x26e   : > { %6081 = vtanh.f32 %v1528_v37  ;;  %v1539_v16 = vadd.f32 %v1475_v18, %v10250_v46  ;;  %v1580_v37 = vmul.f32 0.5, %v1523_v55  ;;  %v1543_v51 = vadd.f32 %v1479_v57, %v10251_v6  ;;  %v10253_v46 = vld [vmem:[#allocation22_spill] sm:$0xff] }
 0x26f   : > { %6083 = vtanh.f32 %v1532_v15  ;;  %v1581_v35 = vmul.f32 0.5, %v1527_v33  ;;  %v1582_v13 = vmul.f32 0.5, %v1531_v47  ;;  %v1457_v56 = vrot.slane %v7869_v41, 7 }
 0x270   : > { %v6060_v48 = vpop.eup %6059  ;;  %6085 = vtanh.f32 %v1536_v43  ;;  %v1583_v42 = vmul.f32 0.5, %v1535_v11  ;;  %v1461_v55 = vrot.slane %v7869_v41, 1  ;;  %v1584_v57 = vmul.f32 0.5, %v1539_v16 }
 0x271   : > { %v6062_v5 = vpop.eup %6061  ;;  %6087 = vtanh.f32 %v1540_v12  ;;  %v1563_v1 = vmul.f32 0.5, %v6060_v48  ;;  %v1465_v33 = vrot.slane %v7869_v41, 2  ;;  %v1585_v47 = vmul.f32 0.5, %v1543_v51  ;;  %v10254_v51 = vld [vmem:[#allocation26_spill] sm:$0xff] }
 0x272   : > { %v6064_v15 = vpop.eup %6063  ;;  %6089 = vtanh.f32 %v1544_v59  ;;  %v1469_v0 = vrot.slane %v7869_v41, 3  ;;  %v1473_v11 = vrot.slane %v7869_v41, 4  ;;  %v1521_v48 = vadd.f32 %v7869_v41, %v10253_v46 }
 0x273   : > { %v6066_v29 = vpop.eup %6065  ;;  %6091 = vtanh.f32 %v1578_v58  ;;  %v1477_v31 = vrot.slane %v7869_v41, 5  ;;  %v1564_v58 = vmul.f32 0.5, %v6064_v15  ;;  %v1571_v44 = vadd.f32 0.5, %v1563_v1  ;;  %v10258_v15 = vld [vmem:[#allocation45_spill] sm:$0xff] }
 0x274   : > { %v6068_v12 = vpop.eup %6067  ;;  %6093 = vtanh.f32 %v1579_v19  ;;  %v10252_v19 = vld [vmem:[#allocation18_spill] sm:$0xff]  ;;  %v1565_v45 = vmul.f32 0.5, %v6066_v29  ;;  %v1619_v21 = vmul.f32 0.5, %v1521_v48 }
 0x275   : > { %v6070_v59 = vpop.eup %6069  ;;  %6095 = vtanh.f32 %v1580_v37  ;;  %v1517_v18 = vadd.f32 %v1457_v56, %v10252_v19  ;;  %v1562_v37 = vmul.f32 0.5, %v6062_v5  ;;  %v1566_v32 = vmul.f32 0.5, %v6068_v12  ;;  %v10256_v56 = vld [vmem:[#allocation43_spill] sm:$0xff]  ;;  %v10257_v5 = vld [vmem:[#allocation44_spill] sm:$0xff]  ;;  %v10259_v48 = vld [vmem:[#allocation46_spill] sm:$0xff] }
 0x276   : > { %v6072_v43 = vpop.eup %6071  ;;  %6097 = vtanh.f32 %v1581_v35  ;;  %v1525_v35 = vadd.f32 %v1461_v55, %v10254_v51  ;;  %v1533_v19 = vadd.f32 %v1469_v0, %v10256_v56  ;;  %v1567_v14 = vmul.f32 0.5, %v6070_v59 }
 0x277   : > { %v6074_v6 = vpop.eup %6073  ;;  %6099 = vtanh.f32 %v1582_v13  ;;  %v1529_v13 = vadd.f32 %v1465_v33, %v10255_v17  ;;  %v1618_v30 = vmul.f32 0.5, %v1517_v18  ;;  %v1568_v55 = vmul.f32 0.5, %v6072_v43 }
 0x278   : > { %v6076_v16 = vpop.eup %6075  ;;  %6101 = vtanh.f32 %v1583_v42  ;;  %v1537_v42 = vadd.f32 %v1473_v11, %v10257_v5  ;;  %v1570_v51 = vadd.f32 0.5, %v1562_v37  ;;  %v1541_v1 = vadd.f32 %v1477_v31, %v10258_v15 }
 0x279   : > { %v6078_v50 = vpop.eup %6077  ;;  %6103 = vtanh.f32 %v1584_v57  ;;  %v1620_v57 = vmul.f32 0.5, %v1525_v35  ;;  %v1569_v33 = vmul.f32 0.5, %v6074_v6  ;;  %v1572_v17 = vadd.f32 0.5, %v1564_v58 }
 0x27a   : > { %v6080_v40 = vpop.eup %6079  ;;  %6105 = vtanh.f32 %v1585_v47  ;;  %v1621_v29 = vmul.f32 0.5, %v1529_v13  ;;  %v1481_v12 = vrot.slane %v7869_v41, 6  ;;  %v1573_v0 = vadd.f32 0.5, %v1565_v45 }
 0x27b   : > { %v6082_v46 = vpop.eup %6081  ;;  %v1574_v59 = vadd.f32 0.5, %v1566_v32  ;;  %v1622_v56 = vmul.f32 0.5, %v1533_v19  ;;  %6107 = vtanh.f32 %v1618_v30  ;;  %v1575_v11 = vadd.f32 0.5, %v1567_v14 }
 0x27c   : > { %v6084_v8 = vpop.eup %6083  ;;  %v1623_v43 = vmul.f32 0.5, %v1537_v42  ;;  %6109 = vtanh.f32 %v1619_v21  ;;  %v1545_v31 = vadd.f32 %v1481_v12, %v10259_v48  ;;  %v1576_v35 = vadd.f32 0.5, %v1568_v55 }
 0x27d   : > { %v6086_v36 = vpop.eup %6085  ;;  %v1682_v6 = vmul.f32 %v6076_v16, %v1570_v51  ;;  %v1624_v58 = vmul.f32 0.5, %v1541_v1  ;;  %6111 = vtanh.f32 %v1620_v57  ;;  %v1577_v41 = vadd.f32 0.5, %v1569_v33 }
 0x27e   : > { %v7893_v47 = vpop.eup %6087  ;;  %6113 = vtanh.f32 %v1621_v29  ;;  %v1625_v45 = vmul.f32 0.5, %v1545_v31  ;;  %v1683_v30 = vmul.f32 %v6078_v50, %v1571_v44  ;;  %v1684_v15 = vmul.f32 %v6080_v40, %v1572_v17 }
 0x27f   : > { %v7895_v18 = vpop.eup %6089  ;;  %6115 = vtanh.f32 %v1622_v56  ;;  %v1685_v9 = vmul.f32 %v6082_v46, %v1573_v0  ;;  %v1686_v51 = vmul.f32 %v6084_v8, %v1574_v59  ;;  %v10260_v29 = vrot.slane %v7504_v61, 7 }
 0x280   : > { %v6092_v37 = vpop.eup %6091  ;;  %6117 = vtanh.f32 %v1623_v43  ;;  %v10261_v44 = vrot.slane %v7508_v34, 7  ;;  %v1687_v46 = vmul.f32 %v6086_v36, %v1575_v11  ;;  %v10262_v8 = vrot.slane %v7512_v2, 7 }
 0x281   : > { %v6094_v13 = vpop.eup %6093  ;;  %v1594_v5 = vmul.f32 0.5, %v6092_v37  ;;  %6119 = vtanh.f32 %v1624_v58  ;;  %v10263_v61 = vrot.slane %v7517_v26, 7  ;;  %v10264_v34 = vrot.slane %v7522_v54, 7 }
 0x282   : > { %v6096_v32 = vpop.eup %6095  ;;  %v1595_v19 = vmul.f32 0.5, %v6094_v13  ;;  %6121 = vtanh.f32 %v1625_v45  ;;  %v10265_v2 = vrot.slane %v7526_v38, 7 }
 0x283   : > { %v6098_v14 = vpop.eup %6097  ;;  %v1596_v42 = vmul.f32 0.5, %v6096_v32  ;;  %v1602_v21 = vadd.f32 0.5, %v1594_v5 }
 0x284   : > { %v6100_v12 = vpop.eup %6099  ;;  %v1597_v55 = vmul.f32 0.5, %v6098_v14  ;;  %v1603_v16 = vadd.f32 0.5, %v1595_v19 }
 0x285   : > { %v6102_v1 = vpop.eup %6101  ;;  %v1598_v57 = vmul.f32 0.5, %v6100_v12  ;;  %v1604_v33 = vadd.f32 0.5, %v1596_v42  ;;  %v1674_v31 = vmul.f32 %v10260_v29, %v1602_v21  ;;  %v1688_v12 = vmul.f32 %v7893_v47, %v1576_v35 }
 0x286   : > { %v6104_v50 = vpop.eup %6103  ;;  %v1599_v17 = vmul.f32 0.5, %v6102_v1  ;;  %v1605_v40 = vadd.f32 0.5, %v1597_v55  ;;  %v1675_v56 = vmul.f32 %v10261_v44, %v1603_v16  ;;  %v1689_v16 = vmul.f32 %v7895_v18, %v1577_v41 }
 0x287   : > { %v6106_v5 = vpop.eup %6105  ;;  %v1600_v0 = vmul.f32 0.5, %v6104_v50  ;;  %v1606_v43 = vadd.f32 0.5, %v1598_v57  ;;  %v1676_v59 = vmul.f32 %v10262_v8, %v1604_v33  ;;  %v7904_v37 = vadd.f32 %v1682_v6, %v1674_v31 }
 0x288   : > { %v1601_v58 = vmul.f32 0.5, %v6106_v5  ;;  %v1607_v13 = vadd.f32 0.5, %v1599_v17  ;;  %v1677_v45 = vmul.f32 %v10263_v61, %v1605_v40  ;;  %v7908_v32 = vadd.f32 %v1683_v30, %v1675_v56  ;;  %v6108_v26 = vpop.eup %6107 }
 0x289   : > { %v1608_v19 = vadd.f32 0.5, %v1600_v0  ;;  %v1678_v14 = vmul.f32 %v10264_v34, %v1606_v43  ;;  %v7912_v36 = vadd.f32 %v1684_v15, %v1676_v59  ;;  %6123 = vtanh.f32 %v7904_v37  ;;  %v6110_v15 = vpop.eup %6109 }
 0x28a   : > { %v1609_v11 = vadd.f32 0.5, %v1601_v58  ;;  %v1679_v6 = vmul.f32 %v10265_v2, %v1607_v13  ;;  %v7917_v42 = vadd.f32 %v1685_v9, %v1677_v45  ;;  %6125 = vtanh.f32 %v7908_v32  ;;  %v6112_v1 = vpop.eup %6111 }
 0x28b   : > { %v10266_v30 = vrot.slane %v7532_v49, 7  ;;  %v7923_v54 = vadd.f32 %v1686_v51, %v1678_v14  ;;  %6127 = vtanh.f32 %v7912_v36  ;;  %v10267_v9 = vrot.slane %v7535_v28, 7  ;;  %v6114_v49 = vpop.eup %6113 }
 0x28c   : > { %v7926_v55 = vadd.f32 %v1687_v46, %v1679_v6  ;;  %6129 = vtanh.f32 %v7917_v42  ;;  %v6116_v35 = vpop.eup %6115  ;;  %v1634_v33 = vmul.f32 0.5, %v6108_v26  ;;  %v1635_v18 = vmul.f32 0.5, %v6110_v15 }
 0x28d   : > { %v1680_v21 = vmul.f32 %v10266_v30, %v1608_v19  ;;  %v1681_v38 = vmul.f32 %v10267_v9, %v1609_v11  ;;  %6131 = vtanh.f32 %v7923_v54  ;;  %v6118_v51 = vpop.eup %6117  ;;  %v1636_v41 = vmul.f32 0.5, %v6112_v1 }
 0x28e   : > { %6133 = vtanh.f32 %v7926_v55  ;;  %v6120_v28 = vpop.eup %6119  ;;  %v1637_v31 = vmul.f32 0.5, %v6114_v49  ;;  %v1638_v50 = vmul.f32 0.5, %v6116_v35  ;;  %v1639_v17 = vmul.f32 0.5, %v6118_v51 }
 0x28f   : > { %v7932_v57 = vadd.f32 %v1688_v12, %v1680_v21  ;;  %v7936_v47 = vadd.f32 %v1689_v16, %v1681_v38  ;;  %v6122_v29 = vpop.eup %6121  ;;  %v1642_v40 = vadd.f32 0.5, %v1634_v33  ;;  %v1640_v56 = vmul.f32 0.5, %v6120_v28 }
 0x290   : > { %v1641_v44 = vmul.f32 0.5, %v6122_v29  ;;  %v1643_v5 = vadd.f32 0.5, %v1635_v18  ;;  %v1644_v43 = vadd.f32 0.5, %v1636_v41  ;;  %v1645_v58 = vadd.f32 0.5, %v1637_v31 }
 0x291   : > { %6135 = vtanh.f32 %v7932_v57  ;;  %v1646_v13 = vadd.f32 0.5, %v1638_v50  ;;  %v1647_v61 = vadd.f32 0.5, %v1639_v17  ;;  %v1648_v14 = vadd.f32 0.5, %v1640_v56 }
 0x292   : > { %6137 = vtanh.f32 %v7936_v47  ;;  %v1649_v34 = vadd.f32 0.5, %v1641_v44 }
 0x296   : > { %v6124_v46 = vpop.eup %6123 }
 0x297   : > { %v6126_v0 = vpop.eup %6125  ;;  %v7940_v8 = vmul.f32 %v6124_v46, %v1642_v40 }
 0x298   : > { %v6128_v59 = vpop.eup %6127  ;;  %v7942_v45 = vmul.f32 %v6126_v0, %v1643_v5 }
 0x299   : > { %v6130_v19 = vpop.eup %6129  ;;  %v7944_v11 = vmul.f32 %v6128_v59, %v1644_v43  ;;  %v1932_v2 = vrot.slane %v7940_v8, 1  ;;  %v1747_v21 = vmul.f32 %v7940_v8, %v7940_v8 }
 0x29a   : > { %v6132_v6 = vpop.eup %6131  ;;  %v7947_v26 = vmul.f32 %v6130_v19, %v1645_v58  ;;  %v1722_v30 = vrot.slane %v7942_v45, 7  ;;  %v1748_v12 = vmul.f32 %v7942_v45, %v7942_v45 }
 0x29b   : > { %v6134_v15 = vpop.eup %6133  ;;  %v7954_v9 = vmul.f32 %v6132_v6, %v1646_v13  ;;  %v1933_v38 = vsel %vm1109_vm1, %v7942_v45, %v1932_v2  ;;  %v1934_v16 = vrot.slane %v7944_v11, 7  ;;  %v1724_v1 = vrot.slane %v7944_v11, 6 }
 0x29c   : > { %v7960_v35 = vmul.f32 %v6134_v15, %v1647_v61  ;;  %v1936_v51 = vrot.slane %v7947_v26, 6  ;;  %v1723_v28 = vsel %vm1112_vm2, %v1722_v30, %v7940_v8  ;;  %v1726_v33 = vrot.slane %v7947_v26, 5 }
 0x29d   : > { %v1935_v41 = vsel %vm1112_vm2, %v1934_v16, %v1933_v38  ;;  %v1938_v31 = vrot.slane %v7954_v9, 5  ;;  %v1725_v50 = vsel %vm1115_vm3, %v1724_v1, %v1723_v28  ;;  %v1728_v0 = vrot.slane %v7954_v9, 4 }
 0x29e   : > { %v6136_v49 = vpop.eup %6135  ;;  %v1937_v40 = vsel %vm1115_vm3, %v1936_v51, %v1935_v41  ;;  %v1940_v44 = vrot.slane %v7960_v35, 4  ;;  %v1727_v56 = vsel %vm1118_vm4, %v1726_v33, %v1725_v50  ;;  %v1730_v43 = vrot.slane %v7960_v35, 3 }
 0x29f   : > { %v6138_v29 = vpop.eup %6137  ;;  %v7966_v18 = vmul.f32 %v6136_v49, %v1648_v14  ;;  %v1939_v46 = vsel %vm1118_vm4, %v1938_v31, %v1937_v40  ;;  %v1749_v2 = vmul.f32 %v7944_v11, %v7944_v11  ;;  %v1750_v1 = vmul.f32 %v7947_v26, %v7947_v26 }
 0x2a0   : > { %v7971_v17 = vmul.f32 %v6138_v29, %v1649_v34  ;;  %v1941_v13 = vsel %vm1121_vm5, %v1940_v44, %v1939_v46  ;;  %v1729_v34 = vsel %vm1121_vm5, %v1728_v0, %v1727_v56  ;;  %v1751_v49 = vmul.f32 %v7954_v9, %v7954_v9  ;;  %v10268_v56 = vld [vmem:[#allocation47_spill] sm:$0xff]  ;;  %v10269_v46 = vld [vmem:[#allocation48_spill] sm:$0xff]  ;;  %v10271_v0 = vld [vmem:[#allocation50_spill] sm:$0xff] }
 0x2a1   : > { %v1942_v5 = vrot.slane %v7966_v18, 3  ;;  %v1732_v14 = vrot.slane %v7966_v18, 2  ;;  %v1731_v38 = vsel %vm1124_vm6, %v1730_v43, %v1729_v34  ;;  %v1763_v51 = vrot.slane %v1748_v12, 7  ;;  %v10273_v43 = vld [vmem:[#allocation52_spill] sm:$0xff]  ;;  %v10278_v34 = vld [vmem:[#allocation57_spill] sm:$0xff] }
 0x2a2   : > { %v1734_v59 = vrot.slane %v7971_v17, 1  ;;  %v1754_v58 = vmul.f32 %v7971_v17, %v7971_v17  ;;  %v1944_v61 = vrot.slane %v7971_v17, 2  ;;  %v1752_v33 = vmul.f32 %v7960_v35, %v7960_v35 }
 0x2a3   : > { %v1943_v19 = vsel %vm1124_vm6, %v1942_v5, %v1941_v13  ;;  %v1733_v16 = vsel %vm1127_vm7, %v1732_v14, %v1731_v38  ;;  %v1753_v29 = vmul.f32 %v7966_v18, %v7966_v18  ;;  %v1764_v41 = vsel %vm1112_vm2, %v1763_v51, %v1747_v21  ;;  %v10270_v5 = vld [vmem:[#allocation49_spill] sm:$0xff]  ;;  %v10275_v13 = vld [vmem:[#allocation54_spill] sm:$0xff]  ;;  %v10284_v38 = vld [vmem:[#allocation63_spill] sm:$0xff] }
 0x2a4   : > { %v1742_v6 = vsel %vm1741_vm8, %v1734_v59, 0.0  ;;  %v1775_v30 = vrot.slane %v1754_v58, 1  ;;  %v1945_v15 = vsel %vm1127_vm7, %v1944_v61, %v1943_v19  ;;  %v1765_v31 = vrot.slane %v1749_v2, 6  ;;  %v10274_v59 = vld [vmem:[#allocation53_spill] sm:$0xff]  ;;  %v10276_v61 = vld [vmem:[#allocation55_spill] sm:$0xff]  ;;  %v10277_v19 = vld [vmem:[#allocation56_spill] sm:$0xff] }
 0x2a5   : > { %1743 = vadd.xlane.f32.xlu1 %v1742_v6  ;;  %2012 = vmatmul.mubr.f32.vlgmr.msra.gmra.mxu0 %v1945_v15  ;;  %v1767_v50 = vrot.slane %v1750_v1, 5  ;;  %v1738_v12 = vsel %vm1737_vm9, %v1733_v16, 0.0  ;;  %v1769_v44 = vrot.slane %v1751_v49, 4  ;;  %v1771_v21 = vrot.slane %v1752_v33, 3  ;;  %v10279_v14 = vld [vmem:[#allocation58_spill] sm:$0xff]  ;;  %v10280_v2 = vld [vmem:[#allocation59_spill] sm:$0xff] }
 0x2a6   : > { %v1781_v28 = vsel %vm1741_vm8, %v1775_v30, 0.0  ;;  %2083 = vmatmul.mubr.f32.vlgmr.msra.gmra.mxu1 %v1945_v15  ;;  %2587 = vmatpush1.msra.mxu0 %v7602_v60  ;;  %v1766_v40 = vsel %vm1115_vm3, %v1765_v31, %v1764_v41  ;;  %v10281_v6 = vld [vmem:[#allocation60_spill] sm:$0xff]  ;;  %v10282_v30 = vld [vmem:[#allocation61_spill] sm:$0xff]  ;;  %v10283_v15 = vld [vmem:[#allocation62_spill] sm:$0xff]  ;;  %vm4297_vm8 = vcmask 1044480  }
 0x2a7   : > { %1782 = vadd.xlane.f32.xlu0 %v1781_v28  ;;  %2658 = vmatpush1.msra.mxu1 %v7604_v4  ;;  %v1768_v60 = vsel %vm1118_vm4, %v1767_v50, %v1766_v40  ;;  %v10285_v16 = vld [vmem:[#allocation64_spill] sm:$0xff]  ;;  %v10286_v1 = vld [vmem:[#allocation65_spill] sm:$0xff]  ;;  %v10287_v49 = vld [vmem:[#allocation66_spill] sm:$0xff] }
 0x2a8   : > { %2588 = vmatprep.subr.mxu0 %v7608_v3  ;;  %2659 = vmatprep.subr.mxu1 %v7610_v53  ;;  %v1770_v4 = vsel %vm1121_vm5, %v1769_v44, %v1768_v60  ;;  %v1773_v3 = vrot.slane %v1753_v29, 2  ;;  %v10288_v51 = vld [vmem:[#allocation67_spill] sm:$0xff]  ;;  %v10289_v28 = vld [vmem:[#allocation68_spill] sm:$0xff]  ;;  %v10290_v33 = vld [vmem:[#allocation69_spill] sm:$0xff] }
 0x2a9   : > { %2589 = vmatpush1.msra.mxu0 %v7614_v52  ;;  %2660 = vmatpush1.msra.mxu1 %v7616_v39  ;;  %v1772_v53 = vsel %vm1124_vm6, %v1771_v21, %v1770_v4  ;;  %v10272_v52 = vld [vmem:[#allocation51_spill] sm:$0xff]  ;;  %v10291_v29 = vld [vmem:[#allocation70_spill] sm:$0xff]  ;;  %v10293_v31 = vld [vmem:[#allocation72_spill] sm:$0xff] }
 0x2aa   : > { %2590 = vmatprep.subr.mxu0 %v10268_v56  ;;  %2661 = vmatprep.subr.mxu1 %v10269_v46  ;;  %v1774_v39 = vsel %vm1127_vm7, %v1773_v3, %v1772_v53  ;;  %v10292_v41 = vld [vmem:[#allocation71_spill] sm:$0xff]  ;;  %v10294_v50 = vld [vmem:[#allocation73_spill] sm:$0xff]  ;;  %v10297_v44 = vld [vmem:[#allocation76_spill] sm:$0xff] }
 0x2ab   : > { %1739 = vadd.xlane.f32.xlu0 %v1738_v12  ;;  %2591 = vmatpush1.msra.mxu0 %v10270_v5  ;;  %v1778_v58 = vsel %vm1737_vm9, %v1774_v39, 0.0  ;;  %v10295_v12 = vld [vmem:[#allocation74_spill] sm:$0xff]  ;;  %v10296_v40 = vld [vmem:[#allocation75_spill] sm:$0xff]  ;;  %v10298_v60 = vld [vmem:[#allocation77_spill] sm:$0xff]  ;;  %vm4932_vm9 = vcmask 1047558  }
 0x2ac   : > { %2662 = vmatpush1.msra.mxu1 %v10271_v0  ;;  %2592 = vmatprep.subr.mxu0 %v10272_v52  ;;  %v10299_v21 = vld [vmem:[#allocation78_spill] sm:$0xff]  ;;  %v10300_v56 = vld [vmem:[#allocation79_spill] sm:$0xff]  ;;  %v10301_v46 = vld [vmem:[#allocation80_spill] sm:$0xff] }
 0x2ad   : > { %2663 = vmatprep.subr.mxu1 %v10273_v43  ;;  %2593 = vmatpush1.msra.mxu0 %v10274_v59  ;;  %v10302_v4 = vld [vmem:[#allocation81_spill] sm:$0xff]  ;;  %v10303_v3 = vld [vmem:[#allocation82_spill] sm:$0xff]  ;;  %v10304_v5 = vld [vmem:[#allocation83_spill] sm:$0xff] }
 0x2ae   : > { %2664 = vmatpush1.msra.mxu1 %v10275_v13  ;;  %2594 = vmatprep.subr.mxu0 %v10276_v61  ;;  %v10305_v53 = vld [vmem:[#allocation84_spill] sm:$0xff]  ;;  %v10306_v0 = vld [vmem:[#allocation85_spill] sm:$0xff]  ;;  %v10307_v52 = vld [vmem:[#allocation86_spill] sm:$0xff] }
 0x2af   : > { %1779 = vadd.xlane.f32.xlu1 %v1778_v58  ;;  %2665 = vmatprep.subr.mxu1 %v10277_v19  ;;  %v10308_v39 = vld [vmem:[#allocation87_spill] sm:$0xff]  ;;  %v10309_v43 = vld [vmem:[#allocation88_spill] sm:$0xff]  ;;  %v10310_v59 = vld [vmem:[#allocation89_spill] sm:$0xff] }
 0x2b0   : > { %2595 = vmatpush1.msra.mxu0 %v10278_v34  ;;  %2666 = vmatpush1.msra.mxu1 %v10279_v14  ;;  %v10311_v58 = vld [vmem:[#allocation90_spill] sm:$0xff]  ;;  %v10312_v13 = vld [vmem:[#allocation91_spill] sm:$0xff]  ;;  %v10313_v61 = vld [vmem:[#allocation92_spill] sm:$0xff] }
 0x2b1   : > { %2596 = vmatprep.subr.mxu0 %v10280_v2  ;;  %2667 = vmatprep.subr.mxu1 %v10281_v6  ;;  %v10314_v19 = vld [vmem:[#allocation93_spill] sm:$0xff]  ;;  %v10315_v34 = vld [vmem:[#allocation94_spill] sm:$0xff]  ;;  %v10316_v14 = vld [vmem:[#allocation95_spill] sm:$0xff] }
 0x2b2   : > { %2597 = vmatpush1.msra.mxu0 %v10282_v30  ;;  %2668 = vmatpush1.msra.mxu1 %v10283_v15  ;;  %v10317_v2 = vld [vmem:[#allocation96_spill] sm:$0xff]  ;;  %v10318_v6 = vld [vmem:[#allocation97_spill] sm:$0xff]  ;;  %v10319_v30 = vld [vmem:[#allocation98_spill] sm:$0xff] }
 0x2b3   : > { %2598 = vmatprep.subr.mxu0 %v10284_v38  ;;  %2669 = vmatprep.subr.mxu1 %v10285_v16  ;;  %v10320_v15 = vld [vmem:[#allocation99_spill] sm:$0xff]  ;;  %v10321_v38 = vld [vmem:[#allocation100_spill] sm:$0xff]  ;;  %v10322_v16 = vld [vmem:[#allocation101_spill] sm:$0xff] }
 0x2b4   : > { %2599 = vmatpush1.msra.mxu0 %v10286_v1  ;;  %2670 = vmatpush1.msra.mxu1 %v10287_v49  ;;  %v10323_v1 = vmov 0.0   ;;  %v10324_v49 = vld [vmem:[#allocation102_spill] sm:$0xff] }
 0x2b5   : > { %2600 = vmatprep.subr.mxu0 %v10288_v51  ;;  %2671 = vmatprep.subr.mxu1 %v10289_v28 }
 0x2b6   : > { %2601 = vmatpush1.msra.mxu0 %v10290_v33  ;;  %2672 = vmatpush1.msra.mxu1 %v10291_v29 }
 0x2b7   : > { %2602 = vmatprep.subr.mxu0 %v10292_v41  ;;  %2673 = vmatprep.subr.mxu1 %v10293_v31 }
 0x2b8   : > { %2603 = vmatpush1.msra.mxu0 %v10294_v50  ;;  %2674 = vmatpush1.msra.mxu1 %v10295_v12 }
 0x2b9   : > { %2604 = vmatprep.subr.mxu0 %v10296_v40  ;;  %2675 = vmatprep.subr.mxu1 %v10297_v44 }
 0x2ba   : > { %2605 = vmatpush1.msra.mxu0 %v10298_v60  ;;  %2676 = vmatpush1.msra.mxu1 %v10299_v21 }
 0x2bb   : > { %2606 = vmatprep.subr.mxu0 %v10300_v56  ;;  %2677 = vmatprep.subr.mxu1 %v10301_v46 }
 0x2bc   : > { %2607 = vmatpush1.msra.mxu0 %v10302_v4  ;;  %2678 = vmatpush1.msra.mxu1 %v10303_v3 }
 0x2bd   : > { %2608 = vmatprep.subr.mxu0 %v10304_v5  ;;  %2679 = vmatprep.subr.mxu1 %v10305_v53 }
 0x2be   : > { %2609 = vmatpush1.msra.mxu0 %v10306_v0  ;;  %2680 = vmatpush1.msra.mxu1 %v10307_v52 }
 0x2bf   : > { %2610 = vmatprep.subr.mxu0 %v10308_v39  ;;  %2681 = vmatprep.subr.mxu1 %v10309_v43 }
 0x2c0   : > { %2611 = vmatpush1.msra.mxu0 %v10310_v59  ;;  %2682 = vmatpush1.msra.mxu1 %v10311_v58 }
 0x2c1   : > { %2612 = vmatprep.subr.mxu0 %v10312_v13  ;;  %2683 = vmatprep.subr.mxu1 %v10313_v61 }
 0x2c2   : > { %2613 = vmatpush1.msra.mxu0 %v10314_v19  ;;  %2684 = vmatpush1.msra.mxu1 %v10315_v34 }
 0x2c3   : > { %2614 = vmatprep.subr.mxu0 %v10316_v14  ;;  %2685 = vmatprep.subr.mxu1 %v10317_v2 }
 0x2c4   : > { %2615 = vmatpush1.msra.mxu0 %v10318_v6  ;;  %2686 = vmatpush1.msra.mxu1 %v10319_v30 }
 0x2c5   : > { %2616 = vmatprep.subr.mxu0 %v10320_v15  ;;  %2687 = vmatprep.subr.mxu1 %v10321_v38 }
 0x2c6   : > { %2617 = vmatpush1.msra.mxu0 %v10322_v16  ;;  %2650 = vmatprep.mubr.f32.mxu0 %v10323_v1 }
 0x2c7   : > { %2688 = vmatpush1.msra.mxu1 %v10324_v49  ;;  %2721 = vmatprep.mubr.f32.mxu1 %v10323_v1 }
 0x32e   : > { %v1744_v51 = vpop.xlane.xlu1 %1743 }
 0x32f   : > { %v1746_v28 = vmul.f32 0.0078125, %v1744_v51 }
 0x330   : > { %v1783_v33 = vpop.xlane.xlu0 %1782 }
 0x331   : > { %v1787_v29 = vmul.f32 %v1746_v28, %v1746_v28  ;;  %v1785_v41 = vmul.f32 0.0078125, %v1783_v33  ;;  %v1798_v4 = vrot.slane %v1746_v28, 7 }
 0x333   : > { %v1789_v31 = vsub.f32 %v1785_v41, %v1787_v29  ;;  %v1814_v5 = vsub.f32 %v7971_v17, %v1798_v4 }
 0x334   : > { %v1740_v50 = vpop.xlane.xlu0 %1739 }
 0x335   : > { %v1816_v12 = vadd.f32 1e-05, %v1789_v31  ;;  %v1745_v40 = vmul.f32 0.0078125, %v1740_v50 }
 0x337   : > { %6139 = vrsqrt.f32 %v1816_v12  ;;  %v1786_v21 = vmul.f32 %v1745_v40, %v1745_v40  ;;  %v1792_v52 = vrot.slane %v1745_v40, 1  ;;  %v1793_v39 = vrot.slane %v1745_v40, 2 }
 0x338   : > { %v1780_v44 = vpop.xlane.xlu1 %1779  ;;  %v1794_v59 = vrot.slane %v1745_v40, 3  ;;  %v1795_v58 = vrot.slane %v1745_v40, 4  ;;  %v1796_v13 = vrot.slane %v1745_v40, 5  ;;  %v1797_v19 = vrot.slane %v1745_v40, 6 }
 0x339   : > { %v1784_v60 = vmul.f32 0.0078125, %v1780_v44  ;;  %v1807_v34 = vsub.f32 %v7940_v8, %v1745_v40  ;;  %v1808_v14 = vsub.f32 %v7942_v45, %v1792_v52  ;;  %v1809_v17 = vsub.f32 %v7944_v11, %v1793_v39 }
 0x33a   : > { %v1810_v6 = vsub.f32 %v7947_v26, %v1794_v59  ;;  %v1811_v30 = vsub.f32 %v7954_v9, %v1795_v58  ;;  %v1812_v15 = vsub.f32 %v7960_v35, %v1796_v13  ;;  %v1813_v28 = vsub.f32 %v7966_v18, %v1797_v19 }
 0x33b   : > { %v1788_v56 = vsub.f32 %v1784_v60, %v1786_v21 }
 0x33d   : > { %v1815_v46 = vadd.f32 1e-05, %v1788_v56 }
 0x33f   : > { %6141 = vrsqrt.f32 %v1815_v46 }
 0x344   : > { %v6140_v3 = vpop.eup %6139 }
 0x345   : > { %v1827_v53 = vrot.slane %v6140_v3, 7 }
 0x347   : > { %v1843_v0 = vmul.f32 %v1827_v53, %v1814_v5 }
 0x349   : > { %v1851_v43 = vmul.f32 %v7813_v62, %v1843_v0 }
 0x34b   : > { %v1859_v61 = vadd.f32 %v7818_v10, %v1851_v43 }
 0x34c   : > { %v6142_v2 = vpop.eup %6141 }
 0x34d   : > { %1867 = vst [vmem:[%s7005_s26 + $0x38] sm:$0x2] %v1859_v61  ;;  %v1821_v38 = vrot.slane %v6142_v2, 1  ;;  %v1822_v16 = vrot.slane %v6142_v2, 2  ;;  %v1823_v49 = vrot.slane %v6142_v2, 3  ;;  %v1824_v51 = vrot.slane %v6142_v2, 4 }
 0x34e   : > { %v1825_v33 = vrot.slane %v6142_v2, 5  ;;  %v1826_v8 = vrot.slane %v6142_v2, 6  ;;  %v1836_v29 = vmul.f32 %v6142_v2, %v1807_v34 }
 0x34f   : > { %v1837_v45 = vmul.f32 %v1821_v38, %v1808_v14  ;;  %v1838_v41 = vmul.f32 %v1822_v16, %v1809_v17  ;;  %v1839_v31 = vmul.f32 %v1823_v49, %v1810_v6  ;;  %v1840_v50 = vmul.f32 %v1824_v51, %v1811_v30 }
 0x350   : > { %v1841_v11 = vmul.f32 %v1825_v33, %v1812_v15  ;;  %v1842_v26 = vmul.f32 %v1826_v8, %v1813_v28  ;;  %v1844_v9 = vmul.f32 %v7813_v62, %v1836_v29 }
 0x351   : > { %v1845_v35 = vmul.f32 %v7813_v62, %v1837_v45  ;;  %v1846_v12 = vmul.f32 %v7813_v62, %v1838_v41  ;;  %v1847_v18 = vmul.f32 %v7813_v62, %v1839_v31  ;;  %v1848_v40 = vmul.f32 %v7813_v62, %v1840_v50 }
 0x352   : > { %v1849_v44 = vmul.f32 %v7813_v62, %v1841_v11  ;;  %v1850_v60 = vmul.f32 %v7813_v62, %v1842_v26  ;;  %v1852_v21 = vadd.f32 %v7818_v10, %v1844_v9  ;;  %v10325_v11 = vld [vmem:[#allocation16_spill] sm:$0xff] }
 0x353   : > { %v1853_v56 = vadd.f32 %v7818_v10, %v1845_v35  ;;  %v1854_v46 = vadd.f32 %v7818_v10, %v1846_v12  ;;  %v1855_v4 = vadd.f32 %v7818_v10, %v1847_v18  ;;  %v1856_v3 = vadd.f32 %v7818_v10, %v1848_v40  ;;  %v10326_v12 = vld [vmem:[#allocation20_spill] sm:$0xff] }
 0x354   : > { %v1857_v5 = vadd.f32 %v7818_v10, %v1849_v44  ;;  %v1858_v53 = vadd.f32 %v7818_v10, %v1850_v60  ;;  %1860 = vst [vmem:[%s7005_s26] sm:$0x2] %v1852_v21  ;;  %v10327_v40 = vld [vmem:[#allocation24_spill] sm:$0xff] }
 0x355   : > { %1861 = vst [vmem:[%s7005_s26 + $0x8] sm:$0x2] %v1853_v56  ;;  %1862 = vst [vmem:[%s7005_s26 + $0x10] sm:$0x2] %v1854_v46  ;;  %v10328_v46 = vld [vmem:[#allocation28_spill] sm:$0xff] }
 0x356   : > { %1863 = vst [vmem:[%s7005_s26 + $0x18] sm:$0x2] %v1855_v4  ;;  %1864 = vst [vmem:[%s7005_s26 + $0x20] sm:$0x2] %v1856_v3 }
 0x357   : > { %1865 = vst [vmem:[%s7005_s26 + $0x28] sm:$0x2] %v1857_v5  ;;  %1866 = vst [vmem:[%s7005_s26 + $0x30] sm:$0x2] %v1858_v53  ;;  %v10329_v5 = vld [vmem:[#allocation34_spill] sm:$0xff] }
 0x365   : > { %v2013_v62 = vpop.f32.mrf.mxu0 }
 0x366   : > { %v2093_v0 = vrot.slane %v2013_v62, 6  ;;  %v2097_v52 = vrot.slane %v2013_v62, 7  ;;  %v2101_v39 = vrot.slane %v2013_v62, 1  ;;  %v2105_v43 = vrot.slane %v2013_v62, 2  ;;  %v2084_v30 = vpop.f32.mrf.mxu1 }
 0x367   : > { %v2109_v59 = vrot.slane %v2013_v62, 3  ;;  %v2113_v58 = vrot.slane %v2013_v62, 4  ;;  %v2117_v13 = vrot.slane %v2013_v62, 5  ;;  %v2161_v61 = vadd.f32 %v2013_v62, %v7372_v63  ;;  %v2015_v31 = vpop.f32.mrf.mxu0 }
 0x368   : > { %v2153_v19 = vadd.f32 %v2093_v0, %v7346_v7  ;;  %v2157_v10 = vadd.f32 %v2097_v52, %v7361_v27  ;;  %v2165_v34 = vadd.f32 %v2101_v39, %v7383_v20  ;;  %v2169_v14 = vadd.f32 %v2105_v43, %v7388_v22  ;;  %v10330_v0 = vld [vmem:[#allocation17_spill] sm:$0xff]  ;;  %v10331_v39 = vld [vmem:[#allocation36_spill] sm:$0xff] }
 0x369   : > { %v2173_v2 = vadd.f32 %v2109_v59, %v7390_v23  ;;  %v2177_v17 = vadd.f32 %v2113_v58, %v7392_v24  ;;  %v2187_v6 = vmul.f32 0.5, %v2161_v61  ;;  %v2181_v15 = vadd.f32 %v2117_v13, %v7394_v25  ;;  %v10332_v58 = vld [vmem:[#allocation21_spill] sm:$0xff]  ;;  %v10333_v61 = vld [vmem:[#allocation38_spill] sm:$0xff] }
 0x36a   : > { %v2185_v38 = vmul.f32 0.5, %v2153_v19  ;;  %v2186_v16 = vmul.f32 0.5, %v2157_v10  ;;  %v2188_v49 = vmul.f32 0.5, %v2165_v34  ;;  %v2189_v51 = vmul.f32 0.5, %v2169_v14  ;;  %v10334_v34 = vld [vmem:[#allocation25_spill] sm:$0xff] }
 0x36b   : > { %6143 = vtanh.f32 %v2187_v6  ;;  %v2190_v28 = vmul.f32 0.5, %v2173_v2  ;;  %v2095_v33 = vrot.slane %v2084_v30, 6  ;;  %v2099_v8 = vrot.slane %v2084_v30, 7  ;;  %v10335_v2 = vld [vmem:[#allocation39_spill] sm:$0xff] }
 0x36c   : > { %6145 = vtanh.f32 %v2185_v38  ;;  %v2191_v29 = vmul.f32 0.5, %v2177_v17  ;;  %v2192_v45 = vmul.f32 0.5, %v2181_v15  ;;  %v2103_v41 = vrot.slane %v2084_v30, 1  ;;  %v10337_v38 = vld [vmem:[#allocation35_spill] sm:$0xff] }
 0x36d   : > { %6147 = vtanh.f32 %v2186_v16  ;;  %v2107_v50 = vrot.slane %v2084_v30, 2  ;;  %v2155_v26 = vadd.f32 %v2095_v33, %v10325_v11  ;;  %v2111_v9 = vrot.slane %v2084_v30, 3 }
 0x36e   : > { %6149 = vtanh.f32 %v2188_v49  ;;  %v2115_v35 = vrot.slane %v2084_v30, 4  ;;  %v2159_v18 = vadd.f32 %v2099_v8, %v10326_v12  ;;  %v2163_v44 = vadd.f32 %v2084_v30, %v10327_v40 }
 0x36f   : > { %6151 = vtanh.f32 %v2189_v51  ;;  %v2094_v60 = vrot.slane %v2015_v31, 6  ;;  %v2098_v21 = vrot.slane %v2015_v31, 7  ;;  %v2119_v56 = vrot.slane %v2084_v30, 5  ;;  %v10336_v30 = vld [vmem:[#allocation33_spill] sm:$0xff] }
 0x370   : > { %6153 = vtanh.f32 %v2190_v28  ;;  %v2167_v4 = vadd.f32 %v2103_v41, %v10328_v46  ;;  %v2102_v3 = vrot.slane %v2015_v31, 1  ;;  %v2171_v53 = vadd.f32 %v2107_v50, %v10329_v5  ;;  %v10338_v28 = vld [vmem:[#allocation37_spill] sm:$0xff]  ;;  %v10341_v50 = vld [vmem:[#allocation18_spill] sm:$0xff] }
 0x371   : > { %6155 = vtanh.f32 %v2191_v29  ;;  %v2106_v62 = vrot.slane %v2015_v31, 2  ;;  %v2154_v52 = vadd.f32 %v2094_v60, %v10330_v0  ;;  %v2175_v43 = vadd.f32 %v2111_v9, %v10331_v39 }
 0x372   : > { %6157 = vtanh.f32 %v2192_v45  ;;  %v2110_v59 = vrot.slane %v2015_v31, 3  ;;  %v2158_v13 = vadd.f32 %v2098_v21, %v10332_v58  ;;  %v2179_v19 = vadd.f32 %v2115_v35, %v10333_v61  ;;  %v8130_v45 = vpop.f32.mrf.mxu1  ;;  %v10343_v21 = vld [vmem:[#allocation26_spill] sm:$0xff] }
 0x373   : > { %6159 = vtanh.f32 %v2155_v26  ;;  %v2114_v10 = vrot.slane %v2015_v31, 4  ;;  %v2162_v14 = vadd.f32 %v2015_v31, %v10334_v34  ;;  %v2183_v17 = vadd.f32 %v2119_v56, %v10335_v2  ;;  %v10345_v2 = vld [vmem:[#allocation45_spill] sm:$0xff] }
 0x374   : > { %6161 = vtanh.f32 %v2159_v18  ;;  %v2118_v6 = vrot.slane %v2015_v31, 5  ;;  %v2166_v15 = vadd.f32 %v2102_v3, %v10336_v30  ;;  %v2170_v16 = vadd.f32 %v2106_v62, %v10337_v38  ;;  %v10339_v31 = vld [vmem:[#allocation40_spill] sm:$0xff]  ;;  %v10340_v18 = vld [vmem:[#allocation41_spill] sm:$0xff] }
 0x375   : > { %6163 = vtanh.f32 %v2163_v44  ;;  %v2217_v49 = vmul.f32 0.5, %v2154_v52  ;;  %v2174_v33 = vadd.f32 %v2110_v59, %v10338_v28  ;;  %v2218_v8 = vmul.f32 0.5, %v2158_v13 }
 0x376   : > { %6165 = vtanh.f32 %v2167_v4  ;;  %v2178_v26 = vadd.f32 %v2114_v10, %v10339_v31  ;;  %v2219_v9 = vmul.f32 0.5, %v2162_v14  ;;  %v2182_v44 = vadd.f32 %v2118_v6, %v10340_v18  ;;  %v10342_v14 = vld [vmem:[#allocation22_spill] sm:$0xff] }
 0x377   : > { %6167 = vtanh.f32 %v2171_v53  ;;  %v2220_v60 = vmul.f32 0.5, %v2166_v15  ;;  %v2221_v4 = vmul.f32 0.5, %v2170_v16  ;;  %v2096_v53 = vrot.slane %v8130_v45, 6 }
 0x378   : > { %v6144_v51 = vpop.eup %6143  ;;  %6169 = vtanh.f32 %v2175_v43  ;;  %v2222_v52 = vmul.f32 0.5, %v2174_v33  ;;  %v2100_v59 = vrot.slane %v8130_v45, 7  ;;  %v2224_v6 = vmul.f32 0.5, %v2182_v44 }
 0x379   : > { %v6146_v41 = vpop.eup %6145  ;;  %6171 = vtanh.f32 %v2179_v19  ;;  %v2223_v19 = vmul.f32 0.5, %v2178_v26  ;;  %v2104_v16 = vrot.slane %v8130_v45, 1  ;;  %v2156_v43 = vadd.f32 %v2096_v53, %v10341_v50 }
 0x37a   : > { %v6148_v35 = vpop.eup %6147  ;;  %6173 = vtanh.f32 %v2183_v17  ;;  %v2201_v33 = vmul.f32 0.5, %v6146_v41  ;;  %v2108_v26 = vrot.slane %v8130_v45, 2  ;;  %v2160_v10 = vadd.f32 %v2100_v59, %v10342_v14 }
 0x37b   : > { %v6150_v56 = vpop.eup %6149  ;;  %6175 = vtanh.f32 %v2217_v49  ;;  %v2120_v15 = vrot.slane %v8130_v45, 5  ;;  %v2257_v59 = vmul.f32 0.5, %v2156_v43 }
 0x37c   : > { %v6152_v62 = vpop.eup %6151  ;;  %6177 = vtanh.f32 %v2218_v8  ;;  %v2203_v8 = vmul.f32 0.5, %v6144_v51  ;;  %v2164_v51 = vadd.f32 %v8130_v45, %v10343_v21  ;;  %v2204_v53 = vmul.f32 0.5, %v6150_v56 }
 0x37d   : > { %v6154_v13 = vpop.eup %6153  ;;  %6179 = vtanh.f32 %v2219_v9  ;;  %v2116_v9 = vrot.slane %v8130_v45, 4  ;;  %v2205_v18 = vmul.f32 0.5, %v6152_v62  ;;  %v2209_v38 = vadd.f32 0.5, %v2201_v33 }
 0x37e   : > { %v6156_v17 = vpop.eup %6155  ;;  %6181 = vtanh.f32 %v2220_v60  ;;  %v2112_v60 = vrot.slane %v8130_v45, 3  ;;  %v2206_v31 = vmul.f32 0.5, %v6154_v13  ;;  %v2211_v28 = vadd.f32 0.5, %v2203_v8  ;;  %v10347_v8 = vld [vmem:[#allocation44_spill] sm:$0xff] }
 0x37f   : > { %v6158_v49 = vpop.eup %6157  ;;  %6183 = vtanh.f32 %v2221_v4  ;;  %v2202_v4 = vmul.f32 0.5, %v6148_v35  ;;  %v2258_v30 = vmul.f32 0.5, %v2160_v10  ;;  %v2180_v34 = vadd.f32 %v2116_v9, %v10345_v2  ;;  %v10346_v35 = vld [vmem:[#allocation43_spill] sm:$0xff] }
 0x380   : > { %v6160_v3 = vpop.eup %6159  ;;  %6185 = vtanh.f32 %v2222_v52  ;;  %v10344_v52 = vld [vmem:[#allocation42_spill] sm:$0xff]  ;;  %v2208_v45 = vmul.f32 0.5, %v6158_v49  ;;  %v2172_v56 = vadd.f32 %v2108_v26, %v10346_v35  ;;  %v2212_v13 = vadd.f32 0.5, %v2204_v53 }
 0x381   : > { %v6162_v44 = vpop.eup %6161  ;;  %6187 = vtanh.f32 %v2223_v19  ;;  %v2168_v29 = vadd.f32 %v2104_v16, %v10344_v52  ;;  %v2207_v19 = vmul.f32 0.5, %v6156_v17  ;;  %v2184_v16 = vadd.f32 %v2120_v15, %v10259_v48 }
 0x382   : > { %v6164_v41 = vpop.eup %6163  ;;  %6189 = vtanh.f32 %v2224_v6  ;;  %v2259_v6 = vmul.f32 0.5, %v2164_v51  ;;  %v2210_v62 = vadd.f32 0.5, %v2202_v4  ;;  %v2176_v21 = vadd.f32 %v2112_v60, %v10347_v8 }
 0x383   : > { %v6166_v50 = vpop.eup %6165  ;;  %v2260_v43 = vmul.f32 0.5, %v2168_v29  ;;  %v2213_v10 = vadd.f32 0.5, %v2205_v18  ;;  %v2214_v33 = vadd.f32 0.5, %v2206_v31  ;;  %6191 = vtanh.f32 %v2257_v59 }
 0x384   : > { %v8153_v14 = vpop.eup %6167  ;;  %v2263_v9 = vmul.f32 0.5, %v2180_v34  ;;  %v2215_v49 = vadd.f32 0.5, %v2207_v19  ;;  %v2321_v58 = vmul.f32 %v6160_v3, %v2209_v38  ;;  %6193 = vtanh.f32 %v2258_v30 }
 0x385   : > { %v8156_v61 = vpop.eup %6169  ;;  %v2264_v26 = vmul.f32 0.5, %v2184_v16  ;;  %v2216_v15 = vadd.f32 0.5, %v2208_v45  ;;  %v2261_v48 = vmul.f32 0.5, %v2172_v56  ;;  %6195 = vtanh.f32 %v2259_v6 }
 0x386   : > { %v8160_v52 = vpop.eup %6171  ;;  %v2322_v53 = vmul.f32 %v6162_v44, %v2210_v62  ;;  %6197 = vtanh.f32 %v2260_v43  ;;  %v2262_v60 = vmul.f32 0.5, %v2176_v21  ;;  %v2323_v59 = vmul.f32 %v6164_v41, %v2211_v28 }
 0x387   : > { %v8163_v17 = vpop.eup %6173  ;;  %6199 = vtanh.f32 %v2263_v9  ;;  %v2324_v30 = vmul.f32 %v6166_v50, %v2212_v13  ;;  %v10348_v56 = vrot.slane %v7904_v37, 7  ;;  %v10349_v62 = vrot.slane %v7908_v32, 7 }
 0x388   : > { %v6176_v2 = vpop.eup %6175  ;;  %6201 = vtanh.f32 %v2264_v26  ;;  %v10350_v50 = vrot.slane %v7912_v36, 7  ;;  %v10351_v37 = vrot.slane %v7917_v42, 7  ;;  %v10352_v32 = vrot.slane %v7923_v54, 7 }
 0x389   : > { %v6178_v51 = vpop.eup %6177  ;;  %v2233_v35 = vmul.f32 0.5, %v6176_v2  ;;  %6203 = vtanh.f32 %v2261_v48  ;;  %v10353_v36 = vrot.slane %v7926_v55, 7  ;;  %v10354_v42 = vrot.slane %v7932_v57, 7 }
 0x38a   : > { %v6180_v4 = vpop.eup %6179  ;;  %v2234_v29 = vmul.f32 0.5, %v6178_v51  ;;  %6205 = vtanh.f32 %v2262_v60  ;;  %v2327_v54 = vmul.f32 %v8160_v52, %v2215_v49  ;;  %v2328_v55 = vmul.f32 %v8163_v17, %v2216_v15 }
 0x38b   : > { %v6182_v8 = vpop.eup %6181  ;;  %v2235_v18 = vmul.f32 0.5, %v6180_v4  ;;  %v2241_v31 = vadd.f32 0.5, %v2233_v35 }
 0x38c   : > { %v6184_v34 = vpop.eup %6183  ;;  %v2236_v19 = vmul.f32 0.5, %v6182_v8  ;;  %v2242_v38 = vadd.f32 0.5, %v2234_v29 }
 0x38d   : > { %v6186_v3 = vpop.eup %6185  ;;  %v2237_v45 = vmul.f32 0.5, %v6184_v34  ;;  %v2243_v2 = vadd.f32 0.5, %v2235_v18  ;;  %v2313_v6 = vmul.f32 %v10348_v56, %v2241_v31  ;;  %v2325_v34 = vmul.f32 %v8153_v14, %v2213_v10 }
 0x38e   : > { %v6188_v44 = vpop.eup %6187  ;;  %v2238_v16 = vmul.f32 0.5, %v6186_v3  ;;  %v2244_v21 = vadd.f32 0.5, %v2236_v19  ;;  %v2314_v35 = vmul.f32 %v10349_v62, %v2242_v38  ;;  %v10355_v19 = vrot.slane %v7936_v47, 7 }
 0x38f   : > { %v6190_v28 = vpop.eup %6189  ;;  %v2239_v41 = vmul.f32 0.5, %v6188_v44  ;;  %v2245_v43 = vadd.f32 0.5, %v2237_v45  ;;  %v2315_v13 = vmul.f32 %v10350_v50, %v2243_v2  ;;  %v8171_v8 = vadd.f32 %v2321_v58, %v2313_v6 }
 0x390   : > { %v2240_v9 = vmul.f32 0.5, %v6190_v28  ;;  %v2246_v26 = vadd.f32 0.5, %v2238_v16  ;;  %v2316_v48 = vmul.f32 %v10351_v37, %v2244_v21  ;;  %v8175_v51 = vadd.f32 %v2322_v53, %v2314_v35 }
 0x391   : > { %v2247_v4 = vadd.f32 0.5, %v2239_v41  ;;  %v2317_v29 = vmul.f32 %v10352_v32, %v2245_v43  ;;  %v8179_v60 = vadd.f32 %v2323_v59, %v2315_v13  ;;  %6207 = vtanh.f32 %v8171_v8  ;;  %v6192_v59 = vpop.eup %6191 }
 0x392   : > { %v2248_v18 = vadd.f32 0.5, %v2240_v9  ;;  %v2318_v58 = vmul.f32 %v10353_v36, %v2246_v26  ;;  %v8184_v31 = vadd.f32 %v2324_v30, %v2316_v48  ;;  %6209 = vtanh.f32 %v8175_v51  ;;  %v6194_v3 = vpop.eup %6193 }
 0x393   : > { %v2319_v53 = vmul.f32 %v10354_v42, %v2247_v4  ;;  %6211 = vtanh.f32 %v8179_v60  ;;  %v2326_v30 = vmul.f32 %v8156_v61, %v2214_v33  ;;  %v8196_v45 = vadd.f32 %v2325_v34, %v2317_v29  ;;  %v6196_v57 = vpop.eup %6195 }
 0x394   : > { %v2320_v38 = vmul.f32 %v10355_v19, %v2248_v18  ;;  %6213 = vtanh.f32 %v8184_v31  ;;  %v6198_v52 = vpop.eup %6197  ;;  %v2273_v61 = vmul.f32 0.5, %v6192_v59  ;;  %v2274_v49 = vmul.f32 0.5, %v6194_v3 }
 0x395   : > { %v8198_v2 = vadd.f32 %v2327_v54, %v2319_v53  ;;  %v8203_v10 = vadd.f32 %v2326_v30, %v2318_v58  ;;  %v6200_v47 = vpop.eup %6199  ;;  %v2275_v56 = vmul.f32 0.5, %v6196_v57  ;;  %v2276_v44 = vmul.f32 0.5, %v6198_v52 }
 0x396   : > { %v8201_v14 = vadd.f32 %v2328_v55, %v2320_v38  ;;  %v6202_v17 = vpop.eup %6201  ;;  %v2279_v6 = vmul.f32 0.5, %v6200_v47  ;;  %v2281_v16 = vadd.f32 0.5, %v2273_v61  ;;  %v2282_v35 = vadd.f32 0.5, %v2274_v49 }
 0x397   : > { %6215 = vtanh.f32 %v8198_v2  ;;  %v6204_v33 = vpop.eup %6203  ;;  %v2280_v62 = vmul.f32 0.5, %v6202_v17  ;;  %v2283_v50 = vadd.f32 0.5, %v2275_v56  ;;  %v2284_v48 = vadd.f32 0.5, %v2276_v44 }
 0x398   : > { %6217 = vtanh.f32 %v8201_v14  ;;  %v6206_v15 = vpop.eup %6205  ;;  %v2277_v41 = vmul.f32 0.5, %v6204_v33  ;;  %v2287_v37 = vadd.f32 0.5, %v2279_v6 }
 0x399   : > { %6219 = vtanh.f32 %v8196_v45  ;;  %v2278_v43 = vmul.f32 0.5, %v6206_v15  ;;  %v2288_v18 = vadd.f32 0.5, %v2280_v62 }
 0x39a   : > { %6221 = vtanh.f32 %v8203_v10  ;;  %v2285_v53 = vadd.f32 0.5, %v2277_v41 }
 0x39b   : > { %v2286_v34 = vadd.f32 0.5, %v2278_v43 }
 0x39e   : > { %v6208_v21 = vpop.eup %6207 }
 0x39f   : > { %v6210_v28 = vpop.eup %6209  ;;  %v8209_v13 = vmul.f32 %v6208_v21, %v2281_v16 }
 0x3a0   : > { %v6212_v9 = vpop.eup %6211  ;;  %v8211_v26 = vmul.f32 %v6210_v28, %v2282_v35 }
 0x3a1   : > { %v8213_v4 = vmul.f32 %v6212_v9, %v2283_v50  ;;  %v2571_v32 = vrot.slane %v8209_v13, 2  ;;  %v6214_v29 = vpop.eup %6213  ;;  %v2386_v30 = vmul.f32 %v8209_v13, %v8209_v13 }
 0x3a2   : > { %v2361_v36 = vrot.slane %v8211_v26, 7  ;;  %v2572_v58 = vrot.slane %v8211_v26, 1  ;;  %v2387_v42 = vmul.f32 %v8211_v26, %v8211_v26  ;;  %v8220_v54 = vmul.f32 %v6214_v29, %v2284_v48 }
 0x3a3   : > { %v2363_v59 = vrot.slane %v8213_v4, 6  ;;  %v2388_v3 = vmul.f32 %v8213_v4, %v8213_v4 }
 0x3a4   : > { %v6216_v19 = vpop.eup %6215  ;;  %v2362_v38 = vsel %vm1115_vm3, %v2361_v36, %v8209_v13  ;;  %v2573_v55 = vsel %vm1109_vm1, %v2572_v58, %v2571_v32  ;;  %v2365_v17 = vrot.slane %v8220_v54, 5  ;;  %v2575_v15 = vrot.slane %v8220_v54, 7 }
 0x3a5   : > { %v6218_v57 = vpop.eup %6217  ;;  %v8230_v52 = vmul.f32 %v6216_v19, %v2287_v37  ;;  %v2364_v47 = vsel %vm1118_vm4, %v2363_v59, %v2362_v38  ;;  %v2574_v61 = vsel %vm1112_vm2, %v8213_v4, %v2573_v55  ;;  %v2389_v56 = vmul.f32 %v8220_v54, %v8220_v54 }
 0x3a6   : > { %v6220_v33 = vpop.eup %6219  ;;  %v8236_v49 = vmul.f32 %v6218_v57, %v2288_v18  ;;  %v2402_v6 = vrot.slane %v2387_v42, 7  ;;  %v2366_v62 = vsel %vm1121_vm5, %v2365_v17, %v2364_v47  ;;  %v2576_v50 = vsel %vm1115_vm3, %v2575_v15, %v2574_v61 }
 0x3a7   : > { %v6222_v44 = vpop.eup %6221  ;;  %v2371_v16 = vrot.slane %v8230_v52, 2  ;;  %v8242_v21 = vmul.f32 %v6220_v33, %v2285_v53  ;;  %v2392_v35 = vmul.f32 %v8230_v52, %v8230_v52  ;;  %v2581_v32 = vrot.slane %v8230_v52, 4 }
 0x3a8   : > { %v2372_v28 = vrot.slane %v8236_v49, 1  ;;  %v8248_v41 = vmul.f32 %v6222_v44, %v2286_v34  ;;  %v2393_v43 = vmul.f32 %v8236_v49, %v8236_v49  ;;  %v2583_v59 = vrot.slane %v8236_v49, 3 }
 0x3a9   : > { %v2367_v9 = vrot.slane %v8242_v21, 4  ;;  %v2412_v37 = vrot.slane %v2392_v35, 2  ;;  %v2577_v48 = vrot.slane %v8242_v21, 6  ;;  %v2390_v57 = vmul.f32 %v8242_v21, %v8242_v21 }
 0x3aa   : > { %v2373_v29 = vsel %vm1109_vm1, %v2372_v28, %v2371_v16  ;;  %v2369_v18 = vrot.slane %v8248_v41, 3  ;;  %v2413_v36 = vrot.slane %v2393_v43, 1  ;;  %v2579_v58 = vrot.slane %v8248_v41, 5 }
 0x3ab   : > { %v2381_v42 = vsel %vm2380_vm10, %v2373_v29, 0.0  ;;  %v2368_v53 = vsel %vm1124_vm6, %v2367_v9, %v2366_v62  ;;  %v2578_v34 = vsel %vm1118_vm4, %v2577_v48, %v2576_v50  ;;  %v2391_v61 = vmul.f32 %v8248_v41, %v8248_v41  ;;  %v8282_v9 = vld [vmem:[#allocation9 + $0x1e8] sm:$0xff]  ;;  %v8290_v48 = vld [vmem:[#allocation9 + $0x1f0] sm:$0xff]  ;;  %v8294_v29 = vld [vmem:[#allocation9 + $0x1d8] sm:$0xff] }
 0x3ac   : > { %2382 = vadd.xlane.f32.xlu0 %v2381_v42  ;;  %v2370_v19 = vsel %vm1127_vm7, %v2369_v18, %v2368_v53  ;;  %v2414_v38 = vsel %vm1109_vm1, %v2413_v36, %v2412_v37  ;;  %v2580_v55 = vsel %vm1121_vm5, %v2579_v58, %v2578_v34  ;;  %v2403_v33 = vsel %vm1115_vm3, %v2402_v6, %v2386_v30  ;;  %v8286_v37 = vld [vmem:[#allocation9 + $0x1e0] sm:$0xff]  ;;  %v8300_v36 = vld [vmem:[#allocation9 + $0x1d0] sm:$0xff]  ;;  %v8302_v58 = vld [vmem:[#allocation9 + $0x1a8] sm:$0xff] }
 0x3ad   : > { %v2377_v47 = vsel %vm2376_vm11, %v2370_v19, 0.0  ;;  %v2582_v17 = vsel %vm1124_vm6, %v2581_v32, %v2580_v55  ;;  %v2404_v44 = vrot.slane %v2388_v3, 6  ;;  %v2420_v16 = vsel %vm2380_vm10, %v2414_v38, 0.0  ;;  %3225 = vmatprep.subr.mxu0 %v8282_v9  ;;  %v8292_v32 = vld [vmem:[#allocation9 + $0x1c8] sm:$0xff]  ;;  %v8298_v18 = vld [vmem:[#allocation9 + $0x1c0] sm:$0xff]  ;;  %v8306_v42 = vld [vmem:[#allocation9 + $0x1b8] sm:$0xff] }
 0x3ae   : > { %2378 = vadd.xlane.f32.xlu1 %v2377_v47  ;;  %v2584_v15 = vsel %vm1127_vm7, %v2583_v59, %v2582_v17  ;;  %v2406_v62 = vrot.slane %v2389_v56, 5  ;;  %v2408_v28 = vrot.slane %v2390_v57, 4  ;;  %v2410_v50 = vrot.slane %v2391_v61, 3  ;;  %v8284_v56 = vld [vmem:[#allocation9 + $0x1f8] sm:$0xff]  ;;  %v8308_v53 = vld [vmem:[#allocation9 + $0x1a0] sm:$0xff]  ;;  %v8310_v34 = vld [vmem:[#allocation9 + $0x1b0] sm:$0xff] }
 0x3af   : > { %2651 = vmatmul.mubr.f32.vlgmr.msra.gmra.mxu0 %v2584_v15  ;;  %2722 = vmatmul.mubr.f32.vlgmr.msra.gmra.mxu1 %v2584_v15  ;;  %v2405_v35 = vsel %vm1118_vm4, %v2404_v44, %v2403_v33  ;;  %v8314_v59 = vld [vmem:[#allocation9 + $0x188] sm:$0xff]  ;;  %v8316_v19 = vld [vmem:[#allocation9 + $0x198] sm:$0xff]  ;;  %v8320_v38 = vld [vmem:[#allocation9 + $0x180] sm:$0xff]  ;;  %vm4936_vm10 = vcmask 1045504  }
 0x3b0   : > { %2421 = vadd.xlane.f32.xlu0 %v2420_v16  ;;  %3289 = vmatprep.mubr.f32.mxu0 %v10323_v1  ;;  %v2407_v43 = vsel %vm1121_vm5, %v2406_v62, %v2405_v35  ;;  %10356 = vst [vmem:[#allocation47_spill] sm:$0xff] %v8316_v19  ;;  %10357 = vst [vmem:[#allocation48_spill] sm:$0xff] %v8320_v38  ;;  %v8322_v55 = vld [vmem:[#allocation9 + $0x190] sm:$0xff]  ;;  %v8326_v57 = vld [vmem:[#allocation9 + $0x168] sm:$0xff] }
 0x3b1   : > { %3360 = vmatprep.mubr.f32.mxu1 %v10323_v1  ;;  %v2409_v30 = vsel %vm1124_vm6, %v2408_v28, %v2407_v43  ;;  %3296 = vmatprep.subr.mxu1 %v8284_v56  ;;  %10358 = vst [vmem:[#allocation49_spill] sm:$0xff] %v8322_v55  ;;  %10359 = vst [vmem:[#allocation50_spill] sm:$0xff] %v8326_v57  ;;  %v8328_v47 = vld [vmem:[#allocation9 + $0x178] sm:$0xff]  ;;  %v8332_v17 = vld [vmem:[#allocation9 + $0x160] sm:$0xff] }
 0x3b2   : > { %v2411_v3 = vsel %vm1127_vm7, %v2410_v50, %v2409_v30  ;;  %3226 = vmatpush1.msra.mxu0 %v8286_v37  ;;  %3297 = vmatpush1.msra.mxu1 %v8290_v48  ;;  %10360 = vst [vmem:[#allocation51_spill] sm:$0xff] %v8328_v47  ;;  %10361 = vst [vmem:[#allocation52_spill] sm:$0xff] %v8332_v17  ;;  %v8334_v61 = vld [vmem:[#allocation9 + $0x170] sm:$0xff]  ;;  %v8338_v33 = vld [vmem:[#allocation9 + $0x148] sm:$0xff] }
 0x3b3   : > { %v2417_v6 = vsel %vm2376_vm11, %v2411_v3, 0.0  ;;  %3227 = vmatprep.subr.mxu0 %v8292_v32  ;;  %3298 = vmatprep.subr.mxu1 %v8294_v29  ;;  %10362 = vst [vmem:[#allocation53_spill] sm:$0xff] %v8334_v61  ;;  %10363 = vst [vmem:[#allocation54_spill] sm:$0xff] %v8338_v33  ;;  %v8340_v15 = vld [vmem:[#allocation9 + $0x158] sm:$0xff]  ;;  %v8344_v44 = vld [vmem:[#allocation9 + $0x140] sm:$0xff] }
 0x3b4   : > { %2418 = vadd.xlane.f32.xlu1 %v2417_v6  ;;  %3228 = vmatpush1.msra.mxu0 %v8298_v18  ;;  %10364 = vst [vmem:[#allocation55_spill] sm:$0xff] %v8340_v15  ;;  %10365 = vst [vmem:[#allocation56_spill] sm:$0xff] %v8344_v44  ;;  %v8346_v16 = vld [vmem:[#allocation9 + $0x150] sm:$0xff]  ;;  %v8350_v62 = vld [vmem:[#allocation9 + $0x128] sm:$0xff] }
 0x3b5   : > { %3299 = vmatpush1.msra.mxu1 %v8300_v36  ;;  %3229 = vmatprep.subr.mxu0 %v8302_v58  ;;  %10366 = vst [vmem:[#allocation57_spill] sm:$0xff] %v8346_v16  ;;  %10367 = vst [vmem:[#allocation58_spill] sm:$0xff] %v8350_v62  ;;  %v8352_v35 = vld [vmem:[#allocation9 + $0x138] sm:$0xff]  ;;  %v8356_v28 = vld [vmem:[#allocation9 + $0x120] sm:$0xff] }
 0x3b6   : > { %3300 = vmatprep.subr.mxu1 %v8306_v42  ;;  %3230 = vmatpush1.msra.mxu0 %v8308_v53  ;;  %10368 = vst [vmem:[#allocation59_spill] sm:$0xff] %v8352_v35  ;;  %10369 = vst [vmem:[#allocation60_spill] sm:$0xff] %v8356_v28  ;;  %v8358_v43 = vld [vmem:[#allocation9 + $0x130] sm:$0xff]  ;;  %v8362_v50 = vld [vmem:[#allocation9 + $0x108] sm:$0xff] }
 0x3b7   : > { %3301 = vmatpush1.msra.mxu1 %v8310_v34  ;;  %3231 = vmatprep.subr.mxu0 %v8314_v59  ;;  %10370 = vst [vmem:[#allocation61_spill] sm:$0xff] %v8358_v43  ;;  %10371 = vst [vmem:[#allocation62_spill] sm:$0xff] %v8362_v50  ;;  %v8364_v30 = vld [vmem:[#allocation9 + $0x118] sm:$0xff]  ;;  %v8368_v3 = vld [vmem:[#allocation9 + $0x100] sm:$0xff] }
 0x3b8   : > { %3302 = vmatprep.subr.mxu1 %v8316_v19  ;;  %3232 = vmatpush1.msra.mxu0 %v8320_v38  ;;  %10372 = vst [vmem:[#allocation63_spill] sm:$0xff] %v8364_v30  ;;  %10373 = vst [vmem:[#allocation64_spill] sm:$0xff] %v8368_v3  ;;  %v8370_v6 = vld [vmem:[#allocation9 + $0x110] sm:$0xff]  ;;  %v8374_v1 = vld [vmem:[#allocation9 + $0xe8] sm:$0xff] }
 0x3b9   : > { %3303 = vmatpush1.msra.mxu1 %v8322_v55  ;;  %3233 = vmatprep.subr.mxu0 %v8326_v57  ;;  %10374 = vst [vmem:[#allocation65_spill] sm:$0xff] %v8370_v6  ;;  %10375 = vst [vmem:[#allocation66_spill] sm:$0xff] %v8374_v1 }
 0x3ba   : > { %3304 = vmatprep.subr.mxu1 %v8328_v47  ;;  %3234 = vmatpush1.msra.mxu0 %v8332_v17 }
 0x3bb   : > { %3305 = vmatpush1.msra.mxu1 %v8334_v61  ;;  %3235 = vmatprep.subr.mxu0 %v8338_v33 }
 0x3bc   : > { %3306 = vmatprep.subr.mxu1 %v8340_v15  ;;  %3236 = vmatpush1.msra.mxu0 %v8344_v44  ;;  %v8376_v44 = vld [vmem:[#allocation9 + $0xf8] sm:$0xff]  ;;  %v8434_v15 = vld [vmem:[#allocation9 + $0x48] sm:$0xff] }
 0x3bd   : > { %3307 = vmatpush1.msra.mxu1 %v8346_v16  ;;  %3237 = vmatprep.subr.mxu0 %v8350_v62  ;;  %10376 = vst [vmem:[#allocation67_spill] sm:$0xff] %v8376_v44  ;;  %v8380_v16 = vld [vmem:[#allocation9 + $0xe0] sm:$0xff]  ;;  %v8382_v62 = vld [vmem:[#allocation9 + $0xf0] sm:$0xff]  ;;  %10395 = vst [vmem:[#allocation86_spill] sm:$0xff] %v8434_v15 }
 0x3be   : > { %3308 = vmatprep.subr.mxu1 %v8352_v35  ;;  %3238 = vmatpush1.msra.mxu0 %v8356_v28  ;;  %10377 = vst [vmem:[#allocation68_spill] sm:$0xff] %v8380_v16  ;;  %10378 = vst [vmem:[#allocation69_spill] sm:$0xff] %v8382_v62  ;;  %v8386_v35 = vld [vmem:[#allocation9 + $0xc8] sm:$0xff]  ;;  %v8388_v28 = vld [vmem:[#allocation9 + $0xd8] sm:$0xff] }
 0x3bf   : > { %3309 = vmatpush1.msra.mxu1 %v8358_v43  ;;  %3239 = vmatprep.subr.mxu0 %v8362_v50  ;;  %10379 = vst [vmem:[#allocation70_spill] sm:$0xff] %v8386_v35  ;;  %10380 = vst [vmem:[#allocation71_spill] sm:$0xff] %v8388_v28  ;;  %v8392_v43 = vld [vmem:[#allocation9 + $0xc0] sm:$0xff]  ;;  %v8394_v50 = vld [vmem:[#allocation9 + $0xd0] sm:$0xff] }
 0x3c0   : > { %3310 = vmatprep.subr.mxu1 %v8364_v30  ;;  %3240 = vmatpush1.msra.mxu0 %v8368_v3  ;;  %10381 = vst [vmem:[#allocation72_spill] sm:$0xff] %v8392_v43  ;;  %10382 = vst [vmem:[#allocation73_spill] sm:$0xff] %v8394_v50  ;;  %v8398_v30 = vld [vmem:[#allocation9 + $0xa8] sm:$0xff]  ;;  %v8400_v3 = vld [vmem:[#allocation9 + $0xb8] sm:$0xff] }
 0x3c1   : > { %3311 = vmatpush1.msra.mxu1 %v8370_v6  ;;  %3241 = vmatprep.subr.mxu0 %v8374_v1  ;;  %10383 = vst [vmem:[#allocation74_spill] sm:$0xff] %v8398_v30  ;;  %10384 = vst [vmem:[#allocation75_spill] sm:$0xff] %v8400_v3  ;;  %v8404_v6 = vld [vmem:[#allocation9 + $0xa0] sm:$0xff]  ;;  %v8406_v1 = vld [vmem:[#allocation9 + $0xb0] sm:$0xff] }
 0x3c2   : > { %3312 = vmatprep.subr.mxu1 %v8376_v44  ;;  %3242 = vmatpush1.msra.mxu0 %v8380_v16  ;;  %10385 = vst [vmem:[#allocation76_spill] sm:$0xff] %v8404_v6  ;;  %10386 = vst [vmem:[#allocation77_spill] sm:$0xff] %v8406_v1  ;;  %v8410_v44 = vld [vmem:[#allocation9 + $0x88] sm:$0xff]  ;;  %v8412_v16 = vld [vmem:[#allocation9 + $0x98] sm:$0xff] }
 0x3c3   : > { %3313 = vmatpush1.msra.mxu1 %v8382_v62  ;;  %3243 = vmatprep.subr.mxu0 %v8386_v35  ;;  %10387 = vst [vmem:[#allocation78_spill] sm:$0xff] %v8410_v44  ;;  %10388 = vst [vmem:[#allocation79_spill] sm:$0xff] %v8412_v16  ;;  %v8416_v62 = vld [vmem:[#allocation9 + $0x80] sm:$0xff]  ;;  %v8418_v35 = vld [vmem:[#allocation9 + $0x90] sm:$0xff] }
 0x3c4   : > { %3314 = vmatprep.subr.mxu1 %v8388_v28  ;;  %3244 = vmatpush1.msra.mxu0 %v8392_v43  ;;  %10389 = vst [vmem:[#allocation80_spill] sm:$0xff] %v8416_v62  ;;  %10390 = vst [vmem:[#allocation81_spill] sm:$0xff] %v8418_v35  ;;  %v8422_v43 = vld [vmem:[#allocation9 + $0x68] sm:$0xff] }
 0x3c5   : > { %3315 = vmatpush1.msra.mxu1 %v8394_v50  ;;  %3245 = vmatprep.subr.mxu0 %v8398_v30  ;;  %10391 = vst [vmem:[#allocation82_spill] sm:$0xff] %v8422_v43  ;;  %v8424_v50 = vld [vmem:[#allocation9 + $0x78] sm:$0xff]  ;;  %v8428_v30 = vld [vmem:[#allocation9 + $0x60] sm:$0xff] }
 0x3c6   : > { %3316 = vmatprep.subr.mxu1 %v8400_v3  ;;  %3246 = vmatpush1.msra.mxu0 %v8404_v6  ;;  %10392 = vst [vmem:[#allocation83_spill] sm:$0xff] %v8424_v50  ;;  %10393 = vst [vmem:[#allocation84_spill] sm:$0xff] %v8428_v30  ;;  %v8430_v3 = vld [vmem:[#allocation9 + $0x70] sm:$0xff]  ;;  %v8436_v6 = vld [vmem:[#allocation9 + $0x58] sm:$0xff] }
 0x3c7   : > { %3317 = vmatpush1.msra.mxu1 %v8406_v1  ;;  %3247 = vmatprep.subr.mxu0 %v8410_v44  ;;  %10394 = vst [vmem:[#allocation85_spill] sm:$0xff] %v8430_v3  ;;  %10396 = vst [vmem:[#allocation87_spill] sm:$0xff] %v8436_v6  ;;  %v8440_v44 = vld [vmem:[#allocation9 + $0x40] sm:$0xff] }
 0x3c8   : > { %3318 = vmatprep.subr.mxu1 %v8412_v16  ;;  %3248 = vmatpush1.msra.mxu0 %v8416_v62  ;;  %10397 = vst [vmem:[#allocation88_spill] sm:$0xff] %v8440_v44  ;;  %v8442_v16 = vld [vmem:[#allocation9 + $0x50] sm:$0xff]  ;;  %v8448_v62 = vld [vmem:[#allocation9 + $0x38] sm:$0xff] }
 0x3c9   : > { %3319 = vmatpush1.msra.mxu1 %v8418_v35  ;;  %3249 = vmatprep.subr.mxu0 %v8422_v43  ;;  %10398 = vst [vmem:[#allocation89_spill] sm:$0xff] %v8442_v16  ;;  %v8446_v35 = vld [vmem:[#allocation9 + $0x28] sm:$0xff]  ;;  %10400 = vst [vmem:[#allocation91_spill] sm:$0xff] %v8448_v62 }
 0x3ca   : > { %3320 = vmatprep.subr.mxu1 %v8424_v50  ;;  %3250 = vmatpush1.msra.mxu0 %v8428_v30  ;;  %10399 = vst [vmem:[#allocation90_spill] sm:$0xff] %v8446_v35  ;;  %v8454_v50 = vld [vmem:[#allocation9 + $0x30] sm:$0xff]  ;;  %v8458_v30 = vld [vmem:[#allocation9 + $0x8] sm:$0xff] }
 0x3cb   : > { %3321 = vmatpush1.msra.mxu1 %v8430_v3  ;;  %3251 = vmatprep.subr.mxu0 %v8434_v15  ;;  %10402 = vst [vmem:[#allocation93_spill] sm:$0xff] %v8454_v50  ;;  %10403 = vst [vmem:[#allocation94_spill] sm:$0xff] %v8458_v30  ;;  %v8460_v3 = vld [vmem:[#allocation9 + $0x18] sm:$0xff]  ;;  %v8466_v15 = vld [vmem:[#allocation9 + $0x10] sm:$0xff] }
 0x3cc   : > { %3322 = vmatprep.subr.mxu1 %v8436_v6  ;;  %3252 = vmatpush1.msra.mxu0 %v8440_v44  ;;  %10404 = vst [vmem:[#allocation95_spill] sm:$0xff] %v8460_v3  ;;  %v8464_v6 = vld [vmem:[#allocation9] sm:$0xff]  ;;  %10406 = vst [vmem:[#allocation97_spill] sm:$0xff] %v8466_v15 }
 0x3cd   : > { %3323 = vmatpush1.msra.mxu1 %v8442_v16  ;;  %3253 = vmatprep.subr.mxu0 %v8446_v35  ;;  %10405 = vst [vmem:[#allocation96_spill] sm:$0xff] %v8464_v6 }
 0x3ce   : > { %3324 = vmatprep.subr.mxu1 %v8448_v62 }
 0x3cf   : > { %3325 = vmatpush1.msra.mxu1 %v8454_v50 }
 0x3d0   : > { %3326 = vmatprep.subr.mxu1 %v8460_v3 }
 0x3d1   : > { %3327 = vmatpush1.msra.mxu1 %v8466_v15 }
 0x3d2   : > { %3935 = vmatprep.subr.mxu1 %v8284_v56 }
 0x435   : > { %v2383_v28 = vpop.xlane.xlu0 %2382 }
 0x436   : > { %v2385_v1 = vmul.f32 0.0078125, %v2383_v28  ;;  %v8452_v28 = vld [vmem:[#allocation9 + $0x20] sm:$0xff] }
 0x437   : > { %v2379_v33 = vpop.xlane.xlu1 %2378  ;;  %10401 = vst [vmem:[#allocation92_spill] sm:$0xff] %v8452_v28  ;;  %3254 = vmatpush1.msra.mxu0 %v8452_v28 }
 0x438   : > { %v2384_v43 = vmul.f32 0.0078125, %v2379_v33  ;;  %v2426_v17 = vmul.f32 %v2385_v1, %v2385_v1  ;;  %3255 = vmatprep.subr.mxu0 %v8458_v30 }
 0x439   : > { %v2422_v61 = vpop.xlane.xlu0 %2421  ;;  %3256 = vmatpush1.msra.mxu0 %v8464_v6 }
 0x43a   : > { %v2424_v47 = vmul.f32 0.0078125, %v2422_v61  ;;  %v2425_v44 = vmul.f32 %v2384_v43, %v2384_v43  ;;  %3864 = vmatprep.subr.mxu0 %v8282_v9  ;;  %v2431_v30 = vrot.slane %v2384_v43, 1  ;;  %v2432_v35 = vrot.slane %v2384_v43, 2 }
 0x43b   : > { %v2433_v3 = vrot.slane %v2384_v43, 3  ;;  %v2434_v57 = vrot.slane %v2384_v43, 4  ;;  %v2446_v56 = vsub.f32 %v8209_v13, %v2384_v43  ;;  %v8487_v13 = vld [vmem:[%s9878_s4] ss:$0 sm:$0xff] }
 0x43c   : > { %v2428_v33 = vsub.f32 %v2424_v47, %v2426_v17  ;;  %v2436_v47 = vrot.slane %v2385_v1, 6  ;;  %v2437_v17 = vrot.slane %v2385_v1, 7 }
 0x43d   : > { %v2419_v16 = vpop.xlane.xlu1 %2418  ;;  %v2449_v1 = vsub.f32 %v8220_v54, %v2433_v3 }
 0x43e   : > { %v2423_v61 = vmul.f32 0.0078125, %v2419_v16  ;;  %v2455_v62 = vadd.f32 1e-05, %v2428_v33  ;;  %v2435_v16 = vrot.slane %v2384_v43, 5  ;;  %v2452_v6 = vsub.f32 %v8230_v52, %v2436_v47 }
 0x43f   : > { %v2453_v33 = vsub.f32 %v8236_v49, %v2437_v17 }
 0x440   : > { %v2427_v28 = vsub.f32 %v2423_v61, %v2425_v44  ;;  %6223 = vrsqrt.f32 %v2455_v62  ;;  %v2447_v44 = vsub.f32 %v8211_v26, %v2431_v30  ;;  %v2448_v62 = vsub.f32 %v8213_v4, %v2432_v35  ;;  %v8494_v35 = vld [vmem:[%s9879_s5] ss:$0 sm:$0xff] }
 0x441   : > { %v2451_v61 = vsub.f32 %v8248_v41, %v2435_v16 }
 0x442   : > { %v2454_v50 = vadd.f32 1e-05, %v2427_v28  ;;  %v2450_v28 = vsub.f32 %v8242_v21, %v2434_v57 }
 0x444   : > { %6225 = vrsqrt.f32 %v2454_v50 }
 0x44d   : > { %v6224_v55 = vpop.eup %6223 }
 0x44e   : > { %v2465_v15 = vrot.slane %v6224_v55, 6  ;;  %v2466_v9 = vrot.slane %v6224_v55, 7 }
 0x450   : > { %v2481_v38 = vmul.f32 %v2465_v15, %v2452_v6  ;;  %v2482_v19 = vmul.f32 %v2466_v9, %v2453_v33 }
 0x451   : > { %v6226_v50 = vpop.eup %6225 }
 0x452   : > { %v2460_v52 = vrot.slane %v6226_v50, 1  ;;  %v2461_v47 = vrot.slane %v6226_v50, 2  ;;  %v2462_v49 = vrot.slane %v6226_v50, 3  ;;  %v2463_v17 = vrot.slane %v6226_v50, 4 }
 0x453   : > { %v2489_v26 = vmul.f32 %v8487_v13, %v2481_v38  ;;  %v2490_v4 = vmul.f32 %v8487_v13, %v2482_v19  ;;  %v2464_v54 = vrot.slane %v6226_v50, 5  ;;  %v2475_v21 = vmul.f32 %v6226_v50, %v2446_v56 }
 0x454   : > { %v2476_v41 = vmul.f32 %v2460_v52, %v2447_v44  ;;  %v2477_v55 = vmul.f32 %v2461_v47, %v2448_v62  ;;  %v2478_v57 = vmul.f32 %v2462_v49, %v2449_v1  ;;  %v2479_v15 = vmul.f32 %v2463_v17, %v2450_v28 }
 0x455   : > { %v2497_v43 = vadd.f32 %v8494_v35, %v2489_v26  ;;  %v2498_v30 = vadd.f32 %v8494_v35, %v2490_v4  ;;  %v2480_v38 = vmul.f32 %v2464_v54, %v2451_v61  ;;  %v2483_v19 = vmul.f32 %v8487_v13, %v2475_v21 }
 0x456   : > { %v2484_v3 = vmul.f32 %v8487_v13, %v2476_v41  ;;  %v2485_v6 = vmul.f32 %v8487_v13, %v2477_v55  ;;  %v2486_v16 = vmul.f32 %v8487_v13, %v2478_v57  ;;  %v2487_v33 = vmul.f32 %v8487_v13, %v2479_v15 }
 0x457   : > { %2505 = vst [vmem:[%s7005_s26 + $0x30] sm:$0x4] %v2497_v43  ;;  %2506 = vst [vmem:[%s7005_s26 + $0x38] sm:$0x4] %v2498_v30  ;;  %v2488_v9 = vmul.f32 %v8487_v13, %v2480_v38  ;;  %v2491_v56 = vadd.f32 %v8494_v35, %v2483_v19 }
 0x458   : > { %v2492_v44 = vadd.f32 %v8494_v35, %v2484_v3  ;;  %v2493_v62 = vadd.f32 %v8494_v35, %v2485_v6  ;;  %v2494_v1 = vadd.f32 %v8494_v35, %v2486_v16  ;;  %v2495_v50 = vadd.f32 %v8494_v35, %v2487_v33 }
 0x459   : > { %v2496_v28 = vadd.f32 %v8494_v35, %v2488_v9  ;;  %2499 = vst [vmem:[%s7005_s26] sm:$0x4] %v2491_v56 }
 0x45a   : > { %2500 = vst [vmem:[%s7005_s26 + $0x8] sm:$0x4] %v2492_v44  ;;  %2501 = vst [vmem:[%s7005_s26 + $0x10] sm:$0x4] %v2493_v62 }
 0x45b   : > { %2502 = vst [vmem:[%s7005_s26 + $0x18] sm:$0x4] %v2494_v1  ;;  %2503 = vst [vmem:[%s7005_s26 + $0x20] sm:$0x4] %v2495_v50 }
 0x45c   : > { %2504 = vst [vmem:[%s7005_s26 + $0x28] sm:$0x4] %v2496_v28 }
 0x46f   : > { %v2652_v61 = vpop.f32.mrf.mxu0  ;;  %v2723_v19 = vpop.f32.mrf.mxu1 }
 0x470   : > { %v2732_v52 = vrot.slane %v2652_v61, 5  ;;  %v2736_v47 = vrot.slane %v2652_v61, 6  ;;  %v2740_v49 = vrot.slane %v2652_v61, 7  ;;  %v2744_v17 = vrot.slane %v2652_v61, 1 }
 0x471   : > { %v2748_v26 = vrot.slane %v2652_v61, 2  ;;  %v2752_v4 = vrot.slane %v2652_v61, 3  ;;  %v2756_v54 = vrot.slane %v2652_v61, 4  ;;  %v2804_v21 = vadd.f32 %v2652_v61, %v7383_v20  ;;  %v2654_v61 = vpop.f32.mrf.mxu0 }
 0x472   : > { %v2792_v41 = vadd.f32 %v2732_v52, %v7346_v7  ;;  %v2796_v55 = vadd.f32 %v2736_v47, %v7361_v27  ;;  %v2800_v57 = vadd.f32 %v2740_v49, %v7372_v63  ;;  %v2808_v15 = vadd.f32 %v2744_v17, %v7388_v22 }
 0x473   : > { %v2812_v43 = vadd.f32 %v2748_v26, %v7390_v23  ;;  %v2816_v30 = vadd.f32 %v2752_v4, %v7392_v24  ;;  %v2827_v38 = vmul.f32 0.5, %v2804_v21  ;;  %v2820_v3 = vadd.f32 %v2756_v54, %v7394_v25 }
 0x474   : > { %v2824_v6 = vmul.f32 0.5, %v2792_v41  ;;  %v2825_v16 = vmul.f32 0.5, %v2796_v55  ;;  %v2826_v33 = vmul.f32 0.5, %v2800_v57  ;;  %v2828_v9 = vmul.f32 0.5, %v2808_v15 }
 0x475   : > { %v2829_v56 = vmul.f32 0.5, %v2812_v43  ;;  %6227 = vtanh.f32 %v2827_v38  ;;  %v2734_v44 = vrot.slane %v2723_v19, 5  ;;  %v2738_v62 = vrot.slane %v2723_v19, 6 }
 0x476   : > { %6229 = vtanh.f32 %v2824_v6  ;;  %v2742_v1 = vrot.slane %v2723_v19, 7  ;;  %v2830_v50 = vmul.f32 0.5, %v2816_v30  ;;  %v2831_v28 = vmul.f32 0.5, %v2820_v3 }
 0x477   : > { %6231 = vtanh.f32 %v2825_v16  ;;  %v2746_v52 = vrot.slane %v2723_v19, 1  ;;  %v2750_v47 = vrot.slane %v2723_v19, 2  ;;  %v2794_v49 = vadd.f32 %v2734_v44, %v10325_v11  ;;  %v10407_v16 = vld [vmem:[#allocation21_spill] sm:$0xff] }
 0x478   : > { %6233 = vtanh.f32 %v2826_v33  ;;  %v2754_v17 = vrot.slane %v2723_v19, 3  ;;  %v2798_v26 = vadd.f32 %v2738_v62, %v10326_v12  ;;  %v2802_v4 = vadd.f32 %v2742_v1, %v10327_v40  ;;  %v10409_v62 = vld [vmem:[#allocation25_spill] sm:$0xff]  ;;  %v10410_v1 = vld [vmem:[#allocation39_spill] sm:$0xff] }
 0x479   : > { %6235 = vtanh.f32 %v2828_v9  ;;  %v2733_v54 = vrot.slane %v2654_v61, 5  ;;  %v2737_v21 = vrot.slane %v2654_v61, 6  ;;  %v2741_v41 = vrot.slane %v2654_v61, 7  ;;  %v10408_v9 = vld [vmem:[#allocation38_spill] sm:$0xff] }
 0x47a   : > { %6237 = vtanh.f32 %v2829_v56  ;;  %v2758_v55 = vrot.slane %v2723_v19, 4  ;;  %v2806_v57 = vadd.f32 %v2723_v19, %v10328_v46  ;;  %v2810_v43 = vadd.f32 %v2746_v52, %v10329_v5  ;;  %v10411_v52 = vld [vmem:[#allocation33_spill] sm:$0xff]  ;;  %v10419_v46 = vld [vmem:[#allocation44_spill] sm:$0xff] }
 0x47b   : > { %6239 = vtanh.f32 %v2830_v50  ;;  %v2745_v30 = vrot.slane %v2654_v61, 1  ;;  %v2793_v38 = vadd.f32 %v2733_v54, %v10330_v0  ;;  %v2814_v3 = vadd.f32 %v2750_v47, %v10331_v39  ;;  %v10412_v54 = vld [vmem:[#allocation35_spill] sm:$0xff] }
 0x47c   : > { %6241 = vtanh.f32 %v2831_v28  ;;  %v2749_v6 = vrot.slane %v2654_v61, 2  ;;  %v2797_v33 = vadd.f32 %v2737_v21, %v10407_v16  ;;  %v2818_v56 = vadd.f32 %v2754_v17, %v10408_v9  ;;  %v10413_v21 = vld [vmem:[#allocation37_spill] sm:$0xff]  ;;  %v10418_v9 = vld [vmem:[#allocation42_spill] sm:$0xff] }
 0x47d   : > { %6243 = vtanh.f32 %v2794_v49  ;;  %v2753_v44 = vrot.slane %v2654_v61, 3  ;;  %v2801_v19 = vadd.f32 %v2741_v41, %v10409_v62  ;;  %v2822_v50 = vadd.f32 %v2758_v55, %v10410_v1  ;;  %v8543_v41 = vpop.f32.mrf.mxu1 }
 0x47e   : > { %6245 = vtanh.f32 %v2798_v26  ;;  %v2757_v28 = vrot.slane %v2654_v61, 4  ;;  %v2805_v49 = vadd.f32 %v2654_v61, %v10411_v52  ;;  %v2809_v15 = vadd.f32 %v2745_v30, %v10412_v54 }
 0x47f   : > { %6247 = vtanh.f32 %v2802_v4  ;;  %v2856_v47 = vmul.f32 0.5, %v2793_v38  ;;  %v2813_v17 = vadd.f32 %v2749_v6, %v10413_v21  ;;  %v2857_v4 = vmul.f32 0.5, %v2797_v33  ;;  %v10415_v38 = vld [vmem:[#allocation41_spill] sm:$0xff] }
 0x480   : > { %6249 = vtanh.f32 %v2806_v57  ;;  %v10414_v57 = vld [vmem:[#allocation40_spill] sm:$0xff]  ;;  %v2858_v61 = vmul.f32 0.5, %v2801_v19  ;;  %v2821_v26 = vadd.f32 %v2757_v28, %v10415_v38  ;;  %v2859_v54 = vmul.f32 0.5, %v2805_v49  ;;  %v10417_v19 = vld [vmem:[#allocation26_spill] sm:$0xff] }
 0x481   : > { %6251 = vtanh.f32 %v2810_v43  ;;  %v2817_v1 = vadd.f32 %v2753_v44, %v10414_v57  ;;  %v2860_v33 = vmul.f32 0.5, %v2809_v15  ;;  %v2739_v16 = vrot.slane %v8543_v41, 6  ;;  %v10416_v44 = vld [vmem:[#allocation22_spill] sm:$0xff] }
 0x482   : > { %v6228_v0 = vpop.eup %6227  ;;  %6253 = vtanh.f32 %v2814_v3  ;;  %v2743_v21 = vrot.slane %v8543_v41, 7  ;;  %v2861_v52 = vmul.f32 0.5, %v2813_v17  ;;  %v2751_v49 = vrot.slane %v8543_v41, 2 }
 0x483   : > { %v6230_v55 = vpop.eup %6229  ;;  %6255 = vtanh.f32 %v2818_v56  ;;  %v2862_v43 = vmul.f32 0.5, %v2817_v1  ;;  %v2735_v3 = vrot.slane %v8543_v41, 5  ;;  %v2755_v38 = vrot.slane %v8543_v41, 3 }
 0x484   : > { %v6232_v30 = vpop.eup %6231  ;;  %6257 = vtanh.f32 %v2822_v50  ;;  %v2799_v57 = vadd.f32 %v2739_v16, %v10416_v44  ;;  %v2803_v62 = vadd.f32 %v2743_v21, %v10417_v19  ;;  %v2747_v28 = vrot.slane %v8543_v41, 1  ;;  %v10420_v21 = vld [vmem:[#allocation45_spill] sm:$0xff]  ;;  %v10421_v44 = vld [vmem:[#allocation18_spill] sm:$0xff] }
 0x485   : > { %v6234_v6 = vpop.eup %6233  ;;  %6259 = vtanh.f32 %v2856_v47  ;;  %v2863_v47 = vmul.f32 0.5, %v2821_v26  ;;  %v2807_v26 = vadd.f32 %v8543_v41, %v10418_v9  ;;  %v2841_v39 = vmul.f32 0.5, %v6232_v30 }
 0x486   : > { %v6236_v56 = vpop.eup %6235  ;;  %6261 = vtanh.f32 %v2857_v4  ;;  %v2843_v4 = vmul.f32 0.5, %v6228_v0  ;;  %v2759_v5 = vrot.slane %v8543_v41, 4  ;;  %v2815_v0 = vadd.f32 %v2751_v49, %v10419_v46  ;;  %v10422_v46 = vld [vmem:[#allocation46_spill] sm:$0xff] }
 0x487   : > { %v6238_v50 = vpop.eup %6237  ;;  %6263 = vtanh.f32 %v2858_v61  ;;  %v2840_v61 = vmul.f32 0.5, %v6230_v55  ;;  %v2842_v40 = vmul.f32 0.5, %v6234_v6  ;;  %v2844_v16 = vmul.f32 0.5, %v6236_v56  ;;  %v10423_v56 = vld [vmem:[#allocation43_spill] sm:$0xff] }
 0x488   : > { %v6240_v15 = vpop.eup %6239  ;;  %6265 = vtanh.f32 %v2859_v54  ;;  %v2819_v19 = vadd.f32 %v2755_v38, %v10420_v21  ;;  %v2795_v12 = vadd.f32 %v2735_v3, %v10421_v44  ;;  %v2897_v11 = vmul.f32 0.5, %v2799_v57 }
 0x489   : > { %v6242_v17 = vpop.eup %6241  ;;  %6267 = vtanh.f32 %v2860_v33  ;;  %v2898_v25 = vmul.f32 0.5, %v2803_v62  ;;  %v2846_v24 = vmul.f32 0.5, %v6240_v15  ;;  %v2848_v30 = vadd.f32 0.5, %v2840_v61 }
 0x48a   : > { %v6244_v1 = vpop.eup %6243  ;;  %6269 = vtanh.f32 %v2861_v52  ;;  %v2845_v52 = vmul.f32 0.5, %v6238_v50  ;;  %v2899_v23 = vmul.f32 0.5, %v2807_v26  ;;  %v2847_v20 = vmul.f32 0.5, %v6242_v17 }
 0x48b   : > { %v6246_v54 = vpop.eup %6245  ;;  %6271 = vtanh.f32 %v2862_v43  ;;  %v2851_v43 = vadd.f32 0.5, %v2843_v4  ;;  %v2901_v49 = vmul.f32 0.5, %v2815_v0  ;;  %v2823_v6 = vadd.f32 %v2759_v5, %v10422_v46 }
 0x48c   : > { %v6248_v33 = vpop.eup %6247  ;;  %6273 = vtanh.f32 %v2863_v47  ;;  %v2811_v47 = vadd.f32 %v2747_v28, %v10423_v56  ;;  %v2849_v38 = vadd.f32 0.5, %v2841_v39  ;;  %v2850_v50 = vadd.f32 0.5, %v2842_v40 }
 0x48d   : > { %v6250_v55 = vpop.eup %6249  ;;  %v2902_v21 = vmul.f32 0.5, %v2819_v19  ;;  %6275 = vtanh.f32 %v2897_v11  ;;  %v2852_v62 = vadd.f32 0.5, %v2844_v16  ;;  %v2853_v3 = vadd.f32 0.5, %v2845_v52 }
 0x48e   : > { %v6252_v9 = vpop.eup %6251  ;;  %v2896_v15 = vmul.f32 0.5, %v2795_v12  ;;  %6277 = vtanh.f32 %v2898_v25  ;;  %v2854_v61 = vadd.f32 0.5, %v2846_v24  ;;  %v2960_v17 = vmul.f32 %v6244_v1, %v2848_v30 }
 0x48f   : > { %v6254_v41 = vpop.eup %6253  ;;  %6279 = vtanh.f32 %v2899_v23  ;;  %v2903_v26 = vmul.f32 0.5, %v2823_v6  ;;  %v2855_v0 = vadd.f32 0.5, %v2847_v20  ;;  %v2900_v46 = vmul.f32 0.5, %v2811_v47 }
 0x490   : > { %v8568_v63 = vpop.eup %6255  ;;  %6281 = vtanh.f32 %v2901_v49  ;;  %v2961_v19 = vmul.f32 %v6246_v54, %v2849_v38  ;;  %v2962_v11 = vmul.f32 %v6248_v33, %v2850_v50  ;;  %v2963_v12 = vmul.f32 %v6250_v55, %v2851_v43 }
 0x491   : > { %v8570_v57 = vpop.eup %6257  ;;  %6283 = vtanh.f32 %v2902_v21  ;;  %v2964_v23 = vmul.f32 %v6252_v9, %v2852_v62  ;;  %v10424_v49 = vrot.slane %v8171_v8, 7  ;;  %v10425_v38 = vrot.slane %v8175_v51, 7 }
 0x492   : > { %v6260_v4 = vpop.eup %6259  ;;  %6285 = vtanh.f32 %v2896_v15  ;;  %v2965_v55 = vmul.f32 %v6254_v41, %v2853_v3  ;;  %v10427_v8 = vrot.slane %v8184_v31, 7  ;;  %v10428_v51 = vrot.slane %v8196_v45, 7 }
 0x493   : > { %v6262_v5 = vpop.eup %6261  ;;  %v2872_v28 = vmul.f32 0.5, %v6260_v4  ;;  %6287 = vtanh.f32 %v2903_v26  ;;  %v10426_v4 = vrot.slane %v8179_v60, 7  ;;  %v10429_v60 = vrot.slane %v8203_v10, 7 }
 0x494   : > { %v6264_v39 = vpop.eup %6263  ;;  %v2873_v40 = vmul.f32 0.5, %v6262_v5  ;;  %6289 = vtanh.f32 %v2900_v46 }
 0x495   : > { %v6266_v44 = vpop.eup %6265  ;;  %v2874_v16 = vmul.f32 0.5, %v6264_v39  ;;  %v2880_v52 = vadd.f32 0.5, %v2872_v28 }
 0x496   : > { %v6268_v25 = vpop.eup %6267  ;;  %v2875_v24 = vmul.f32 0.5, %v6266_v44  ;;  %v2881_v1 = vadd.f32 0.5, %v2873_v40 }
 0x497   : > { %v6270_v30 = vpop.eup %6269  ;;  %v2876_v20 = vmul.f32 0.5, %v6268_v25  ;;  %v2882_v6 = vadd.f32 0.5, %v2874_v16  ;;  %v2952_v47 = vmul.f32 %v10424_v49, %v2880_v52  ;;  %v2966_v25 = vmul.f32 %v8568_v63, %v2854_v61 }
 0x498   : > { %v6272_v54 = vpop.eup %6271  ;;  %v2877_v33 = vmul.f32 0.5, %v6270_v30  ;;  %v2883_v21 = vadd.f32 0.5, %v2875_v24  ;;  %v2953_v50 = vmul.f32 %v10425_v38, %v2881_v1  ;;  %v10431_v24 = vrot.slane %v8201_v14, 7 }
 0x499   : > { %v6274_v43 = vpop.eup %6273  ;;  %v2878_v15 = vmul.f32 0.5, %v6272_v54  ;;  %v2884_v44 = vadd.f32 0.5, %v2876_v20  ;;  %v2954_v9 = vmul.f32 %v10426_v4, %v2882_v6  ;;  %v8578_v62 = vadd.f32 %v2960_v17, %v2952_v47 }
 0x49a   : > { %v2879_v26 = vmul.f32 0.5, %v6274_v43  ;;  %v2885_v5 = vadd.f32 0.5, %v2877_v33  ;;  %v2955_v46 = vmul.f32 %v10427_v8, %v2883_v21  ;;  %v8582_v28 = vadd.f32 %v2961_v19, %v2953_v50  ;;  %v6276_v31 = vpop.eup %6275 }
 0x49b   : > { %v2886_v39 = vadd.f32 0.5, %v2878_v15  ;;  %v2956_v40 = vmul.f32 %v10428_v51, %v2884_v44  ;;  %v8586_v41 = vadd.f32 %v2962_v11, %v2954_v9  ;;  %6291 = vtanh.f32 %v8578_v62  ;;  %v6278_v11 = vpop.eup %6277 }
 0x49c   : > { %v2887_v3 = vadd.f32 0.5, %v2879_v26  ;;  %v2957_v17 = vmul.f32 %v10429_v60, %v2885_v5  ;;  %v8591_v16 = vadd.f32 %v2963_v12, %v2955_v46  ;;  %6293 = vtanh.f32 %v8582_v28  ;;  %v6280_v30 = vpop.eup %6279 }
 0x49d   : > { %v10430_v19 = vrot.slane %v8198_v2, 7  ;;  %v8597_v45 = vadd.f32 %v2964_v23, %v2956_v40  ;;  %6295 = vtanh.f32 %v8586_v41  ;;  %v2967_v12 = vmul.f32 %v8570_v57, %v2855_v0  ;;  %v6282_v63 = vpop.eup %6281 }
 0x49e   : > { %v2959_v1 = vmul.f32 %v10431_v24, %v2887_v3  ;;  %v8602_v10 = vadd.f32 %v2965_v55, %v2957_v17  ;;  %6297 = vtanh.f32 %v8591_v16  ;;  %v6284_v61 = vpop.eup %6283  ;;  %v2913_v6 = vmul.f32 0.5, %v6276_v31 }
 0x49f   : > { %v2958_v52 = vmul.f32 %v10430_v19, %v2886_v39  ;;  %6299 = vtanh.f32 %v8597_v45  ;;  %v6286_v14 = vpop.eup %6285  ;;  %v2914_v49 = vmul.f32 0.5, %v6278_v11  ;;  %v2915_v47 = vmul.f32 0.5, %v6280_v30 }
 0x4a0   : > { %v8609_v2 = vadd.f32 %v2967_v12, %v2959_v1  ;;  %6301 = vtanh.f32 %v8602_v10  ;;  %v6288_v23 = vpop.eup %6287  ;;  %v2912_v57 = vmul.f32 0.5, %v6286_v14  ;;  %v2917_v54 = vmul.f32 0.5, %v6282_v63 }
 0x4a1   : > { %v8606_v20 = vadd.f32 %v2966_v25, %v2958_v52  ;;  %v6290_v0 = vpop.eup %6289  ;;  %v2918_v33 = vmul.f32 0.5, %v6284_v61  ;;  %v2919_v21 = vmul.f32 0.5, %v6288_v23  ;;  %v2921_v43 = vadd.f32 0.5, %v2913_v6 }
 0x4a2   : > { %v2916_v38 = vmul.f32 0.5, %v6290_v0  ;;  %v2920_v50 = vadd.f32 0.5, %v2912_v57  ;;  %v2922_v44 = vadd.f32 0.5, %v2914_v49  ;;  %v2923_v4 = vadd.f32 0.5, %v2915_v47 }
 0x4a3   : > { %6303 = vtanh.f32 %v8606_v20  ;;  %v2925_v5 = vadd.f32 0.5, %v2917_v54  ;;  %v2926_v8 = vadd.f32 0.5, %v2918_v33  ;;  %v2927_v46 = vadd.f32 0.5, %v2919_v21 }
 0x4a4   : > { %6305 = vtanh.f32 %v8609_v2  ;;  %v2924_v40 = vadd.f32 0.5, %v2916_v38 }
 0x4a8   : > { %v6292_v55 = vpop.eup %6291 }
 0x4a9   : > { %v6294_v15 = vpop.eup %6293  ;;  %v8614_v9 = vmul.f32 %v6292_v55, %v2920_v50 }
 0x4aa   : > { %v6296_v26 = vpop.eup %6295  ;;  %v8616_v39 = vmul.f32 %v6294_v15, %v2921_v43 }
 0x4ab   : > { %v6298_v51 = vpop.eup %6297  ;;  %v8618_v3 = vmul.f32 %v6296_v26, %v2922_v44  ;;  %v3210_v60 = vrot.slane %v8614_v9, 3  ;;  %v3025_v17 = vmul.f32 %v8614_v9, %v8614_v9 }
 0x4ac   : > { %v6300_v31 = vpop.eup %6299  ;;  %v8623_v19 = vmul.f32 %v6298_v51, %v2923_v4  ;;  %v3000_v52 = vrot.slane %v8616_v39, 7  ;;  %v3211_v25 = vrot.slane %v8616_v39, 2  ;;  %v3026_v11 = vmul.f32 %v8616_v39, %v8616_v39 }
 0x4ad   : > { %v6302_v24 = vpop.eup %6301  ;;  %v8629_v1 = vmul.f32 %v6300_v31, %v2924_v40  ;;  %v3002_v12 = vrot.slane %v8618_v3, 6  ;;  %v3213_v30 = vrot.slane %v8618_v3, 1  ;;  %v3027_v63 = vmul.f32 %v8618_v3, %v8618_v3 }
 0x4ae   : > { %v8635_v14 = vmul.f32 %v6302_v24, %v2925_v5  ;;  %v3001_v23 = vsel %vm1118_vm4, %v3000_v52, %v8614_v9  ;;  %v3004_v57 = vrot.slane %v8623_v19, 5  ;;  %v3212_v0 = vsel %vm1109_vm1, %v3211_v25, %v3210_v60 }
 0x4af   : > { %v3003_v47 = vsel %vm1121_vm5, %v3002_v12, %v3001_v23  ;;  %v3006_v54 = vrot.slane %v8629_v1, 4  ;;  %v3214_v33 = vsel %vm1112_vm2, %v3213_v30, %v3212_v0  ;;  %v3216_v44 = vrot.slane %v8629_v1, 7 }
 0x4b0   : > { %v6304_v61 = vpop.eup %6303  ;;  %v3008_v38 = vrot.slane %v8635_v14, 3  ;;  %v3005_v50 = vsel %vm1124_vm6, %v3004_v57, %v3003_v47  ;;  %v3215_v55 = vsel %vm1115_vm3, %v8623_v19, %v3214_v33  ;;  %v3218_v4 = vrot.slane %v8635_v14, 6 }
 0x4b1   : > { %v6306_v6 = vpop.eup %6305  ;;  %v8641_v49 = vmul.f32 %v6304_v61, %v2926_v8  ;;  %v3007_v15 = vsel %vm1127_vm7, %v3006_v54, %v3005_v50  ;;  %v3217_v40 = vsel %vm1118_vm4, %v3216_v44, %v3215_v55  ;;  %v3030_v60 = vmul.f32 %v8635_v14, %v8635_v14 }
 0x4b2   : > { %v8646_v21 = vmul.f32 %v6306_v6, %v2927_v46  ;;  %v3016_v5 = vsel %vm3015_vm12, %v3007_v15, 0.0  ;;  %v3219_v25 = vsel %vm1121_vm5, %v3218_v4, %v3217_v40  ;;  %v3028_v12 = vmul.f32 %v8623_v19, %v8623_v19  ;;  %v10448_v40 = vld [vmem:[#allocation63_spill] sm:$0xff] }
 0x4b3   : > { %v3009_v43 = vrot.slane %v8641_v49, 2  ;;  %v3220_v8 = vrot.slane %v8641_v49, 5  ;;  %3017 = vadd.xlane.f32.xlu1 %v3016_v5  ;;  %v3031_v31 = vmul.f32 %v8641_v49, %v8641_v49  ;;  %v3049_v23 = vrot.slane %v3030_v60, 3  ;;  %v10444_v5 = vld [vmem:[#allocation59_spill] sm:$0xff]  ;;  %v10449_v60 = vld [vmem:[#allocation64_spill] sm:$0xff] }
 0x4b4   : > { %v3011_v26 = vrot.slane %v8646_v21, 1  ;;  %v3222_v46 = vrot.slane %v8646_v21, 4  ;;  %v3032_v24 = vmul.f32 %v8646_v21, %v8646_v21  ;;  %v3029_v47 = vmul.f32 %v8629_v1, %v8629_v1 }
 0x4b5   : > { %v3010_v51 = vsel %vm1109_vm1, %v3009_v43, %v3008_v38  ;;  %v3221_v61 = vsel %vm1124_vm6, %v3220_v8, %v3219_v25  ;;  %v3050_v57 = vrot.slane %v3031_v31, 2  ;;  %v3041_v54 = vrot.slane %v3026_v11, 7  ;;  %v10445_v8 = vld [vmem:[#allocation60_spill] sm:$0xff]  ;;  %v10450_v31 = vld [vmem:[#allocation65_spill] sm:$0xff]  ;;  %v10452_v25 = vld [vmem:[#allocation67_spill] sm:$0xff] }
 0x4b6   : > { %v3012_v52 = vsel %vm1112_vm2, %v3011_v26, %v3010_v51  ;;  %v3223_v0 = vsel %vm1127_vm7, %v3222_v46, %v3221_v61  ;;  %v3052_v6 = vrot.slane %v3032_v24, 1  ;;  %v3043_v38 = vrot.slane %v3027_v63, 6  ;;  %v10440_v63 = vld [vmem:[#allocation55_spill] sm:$0xff]  ;;  %v10443_v26 = vld [vmem:[#allocation58_spill] sm:$0xff]  ;;  %v10446_v46 = vld [vmem:[#allocation61_spill] sm:$0xff] }
 0x4b7   : > { %v3020_v30 = vsel %vm3019_vm13, %v3012_v52, 0.0  ;;  %3290 = vmatmul.mubr.f32.vlgmr.msra.gmra.mxu0 %v3223_v0  ;;  %3361 = vmatmul.mubr.f32.vlgmr.msra.gmra.mxu1 %v3223_v0  ;;  %v3051_v33 = vsel %vm1109_vm1, %v3050_v57, %v3049_v23  ;;  %v3042_v55 = vsel %vm1118_vm4, %v3041_v54, %v3025_v17  ;;  %v3045_v43 = vrot.slane %v3028_v12, 5  ;;  %v10447_v51 = vld [vmem:[#allocation62_spill] sm:$0xff]  ;;  %v10453_v24 = vld [vmem:[#allocation68_spill] sm:$0xff]  ;;  %v10454_v12 = vld [vmem:[#allocation69_spill] sm:$0xff] }
 0x4b8   : > { %3021 = vadd.xlane.f32.xlu0 %v3020_v30  ;;  %v3053_v50 = vsel %vm1112_vm2, %v3052_v6, %v3051_v33  ;;  %3865 = vmatpush1.msra.mxu0 %v8286_v37  ;;  %v3044_v44 = vsel %vm1121_vm5, %v3043_v38, %v3042_v55  ;;  %v3047_v4 = vrot.slane %v3029_v47, 4  ;;  %v10451_v52 = vld [vmem:[#allocation66_spill] sm:$0xff]  ;;  %v10456_v61 = vld [vmem:[#allocation71_spill] sm:$0xff]  ;;  %v10457_v23 = vld [vmem:[#allocation72_spill] sm:$0xff] }
 0x4b9   : > { %3936 = vmatpush1.msra.mxu1 %v8290_v48  ;;  %v3059_v15 = vsel %vm3019_vm13, %v3053_v50, 0.0  ;;  %3866 = vmatprep.subr.mxu0 %v8292_v32  ;;  %v3046_v11 = vsel %vm1124_vm6, %v3045_v43, %v3044_v44  ;;  %v10432_v48 = vld [vmem:[#allocation47_spill] sm:$0xff]  ;;  %v10433_v32 = vld [vmem:[#allocation48_spill] sm:$0xff]  ;;  %v10455_v30 = vld [vmem:[#allocation70_spill] sm:$0xff] }
 0x4ba   : > { %3937 = vmatprep.subr.mxu1 %v8294_v29  ;;  %3867 = vmatpush1.msra.mxu0 %v8298_v18  ;;  %v3048_v17 = vsel %vm1127_vm7, %v3047_v4, %v3046_v11  ;;  %v10434_v29 = vld [vmem:[#allocation49_spill] sm:$0xff]  ;;  %v10435_v18 = vld [vmem:[#allocation50_spill] sm:$0xff]  ;;  %v10460_v6 = vld [vmem:[#allocation75_spill] sm:$0xff] }
 0x4bb   : > { %3938 = vmatpush1.msra.mxu1 %v8300_v36  ;;  %3868 = vmatprep.subr.mxu0 %v8302_v58  ;;  %v3056_v37 = vsel %vm3015_vm12, %v3048_v17, 0.0  ;;  %v10436_v36 = vld [vmem:[#allocation51_spill] sm:$0xff]  ;;  %v10437_v58 = vld [vmem:[#allocation52_spill] sm:$0xff]  ;;  %v10458_v57 = vld [vmem:[#allocation73_spill] sm:$0xff] }
 0x4bc   : > { %3060 = vadd.xlane.f32.xlu0 %v3059_v15  ;;  %3939 = vmatprep.subr.mxu1 %v8306_v42  ;;  %v10438_v42 = vld [vmem:[#allocation53_spill] sm:$0xff]  ;;  %v10459_v0 = vld [vmem:[#allocation74_spill] sm:$0xff]  ;;  %v10461_v47 = vld [vmem:[#allocation76_spill] sm:$0xff] }
 0x4bd   : > { %3869 = vmatpush1.msra.mxu0 %v8308_v53  ;;  %3057 = vadd.xlane.f32.xlu1 %v3056_v37  ;;  %v10439_v53 = vld [vmem:[#allocation54_spill] sm:$0xff]  ;;  %v10462_v54 = vld [vmem:[#allocation77_spill] sm:$0xff]  ;;  %v10464_v38 = vld [vmem:[#allocation79_spill] sm:$0xff] }
 0x4be   : > { %3940 = vmatpush1.msra.mxu1 %v8310_v34  ;;  %3870 = vmatprep.subr.mxu0 %v8314_v59  ;;  %v10441_v34 = vld [vmem:[#allocation56_spill] sm:$0xff]  ;;  %v10442_v59 = vld [vmem:[#allocation57_spill] sm:$0xff]  ;;  %v10463_v33 = vld [vmem:[#allocation78_spill] sm:$0xff] }
 0x4bf   : > { %3941 = vmatprep.subr.mxu1 %v10432_v48  ;;  %3871 = vmatpush1.msra.mxu0 %v10433_v32  ;;  %v10465_v50 = vld [vmem:[#allocation80_spill] sm:$0xff]  ;;  %v10466_v55 = vld [vmem:[#allocation81_spill] sm:$0xff]  ;;  %v10467_v43 = vld [vmem:[#allocation82_spill] sm:$0xff] }
 0x4c0   : > { %3942 = vmatpush1.msra.mxu1 %v10434_v29  ;;  %3872 = vmatprep.subr.mxu0 %v10435_v18  ;;  %v10468_v15 = vld [vmem:[#allocation83_spill] sm:$0xff]  ;;  %v10469_v44 = vld [vmem:[#allocation84_spill] sm:$0xff]  ;;  %v10470_v4 = vld [vmem:[#allocation85_spill] sm:$0xff] }
 0x4c1   : > { %3943 = vmatprep.subr.mxu1 %v10436_v36  ;;  %3873 = vmatpush1.msra.mxu0 %v10437_v58  ;;  %v10471_v11 = vld [vmem:[#allocation86_spill] sm:$0xff]  ;;  %v10472_v17 = vld [vmem:[#allocation87_spill] sm:$0xff]  ;;  %v10473_v37 = vld [vmem:[#allocation88_spill] sm:$0xff] }
 0x4c2   : > { %3944 = vmatpush1.msra.mxu1 %v10438_v42  ;;  %3874 = vmatprep.subr.mxu0 %v10439_v53  ;;  %v10474_v48 = vld [vmem:[#allocation89_spill] sm:$0xff]  ;;  %v10475_v32 = vld [vmem:[#allocation90_spill] sm:$0xff]  ;;  %v10476_v29 = vld [vmem:[#allocation91_spill] sm:$0xff] }
 0x4c3   : > { %3945 = vmatprep.subr.mxu1 %v10440_v63  ;;  %3875 = vmatpush1.msra.mxu0 %v10441_v34  ;;  %v10477_v18 = vld [vmem:[#allocation92_spill] sm:$0xff]  ;;  %v10478_v36 = vld [vmem:[#allocation93_spill] sm:$0xff]  ;;  %v10479_v58 = vld [vmem:[#allocation94_spill] sm:$0xff]  ;;  %v10482_v63 = vmov 0.0  }
 0x4c4   : > { %3946 = vmatpush1.msra.mxu1 %v10442_v59  ;;  %3876 = vmatprep.subr.mxu0 %v10443_v26  ;;  %v10480_v42 = vld [vmem:[#allocation95_spill] sm:$0xff]  ;;  %v10481_v53 = vld [vmem:[#allocation96_spill] sm:$0xff]  ;;  %v10483_v34 = vld [vmem:[#allocation97_spill] sm:$0xff] }
 0x4c5   : > { %3947 = vmatprep.subr.mxu1 %v10444_v5  ;;  %3877 = vmatpush1.msra.mxu0 %v10445_v8 }
 0x4c6   : > { %3948 = vmatpush1.msra.mxu1 %v10446_v46  ;;  %3878 = vmatprep.subr.mxu0 %v10447_v51 }
 0x4c7   : > { %3949 = vmatprep.subr.mxu1 %v10448_v40  ;;  %3879 = vmatpush1.msra.mxu0 %v10449_v60 }
 0x4c8   : > { %3950 = vmatpush1.msra.mxu1 %v10450_v31  ;;  %3880 = vmatprep.subr.mxu0 %v10451_v52 }
 0x4c9   : > { %3951 = vmatprep.subr.mxu1 %v10452_v25  ;;  %3881 = vmatpush1.msra.mxu0 %v10453_v24 }
 0x4ca   : > { %3952 = vmatpush1.msra.mxu1 %v10454_v12  ;;  %3882 = vmatprep.subr.mxu0 %v10455_v30 }
 0x4cb   : > { %3953 = vmatprep.subr.mxu1 %v10456_v61  ;;  %3883 = vmatpush1.msra.mxu0 %v10457_v23 }
 0x4cc   : > { %3954 = vmatpush1.msra.mxu1 %v10458_v57  ;;  %3884 = vmatprep.subr.mxu0 %v10459_v0 }
 0x4cd   : > { %3955 = vmatprep.subr.mxu1 %v10460_v6  ;;  %3885 = vmatpush1.msra.mxu0 %v10461_v47 }
 0x4ce   : > { %3956 = vmatpush1.msra.mxu1 %v10462_v54  ;;  %3886 = vmatprep.subr.mxu0 %v10463_v33 }
 0x4cf   : > { %3957 = vmatprep.subr.mxu1 %v10464_v38  ;;  %3887 = vmatpush1.msra.mxu0 %v10465_v50 }
 0x4d0   : > { %3958 = vmatpush1.msra.mxu1 %v10466_v55  ;;  %3888 = vmatprep.subr.mxu0 %v10467_v43 }
 0x4d1   : > { %3959 = vmatprep.subr.mxu1 %v10468_v15  ;;  %3889 = vmatpush1.msra.mxu0 %v10469_v44 }
 0x4d2   : > { %3960 = vmatpush1.msra.mxu1 %v10470_v4  ;;  %3890 = vmatprep.subr.mxu0 %v10471_v11 }
 0x4d3   : > { %3961 = vmatprep.subr.mxu1 %v10472_v17  ;;  %3891 = vmatpush1.msra.mxu0 %v10473_v37 }
 0x4d4   : > { %3962 = vmatpush1.msra.mxu1 %v10474_v48  ;;  %3892 = vmatprep.subr.mxu0 %v10475_v32 }
 0x4d5   : > { %3963 = vmatprep.subr.mxu1 %v10476_v29  ;;  %3893 = vmatpush1.msra.mxu0 %v10477_v18 }
 0x4d6   : > { %3964 = vmatpush1.msra.mxu1 %v10478_v36  ;;  %3894 = vmatprep.subr.mxu0 %v10479_v58 }
 0x4d7   : > { %3965 = vmatprep.subr.mxu1 %v10480_v42  ;;  %3895 = vmatpush1.msra.mxu0 %v10481_v53 }
 0x4d8   : > { %3928 = vmatprep.mubr.f32.mxu0 %v10482_v63  ;;  %3966 = vmatpush1.msra.mxu1 %v10483_v34 }
 0x4d9   : > { %3999 = vmatprep.mubr.f32.mxu1 %v10482_v63 }
 0x53c   : > { %v3018_v5 = vpop.xlane.xlu1 %3017 }
 0x53d   : > { %v3023_v8 = vmul.f32 0.0078125, %v3018_v5 }
 0x53f   : > { %v3064_v52 = vmul.f32 %v3023_v8, %v3023_v8  ;;  %v3070_v0 = vrot.slane %v3023_v8, 1  ;;  %v3071_v6 = vrot.slane %v3023_v8, 2  ;;  %v3072_v47 = vrot.slane %v3023_v8, 3 }
 0x540   : > { %v3073_v54 = vrot.slane %v3023_v8, 4  ;;  %v3085_v4 = vsub.f32 %v8614_v9, %v3023_v8 }
 0x541   : > { %v3022_v59 = vpop.xlane.xlu0 %3021  ;;  %v3086_v11 = vsub.f32 %v8616_v39, %v3070_v0  ;;  %v3087_v17 = vsub.f32 %v8618_v3, %v3071_v6  ;;  %v3088_v37 = vsub.f32 %v8623_v19, %v3072_v47 }
 0x542   : > { %v3024_v26 = vmul.f32 0.0078125, %v3022_v59  ;;  %v3089_v32 = vsub.f32 %v8629_v1, %v3073_v54 }
 0x544   : > { %v3065_v51 = vmul.f32 %v3024_v26, %v3024_v26  ;;  %v3074_v61 = vrot.slane %v3024_v26, 5  ;;  %v3075_v23 = vrot.slane %v3024_v26, 6  ;;  %v3076_v57 = vrot.slane %v3024_v26, 7 }
 0x545   : > { %v3061_v46 = vpop.xlane.xlu0 %3060 }
 0x546   : > { %v3063_v40 = vmul.f32 0.0078125, %v3061_v46  ;;  %v3058_v31 = vpop.xlane.xlu1 %3057  ;;  %v3090_v38 = vsub.f32 %v8635_v14, %v3074_v61  ;;  %v3091_v50 = vsub.f32 %v8641_v49, %v3075_v23  ;;  %v3092_v55 = vsub.f32 %v8646_v21, %v3076_v57 }
 0x547   : > { %v3062_v25 = vmul.f32 0.0078125, %v3058_v31 }
 0x548   : > { %v3067_v60 = vsub.f32 %v3063_v40, %v3065_v51 }
 0x549   : > { %v3066_v12 = vsub.f32 %v3062_v25, %v3064_v52 }
 0x54a   : > { %v3094_v24 = vadd.f32 1e-05, %v3067_v60 }
 0x54b   : > { %v3093_v30 = vadd.f32 1e-05, %v3066_v12 }
 0x54c   : > { %6307 = vrsqrt.f32 %v3094_v24 }
 0x54d   : > { %6309 = vrsqrt.f32 %v3093_v30 }
 0x559   : > { %v6308_v33 = vpop.eup %6307 }
 0x55a   : > { %v3103_v43 = vrot.slane %v6308_v33, 5  ;;  %v3104_v15 = vrot.slane %v6308_v33, 6  ;;  %v3105_v44 = vrot.slane %v6308_v33, 7  ;;  %v6310_v48 = vpop.eup %6309 }
 0x55b   : > { %v3099_v49 = vrot.slane %v6310_v48, 1  ;;  %v3100_v36 = vrot.slane %v6310_v48, 2  ;;  %v3101_v21 = vrot.slane %v6310_v48, 3  ;;  %v3102_v58 = vrot.slane %v6310_v48, 4 }
 0x55c   : > { %v3119_v29 = vmul.f32 %v3103_v43, %v3090_v38  ;;  %v3120_v14 = vmul.f32 %v3104_v15, %v3091_v50  ;;  %v3121_v18 = vmul.f32 %v3105_v44, %v3092_v55  ;;  %v3114_v3 = vmul.f32 %v6310_v48, %v3085_v4  ;;  %v10485_v55 = vld [vmem:[#allocation27_spill] sm:$0xff]  ;;  %v10486_v15 = vld [vmem:[#allocation30_spill] sm:$0xff]  ;;  %v10488_v48 = vld [vmem:[#allocation32_spill] sm:$0xff] }
 0x55d   : > { %v3115_v19 = vmul.f32 %v3099_v49, %v3086_v11  ;;  %v3116_v53 = vmul.f32 %v3100_v36, %v3087_v17  ;;  %v3117_v1 = vmul.f32 %v3101_v21, %v3088_v37  ;;  %v3118_v34 = vmul.f32 %v3102_v58, %v3089_v32  ;;  %v10487_v4 = vld [vmem:[#allocation31_spill] sm:$0xff] }
 0x55e   : > { %v3127_v42 = vmul.f32 %v8487_v13, %v3119_v29  ;;  %v3128_v9 = vmul.f32 %v8487_v13, %v3120_v14  ;;  %v3129_v39 = vmul.f32 %v8487_v13, %v3121_v18  ;;  %v3122_v8 = vmul.f32 %v8487_v13, %v3114_v3 }
 0x55f   : > { %v3123_v46 = vmul.f32 %v8487_v13, %v3115_v19  ;;  %v3124_v51 = vmul.f32 %v8487_v13, %v3116_v53  ;;  %v3125_v40 = vmul.f32 %v8487_v13, %v3117_v1  ;;  %v3126_v60 = vmul.f32 %v8487_v13, %v3118_v34  ;;  %v10489_v1 = vld [vmem:[#allocation16_spill] sm:$0xff] }
 0x560   : > { %v3135_v59 = vadd.f32 %v8494_v35, %v3127_v42  ;;  %v3136_v26 = vadd.f32 %v8494_v35, %v3128_v9  ;;  %v3137_v5 = vadd.f32 %v8494_v35, %v3129_v39  ;;  %v3130_v31 = vadd.f32 %v8494_v35, %v3122_v8  ;;  %v10491_v8 = vld [vmem:[#allocation24_spill] sm:$0xff] }
 0x561   : > { %v3131_v52 = vadd.f32 %v8494_v35, %v3123_v46  ;;  %v3132_v25 = vadd.f32 %v8494_v35, %v3124_v51  ;;  %v3133_v24 = vadd.f32 %v8494_v35, %v3125_v40  ;;  %v3134_v12 = vadd.f32 %v8494_v35, %v3126_v60  ;;  %v10484_v35 = vld [vmem:[#allocation23_spill] sm:$0xff] }
 0x562   : > { %3143 = vst [vmem:[%s7005_s26 + $0x28] sm:$0x8] %v3135_v59  ;;  %3144 = vst [vmem:[%s7005_s26 + $0x30] sm:$0x8] %v3136_v26  ;;  %v10490_v26 = vld [vmem:[#allocation20_spill] sm:$0xff] }
 0x563   : > { %3145 = vst [vmem:[%s7005_s26 + $0x38] sm:$0x8] %v3137_v5  ;;  %3138 = vst [vmem:[%s7005_s26] sm:$0x8] %v3130_v31 }
 0x564   : > { %3139 = vst [vmem:[%s7005_s26 + $0x8] sm:$0x8] %v3131_v52  ;;  %3140 = vst [vmem:[%s7005_s26 + $0x10] sm:$0x8] %v3132_v25  ;;  %v10492_v52 = vld [vmem:[#allocation28_spill] sm:$0xff] }
 0x565   : > { %3141 = vst [vmem:[%s7005_s26 + $0x18] sm:$0x8] %v3133_v24  ;;  %3142 = vst [vmem:[%s7005_s26 + $0x20] sm:$0x8] %v3134_v12  ;;  %v10493_v12 = vld [vmem:[#allocation34_spill] sm:$0xff] }
 0x577   : > { %v3291_v30 = vpop.f32.mrf.mxu0  ;;  %v3362_v37 = vpop.f32.mrf.mxu1 }
 0x578   : > { %v3371_v13 = vrot.slane %v3291_v30, 4  ;;  %v3375_v61 = vrot.slane %v3291_v30, 5  ;;  %v3379_v23 = vrot.slane %v3291_v30, 6  ;;  %v3383_v57 = vrot.slane %v3291_v30, 7 }
 0x579   : > { %v3387_v0 = vrot.slane %v3291_v30, 1  ;;  %v3391_v6 = vrot.slane %v3291_v30, 2  ;;  %v3395_v47 = vrot.slane %v3291_v30, 3  ;;  %v3447_v54 = vadd.f32 %v3291_v30, %v7388_v22  ;;  %v3293_v19 = vpop.f32.mrf.mxu0 }
 0x57a   : > { %v3431_v33 = vadd.f32 %v3371_v13, %v7346_v7  ;;  %v3435_v38 = vadd.f32 %v3375_v61, %v7361_v27  ;;  %v3439_v50 = vadd.f32 %v3379_v23, %v10484_v35  ;;  %v3443_v43 = vadd.f32 %v3383_v57, %v10485_v55  ;;  %v10494_v13 = vld [vmem:[#allocation36_spill] sm:$0xff]  ;;  %v10495_v23 = vld [vmem:[#allocation17_spill] sm:$0xff] }
 0x57b   : > { %v3451_v44 = vadd.f32 %v3387_v0, %v10486_v15  ;;  %v3455_v11 = vadd.f32 %v3391_v6, %v10487_v4  ;;  %v3467_v17 = vmul.f32 0.5, %v3447_v54  ;;  %v3459_v32 = vadd.f32 %v3395_v47, %v10488_v48  ;;  %v10496_v0 = vld [vmem:[#allocation38_spill] sm:$0xff]  ;;  %v10497_v54 = vld [vmem:[#allocation21_spill] sm:$0xff] }
 0x57c   : > { %v3463_v29 = vmul.f32 0.5, %v3431_v33  ;;  %v3464_v14 = vmul.f32 0.5, %v3435_v38  ;;  %v3465_v18 = vmul.f32 0.5, %v3439_v50  ;;  %v3466_v49 = vmul.f32 0.5, %v3443_v43  ;;  %v10498_v43 = vld [vmem:[#allocation25_spill] sm:$0xff] }
 0x57d   : > { %v3468_v36 = vmul.f32 0.5, %v3451_v44  ;;  %6311 = vtanh.f32 %v3467_v17  ;;  %v3373_v21 = vrot.slane %v3362_v37, 4  ;;  %v3377_v58 = vrot.slane %v3362_v37, 5 }
 0x57e   : > { %6313 = vtanh.f32 %v3463_v29  ;;  %v3381_v42 = vrot.slane %v3362_v37, 6  ;;  %v3469_v9 = vmul.f32 0.5, %v3455_v11  ;;  %v3470_v39 = vmul.f32 0.5, %v3459_v32  ;;  %v10499_v11 = vld [vmem:[#allocation39_spill] sm:$0xff] }
 0x57f   : > { %6315 = vtanh.f32 %v3464_v14  ;;  %v3385_v3 = vrot.slane %v3362_v37, 7  ;;  %v3389_v53 = vrot.slane %v3362_v37, 1  ;;  %v3433_v34 = vadd.f32 %v3373_v21, %v10489_v1  ;;  %v10501_v29 = vld [vmem:[#allocation35_spill] sm:$0xff]  ;;  %v10502_v21 = vld [vmem:[#allocation37_spill] sm:$0xff] }
 0x580   : > { %6317 = vtanh.f32 %v3465_v18  ;;  %v3393_v59 = vrot.slane %v3362_v37, 2  ;;  %v3437_v5 = vadd.f32 %v3377_v58, %v10490_v26  ;;  %v3441_v46 = vadd.f32 %v3381_v42, %v10491_v8 }
 0x581   : > { %6319 = vtanh.f32 %v3466_v49  ;;  %v3372_v51 = vrot.slane %v3293_v19, 4  ;;  %v3376_v40 = vrot.slane %v3293_v19, 5  ;;  %v3380_v60 = vrot.slane %v3293_v19, 6 }
 0x582   : > { %6321 = vtanh.f32 %v3468_v36  ;;  %v3397_v31 = vrot.slane %v3362_v37, 3  ;;  %v3445_v25 = vadd.f32 %v3385_v3, %v10492_v52  ;;  %v3384_v24 = vrot.slane %v3293_v19, 7 }
 0x583   : > { %6323 = vtanh.f32 %v3469_v9  ;;  %v3449_v30 = vadd.f32 %v3362_v37, %v10493_v12  ;;  %v3453_v61 = vadd.f32 %v3389_v53, %v10494_v13  ;;  %v3432_v57 = vadd.f32 %v3372_v51, %v10495_v23  ;;  %v10500_v37 = vld [vmem:[#allocation33_spill] sm:$0xff]  ;;  %v10503_v53 = vld [vmem:[#allocation40_spill] sm:$0xff] }
 0x584   : > { %6325 = vtanh.f32 %v3470_v39  ;;  %v3457_v6 = vadd.f32 %v3393_v59, %v10496_v0  ;;  %v3388_v47 = vrot.slane %v3293_v19, 1  ;;  %v3436_v33 = vadd.f32 %v3376_v40, %v10497_v54  ;;  %v8805_v39 = vpop.f32.mrf.mxu1  ;;  %v10504_v59 = vld [vmem:[#allocation41_spill] sm:$0xff] }
 0x585   : > { %6327 = vtanh.f32 %v3433_v34  ;;  %v3392_v38 = vrot.slane %v3293_v19, 2  ;;  %v3396_v50 = vrot.slane %v3293_v19, 3  ;;  %v3440_v44 = vadd.f32 %v3380_v60, %v10498_v43  ;;  %v10510_v54 = vld [vmem:[#allocation45_spill] sm:$0xff] }
 0x586   : > { %6329 = vtanh.f32 %v3437_v5  ;;  %v3461_v17 = vadd.f32 %v3397_v31, %v10499_v11  ;;  %v3444_v32 = vadd.f32 %v3384_v24, %v10500_v37  ;;  %v3448_v14 = vadd.f32 %v3293_v19, %v10501_v29  ;;  %v10509_v11 = vld [vmem:[#allocation42_spill] sm:$0xff] }
 0x587   : > { %6331 = vtanh.f32 %v3441_v46  ;;  %v3495_v18 = vmul.f32 0.5, %v3432_v57  ;;  %v3452_v58 = vadd.f32 %v3388_v47, %v10502_v21  ;;  %v3496_v42 = vmul.f32 0.5, %v3436_v33 }
 0x588   : > { %6333 = vtanh.f32 %v3445_v25  ;;  %v3456_v34 = vadd.f32 %v3392_v38, %v10503_v53  ;;  %v3460_v5 = vadd.f32 %v3396_v50, %v10504_v59  ;;  %v3497_v46 = vmul.f32 0.5, %v3440_v44  ;;  %v10507_v59 = vld [vmem:[#allocation26_spill] sm:$0xff] }
 0x589   : > { %6335 = vtanh.f32 %v3449_v30  ;;  %v3498_v51 = vmul.f32 0.5, %v3444_v32  ;;  %v3499_v25 = vmul.f32 0.5, %v3448_v14  ;;  %v3378_v30 = vrot.slane %v8805_v39, 5 }
 0x58a   : > { %v6312_v36 = vpop.eup %6311  ;;  %6337 = vtanh.f32 %v3453_v61  ;;  %v3500_v57 = vmul.f32 0.5, %v3452_v58  ;;  %v3501_v38 = vmul.f32 0.5, %v3456_v34  ;;  %v3502_v50 = vmul.f32 0.5, %v3460_v5 }
 0x58b   : > { %v6314_v3 = vpop.eup %6313  ;;  %6339 = vtanh.f32 %v3457_v6  ;;  %v3374_v14 = vrot.slane %v8805_v39, 4  ;;  %v3483_v58 = vmul.f32 0.5, %v6312_v36  ;;  %v10505_v6 = vld [vmem:[#allocation22_spill] sm:$0xff]  ;;  %v3386_v5 = vrot.slane %v8805_v39, 7 }
 0x58c   : > { %v6316_v19 = vpop.eup %6315  ;;  %6341 = vtanh.f32 %v3461_v17  ;;  %v3438_v47 = vadd.f32 %v3378_v30, %v10505_v6  ;;  %v3479_v34 = vmul.f32 0.5, %v6314_v3  ;;  %v3394_v44 = vrot.slane %v8805_v39, 2  ;;  %v10506_v30 = vld [vmem:[#allocation44_spill] sm:$0xff] }
 0x58d   : > { %v6318_v31 = vpop.eup %6317  ;;  %6343 = vtanh.f32 %v3495_v18  ;;  %v3480_v32 = vmul.f32 0.5, %v6316_v19  ;;  %v3390_v18 = vrot.slane %v8805_v39, 1  ;;  %v3398_v36 = vrot.slane %v8805_v39, 3 }
 0x58e   : > { %v6320_v61 = vpop.eup %6319  ;;  %6345 = vtanh.f32 %v3496_v42  ;;  %v3382_v42 = vrot.slane %v8805_v39, 6  ;;  %v3536_v21 = vmul.f32 0.5, %v3438_v47  ;;  %v3446_v43 = vadd.f32 %v3386_v5, %v10509_v11  ;;  %v10511_v47 = vld [vmem:[#allocation46_spill] sm:$0xff] }
 0x58f   : > { %v6322_v33 = vpop.eup %6321  ;;  %6347 = vtanh.f32 %v3497_v46  ;;  %v3450_v46 = vadd.f32 %v8805_v39, %v10423_v56  ;;  %v3482_v40 = vmul.f32 0.5, %v6320_v61  ;;  %v3488_v9 = vadd.f32 0.5, %v3480_v32 }
 0x590   : > { %v6324_v17 = vpop.eup %6323  ;;  %6349 = vtanh.f32 %v3498_v51  ;;  %v3481_v51 = vmul.f32 0.5, %v6318_v31  ;;  %v3454_v49 = vadd.f32 %v3390_v18, %v10506_v30  ;;  %v3442_v53 = vadd.f32 %v3382_v42, %v10507_v59 }
 0x591   : > { %v6326_v24 = vpop.eup %6325  ;;  %6351 = vtanh.f32 %v3499_v25  ;;  %v3485_v6 = vmul.f32 0.5, %v6324_v17  ;;  %v3539_v31 = vmul.f32 0.5, %v3450_v46  ;;  %v3487_v61 = vadd.f32 0.5, %v3479_v34 }
 0x592   : > { %v6328_v60 = vpop.eup %6327  ;;  %6353 = vtanh.f32 %v3500_v57  ;;  %v3484_v57 = vmul.f32 0.5, %v6322_v33  ;;  %v3486_v29 = vmul.f32 0.5, %v6326_v24  ;;  %v3489_v32 = vadd.f32 0.5, %v3481_v51 }
 0x593   : > { %v6330_v19 = vpop.eup %6329  ;;  %6355 = vtanh.f32 %v3501_v38  ;;  %v10508_v38 = vld [vmem:[#allocation18_spill] sm:$0xff]  ;;  %v3458_v18 = vadd.f32 %v3394_v44, %v10510_v54  ;;  %v3490_v33 = vadd.f32 0.5, %v3482_v40  ;;  %v3540_v17 = vmul.f32 0.5, %v3454_v49 }
 0x594   : > { %v6332_v25 = vpop.eup %6331  ;;  %6357 = vtanh.f32 %v3502_v50  ;;  %v3434_v37 = vadd.f32 %v3374_v14, %v10508_v38  ;;  %v3491_v50 = vadd.f32 0.5, %v3483_v58  ;;  %v3462_v59 = vadd.f32 %v3398_v36, %v10511_v47 }
 0x595   : > { %v6334_v3 = vpop.eup %6333  ;;  %v3492_v46 = vadd.f32 0.5, %v3484_v57  ;;  %v3493_v14 = vadd.f32 0.5, %v3485_v6  ;;  %v3537_v38 = vmul.f32 0.5, %v3442_v53  ;;  %6359 = vtanh.f32 %v3536_v21 }
 0x596   : > { %v6336_v56 = vpop.eup %6335  ;;  %v3535_v42 = vmul.f32 0.5, %v3434_v37  ;;  %v3494_v11 = vadd.f32 0.5, %v3486_v29  ;;  %v3600_v34 = vmul.f32 %v6330_v19, %v3488_v9  ;;  %6361 = vtanh.f32 %v3539_v31 }
 0x597   : > { %v8829_v39 = vpop.eup %6337  ;;  %v3538_v58 = vmul.f32 0.5, %v3446_v43  ;;  %v3601_v54 = vmul.f32 %v6332_v25, %v3489_v32  ;;  %v3541_v0 = vmul.f32 0.5, %v3458_v18  ;;  %v3599_v40 = vmul.f32 %v6328_v60, %v3487_v61 }
 0x598   : > { %v8832_v30 = vpop.eup %6339  ;;  %6363 = vtanh.f32 %v3535_v42  ;;  %v3542_v36 = vmul.f32 0.5, %v3462_v59  ;;  %v3603_v53 = vmul.f32 %v6336_v56, %v3491_v50  ;;  %v3602_v43 = vmul.f32 %v6334_v3, %v3490_v33 }
 0x599   : > { %v8835_v24 = vpop.eup %6341  ;;  %6365 = vtanh.f32 %v3540_v17  ;;  %v10512_v32 = vrot.slane %v8578_v62, 7  ;;  %v10513_v61 = vrot.slane %v8582_v28, 7  ;;  %v10515_v62 = vrot.slane %v8591_v16, 7 }
 0x59a   : > { %v6344_v5 = vpop.eup %6343  ;;  %6367 = vtanh.f32 %v3537_v38  ;;  %v10516_v28 = vrot.slane %v8597_v45, 7  ;;  %v10518_v16 = vrot.slane %v8606_v20, 7 }
 0x59b   : > { %v6346_v51 = vpop.eup %6345  ;;  %v3511_v44 = vmul.f32 0.5, %v6344_v5  ;;  %6369 = vtanh.f32 %v3538_v58 }
 0x59c   : > { %v6348_v49 = vpop.eup %6347  ;;  %v3512_v37 = vmul.f32 0.5, %v6346_v51  ;;  %6371 = vtanh.f32 %v3541_v0 }
 0x59d   : > { %v6350_v47 = vpop.eup %6349  ;;  %v3513_v57 = vmul.f32 0.5, %v6348_v49  ;;  %v3519_v6 = vadd.f32 0.5, %v3511_v44  ;;  %6373 = vtanh.f32 %v3542_v36 }
 0x59e   : > { %v6352_v21 = vpop.eup %6351  ;;  %v3514_v29 = vmul.f32 0.5, %v6350_v47  ;;  %v3520_v9 = vadd.f32 0.5, %v3512_v37  ;;  %v10514_v47 = vrot.slane %v8586_v41, 7  ;;  %v10517_v41 = vrot.slane %v8602_v10, 7 }
 0x59f   : > { %v6354_v19 = vpop.eup %6353  ;;  %v3515_v31 = vmul.f32 0.5, %v6352_v21  ;;  %v3521_v25 = vadd.f32 0.5, %v3513_v57  ;;  %v3591_v18 = vmul.f32 %v10512_v32, %v3519_v6  ;;  %v3604_v57 = vmul.f32 %v8829_v39, %v3492_v46 }
 0x5a0   : > { %v6356_v17 = vpop.eup %6355  ;;  %v3516_v60 = vmul.f32 0.5, %v6354_v19  ;;  %v3522_v59 = vadd.f32 0.5, %v3514_v29  ;;  %v3592_v42 = vmul.f32 %v10513_v61, %v3520_v9  ;;  %v3605_v21 = vmul.f32 %v8832_v30, %v3493_v14 }
 0x5a1   : > { %v6358_v56 = vpop.eup %6357  ;;  %v3517_v38 = vmul.f32 0.5, %v6356_v17  ;;  %v3523_v50 = vadd.f32 0.5, %v3515_v31  ;;  %v3593_v3 = vmul.f32 %v10514_v47, %v3521_v25  ;;  %v8843_v33 = vadd.f32 %v3599_v40, %v3591_v18 }
 0x5a2   : > { %v3518_v5 = vmul.f32 0.5, %v6358_v56  ;;  %v3524_v58 = vadd.f32 0.5, %v3516_v60  ;;  %v3594_v0 = vmul.f32 %v10515_v62, %v3522_v59  ;;  %v8847_v51 = vadd.f32 %v3600_v34, %v3592_v42  ;;  %v6360_v45 = vpop.eup %6359 }
 0x5a3   : > { %v3525_v44 = vadd.f32 0.5, %v3517_v38  ;;  %v3595_v49 = vmul.f32 %v10516_v28, %v3523_v50  ;;  %v8851_v37 = vadd.f32 %v3601_v54, %v3593_v3  ;;  %6375 = vtanh.f32 %v8843_v33  ;;  %v6362_v39 = vpop.eup %6361 }
 0x5a4   : > { %v3526_v36 = vadd.f32 0.5, %v3518_v5  ;;  %v3596_v40 = vmul.f32 %v10517_v41, %v3524_v58  ;;  %v8857_v6 = vadd.f32 %v3602_v43, %v3594_v0  ;;  %6377 = vtanh.f32 %v8847_v51 }
 0x5a5   : > { %v3597_v34 = vmul.f32 %v10518_v16, %v3525_v44  ;;  %v8862_v29 = vadd.f32 %v3603_v53, %v3595_v49  ;;  %v10519_v54 = vrot.slane %v8609_v2, 7  ;;  %6379 = vtanh.f32 %v8851_v37  ;;  %v6364_v20 = vpop.eup %6363 }
 0x5a6   : > { %v8867_v19 = vadd.f32 %v3604_v57, %v3596_v40  ;;  %v3606_v10 = vmul.f32 %v8835_v24, %v3494_v11  ;;  %v6366_v14 = vpop.eup %6365  ;;  %v3551_v43 = vmul.f32 0.5, %v6364_v20  ;;  %v3552_v31 = vmul.f32 0.5, %v6360_v45 }
 0x5a7   : > { %v3598_v9 = vmul.f32 %v10519_v54, %v3526_v36  ;;  %v8871_v46 = vadd.f32 %v3605_v21, %v3597_v34  ;;  %6381 = vtanh.f32 %v8862_v29  ;;  %v6368_v2 = vpop.eup %6367  ;;  %v3555_v32 = vmul.f32 0.5, %v6362_v39 }
 0x5a8   : > { %6383 = vtanh.f32 %v8857_v6  ;;  %v6370_v53 = vpop.eup %6369  ;;  %v3553_v25 = vmul.f32 0.5, %v6368_v2  ;;  %v3559_v17 = vadd.f32 0.5, %v3551_v43  ;;  %v3556_v60 = vmul.f32 0.5, %v6366_v14 }
 0x5a9   : > { %v8875_v30 = vadd.f32 %v3606_v10, %v3598_v9  ;;  %6385 = vtanh.f32 %v8867_v19  ;;  %v6372_v11 = vpop.eup %6371  ;;  %v3554_v18 = vmul.f32 0.5, %v6370_v53  ;;  %v3560_v56 = vadd.f32 0.5, %v3552_v31 }
 0x5aa   : > { %6387 = vtanh.f32 %v8871_v46  ;;  %v6374_v24 = vpop.eup %6373  ;;  %v3557_v61 = vmul.f32 0.5, %v6372_v11  ;;  %v3561_v47 = vadd.f32 0.5, %v3553_v25  ;;  %v3563_v3 = vadd.f32 0.5, %v3555_v32 }
 0x5ab   : > { %6389 = vtanh.f32 %v8875_v30  ;;  %v3558_v42 = vmul.f32 0.5, %v6374_v24  ;;  %v3562_v58 = vadd.f32 0.5, %v3554_v18  ;;  %v3564_v0 = vadd.f32 0.5, %v3556_v60 }
 0x5ac   : > { %v3565_v36 = vadd.f32 0.5, %v3557_v61 }
 0x5ad   : > { %v3566_v41 = vadd.f32 0.5, %v3558_v42 }
 0x5b0   : > { %v6376_v59 = vpop.eup %6375 }
 0x5b1   : > { %v8880_v38 = vmul.f32 %v6376_v59, %v3559_v17  ;;  %v6378_v50 = vpop.eup %6377 }
 0x5b2   : > { %v6380_v5 = vpop.eup %6379  ;;  %v8882_v62 = vmul.f32 %v6378_v50, %v3560_v56 }
 0x5b3   : > { %v3849_v44 = vrot.slane %v8880_v38, 4  ;;  %v8885_v49 = vmul.f32 %v6380_v5, %v3561_v47  ;;  %v3664_v40 = vmul.f32 %v8880_v38, %v8880_v38 }
 0x5b4   : > { %v6382_v28 = vpop.eup %6381  ;;  %v3639_v16 = vrot.slane %v8882_v62, 7  ;;  %v3850_v21 = vrot.slane %v8882_v62, 3  ;;  %v3665_v45 = vmul.f32 %v8882_v62, %v8882_v62 }
 0x5b5   : > { %v6384_v57 = vpop.eup %6383  ;;  %v8890_v34 = vmul.f32 %v6382_v28, %v3563_v3  ;;  %v3641_v10 = vrot.slane %v8885_v49, 6  ;;  %v3852_v39 = vrot.slane %v8885_v49, 2  ;;  %v3666_v20 = vmul.f32 %v8885_v49, %v8885_v49 }
 0x5b6   : > { %v6386_v54 = vpop.eup %6385  ;;  %v8895_v9 = vmul.f32 %v6384_v57, %v3562_v58  ;;  %v3640_v2 = vsel %vm1121_vm5, %v3639_v16, %v8880_v38  ;;  %v3851_v11 = vsel %vm1109_vm1, %v3850_v21, %v3849_v44 }
 0x5b7   : > { %v6388_v14 = vpop.eup %6387  ;;  %v8903_v53 = vmul.f32 %v6386_v54, %v3564_v0  ;;  %v3645_v43 = vrot.slane %v8890_v34, 4  ;;  %v3642_v31 = vsel %vm1124_vm6, %v3641_v10, %v3640_v2  ;;  %v3853_v18 = vsel %vm1112_vm2, %v3852_v39, %v3851_v11 }
 0x5b8   : > { %v6390_v24 = vpop.eup %6389  ;;  %v3643_v25 = vrot.slane %v8895_v9, 5  ;;  %v8909_v32 = vmul.f32 %v6388_v14, %v3565_v36  ;;  %v3854_v59 = vrot.slane %v8895_v9, 1  ;;  %v3667_v47 = vmul.f32 %v8895_v9, %v8895_v9 }
 0x5b9   : > { %v8912_v17 = vmul.f32 %v6390_v24, %v3566_v41  ;;  %v3646_v60 = vrot.slane %v8903_v53, 3  ;;  %v3857_v61 = vrot.slane %v8903_v53, 7  ;;  %v3680_v41 = vrot.slane %v3665_v45, 7 }
 0x5ba   : > { %v3644_v42 = vsel %vm1127_vm7, %v3643_v25, %v3642_v31  ;;  %v3648_v56 = vrot.slane %v8909_v32, 2  ;;  %v3859_v50 = vrot.slane %v8909_v32, 6  ;;  %v3855_v0 = vsel %vm1115_vm3, %v3854_v59, %v3853_v18 }
 0x5bb   : > { %v3655_v3 = vsel %vm3654_vm14, %v3644_v42, 0.0  ;;  %v3647_v5 = vsel %vm1109_vm1, %v3646_v60, %v3645_v43  ;;  %v3650_v58 = vrot.slane %v8912_v17, 1  ;;  %v3856_v28 = vsel %vm1118_vm4, %v8890_v34, %v3855_v0  ;;  %v8963_v0 = vld [vmem:[#allocation9 + $0x1c8] sm:$0xff] }
 0x5bc   : > { %3656 = vadd.xlane.f32.xlu1 %v3655_v3  ;;  %v3649_v44 = vsel %vm1112_vm2, %v3648_v56, %v3647_v5  ;;  %v3861_v36 = vrot.slane %v8912_v17, 5  ;;  %v3858_v16 = vsel %vm1121_vm5, %v3857_v61, %v3856_v28  ;;  %v3682_v21 = vrot.slane %v3666_v20, 6  ;;  %v8955_v3 = vld [vmem:[#allocation9 + $0x1f8] sm:$0xff]  ;;  %v8957_v5 = vld [vmem:[#allocation9 + $0x1e0] sm:$0xff] }
 0x5bd   : > { %v3651_v57 = vsel %vm1115_vm3, %v3650_v58, %v3649_v44  ;;  %v3684_v54 = vrot.slane %v3667_v47, 5  ;;  %v3860_v39 = vsel %vm1124_vm6, %v3859_v50, %v3858_v16  ;;  %v3681_v14 = vsel %vm1121_vm5, %v3680_v41, %v3664_v40  ;;  %v8953_v47 = vld [vmem:[#allocation9 + $0x1e8] sm:$0xff]  ;;  %4574 = vmatprep.subr.mxu1 %v8955_v3  ;;  %v8961_v58 = vld [vmem:[#allocation9 + $0x1f0] sm:$0xff]  ;;  %v8965_v44 = vld [vmem:[#allocation9 + $0x1d8] sm:$0xff] }
 0x5be   : > { %v3659_v10 = vsel %vm3658_vm15, %v3651_v57, 0.0  ;;  %v3668_v2 = vmul.f32 %v8890_v34, %v8890_v34  ;;  %v3862_v43 = vsel %vm1127_vm7, %v3861_v36, %v3860_v39  ;;  %v3683_v45 = vsel %vm1124_vm6, %v3682_v21, %v3681_v14  ;;  %4503 = vmatprep.subr.mxu0 %v8953_v47  ;;  %v8969_v28 = vld [vmem:[#allocation9 + $0x1c0] sm:$0xff]  ;;  %v8971_v36 = vld [vmem:[#allocation9 + $0x1d0] sm:$0xff]  ;;  %v8973_v41 = vld [vmem:[#allocation9 + $0x1a8] sm:$0xff] }
 0x5bf   : > { %3660 = vadd.xlane.f32.xlu0 %v3659_v10  ;;  %v3669_v11 = vmul.f32 %v8903_v53, %v8903_v53  ;;  %v3670_v20 = vmul.f32 %v8909_v32, %v8909_v32  ;;  %3929 = vmatmul.mubr.f32.vlgmr.msra.gmra.mxu0 %v3862_v43  ;;  %v3685_v24 = vsel %vm1127_vm7, %v3684_v54, %v3683_v45  ;;  %v8977_v57 = vld [vmem:[#allocation9 + $0x1b8] sm:$0xff]  ;;  %v8979_v16 = vld [vmem:[#allocation9 + $0x1a0] sm:$0xff]  ;;  %v8981_v21 = vld [vmem:[#allocation9 + $0x1b0] sm:$0xff] }
 0x5c0   : > { %4000 = vmatmul.mubr.f32.vlgmr.msra.gmra.mxu1 %v3862_v43  ;;  %v3671_v40 = vmul.f32 %v8912_v17, %v8912_v17  ;;  %v3695_v31 = vsel %vm3654_vm14, %v3685_v24, 0.0  ;;  %v3686_v25 = vrot.slane %v3668_v2, 4  ;;  %4567 = vmatprep.mubr.f32.mxu0 %v10482_v63  ;;  %v8985_v54 = vld [vmem:[#allocation9 + $0x188] sm:$0xff]  ;;  %v8987_v10 = vld [vmem:[#allocation9 + $0x198] sm:$0xff]  ;;  %v8991_v39 = vld [vmem:[#allocation9 + $0x180] sm:$0xff] }
 0x5c1   : > { %v3687_v18 = vrot.slane %v3669_v11, 3  ;;  %v3689_v60 = vrot.slane %v3670_v20, 2  ;;  %4638 = vmatprep.mubr.f32.mxu1 %v10482_v63  ;;  %3696 = vadd.xlane.f32.xlu1 %v3695_v31  ;;  %10520 = vst [vmem:[#allocation98_spill] sm:$0xff] %v8991_v39  ;;  %v8993_v14 = vld [vmem:[#allocation9 + $0x190] sm:$0xff]  ;;  %v8997_v2 = vld [vmem:[#allocation9 + $0x168] sm:$0xff]  ;;  %v8999_v43 = vld [vmem:[#allocation9 + $0x178] sm:$0xff] }
 0x5c2   : > { %v3691_v61 = vrot.slane %v3671_v40, 1  ;;  %4504 = vmatpush1.msra.mxu0 %v8957_v5  ;;  %4575 = vmatpush1.msra.mxu1 %v8961_v58  ;;  %10521 = vst [vmem:[#allocation99_spill] sm:$0xff] %v8993_v14  ;;  %10522 = vst [vmem:[#allocation100_spill] sm:$0xff] %v8997_v2  ;;  %v9003_v45 = vld [vmem:[#allocation9 + $0x160] sm:$0xff]  ;;  %v9005_v11 = vld [vmem:[#allocation9 + $0x170] sm:$0xff] }
 0x5c3   : > { %v3688_v59 = vsel %vm1109_vm1, %v3687_v18, %v3686_v25  ;;  %4505 = vmatprep.subr.mxu0 %v8963_v0  ;;  %4576 = vmatprep.subr.mxu1 %v8965_v44  ;;  %10523 = vst [vmem:[#allocation101_spill] sm:$0xff] %v8999_v43  ;;  %10524 = vst [vmem:[#allocation102_spill] sm:$0xff] %v9003_v45  ;;  %v9009_v20 = vld [vmem:[#allocation9 + $0x148] sm:$0xff]  ;;  %v9011_v24 = vld [vmem:[#allocation9 + $0x158] sm:$0xff] }
 0x5c4   : > { %v3690_v42 = vsel %vm1112_vm2, %v3689_v60, %v3688_v59  ;;  %4506 = vmatpush1.msra.mxu0 %v8969_v28  ;;  %4577 = vmatpush1.msra.mxu1 %v8971_v36  ;;  %10525 = vst [vmem:[#allocation47_spill] sm:$0xff] %v9005_v11  ;;  %10526 = vst [vmem:[#allocation48_spill] sm:$0xff] %v9009_v20  ;;  %v9015_v40 = vld [vmem:[#allocation9 + $0x140] sm:$0xff]  ;;  %v9017_v31 = vld [vmem:[#allocation9 + $0x150] sm:$0xff] }
 0x5c5   : > { %v3692_v56 = vsel %vm1115_vm3, %v3691_v61, %v3690_v42  ;;  %4507 = vmatprep.subr.mxu0 %v8973_v41  ;;  %4578 = vmatprep.subr.mxu1 %v8977_v57  ;;  %10527 = vst [vmem:[#allocation49_spill] sm:$0xff] %v9011_v24  ;;  %10528 = vst [vmem:[#allocation50_spill] sm:$0xff] %v9015_v40  ;;  %v9021_v25 = vld [vmem:[#allocation9 + $0x128] sm:$0xff]  ;;  %v9023_v18 = vld [vmem:[#allocation9 + $0x138] sm:$0xff] }
 0x5c6   : > { %v3698_v50 = vsel %vm3658_vm15, %v3692_v56, 0.0  ;;  %4508 = vmatpush1.msra.mxu0 %v8979_v16  ;;  %4579 = vmatpush1.msra.mxu1 %v8981_v21  ;;  %10529 = vst [vmem:[#allocation51_spill] sm:$0xff] %v9017_v31  ;;  %10530 = vst [vmem:[#allocation52_spill] sm:$0xff] %v9021_v25  ;;  %v9027_v60 = vld [vmem:[#allocation9 + $0x120] sm:$0xff]  ;;  %v9029_v59 = vld [vmem:[#allocation9 + $0x130] sm:$0xff] }
 0x5c7   : > { %3699 = vadd.xlane.f32.xlu0 %v3698_v50  ;;  %4509 = vmatprep.subr.mxu0 %v8985_v54  ;;  %10531 = vst [vmem:[#allocation53_spill] sm:$0xff] %v9023_v18  ;;  %10532 = vst [vmem:[#allocation54_spill] sm:$0xff] %v9027_v60  ;;  %v9033_v61 = vld [vmem:[#allocation9 + $0x108] sm:$0xff]  ;;  %v9035_v42 = vld [vmem:[#allocation9 + $0x118] sm:$0xff] }
 0x5c8   : > { %4580 = vmatprep.subr.mxu1 %v8987_v10  ;;  %4510 = vmatpush1.msra.mxu0 %v8991_v39  ;;  %10533 = vst [vmem:[#allocation55_spill] sm:$0xff] %v9029_v59  ;;  %10534 = vst [vmem:[#allocation56_spill] sm:$0xff] %v9033_v61  ;;  %v9039_v56 = vld [vmem:[#allocation9 + $0x100] sm:$0xff]  ;;  %v9041_v50 = vld [vmem:[#allocation9 + $0x110] sm:$0xff] }
 0x5c9   : > { %4581 = vmatpush1.msra.mxu1 %v8993_v14  ;;  %4511 = vmatprep.subr.mxu0 %v8997_v2  ;;  %10535 = vst [vmem:[#allocation57_spill] sm:$0xff] %v9035_v42  ;;  %10536 = vst [vmem:[#allocation58_spill] sm:$0xff] %v9039_v56  ;;  %v9045_v63 = vld [vmem:[#allocation9 + $0xe8] sm:$0xff] }
 0x5ca   : > { %4582 = vmatprep.subr.mxu1 %v8999_v43  ;;  %4512 = vmatpush1.msra.mxu0 %v9003_v45  ;;  %10537 = vst [vmem:[#allocation59_spill] sm:$0xff] %v9041_v50  ;;  %10538 = vst [vmem:[#allocation60_spill] sm:$0xff] %v9045_v63 }
 0x5cb   : > { %4583 = vmatpush1.msra.mxu1 %v9005_v11  ;;  %4513 = vmatprep.subr.mxu0 %v9009_v20 }
 0x5cc   : > { %4584 = vmatprep.subr.mxu1 %v9011_v24  ;;  %4514 = vmatpush1.msra.mxu0 %v9015_v40  ;;  %v9047_v40 = vld [vmem:[#allocation9 + $0xf8] sm:$0xff]  ;;  %v9093_v24 = vld [vmem:[#allocation9 + $0x68] sm:$0xff] }
 0x5cd   : > { %4585 = vmatpush1.msra.mxu1 %v9017_v31  ;;  %4515 = vmatprep.subr.mxu0 %v9021_v25  ;;  %10539 = vst [vmem:[#allocation61_spill] sm:$0xff] %v9047_v40  ;;  %v9051_v31 = vld [vmem:[#allocation9 + $0xe0] sm:$0xff]  ;;  %v9053_v25 = vld [vmem:[#allocation9 + $0xf0] sm:$0xff]  ;;  %10554 = vst [vmem:[#allocation76_spill] sm:$0xff] %v9093_v24 }
 0x5ce   : > { %4586 = vmatprep.subr.mxu1 %v9023_v18  ;;  %4516 = vmatpush1.msra.mxu0 %v9027_v60  ;;  %10540 = vst [vmem:[#allocation62_spill] sm:$0xff] %v9051_v31  ;;  %10541 = vst [vmem:[#allocation63_spill] sm:$0xff] %v9053_v25  ;;  %v9057_v18 = vld [vmem:[#allocation9 + $0xc8] sm:$0xff]  ;;  %v9059_v60 = vld [vmem:[#allocation9 + $0xd8] sm:$0xff] }
 0x5cf   : > { %4587 = vmatpush1.msra.mxu1 %v9029_v59  ;;  %4517 = vmatprep.subr.mxu0 %v9033_v61  ;;  %10542 = vst [vmem:[#allocation64_spill] sm:$0xff] %v9057_v18  ;;  %10543 = vst [vmem:[#allocation65_spill] sm:$0xff] %v9059_v60  ;;  %v9063_v59 = vld [vmem:[#allocation9 + $0xc0] sm:$0xff]  ;;  %v9065_v61 = vld [vmem:[#allocation9 + $0xd0] sm:$0xff] }
 0x5d0   : > { %4588 = vmatprep.subr.mxu1 %v9035_v42  ;;  %4518 = vmatpush1.msra.mxu0 %v9039_v56  ;;  %10544 = vst [vmem:[#allocation66_spill] sm:$0xff] %v9063_v59  ;;  %10545 = vst [vmem:[#allocation67_spill] sm:$0xff] %v9065_v61  ;;  %v9069_v42 = vld [vmem:[#allocation9 + $0xa8] sm:$0xff]  ;;  %v9071_v56 = vld [vmem:[#allocation9 + $0xb8] sm:$0xff] }
 0x5d1   : > { %4589 = vmatpush1.msra.mxu1 %v9041_v50  ;;  %4519 = vmatprep.subr.mxu0 %v9045_v63  ;;  %10546 = vst [vmem:[#allocation68_spill] sm:$0xff] %v9069_v42  ;;  %10547 = vst [vmem:[#allocation69_spill] sm:$0xff] %v9071_v56  ;;  %v9075_v50 = vld [vmem:[#allocation9 + $0xa0] sm:$0xff]  ;;  %v9077_v63 = vld [vmem:[#allocation9 + $0xb0] sm:$0xff] }
 0x5d2   : > { %4590 = vmatprep.subr.mxu1 %v9047_v40  ;;  %4520 = vmatpush1.msra.mxu0 %v9051_v31  ;;  %10548 = vst [vmem:[#allocation70_spill] sm:$0xff] %v9075_v50  ;;  %10549 = vst [vmem:[#allocation71_spill] sm:$0xff] %v9077_v63  ;;  %v9081_v31 = vld [vmem:[#allocation9 + $0x88] sm:$0xff] }
 0x5d3   : > { %4591 = vmatpush1.msra.mxu1 %v9053_v25  ;;  %4521 = vmatprep.subr.mxu0 %v9057_v18  ;;  %10550 = vst [vmem:[#allocation72_spill] sm:$0xff] %v9081_v31  ;;  %v9083_v25 = vld [vmem:[#allocation9 + $0x98] sm:$0xff]  ;;  %v9087_v18 = vld [vmem:[#allocation9 + $0x80] sm:$0xff] }
 0x5d4   : > { %4592 = vmatprep.subr.mxu1 %v9059_v60  ;;  %4522 = vmatpush1.msra.mxu0 %v9063_v59  ;;  %10551 = vst [vmem:[#allocation73_spill] sm:$0xff] %v9083_v25  ;;  %10552 = vst [vmem:[#allocation74_spill] sm:$0xff] %v9087_v18  ;;  %v9089_v60 = vld [vmem:[#allocation9 + $0x90] sm:$0xff]  ;;  %v9095_v59 = vld [vmem:[#allocation9 + $0x78] sm:$0xff] }
 0x5d5   : > { %4593 = vmatpush1.msra.mxu1 %v9065_v61  ;;  %4523 = vmatprep.subr.mxu0 %v9069_v42  ;;  %10553 = vst [vmem:[#allocation75_spill] sm:$0xff] %v9089_v60  ;;  %10555 = vst [vmem:[#allocation77_spill] sm:$0xff] %v9095_v59  ;;  %v9101_v42 = vld [vmem:[#allocation9 + $0x60] sm:$0xff] }
 0x5d6   : > { %4594 = vmatprep.subr.mxu1 %v9071_v56  ;;  %4524 = vmatpush1.msra.mxu0 %v9075_v50  ;;  %10556 = vst [vmem:[#allocation78_spill] sm:$0xff] %v9101_v42  ;;  %v9103_v56 = vld [vmem:[#allocation9 + $0x70] sm:$0xff]  ;;  %v9107_v50 = vld [vmem:[#allocation9 + $0x48] sm:$0xff] }
 0x5d7   : > { %4595 = vmatpush1.msra.mxu1 %v9077_v63  ;;  %4525 = vmatprep.subr.mxu0 %v9081_v31  ;;  %10557 = vst [vmem:[#allocation79_spill] sm:$0xff] %v9103_v56  ;;  %10558 = vst [vmem:[#allocation80_spill] sm:$0xff] %v9107_v50  ;;  %v9109_v63 = vld [vmem:[#allocation9 + $0x58] sm:$0xff]  ;;  %v9117_v31 = vld [vmem:[#allocation9 + $0x50] sm:$0xff] }
 0x5d8   : > { %4596 = vmatprep.subr.mxu1 %v9083_v25  ;;  %4526 = vmatpush1.msra.mxu0 %v9087_v18  ;;  %10559 = vst [vmem:[#allocation81_spill] sm:$0xff] %v9109_v63  ;;  %10561 = vst [vmem:[#allocation83_spill] sm:$0xff] %v9117_v31  ;;  %v9119_v18 = vld [vmem:[#allocation9 + $0x28] sm:$0xff] }
 0x5d9   : > { %4597 = vmatpush1.msra.mxu1 %v9089_v60  ;;  %4527 = vmatprep.subr.mxu0 %v9093_v24  ;;  %10562 = vst [vmem:[#allocation84_spill] sm:$0xff] %v9119_v18  ;;  %v9127_v24 = vld [vmem:[#allocation9 + $0x20] sm:$0xff] }
 0x5da   : > { %4598 = vmatprep.subr.mxu1 %v9095_v59  ;;  %4528 = vmatpush1.msra.mxu0 %v9101_v42  ;;  %v9125_v59 = vld [vmem:[#allocation9 + $0x38] sm:$0xff]  ;;  %10564 = vst [vmem:[#allocation86_spill] sm:$0xff] %v9127_v24  ;;  %v9132_v42 = vld [vmem:[#allocation9 + $0x8] sm:$0xff] }
 0x5db   : > { %4599 = vmatpush1.msra.mxu1 %v9103_v56  ;;  %4529 = vmatprep.subr.mxu0 %v9107_v50  ;;  %10563 = vst [vmem:[#allocation85_spill] sm:$0xff] %v9125_v59  ;;  %v9130_v56 = vld [vmem:[#allocation9 + $0x30] sm:$0xff]  ;;  %10566 = vst [vmem:[#allocation88_spill] sm:$0xff] %v9132_v42  ;;  %v9138_v50 = vld [vmem:[#allocation9] sm:$0xff] }
 0x5dc   : > { %4600 = vmatprep.subr.mxu1 %v9109_v63  ;;  %10565 = vst [vmem:[#allocation87_spill] sm:$0xff] %v9130_v56  ;;  %10568 = vst [vmem:[#allocation90_spill] sm:$0xff] %v9138_v50 }
 0x5dd   : > { %4601 = vmatpush1.msra.mxu1 %v9117_v31 }
 0x5de   : > { %4602 = vmatprep.subr.mxu1 %v9125_v59 }
 0x5df   : > { %4603 = vmatpush1.msra.mxu1 %v9130_v56 }
 0x645   : > { %v3657_v40 = vpop.xlane.xlu1 %3656 }
 0x646   : > { %v9097_v61 = vmul.f32 0.0078125, %v3657_v40  ;;  %v9113_v40 = vld [vmem:[#allocation9 + $0x40] sm:$0xff] }
 0x647   : > { %10560 = vst [vmem:[#allocation82_spill] sm:$0xff] %v9113_v40  ;;  %4530 = vmatpush1.msra.mxu0 %v9113_v40 }
 0x648   : > { %v3661_v20 = vpop.xlane.xlu0 %3660  ;;  %v3703_v60 = vmul.f32 %v9097_v61, %v9097_v61  ;;  %4531 = vmatprep.subr.mxu0 %v9119_v18  ;;  %v3709_v56 = vrot.slane %v9097_v61, 1 }
 0x649   : > { %v3663_v45 = vmul.f32 0.0078125, %v3661_v20  ;;  %4532 = vmatpush1.msra.mxu0 %v9127_v24  ;;  %v9142_v20 = vld [vmem:[#allocation9 + $0x10] sm:$0xff] }
 0x64a   : > { %v3697_v25 = vpop.xlane.xlu1 %3696  ;;  %10569 = vst [vmem:[#allocation91_spill] sm:$0xff] %v9142_v20  ;;  %4533 = vmatprep.subr.mxu0 %v9132_v42  ;;  %v3710_v42 = vrot.slane %v9097_v61, 2 }
 0x64b   : > { %v3701_v11 = vmul.f32 0.0078125, %v3697_v25  ;;  %v9136_v25 = vld [vmem:[#allocation9 + $0x18] sm:$0xff]  ;;  %4534 = vmatpush1.msra.mxu0 %v9138_v50 }
 0x64c   : > { %10567 = vst [vmem:[#allocation89_spill] sm:$0xff] %v9136_v25  ;;  %4604 = vmatprep.subr.mxu1 %v9136_v25  ;;  %5142 = vmatprep.subr.mxu0 %v8953_v47  ;;  %v3724_v25 = vsub.f32 %v8880_v38, %v9097_v61  ;;  %v9162_v38 = vld [vmem:[%s9878_s4] ss:$0 sm:$0xff] }
 0x64d   : > { %v3705_v43 = vsub.f32 %v3701_v11, %v3703_v60  ;;  %v3704_v11 = vmul.f32 %v3663_v45, %v3663_v45  ;;  %4605 = vmatpush1.msra.mxu1 %v9142_v20  ;;  %v3726_v20 = vsub.f32 %v8885_v49, %v3710_v42 }
 0x64e   : > { %5213 = vmatprep.subr.mxu1 %v8955_v3  ;;  %v3713_v3 = vrot.slane %v3663_v45, 5 }
 0x64f   : > { %v3732_v40 = vadd.f32 1e-05, %v3705_v43 }
 0x650   : > { %v3700_v63 = vpop.xlane.xlu0 %3699 }
 0x651   : > { %v3702_v60 = vmul.f32 0.0078125, %v3700_v63  ;;  %6391 = vrsqrt.f32 %v3732_v40  ;;  %v3711_v63 = vrot.slane %v9097_v61, 3  ;;  %v3725_v40 = vsub.f32 %v8882_v62, %v3709_v56 }
 0x653   : > { %v3706_v24 = vsub.f32 %v3702_v60, %v3704_v11  ;;  %v3727_v47 = vsub.f32 %v8895_v9, %v3711_v63  ;;  %v3712_v60 = vrot.slane %v3663_v45, 4  ;;  %v3729_v9 = vsub.f32 %v8903_v53, %v3713_v3 }
 0x655   : > { %v3733_v43 = vadd.f32 1e-05, %v3706_v24  ;;  %v3714_v24 = vrot.slane %v3663_v45, 6  ;;  %v3728_v49 = vsub.f32 %v8890_v34, %v3712_v60  ;;  %v9175_v34 = vld [vmem:[%s9879_s5] ss:$0 sm:$0xff] }
 0x657   : > { %6393 = vrsqrt.f32 %v3733_v43  ;;  %v3715_v43 = vrot.slane %v3663_v45, 7  ;;  %v3730_v45 = vsub.f32 %v8909_v32, %v3714_v24 }
 0x659   : > { %v3731_v61 = vsub.f32 %v8912_v17, %v3715_v43 }
 0x65e   : > { %v6392_v11 = vpop.eup %6391 }
 0x65f   : > { %v3738_v50 = vrot.slane %v6392_v11, 1  ;;  %v3739_v59 = vrot.slane %v6392_v11, 2  ;;  %v3740_v18 = vrot.slane %v6392_v11, 3  ;;  %v3753_v31 = vmul.f32 %v6392_v11, %v3724_v25 }
 0x661   : > { %v3754_v2 = vmul.f32 %v3738_v50, %v3725_v40  ;;  %v3755_v14 = vmul.f32 %v3739_v59, %v3726_v20  ;;  %v3756_v39 = vmul.f32 %v3740_v18, %v3727_v47  ;;  %v3761_v62 = vmul.f32 %v9162_v38, %v3753_v31 }
 0x663   : > { %v3762_v59 = vmul.f32 %v9162_v38, %v3754_v2  ;;  %v3763_v18 = vmul.f32 %v9162_v38, %v3755_v14  ;;  %v3764_v56 = vmul.f32 %v9162_v38, %v3756_v39  ;;  %v3769_v53 = vadd.f32 %v9175_v34, %v3761_v62 }
 0x664   : > { %v6394_v42 = vpop.eup %6393 }
 0x665   : > { %v3741_v32 = vrot.slane %v6394_v42, 4  ;;  %v3742_v31 = vrot.slane %v6394_v42, 5  ;;  %v3743_v17 = vrot.slane %v6394_v42, 6  ;;  %v3744_v50 = vrot.slane %v6394_v42, 7  ;;  %3777 = vst [vmem:[%s7005_s26] sm:$0x10] %v3769_v53 }
 0x666   : > { %v3770_v2 = vadd.f32 %v9175_v34, %v3762_v59  ;;  %v3771_v14 = vadd.f32 %v9175_v34, %v3763_v18  ;;  %v3772_v25 = vadd.f32 %v9175_v34, %v3764_v56 }
 0x667   : > { %v3757_v39 = vmul.f32 %v3741_v32, %v3728_v49  ;;  %v3758_v20 = vmul.f32 %v3742_v31, %v3729_v9  ;;  %v3759_v63 = vmul.f32 %v3743_v17, %v3730_v45  ;;  %v3760_v40 = vmul.f32 %v3744_v50, %v3731_v61 }
 0x668   : > { %3778 = vst [vmem:[%s7005_s26 + $0x8] sm:$0x10] %v3770_v2  ;;  %3779 = vst [vmem:[%s7005_s26 + $0x10] sm:$0x10] %v3771_v14 }
 0x669   : > { %3780 = vst [vmem:[%s7005_s26 + $0x18] sm:$0x10] %v3772_v25  ;;  %v3765_v47 = vmul.f32 %v9162_v38, %v3757_v39  ;;  %v3766_v11 = vmul.f32 %v9162_v38, %v3758_v20  ;;  %v3767_v60 = vmul.f32 %v9162_v38, %v3759_v63  ;;  %v3768_v3 = vmul.f32 %v9162_v38, %v3760_v40 }
 0x66b   : > { %v3773_v24 = vadd.f32 %v9175_v34, %v3765_v47  ;;  %v3774_v43 = vadd.f32 %v9175_v34, %v3766_v11  ;;  %v3775_v62 = vadd.f32 %v9175_v34, %v3767_v60  ;;  %v3776_v49 = vadd.f32 %v9175_v34, %v3768_v3 }
 0x66d   : > { %3781 = vst [vmem:[%s7005_s26 + $0x20] sm:$0x10] %v3773_v24  ;;  %3782 = vst [vmem:[%s7005_s26 + $0x28] sm:$0x10] %v3774_v43 }
 0x66e   : > { %3783 = vst [vmem:[%s7005_s26 + $0x30] sm:$0x10] %v3775_v62  ;;  %3784 = vst [vmem:[%s7005_s26 + $0x38] sm:$0x10] %v3776_v49 }
 0x67f   : > { %v3930_v9 = vpop.f32.mrf.mxu0 }
 0x680   : > { %v4010_v45 = vrot.slane %v3930_v9, 3  ;;  %v4014_v61 = vrot.slane %v3930_v9, 4  ;;  %v4018_v42 = vrot.slane %v3930_v9, 5  ;;  %v4022_v59 = vrot.slane %v3930_v9, 6  ;;  %v4001_v20 = vpop.f32.mrf.mxu1 }
 0x681   : > { %v4026_v18 = vrot.slane %v3930_v9, 7  ;;  %v4030_v56 = vrot.slane %v3930_v9, 1  ;;  %v4034_v53 = vrot.slane %v3930_v9, 2  ;;  %v4090_v32 = vadd.f32 %v3930_v9, %v10486_v15 }
 0x682   : > { %v4070_v31 = vadd.f32 %v4010_v45, %v7346_v7  ;;  %v4074_v17 = vadd.f32 %v4014_v61, %v7361_v27  ;;  %v4078_v50 = vadd.f32 %v4018_v42, %v10484_v35  ;;  %v4082_v2 = vadd.f32 %v4022_v59, %v10485_v55  ;;  %v3932_v61 = vpop.f32.mrf.mxu0 }
 0x683   : > { %v4086_v14 = vadd.f32 %v4026_v18, %v7388_v22  ;;  %v4094_v25 = vadd.f32 %v4030_v56, %v10487_v4  ;;  %v4107_v39 = vmul.f32 0.5, %v4090_v32  ;;  %v4098_v63 = vadd.f32 %v4034_v53, %v10488_v48  ;;  %v10584_v22 = vld [vmem:[#allocation45_spill] sm:$0xff] }
 0x684   : > { %v4102_v40 = vmul.f32 0.5, %v4070_v31  ;;  %v4103_v47 = vmul.f32 0.5, %v4074_v17  ;;  %v4104_v11 = vmul.f32 0.5, %v4078_v50  ;;  %v4105_v60 = vmul.f32 0.5, %v4082_v2 }
 0x685   : > { %v4106_v3 = vmul.f32 0.5, %v4086_v14  ;;  %6395 = vtanh.f32 %v4107_v39  ;;  %v4012_v24 = vrot.slane %v4001_v20, 3  ;;  %v4016_v43 = vrot.slane %v4001_v20, 4 }
 0x686   : > { %6397 = vtanh.f32 %v4102_v40  ;;  %v4020_v62 = vrot.slane %v4001_v20, 5  ;;  %v4108_v49 = vmul.f32 0.5, %v4094_v25  ;;  %v4109_v9 = vmul.f32 0.5, %v4098_v63 }
 0x687   : > { %6399 = vtanh.f32 %v4103_v47  ;;  %v4024_v45 = vrot.slane %v4001_v20, 6  ;;  %v4028_v42 = vrot.slane %v4001_v20, 7  ;;  %v4072_v59 = vadd.f32 %v4012_v24, %v10489_v1  ;;  %v10570_v47 = vld [vmem:[#allocation38_spill] sm:$0xff] }
 0x688   : > { %6401 = vtanh.f32 %v4104_v11  ;;  %v4032_v18 = vrot.slane %v4001_v20, 1  ;;  %v4076_v56 = vadd.f32 %v4016_v43, %v10490_v26  ;;  %v4080_v53 = vadd.f32 %v4020_v62, %v10491_v8  ;;  %v10572_v62 = vld [vmem:[#allocation25_spill] sm:$0xff]  ;;  %v10583_v1 = vld [vmem:[#allocation18_spill] sm:$0xff] }
 0x689   : > { %6403 = vtanh.f32 %v4105_v60  ;;  %v4011_v32 = vrot.slane %v3932_v61, 3  ;;  %v4015_v31 = vrot.slane %v3932_v61, 4  ;;  %v4019_v17 = vrot.slane %v3932_v61, 5  ;;  %v10571_v60 = vld [vmem:[#allocation21_spill] sm:$0xff] }
 0x68a   : > { %6405 = vtanh.f32 %v4106_v3  ;;  %v4036_v50 = vrot.slane %v4001_v20, 2  ;;  %v4084_v2 = vadd.f32 %v4024_v45, %v10492_v52  ;;  %v4023_v14 = vrot.slane %v3932_v61, 6 }
 0x68b   : > { %6407 = vtanh.f32 %v4108_v49  ;;  %v4088_v25 = vadd.f32 %v4028_v42, %v10493_v12  ;;  %v4027_v39 = vrot.slane %v3932_v61, 7  ;;  %v4071_v63 = vadd.f32 %v4011_v32, %v10495_v23  ;;  %v10574_v42 = vld [vmem:[#allocation33_spill] sm:$0xff]  ;;  %v10575_v32 = vld [vmem:[#allocation35_spill] sm:$0xff] }
 0x68c   : > { %6409 = vtanh.f32 %v4109_v9  ;;  %v4092_v40 = vadd.f32 %v4001_v20, %v10494_v13  ;;  %v4096_v11 = vadd.f32 %v4032_v18, %v10570_v47  ;;  %v4075_v3 = vadd.f32 %v4015_v31, %v10571_v60  ;;  %v10573_v9 = vld [vmem:[#allocation39_spill] sm:$0xff]  ;;  %v10576_v31 = vld [vmem:[#allocation37_spill] sm:$0xff]  ;;  %v10581_v18 = vld [vmem:[#allocation44_spill] sm:$0xff] }
 0x68d   : > { %6411 = vtanh.f32 %v4072_v59  ;;  %v4031_v24 = vrot.slane %v3932_v61, 1  ;;  %v4035_v43 = vrot.slane %v3932_v61, 2  ;;  %v4079_v49 = vadd.f32 %v4019_v17, %v10572_v62  ;;  %v10578_v12 = vld [vmem:[#allocation41_spill] sm:$0xff] }
 0x68e   : > { %6413 = vtanh.f32 %v4076_v56  ;;  %v4100_v45 = vadd.f32 %v4036_v50, %v10573_v9  ;;  %v4083_v59 = vadd.f32 %v4023_v14, %v10574_v42  ;;  %v4087_v20 = vadd.f32 %v4027_v39, %v10575_v32  ;;  %v9220_v56 = vpop.f32.mrf.mxu1  ;;  %v10577_v14 = vld [vmem:[#allocation40_spill] sm:$0xff] }
 0x68f   : > { %6415 = vtanh.f32 %v4080_v53  ;;  %v4134_v13 = vmul.f32 0.5, %v4071_v63  ;;  %v4091_v47 = vadd.f32 %v3932_v61, %v10576_v31  ;;  %v4135_v17 = vmul.f32 0.5, %v4075_v3  ;;  %v10579_v61 = vld [vmem:[#allocation42_spill] sm:$0xff] }
 0x690   : > { %6417 = vtanh.f32 %v4084_v2  ;;  %v4095_v42 = vadd.f32 %v4031_v24, %v10577_v14  ;;  %v4136_v9 = vmul.f32 0.5, %v4079_v49  ;;  %v4137_v63 = vmul.f32 0.5, %v4083_v59 }
 0x691   : > { %6419 = vtanh.f32 %v4088_v25  ;;  %v4099_v25 = vadd.f32 %v4035_v43, %v10578_v12  ;;  %v4025_v32 = vrot.slane %v9220_v56, 6  ;;  %v4138_v62 = vmul.f32 0.5, %v4087_v20  ;;  %v10580_v43 = vld [vmem:[#allocation43_spill] sm:$0xff] }
 0x692   : > { %v6396_v53 = vpop.eup %6395  ;;  %6421 = vtanh.f32 %v4092_v40  ;;  %v4029_v3 = vrot.slane %v9220_v56, 7  ;;  %v4139_v50 = vmul.f32 0.5, %v4091_v47  ;;  %v4017_v20 = vrot.slane %v9220_v56, 4 }
 0x693   : > { %v6398_v2 = vpop.eup %6397  ;;  %6423 = vtanh.f32 %v4096_v11  ;;  %v4141_v59 = vmul.f32 0.5, %v4099_v25  ;;  %v4085_v14 = vadd.f32 %v4025_v32, %v10579_v61  ;;  %v4021_v24 = vrot.slane %v9220_v56, 5  ;;  %v10582_v61 = vld [vmem:[#allocation22_spill] sm:$0xff] }
 0x694   : > { %v6400_v39 = vpop.eup %6399  ;;  %6425 = vtanh.f32 %v4100_v45  ;;  %v4140_v45 = vmul.f32 0.5, %v4095_v42  ;;  %v4089_v31 = vadd.f32 %v4029_v3, %v10580_v43  ;;  %v4118_v25 = vmul.f32 0.5, %v6398_v2 }
 0x695   : > { %v6402_v40 = vpop.eup %6401  ;;  %6427 = vtanh.f32 %v4134_v13  ;;  %v4013_v13 = vrot.slane %v9220_v56, 3  ;;  %v4119_v23 = vmul.f32 0.5, %v6400_v39  ;;  %v4037_v32 = vrot.slane %v9220_v56, 2 }
 0x696   : > { %v6404_v11 = vpop.eup %6403  ;;  %6429 = vtanh.f32 %v4135_v17  ;;  %v4123_v17 = vmul.f32 0.5, %v6396_v53  ;;  %v4120_v52 = vmul.f32 0.5, %v6402_v40  ;;  %v4077_v8 = vadd.f32 %v4017_v20, %v10582_v61 }
 0x697   : > { %v6406_v49 = vpop.eup %6405  ;;  %6431 = vtanh.f32 %v4136_v9  ;;  %v4033_v9 = vrot.slane %v9220_v56, 1  ;;  %v4177_v3 = vmul.f32 0.5, %v4085_v14  ;;  %v4178_v26 = vmul.f32 0.5, %v4089_v31 }
 0x698   : > { %v6408_v12 = vpop.eup %6407  ;;  %6433 = vtanh.f32 %v4137_v63  ;;  %v4093_v63 = vadd.f32 %v9220_v56, %v10581_v18  ;;  %v4122_v2 = vmul.f32 0.5, %v6406_v49  ;;  %v4073_v48 = vadd.f32 %v4013_v13, %v10583_v1 }
 0x699   : > { %v6410_v47 = vpop.eup %6409  ;;  %6435 = vtanh.f32 %v4138_v62  ;;  %v4121_v62 = vmul.f32 0.5, %v6404_v11  ;;  %v4097_v39 = vadd.f32 %v4033_v9, %v10584_v22  ;;  %v4126_v35 = vadd.f32 0.5, %v4118_v25 }
 0x69a   : > { %v6412_v42 = vpop.eup %6411  ;;  %6437 = vtanh.f32 %v4139_v50  ;;  %v4124_v50 = vmul.f32 0.5, %v6408_v12  ;;  %v4125_v18 = vmul.f32 0.5, %v6410_v47  ;;  %v4179_v40 = vmul.f32 0.5, %v4093_v63  ;;  %v10586_v12 = vld [vmem:[#allocation46_spill] sm:$0xff] }
 0x69b   : > { %v6414_v60 = vpop.eup %6413  ;;  %6439 = vtanh.f32 %v4140_v45  ;;  %v10585_v45 = vld [vmem:[#allocation26_spill] sm:$0xff]  ;;  %v4127_v11 = vadd.f32 0.5, %v4119_v23  ;;  %v4174_v27 = vmul.f32 0.5, %v4073_v48  ;;  %v4129_v14 = vadd.f32 0.5, %v4121_v62 }
 0x69c   : > { %v6416_v53 = vpop.eup %6415  ;;  %6441 = vtanh.f32 %v4141_v59  ;;  %v4081_v55 = vadd.f32 %v4021_v24, %v10585_v45  ;;  %v4131_v59 = vadd.f32 0.5, %v4123_v17  ;;  %v4175_v49 = vmul.f32 0.5, %v4077_v8 }
 0x69d   : > { %v6418_v43 = vpop.eup %6417  ;;  %6443 = vtanh.f32 %v4177_v3  ;;  %v4101_v31 = vadd.f32 %v4037_v32, %v10586_v12  ;;  %v4128_v47 = vadd.f32 0.5, %v4120_v52  ;;  %v4130_v1 = vadd.f32 0.5, %v4122_v2 }
 0x69e   : > { %v6420_v15 = vpop.eup %6419  ;;  %6445 = vtanh.f32 %v4178_v26  ;;  %v4176_v9 = vmul.f32 0.5, %v4081_v55  ;;  %v4132_v24 = vadd.f32 0.5, %v4124_v50  ;;  %v4133_v61 = vadd.f32 0.5, %v4125_v18 }
 0x69f   : > { %v6422_v56 = vpop.eup %6421  ;;  %v4180_v25 = vmul.f32 0.5, %v4097_v39  ;;  %6447 = vtanh.f32 %v4179_v40  ;;  %v4239_v17 = vmul.f32 %v6414_v60, %v4127_v11  ;;  %v4181_v62 = vmul.f32 0.5, %v4101_v31 }
 0x6a0   : > { %v9246_v20 = vpop.eup %6423  ;;  %6449 = vtanh.f32 %v4174_v27  ;;  %v4241_v22 = vmul.f32 %v6418_v43, %v4129_v14  ;;  %v4238_v32 = vmul.f32 %v6412_v42, %v4126_v35  ;;  %v4242_v26 = vmul.f32 %v6420_v15, %v4130_v1 }
 0x6a1   : > { %v9249_v13 = vpop.eup %6425  ;;  %6451 = vtanh.f32 %v4175_v49  ;;  %v4240_v39 = vmul.f32 %v6416_v53, %v4128_v47  ;;  %v10587_v27 = vrot.slane %v8843_v33, 7  ;;  %v10588_v42 = vrot.slane %v8847_v51, 7 }
 0x6a2   : > { %v6428_v63 = vpop.eup %6427  ;;  %6453 = vtanh.f32 %v4176_v9  ;;  %v4243_v15 = vmul.f32 %v6422_v56, %v4131_v59  ;;  %v10589_v53 = vrot.slane %v8851_v37, 7  ;;  %v10590_v33 = vrot.slane %v8857_v6, 7 }
 0x6a3   : > { %v6430_v23 = vpop.eup %6429  ;;  %v4150_v48 = vmul.f32 0.5, %v6428_v63  ;;  %6455 = vtanh.f32 %v4180_v25  ;;  %v10591_v51 = vrot.slane %v8862_v29, 7  ;;  %v10592_v37 = vrot.slane %v8867_v19, 7 }
 0x6a4   : > { %v6432_v8 = vpop.eup %6431  ;;  %v4151_v3 = vmul.f32 0.5, %v6430_v23  ;;  %6457 = vtanh.f32 %v4181_v62 }
 0x6a5   : > { %v6434_v12 = vpop.eup %6433  ;;  %v4152_v52 = vmul.f32 0.5, %v6432_v8  ;;  %v4158_v2 = vadd.f32 0.5, %v4150_v48 }
 0x6a6   : > { %v6436_v55 = vpop.eup %6435  ;;  %v4153_v50 = vmul.f32 0.5, %v6434_v12  ;;  %v4159_v18 = vadd.f32 0.5, %v4151_v3 }
 0x6a7   : > { %v6438_v40 = vpop.eup %6437  ;;  %v4154_v63 = vmul.f32 0.5, %v6436_v55  ;;  %v4160_v60 = vadd.f32 0.5, %v4152_v52  ;;  %v4230_v11 = vmul.f32 %v10587_v27, %v4158_v2  ;;  %v4244_v55 = vmul.f32 %v9246_v20, %v4132_v24 }
 0x6a8   : > { %v6440_v43 = vpop.eup %6439  ;;  %v4155_v14 = vmul.f32 0.5, %v6438_v40  ;;  %v4161_v35 = vadd.f32 0.5, %v4153_v50  ;;  %v4231_v49 = vmul.f32 %v10588_v42, %v4159_v18  ;;  %v10594_v18 = vrot.slane %v8875_v30, 7 }
 0x6a9   : > { %v6442_v1 = vpop.eup %6441  ;;  %v4156_v31 = vmul.f32 0.5, %v6440_v43  ;;  %v4162_v12 = vadd.f32 0.5, %v4154_v63  ;;  %v4232_v47 = vmul.f32 %v10589_v53, %v4160_v60  ;;  %v9257_v9 = vadd.f32 %v4238_v32, %v4230_v11 }
 0x6aa   : > { %v4157_v25 = vmul.f32 0.5, %v6442_v1  ;;  %v4163_v23 = vadd.f32 0.5, %v4155_v14  ;;  %v4233_v48 = vmul.f32 %v10590_v33, %v4161_v35  ;;  %v9261_v62 = vadd.f32 %v4239_v17, %v4231_v49  ;;  %v6444_v6 = vpop.eup %6443 }
 0x6ab   : > { %v4164_v8 = vadd.f32 0.5, %v4156_v31  ;;  %v4234_v3 = vmul.f32 %v10591_v51, %v4162_v12  ;;  %v9265_v56 = vadd.f32 %v4240_v39, %v4232_v47  ;;  %6459 = vtanh.f32 %v9257_v9  ;;  %v6446_v50 = vpop.eup %6445 }
 0x6ac   : > { %v4165_v59 = vadd.f32 0.5, %v4157_v25  ;;  %v4235_v32 = vmul.f32 %v10592_v37, %v4163_v23  ;;  %v9270_v52 = vadd.f32 %v4241_v22, %v4233_v48  ;;  %6461 = vtanh.f32 %v9261_v62  ;;  %v6448_v22 = vpop.eup %6447 }
 0x6ad   : > { %v10593_v17 = vrot.slane %v8871_v46, 7  ;;  %v9276_v29 = vadd.f32 %v4242_v26, %v4234_v3  ;;  %6463 = vtanh.f32 %v9265_v56  ;;  %v4245_v46 = vmul.f32 %v9249_v13, %v4133_v61  ;;  %v6450_v20 = vpop.eup %6449 }
 0x6ae   : > { %v4237_v39 = vmul.f32 %v10594_v18, %v4165_v59  ;;  %v9281_v19 = vadd.f32 %v4243_v15, %v4235_v32  ;;  %6465 = vtanh.f32 %v9270_v52  ;;  %v6452_v24 = vpop.eup %6451  ;;  %v4190_v60 = vmul.f32 0.5, %v6450_v20 }
 0x6af   : > { %v4236_v2 = vmul.f32 %v10593_v17, %v4164_v8  ;;  %6467 = vtanh.f32 %v9276_v29  ;;  %v6454_v63 = vpop.eup %6453  ;;  %v4191_v11 = vmul.f32 0.5, %v6452_v24  ;;  %v4193_v14 = vmul.f32 0.5, %v6444_v6 }
 0x6b0   : > { %6469 = vtanh.f32 %v9281_v19  ;;  %v9289_v26 = vadd.f32 %v4245_v46, %v4237_v39  ;;  %v6456_v30 = vpop.eup %6455  ;;  %v4192_v43 = vmul.f32 0.5, %v6454_v63  ;;  %v4194_v35 = vmul.f32 0.5, %v6446_v50 }
 0x6b1   : > { %v9284_v40 = vadd.f32 %v4244_v55, %v4236_v2  ;;  %v6458_v27 = vpop.eup %6457  ;;  %v4195_v42 = vmul.f32 0.5, %v6448_v22  ;;  %v4196_v61 = vmul.f32 0.5, %v6456_v30  ;;  %v4198_v13 = vadd.f32 0.5, %v4190_v60 }
 0x6b2   : > { %v4197_v49 = vmul.f32 0.5, %v6458_v27  ;;  %v4199_v1 = vadd.f32 0.5, %v4191_v11  ;;  %v4200_v12 = vadd.f32 0.5, %v4192_v43  ;;  %v4201_v47 = vadd.f32 0.5, %v4193_v14 }
 0x6b3   : > { %6471 = vtanh.f32 %v9284_v40  ;;  %v4202_v33 = vadd.f32 0.5, %v4194_v35  ;;  %v4203_v48 = vadd.f32 0.5, %v4195_v42  ;;  %v4204_v8 = vadd.f32 0.5, %v4196_v61 }
 0x6b4   : > { %6473 = vtanh.f32 %v9289_v26  ;;  %v4205_v37 = vadd.f32 0.5, %v4197_v49 }
 0x6b8   : > { %v6460_v15 = vpop.eup %6459 }
 0x6b9   : > { %v6462_v31 = vpop.eup %6461  ;;  %v9293_v53 = vmul.f32 %v6460_v15, %v4198_v13 }
 0x6ba   : > { %v6464_v25 = vpop.eup %6463  ;;  %v9295_v23 = vmul.f32 %v6462_v31, %v4199_v1 }
 0x6bb   : > { %v6466_v51 = vpop.eup %6465  ;;  %v9297_v3 = vmul.f32 %v6464_v25, %v4200_v12  ;;  %v4488_v59 = vrot.slane %v9293_v53, 5  ;;  %v4303_v32 = vmul.f32 %v9293_v53, %v9293_v53 }
 0x6bc   : > { %v6468_v6 = vpop.eup %6467  ;;  %v4278_v17 = vrot.slane %v9295_v23, 7  ;;  %v9303_v2 = vmul.f32 %v6466_v51, %v4201_v47  ;;  %v4489_v55 = vrot.slane %v9295_v23, 4  ;;  %v4304_v50 = vmul.f32 %v9295_v23, %v9295_v23 }
 0x6bd   : > { %v6470_v18 = vpop.eup %6469  ;;  %v4280_v39 = vrot.slane %v9297_v3, 6  ;;  %v9309_v22 = vmul.f32 %v6468_v6, %v4202_v33  ;;  %v4491_v46 = vrot.slane %v9297_v3, 3  ;;  %v4305_v20 = vmul.f32 %v9297_v3, %v9297_v3 }
 0x6be   : > { %v4279_v24 = vsel %vm1124_vm6, %v4278_v17, %v9293_v53  ;;  %v9316_v63 = vmul.f32 %v6470_v18, %v4203_v48  ;;  %v4282_v30 = vrot.slane %v9303_v2, 5  ;;  %v4490_v60 = vsel %vm1109_vm1, %v4489_v55, %v4488_v59 }
 0x6bf   : > { %v4281_v11 = vsel %vm1127_vm7, %v4280_v39, %v4279_v24  ;;  %v4283_v43 = vrot.slane %v9309_v22, 4  ;;  %v4492_v14 = vsel %vm1112_vm2, %v4491_v46, %v4490_v60  ;;  %v4493_v35 = vrot.slane %v9303_v2, 2 }
 0x6c0   : > { %v6472_v27 = vpop.eup %6471  ;;  %v4294_v61 = vsel %vm4293_vm0, %v4281_v11, 0.0  ;;  %v4285_v49 = vrot.slane %v9316_v63, 3  ;;  %v4495_v15 = vrot.slane %v9309_v22, 1  ;;  %v4319_v47 = vrot.slane %v4304_v50, 7 }
 0x6c1   : > { %v6474_v42 = vpop.eup %6473  ;;  %v9325_v13 = vmul.f32 %v6472_v27, %v4204_v8  ;;  %4295 = vadd.xlane.f32.xlu1 %v4294_v61  ;;  %v4284_v31 = vsel %vm1109_vm1, %v4283_v43, %v4282_v30  ;;  %v4494_v12 = vsel %vm1115_vm3, %v4493_v35, %v4492_v14  ;;  %v4321_v50 = vrot.slane %v4305_v20, 6 }
 0x6c2   : > { %v9329_v1 = vmul.f32 %v6474_v42, %v4205_v37  ;;  %v4286_v25 = vsel %vm1112_vm2, %v4285_v49, %v4284_v31  ;;  %v4496_v48 = vsel %vm1118_vm4, %v4495_v15, %v4494_v12  ;;  %v4320_v6 = vsel %vm1124_vm6, %v4319_v47, %v4303_v32  ;;  %v10602_v31 = vld [vmem:[#allocation49_spill] sm:$0xff]  ;;  %v10605_v12 = vld [vmem:[#allocation52_spill] sm:$0xff] }
 0x6c3   : > { %v4287_v33 = vrot.slane %v9325_v13, 2  ;;  %v4498_v8 = vrot.slane %v9325_v13, 7  ;;  %v4497_v59 = vsel %vm1121_vm5, %v9316_v63, %v4496_v48  ;;  %v4306_v18 = vmul.f32 %v9303_v2, %v9303_v2  ;;  %v10606_v47 = vld [vmem:[#allocation53_spill] sm:$0xff]  ;;  %v10609_v48 = vld [vmem:[#allocation56_spill] sm:$0xff] }
 0x6c4   : > { %v4289_v51 = vrot.slane %v9329_v1, 1  ;;  %v4500_v37 = vrot.slane %v9329_v1, 6  ;;  %v4307_v24 = vmul.f32 %v9309_v22, %v9309_v22  ;;  %v4308_v30 = vmul.f32 %v9316_v63, %v9316_v63 }
 0x6c5   : > { %v4288_v17 = vsel %vm1115_vm3, %v4287_v33, %v4286_v25  ;;  %v4499_v55 = vsel %vm1124_vm6, %v4498_v8, %v4497_v59  ;;  %v4322_v60 = vsel %vm1127_vm7, %v4321_v50, %v4320_v6  ;;  %v4309_v20 = vmul.f32 %v9325_v13, %v9325_v13  ;;  %v10607_v25 = vld [vmem:[#allocation54_spill] sm:$0xff]  ;;  %v10608_v33 = vld [vmem:[#allocation55_spill] sm:$0xff]  ;;  %v10610_v8 = vld [vmem:[#allocation57_spill] sm:$0xff] }
 0x6c6   : > { %v4290_v39 = vsel %vm1118_vm4, %v4289_v51, %v4288_v17  ;;  %v4501_v46 = vsel %vm1127_vm7, %v4500_v37, %v4499_v55  ;;  %v4310_v27 = vmul.f32 %v9329_v1, %v9329_v1  ;;  %v4334_v11 = vsel %vm4293_vm0, %v4322_v60, 0.0  ;;  %v10611_v51 = vld [vmem:[#allocation58_spill] sm:$0xff]  ;;  %v10612_v59 = vld [vmem:[#allocation59_spill] sm:$0xff]  ;;  %v10613_v37 = vld [vmem:[#allocation60_spill] sm:$0xff] }
 0x6c7   : > { %v4298_v32 = vsel %vm4297_vm8, %v4290_v39, 0.0  ;;  %4568 = vmatmul.mubr.f32.vlgmr.msra.gmra.mxu0 %v4501_v46  ;;  %4639 = vmatmul.mubr.f32.vlgmr.msra.gmra.mxu1 %v4501_v46  ;;  %v4323_v43 = vrot.slane %v4306_v18, 5  ;;  %v4324_v14 = vrot.slane %v4307_v24, 4  ;;  %v4326_v35 = vrot.slane %v4308_v30, 3  ;;  %v10614_v6 = vld [vmem:[#allocation61_spill] sm:$0xff]  ;;  %v10615_v17 = vld [vmem:[#allocation62_spill] sm:$0xff] }
 0x6c8   : > { %4299 = vadd.xlane.f32.xlu0 %v4298_v32  ;;  %5143 = vmatpush1.msra.mxu0 %v8957_v5  ;;  %v4328_v61 = vrot.slane %v4309_v20, 2  ;;  %v4330_v15 = vrot.slane %v4310_v27, 1  ;;  %v10616_v55 = vld [vmem:[#allocation63_spill] sm:$0xff]  ;;  %v10617_v50 = vld [vmem:[#allocation64_spill] sm:$0xff]  ;;  %v10618_v18 = vld [vmem:[#allocation65_spill] sm:$0xff] }
 0x6c9   : > { %4335 = vadd.xlane.f32.xlu1 %v4334_v11  ;;  %5214 = vmatpush1.msra.mxu1 %v8961_v58  ;;  %v4325_v42 = vsel %vm1109_vm1, %v4324_v14, %v4323_v43  ;;  %v10619_v39 = vld [vmem:[#allocation66_spill] sm:$0xff]  ;;  %v10620_v46 = vld [vmem:[#allocation67_spill] sm:$0xff]  ;;  %v10621_v24 = vld [vmem:[#allocation68_spill] sm:$0xff] }
 0x6ca   : > { %5144 = vmatprep.subr.mxu0 %v8963_v0  ;;  %5215 = vmatprep.subr.mxu1 %v8965_v44  ;;  %v4327_v49 = vsel %vm1112_vm2, %v4326_v35, %v4325_v42  ;;  %v10595_v44 = vld [vmem:[#allocation98_spill] sm:$0xff]  ;;  %v10622_v30 = vld [vmem:[#allocation69_spill] sm:$0xff]  ;;  %v10624_v60 = vld [vmem:[#allocation71_spill] sm:$0xff] }
 0x6cb   : > { %5145 = vmatpush1.msra.mxu0 %v8969_v28  ;;  %5216 = vmatpush1.msra.mxu1 %v8971_v36  ;;  %v4329_v5 = vsel %vm1115_vm3, %v4328_v61, %v4327_v49  ;;  %v10596_v28 = vld [vmem:[#allocation99_spill] sm:$0xff]  ;;  %v10597_v36 = vld [vmem:[#allocation100_spill] sm:$0xff]  ;;  %v10623_v32 = vld [vmem:[#allocation70_spill] sm:$0xff] }
 0x6cc   : > { %5146 = vmatprep.subr.mxu0 %v8973_v41  ;;  %5217 = vmatprep.subr.mxu1 %v8977_v57  ;;  %v4331_v58 = vsel %vm1118_vm4, %v4330_v15, %v4329_v5  ;;  %v10598_v41 = vld [vmem:[#allocation101_spill] sm:$0xff]  ;;  %v10599_v57 = vld [vmem:[#allocation102_spill] sm:$0xff]  ;;  %v10625_v20 = vld [vmem:[#allocation72_spill] sm:$0xff] }
 0x6cd   : > { %5147 = vmatpush1.msra.mxu0 %v8979_v16  ;;  %5218 = vmatpush1.msra.mxu1 %v8981_v21  ;;  %v4337_v0 = vsel %vm4297_vm8, %v4331_v58, 0.0  ;;  %v10600_v16 = vld [vmem:[#allocation47_spill] sm:$0xff]  ;;  %v10601_v21 = vld [vmem:[#allocation48_spill] sm:$0xff]  ;;  %v10626_v27 = vld [vmem:[#allocation73_spill] sm:$0xff] }
 0x6ce   : > { %5148 = vmatprep.subr.mxu0 %v8985_v54  ;;  %5219 = vmatprep.subr.mxu1 %v8987_v10  ;;  %v10603_v54 = vld [vmem:[#allocation50_spill] sm:$0xff]  ;;  %v10604_v10 = vld [vmem:[#allocation51_spill] sm:$0xff]  ;;  %v10629_v14 = vld [vmem:[#allocation76_spill] sm:$0xff] }
 0x6cf   : > { %4338 = vadd.xlane.f32.xlu0 %v4337_v0  ;;  %5149 = vmatpush1.msra.mxu0 %v10595_v44  ;;  %v10627_v11 = vld [vmem:[#allocation74_spill] sm:$0xff]  ;;  %v10628_v43 = vld [vmem:[#allocation75_spill] sm:$0xff]  ;;  %v10630_v35 = vld [vmem:[#allocation77_spill] sm:$0xff] }
 0x6d0   : > { %5220 = vmatpush1.msra.mxu1 %v10596_v28  ;;  %5150 = vmatprep.subr.mxu0 %v10597_v36  ;;  %v10631_v42 = vld [vmem:[#allocation78_spill] sm:$0xff]  ;;  %v10632_v61 = vld [vmem:[#allocation79_spill] sm:$0xff]  ;;  %v10633_v49 = vld [vmem:[#allocation80_spill] sm:$0xff] }
 0x6d1   : > { %5221 = vmatprep.subr.mxu1 %v10598_v41  ;;  %5151 = vmatpush1.msra.mxu0 %v10599_v57  ;;  %v10634_v15 = vld [vmem:[#allocation81_spill] sm:$0xff]  ;;  %v10635_v5 = vld [vmem:[#allocation82_spill] sm:$0xff]  ;;  %v10636_v58 = vld [vmem:[#allocation83_spill] sm:$0xff] }
 0x6d2   : > { %5222 = vmatpush1.msra.mxu1 %v10600_v16  ;;  %5152 = vmatprep.subr.mxu0 %v10601_v21  ;;  %v10637_v0 = vld [vmem:[#allocation84_spill] sm:$0xff]  ;;  %v10638_v44 = vld [vmem:[#allocation85_spill] sm:$0xff]  ;;  %v10639_v28 = vld [vmem:[#allocation86_spill] sm:$0xff]  ;;  %v10644_v21 = vmov 0.0  }
 0x6d3   : > { %5223 = vmatprep.subr.mxu1 %v10602_v31  ;;  %5153 = vmatpush1.msra.mxu0 %v10603_v54  ;;  %v10640_v36 = vld [vmem:[#allocation87_spill] sm:$0xff]  ;;  %v10641_v41 = vld [vmem:[#allocation88_spill] sm:$0xff]  ;;  %v10642_v57 = vld [vmem:[#allocation89_spill] sm:$0xff] }
 0x6d4   : > { %5224 = vmatpush1.msra.mxu1 %v10604_v10  ;;  %5154 = vmatprep.subr.mxu0 %v10605_v12  ;;  %v10643_v16 = vld [vmem:[#allocation90_spill] sm:$0xff]  ;;  %v10645_v31 = vld [vmem:[#allocation91_spill] sm:$0xff] }
 0x6d5   : > { %5225 = vmatprep.subr.mxu1 %v10606_v47  ;;  %5155 = vmatpush1.msra.mxu0 %v10607_v25 }
 0x6d6   : > { %5226 = vmatpush1.msra.mxu1 %v10608_v33  ;;  %5156 = vmatprep.subr.mxu0 %v10609_v48 }
 0x6d7   : > { %5227 = vmatprep.subr.mxu1 %v10610_v8  ;;  %5157 = vmatpush1.msra.mxu0 %v10611_v51 }
 0x6d8   : > { %5228 = vmatpush1.msra.mxu1 %v10612_v59  ;;  %5158 = vmatprep.subr.mxu0 %v10613_v37 }
 0x6d9   : > { %5229 = vmatprep.subr.mxu1 %v10614_v6  ;;  %5159 = vmatpush1.msra.mxu0 %v10615_v17 }
 0x6da   : > { %5230 = vmatpush1.msra.mxu1 %v10616_v55  ;;  %5160 = vmatprep.subr.mxu0 %v10617_v50 }
 0x6db   : > { %5231 = vmatprep.subr.mxu1 %v10618_v18  ;;  %5161 = vmatpush1.msra.mxu0 %v10619_v39 }
 0x6dc   : > { %5232 = vmatpush1.msra.mxu1 %v10620_v46  ;;  %5162 = vmatprep.subr.mxu0 %v10621_v24 }
 0x6dd   : > { %5233 = vmatprep.subr.mxu1 %v10622_v30  ;;  %5163 = vmatpush1.msra.mxu0 %v10623_v32 }
 0x6de   : > { %5234 = vmatpush1.msra.mxu1 %v10624_v60  ;;  %5164 = vmatprep.subr.mxu0 %v10625_v20 }
 0x6df   : > { %5235 = vmatprep.subr.mxu1 %v10626_v27  ;;  %5165 = vmatpush1.msra.mxu0 %v10627_v11 }
 0x6e0   : > { %5236 = vmatpush1.msra.mxu1 %v10628_v43  ;;  %5166 = vmatprep.subr.mxu0 %v10629_v14 }
 0x6e1   : > { %5237 = vmatprep.subr.mxu1 %v10630_v35  ;;  %5167 = vmatpush1.msra.mxu0 %v10631_v42 }
 0x6e2   : > { %5238 = vmatpush1.msra.mxu1 %v10632_v61  ;;  %5168 = vmatprep.subr.mxu0 %v10633_v49 }
 0x6e3   : > { %5239 = vmatprep.subr.mxu1 %v10634_v15  ;;  %5169 = vmatpush1.msra.mxu0 %v10635_v5 }
 0x6e4   : > { %5240 = vmatpush1.msra.mxu1 %v10636_v58  ;;  %5170 = vmatprep.subr.mxu0 %v10637_v0 }
 0x6e5   : > { %5241 = vmatprep.subr.mxu1 %v10638_v44  ;;  %5171 = vmatpush1.msra.mxu0 %v10639_v28 }
 0x6e6   : > { %5242 = vmatpush1.msra.mxu1 %v10640_v36  ;;  %5172 = vmatprep.subr.mxu0 %v10641_v41 }
 0x6e7   : > { %5243 = vmatprep.subr.mxu1 %v10642_v57  ;;  %5173 = vmatpush1.msra.mxu0 %v10643_v16 }
 0x6e8   : > { %5206 = vmatprep.mubr.f32.mxu0 %v10644_v21  ;;  %5244 = vmatpush1.msra.mxu1 %v10645_v31 }
 0x6e9   : > { %5277 = vmatprep.mubr.f32.mxu1 %v10644_v21 }
 0x74a   : > { %v4296_v54 = vpop.xlane.xlu1 %4295 }
 0x74b   : > { %v4301_v10 = vmul.f32 0.0078125, %v4296_v54 }
 0x74d   : > { %v4342_v25 = vmul.f32 %v4301_v10, %v4301_v10  ;;  %v4348_v50 = vrot.slane %v4301_v10, 1  ;;  %v4349_v18 = vrot.slane %v4301_v10, 2  ;;  %v4363_v39 = vsub.f32 %v9293_v53, %v4301_v10 }
 0x74f   : > { %v4364_v24 = vsub.f32 %v9295_v23, %v4348_v50  ;;  %v4365_v30 = vsub.f32 %v9297_v3, %v4349_v18 }
 0x751   : > { %v4300_v12 = vpop.xlane.xlu0 %4299 }
 0x752   : > { %v4336_v47 = vpop.xlane.xlu1 %4335  ;;  %v4302_v48 = vmul.f32 0.0078125, %v4300_v12 }
 0x753   : > { %v4340_v33 = vmul.f32 0.0078125, %v4336_v47 }
 0x754   : > { %v4343_v37 = vmul.f32 %v4302_v48, %v4302_v48  ;;  %v4350_v27 = vrot.slane %v4302_v48, 3  ;;  %v4351_v11 = vrot.slane %v4302_v48, 4  ;;  %v4352_v43 = vrot.slane %v4302_v48, 5 }
 0x755   : > { %v4344_v8 = vsub.f32 %v4340_v33, %v4342_v25  ;;  %v4353_v14 = vrot.slane %v4302_v48, 6  ;;  %v4354_v49 = vrot.slane %v4302_v48, 7 }
 0x756   : > { %v4366_v5 = vsub.f32 %v9303_v2, %v4350_v27  ;;  %v4367_v58 = vsub.f32 %v9309_v22, %v4351_v11  ;;  %v4368_v0 = vsub.f32 %v9316_v63, %v4352_v43  ;;  %v10648_v27 = vld [vmem:[#allocation27_spill] sm:$0xff]  ;;  %v10649_v43 = vld [vmem:[#allocation29_spill] sm:$0xff] }
 0x757   : > { %v4371_v51 = vadd.f32 1e-05, %v4344_v8  ;;  %v4369_v44 = vsub.f32 %v9325_v13, %v4353_v14  ;;  %v4370_v16 = vsub.f32 %v9329_v1, %v4354_v49 }
 0x758   : > { %v4339_v59 = vpop.xlane.xlu0 %4338 }
 0x759   : > { %6475 = vrsqrt.f32 %v4371_v51  ;;  %v4341_v6 = vmul.f32 0.0078125, %v4339_v59 }
 0x75b   : > { %v4345_v17 = vsub.f32 %v4341_v6, %v4343_v37 }
 0x75d   : > { %v4372_v55 = vadd.f32 1e-05, %v4345_v17 }
 0x75f   : > { %6477 = vrsqrt.f32 %v4372_v55 }
 0x766   : > { %v6476_v46 = vpop.eup %6475 }
 0x767   : > { %v4377_v32 = vrot.slane %v6476_v46, 1  ;;  %v4378_v60 = vrot.slane %v6476_v46, 2  ;;  %v4392_v20 = vmul.f32 %v6476_v46, %v4363_v39 }
 0x769   : > { %v4393_v35 = vmul.f32 %v4377_v32, %v4364_v24  ;;  %v4394_v42 = vmul.f32 %v4378_v60, %v4365_v30  ;;  %v4400_v61 = vmul.f32 %v9162_v38, %v4392_v20  ;;  %v10646_v32 = vld [vmem:[#allocation19_spill] sm:$0xff] }
 0x76b   : > { %v4401_v53 = vmul.f32 %v9162_v38, %v4393_v35  ;;  %v4402_v15 = vmul.f32 %v9162_v38, %v4394_v42  ;;  %v4408_v23 = vadd.f32 %v9175_v34, %v4400_v61  ;;  %v10650_v35 = vld [vmem:[#allocation30_spill] sm:$0xff] }
 0x76c   : > { %v6478_v3 = vpop.eup %6477 }
 0x76d   : > { %v4409_v28 = vadd.f32 %v9175_v34, %v4401_v53  ;;  %v4410_v36 = vadd.f32 %v9175_v34, %v4402_v15  ;;  %4416 = vst [vmem:[%s7005_s26] sm:$0x20] %v4408_v23  ;;  %v4379_v41 = vrot.slane %v6478_v3, 3  ;;  %v4380_v57 = vrot.slane %v6478_v3, 4  ;;  %v10651_v53 = vld [vmem:[#allocation32_spill] sm:$0xff] }
 0x76e   : > { %v4381_v21 = vrot.slane %v6478_v3, 5  ;;  %v4382_v31 = vrot.slane %v6478_v3, 6  ;;  %v4383_v54 = vrot.slane %v6478_v3, 7 }
 0x76f   : > { %4417 = vst [vmem:[%s7005_s26 + $0x8] sm:$0x20] %v4409_v28  ;;  %4418 = vst [vmem:[%s7005_s26 + $0x10] sm:$0x20] %v4410_v36  ;;  %v4395_v2 = vmul.f32 %v4379_v41, %v4366_v5  ;;  %v4396_v22 = vmul.f32 %v4380_v57, %v4367_v58 }
 0x770   : > { %v4397_v63 = vmul.f32 %v4381_v21, %v4368_v0  ;;  %v4398_v13 = vmul.f32 %v4382_v31, %v4369_v44  ;;  %v4399_v10 = vmul.f32 %v4383_v54, %v4370_v16  ;;  %v10652_v54 = vld [vmem:[#allocation16_spill] sm:$0xff] }
 0x771   : > { %v4403_v12 = vmul.f32 %v9162_v38, %v4395_v2  ;;  %v4404_v47 = vmul.f32 %v9162_v38, %v4396_v22 }
 0x772   : > { %v4405_v1 = vmul.f32 %v9162_v38, %v4397_v63  ;;  %v4406_v25 = vmul.f32 %v9162_v38, %v4398_v13  ;;  %v4407_v33 = vmul.f32 %v9162_v38, %v4399_v10  ;;  %v10653_v63 = vld [vmem:[#allocation20_spill] sm:$0xff] }
 0x773   : > { %v4411_v48 = vadd.f32 %v9175_v34, %v4403_v12  ;;  %v4412_v8 = vadd.f32 %v9175_v34, %v4404_v47  ;;  %v10654_v10 = vld [vmem:[#allocation24_spill] sm:$0xff] }
 0x774   : > { %v4413_v51 = vadd.f32 %v9175_v34, %v4405_v1  ;;  %v4414_v59 = vadd.f32 %v9175_v34, %v4406_v25  ;;  %v4415_v37 = vadd.f32 %v9175_v34, %v4407_v33  ;;  %v10647_v34 = vld [vmem:[#allocation23_spill] sm:$0xff] }
 0x775   : > { %4419 = vst [vmem:[%s7005_s26 + $0x18] sm:$0x20] %v4411_v48  ;;  %4420 = vst [vmem:[%s7005_s26 + $0x20] sm:$0x20] %v4412_v8  ;;  %v10655_v48 = vld [vmem:[#allocation28_spill] sm:$0xff] }
 0x776   : > { %4421 = vst [vmem:[%s7005_s26 + $0x28] sm:$0x20] %v4413_v51  ;;  %4422 = vst [vmem:[%s7005_s26 + $0x30] sm:$0x20] %v4414_v59  ;;  %v10656_v59 = vld [vmem:[#allocation34_spill] sm:$0xff] }
 0x777   : > { %4423 = vst [vmem:[%s7005_s26 + $0x38] sm:$0x20] %v4415_v37 }
 0x787   : > { %v4569_v6 = vpop.f32.mrf.mxu0  ;;  %v4640_v49 = vpop.f32.mrf.mxu1 }
 0x788   : > { %v4649_v17 = vrot.slane %v4569_v6, 2  ;;  %v4653_v55 = vrot.slane %v4569_v6, 3  ;;  %v4657_v50 = vrot.slane %v4569_v6, 4  ;;  %v4661_v38 = vrot.slane %v4569_v6, 5 }
 0x789   : > { %v4665_v18 = vrot.slane %v4569_v6, 6  ;;  %v4669_v39 = vrot.slane %v4569_v6, 7  ;;  %v4673_v46 = vrot.slane %v4569_v6, 1  ;;  %v4733_v24 = vadd.f32 %v4569_v6, %v10487_v4  ;;  %v4571_v21 = vpop.f32.mrf.mxu0 }
 0x78a   : > { %v4709_v30 = vadd.f32 %v4649_v17, %v7346_v7  ;;  %v4713_v60 = vadd.f32 %v4653_v55, %v10646_v32  ;;  %v4717_v20 = vadd.f32 %v4657_v50, %v10647_v34  ;;  %v4721_v11 = vadd.f32 %v4661_v38, %v10648_v27  ;;  %v10657_v17 = vld [vmem:[#allocation17_spill] sm:$0xff]  ;;  %v10658_v50 = vld [vmem:[#allocation36_spill] sm:$0xff] }
 0x78b   : > { %v4725_v14 = vadd.f32 %v4665_v18, %v10649_v43  ;;  %v4729_v42 = vadd.f32 %v4669_v39, %v10650_v35  ;;  %v4747_v61 = vmul.f32 0.5, %v4733_v24  ;;  %v4737_v15 = vadd.f32 %v4673_v46, %v10651_v53  ;;  %v10659_v39 = vld [vmem:[#allocation21_spill] sm:$0xff]  ;;  %v10660_v24 = vld [vmem:[#allocation38_spill] sm:$0xff] }
 0x78c   : > { %v4741_v23 = vmul.f32 0.5, %v4709_v30  ;;  %v4742_v3 = vmul.f32 0.5, %v4713_v60  ;;  %v4743_v5 = vmul.f32 0.5, %v4717_v20  ;;  %v4744_v58 = vmul.f32 0.5, %v4721_v11  ;;  %v10661_v60 = vld [vmem:[#allocation25_spill] sm:$0xff] }
 0x78d   : > { %v4745_v0 = vmul.f32 0.5, %v4725_v14  ;;  %6479 = vtanh.f32 %v4747_v61  ;;  %v4651_v44 = vrot.slane %v4640_v49, 2  ;;  %v4655_v28 = vrot.slane %v4640_v49, 3  ;;  %v10662_v14 = vld [vmem:[#allocation39_spill] sm:$0xff] }
 0x78e   : > { %6481 = vtanh.f32 %v4741_v23  ;;  %v4659_v36 = vrot.slane %v4640_v49, 4  ;;  %v4746_v41 = vmul.f32 0.5, %v4729_v42  ;;  %v4748_v57 = vmul.f32 0.5, %v4737_v15  ;;  %v10663_v15 = vld [vmem:[#allocation33_spill] sm:$0xff] }
 0x78f   : > { %6483 = vtanh.f32 %v4742_v3  ;;  %v4663_v16 = vrot.slane %v4640_v49, 5  ;;  %v4667_v31 = vrot.slane %v4640_v49, 6  ;;  %v4711_v2 = vadd.f32 %v4651_v44, %v10652_v54  ;;  %v10664_v3 = vld [vmem:[#allocation35_spill] sm:$0xff]  ;;  %v9483_v44 = vpop.f32.mrf.mxu1 }
 0x790   : > { %6485 = vtanh.f32 %v4743_v5  ;;  %v4671_v22 = vrot.slane %v4640_v49, 7  ;;  %v4715_v13 = vadd.f32 %v4655_v28, %v10653_v63  ;;  %v4719_v12 = vadd.f32 %v4659_v36, %v10654_v10  ;;  %v10665_v28 = vld [vmem:[#allocation37_spill] sm:$0xff] }
 0x791   : > { %6487 = vtanh.f32 %v4744_v58  ;;  %v4650_v47 = vrot.slane %v4571_v21, 2  ;;  %v4654_v1 = vrot.slane %v4571_v21, 3  ;;  %v4658_v25 = vrot.slane %v4571_v21, 4 }
 0x792   : > { %6489 = vtanh.f32 %v4745_v0  ;;  %v4675_v33 = vrot.slane %v4640_v49, 1  ;;  %v4723_v8 = vadd.f32 %v4663_v16, %v10655_v48  ;;  %v4662_v51 = vrot.slane %v4571_v21, 5 }
 0x793   : > { %6491 = vtanh.f32 %v4746_v41  ;;  %v4727_v37 = vadd.f32 %v4667_v31, %v10656_v59  ;;  %v4666_v6 = vrot.slane %v4571_v21, 6  ;;  %v4710_v55 = vadd.f32 %v4650_v47, %v10657_v17  ;;  %v10666_v31 = vld [vmem:[#allocation40_spill] sm:$0xff]  ;;  %v10667_v47 = vld [vmem:[#allocation41_spill] sm:$0xff] }
 0x794   : > { %6493 = vtanh.f32 %v4748_v57  ;;  %v4731_v38 = vadd.f32 %v4671_v22, %v10658_v50  ;;  %v4670_v18 = vrot.slane %v4571_v21, 7  ;;  %v4714_v46 = vadd.f32 %v4654_v1, %v10659_v39 }
 0x795   : > { %6495 = vtanh.f32 %v4711_v2  ;;  %v4735_v30 = vadd.f32 %v4640_v49, %v10660_v24  ;;  %v4718_v20 = vadd.f32 %v4658_v25, %v10661_v60  ;;  %v4739_v42 = vadd.f32 %v4675_v33, %v10662_v14 }
 0x796   : > { %6497 = vtanh.f32 %v4715_v13  ;;  %v4674_v61 = vrot.slane %v4571_v21, 1  ;;  %v4722_v23 = vadd.f32 %v4662_v51, %v10663_v15  ;;  %v4726_v5 = vadd.f32 %v4666_v6, %v10664_v3 }
 0x797   : > { %6499 = vtanh.f32 %v4719_v12  ;;  %v4773_v58 = vmul.f32 0.5, %v4710_v55  ;;  %v4730_v36 = vadd.f32 %v4670_v18, %v10665_v28  ;;  %v4774_v41 = vmul.f32 0.5, %v4714_v46 }
 0x798   : > { %6501 = vtanh.f32 %v4723_v8  ;;  %v4734_v2 = vadd.f32 %v4571_v21, %v10666_v31  ;;  %v4775_v22 = vmul.f32 0.5, %v4718_v20  ;;  %v4738_v1 = vadd.f32 %v4674_v61, %v10667_v47  ;;  %v10668_v21 = vld [vmem:[#allocation42_spill] sm:$0xff] }
 0x799   : > { %6503 = vtanh.f32 %v4727_v37  ;;  %v4776_v25 = vmul.f32 0.5, %v4722_v23  ;;  %v4660_v33 = vrot.slane %v9483_v44, 4  ;;  %v4777_v51 = vmul.f32 0.5, %v4726_v5  ;;  %v10672_v31 = vld [vmem:[#allocation22_spill] sm:$0xff] }
 0x79a   : > { %v6480_v49 = vpop.eup %6479  ;;  %6505 = vtanh.f32 %v4731_v38  ;;  %v4664_v6 = vrot.slane %v9483_v44, 5  ;;  %v4778_v38 = vmul.f32 0.5, %v4730_v36  ;;  %v4668_v18 = vrot.slane %v9483_v44, 6 }
 0x79b   : > { %v6482_v16 = vpop.eup %6481  ;;  %6507 = vtanh.f32 %v4735_v30  ;;  %v4763_v30 = vmul.f32 0.5, %v6480_v49  ;;  %v4779_v20 = vmul.f32 0.5, %v4734_v2  ;;  %v4780_v23 = vmul.f32 0.5, %v4738_v1 }
 0x79c   : > { %v6484_v12 = vpop.eup %6483  ;;  %6509 = vtanh.f32 %v4739_v42  ;;  %v4720_v5 = vadd.f32 %v4660_v33, %v10585_v45  ;;  %v4656_v36 = vrot.slane %v9483_v44, 3  ;;  %v4724_v13 = vadd.f32 %v4664_v6, %v10668_v21  ;;  %v10669_v42 = vld [vmem:[#allocation43_spill] sm:$0xff]  ;;  %v10670_v21 = vld [vmem:[#allocation44_spill] sm:$0xff] }
 0x79d   : > { %v6486_v8 = vpop.eup %6485  ;;  %6511 = vtanh.f32 %v4773_v58  ;;  %v4757_v2 = vmul.f32 0.5, %v6482_v16  ;;  %v4728_v57 = vadd.f32 %v4668_v18, %v10669_v42  ;;  %v9502_v0 = vadd.f32 0.5, %v4763_v30 }
 0x79e   : > { %v6488_v55 = vpop.eup %6487  ;;  %6513 = vtanh.f32 %v4774_v41  ;;  %v4672_v41 = vrot.slane %v9483_v44, 7  ;;  %v4676_v33 = vrot.slane %v9483_v44, 1  ;;  %v4815_v45 = vmul.f32 0.5, %v4720_v5  ;;  %v10673_v5 = vld [vmem:[#allocation18_spill] sm:$0xff] }
 0x79f   : > { %v6490_v46 = vpop.eup %6489  ;;  %6515 = vtanh.f32 %v4775_v22  ;;  %v4758_v22 = vmul.f32 0.5, %v6484_v12  ;;  %v4760_v11 = vmul.f32 0.5, %v6488_v55  ;;  %v4816_v12 = vmul.f32 0.5, %v4724_v13 }
 0x7a0   : > { %v6492_v61 = vpop.eup %6491  ;;  %6517 = vtanh.f32 %v4776_v25  ;;  %v4759_v25 = vmul.f32 0.5, %v6486_v8  ;;  %v4761_v58 = vmul.f32 0.5, %v6490_v46  ;;  %v4732_v16 = vadd.f32 %v4672_v41, %v10670_v21  ;;  %v10671_v8 = vld [vmem:[#allocation45_spill] sm:$0xff]  ;;  %v10674_v21 = vld [vmem:[#allocation46_spill] sm:$0xff] }
 0x7a1   : > { %v6494_v37 = vpop.eup %6493  ;;  %6519 = vtanh.f32 %v4777_v51  ;;  %v4762_v6 = vmul.f32 0.5, %v6492_v61  ;;  %v4736_v30 = vadd.f32 %v9483_v44, %v10671_v8  ;;  %v4716_v28 = vadd.f32 %v4656_v36, %v10672_v31 }
 0x7a2   : > { %v6496_v49 = vpop.eup %6495  ;;  %6521 = vtanh.f32 %v4778_v38  ;;  %v4652_v38 = vrot.slane %v9483_v44, 2  ;;  %v4764_v42 = vmul.f32 0.5, %v6494_v37  ;;  %v4765_v55 = vadd.f32 0.5, %v4757_v2 }
 0x7a3   : > { %v6498_v1 = vpop.eup %6497  ;;  %6523 = vtanh.f32 %v4779_v20  ;;  %v4817_v20 = vmul.f32 0.5, %v4728_v57  ;;  %v4766_v46 = vadd.f32 0.5, %v4758_v22  ;;  %v4768_v41 = vadd.f32 0.5, %v4760_v11 }
 0x7a4   : > { %v6500_v51 = vpop.eup %6499  ;;  %6525 = vtanh.f32 %v4780_v23  ;;  %v4767_v23 = vadd.f32 0.5, %v4759_v25  ;;  %v4712_v15 = vadd.f32 %v4652_v38, %v10673_v5  ;;  %v4814_v13 = vmul.f32 0.5, %v4716_v28 }
 0x7a5   : > { %v6502_v47 = vpop.eup %6501  ;;  %6527 = vtanh.f32 %v4815_v45  ;;  %v4740_v14 = vadd.f32 %v4676_v33, %v10674_v21  ;;  %v4769_v60 = vadd.f32 0.5, %v4761_v58  ;;  %v4818_v44 = vmul.f32 0.5, %v4732_v16 }
 0x7a6   : > { %v6504_v18 = vpop.eup %6503  ;;  %6529 = vtanh.f32 %v4816_v12  ;;  %v4813_v57 = vmul.f32 0.5, %v4712_v15  ;;  %v4770_v8 = vadd.f32 0.5, %v4762_v6  ;;  %v4772_v2 = vadd.f32 0.5, %v4764_v42 }
 0x7a7   : > { %v6506_v3 = vpop.eup %6505  ;;  %v4819_v22 = vmul.f32 0.5, %v4736_v30  ;;  %6531 = vtanh.f32 %v4817_v20  ;;  %v4879_v5 = vmul.f32 %v6500_v51, %v4767_v23  ;;  %v4820_v11 = vmul.f32 0.5, %v4740_v14 }
 0x7a8   : > { %v9511_v61 = vpop.eup %6507  ;;  %6533 = vtanh.f32 %v4813_v57  ;;  %v4880_v31 = vmul.f32 %v6502_v47, %v4768_v41  ;;  %v4877_v33 = vmul.f32 %v6496_v49, %v4765_v55  ;;  %v4881_v12 = vmul.f32 %v6504_v18, %v4769_v60 }
 0x7a9   : > { %v9514_v37 = vpop.eup %6509  ;;  %6535 = vtanh.f32 %v4814_v13  ;;  %v4878_v30 = vmul.f32 %v6498_v1, %v4766_v46  ;;  %v10675_v14 = vrot.slane %v9257_v9, 7  ;;  %v10676_v55 = vrot.slane %v9261_v62, 7 }
 0x7aa   : > { %v6512_v36 = vpop.eup %6511  ;;  %6537 = vtanh.f32 %v4818_v44  ;;  %v4882_v60 = vmul.f32 %v6506_v3, %v4770_v8  ;;  %v10677_v57 = vrot.slane %v9265_v56, 7  ;;  %v10678_v9 = vrot.slane %v9270_v52, 7 }
 0x7ab   : > { %v6514_v25 = vpop.eup %6513  ;;  %v4789_v38 = vmul.f32 0.5, %v6512_v36  ;;  %6539 = vtanh.f32 %v4819_v22  ;;  %v10679_v62 = vrot.slane %v9276_v29, 7  ;;  %v10680_v56 = vrot.slane %v9281_v19, 7 }
 0x7ac   : > { %v6516_v45 = vpop.eup %6515  ;;  %v4790_v28 = vmul.f32 0.5, %v6514_v25  ;;  %6541 = vtanh.f32 %v4820_v11  ;;  %v4883_v29 = vmul.f32 %v9511_v61, %v9502_v0 }
 0x7ad   : > { %v6518_v21 = vpop.eup %6517  ;;  %v4791_v58 = vmul.f32 0.5, %v6516_v45  ;;  %v4797_v16 = vadd.f32 0.5, %v4789_v38 }
 0x7ae   : > { %v6520_v15 = vpop.eup %6519  ;;  %v4792_v6 = vmul.f32 0.5, %v6518_v21  ;;  %v4798_v42 = vadd.f32 0.5, %v4790_v28 }
 0x7af   : > { %v6522_v20 = vpop.eup %6521  ;;  %v4793_v36 = vmul.f32 0.5, %v6520_v15  ;;  %v4799_v51 = vadd.f32 0.5, %v4791_v58  ;;  %v4869_v23 = vmul.f32 %v10675_v14, %v4797_v16  ;;  %v10681_v16 = vrot.slane %v9284_v40, 7 }
 0x7b0   : > { %v6524_v47 = vpop.eup %6523  ;;  %v4794_v41 = vmul.f32 0.5, %v6522_v20  ;;  %v4800_v49 = vadd.f32 0.5, %v4792_v6  ;;  %v4870_v13 = vmul.f32 %v10676_v55, %v4798_v42  ;;  %v10682_v42 = vrot.slane %v9289_v26, 7 }
 0x7b1   : > { %v6526_v18 = vpop.eup %6525  ;;  %v4795_v44 = vmul.f32 0.5, %v6524_v47  ;;  %v4801_v21 = vadd.f32 0.5, %v4793_v36  ;;  %v4871_v1 = vmul.f32 %v10677_v57, %v4799_v51  ;;  %v9522_v46 = vadd.f32 %v4877_v33, %v4869_v23 }
 0x7b2   : > { %v4796_v22 = vmul.f32 0.5, %v6526_v18  ;;  %v4802_v25 = vadd.f32 0.5, %v4794_v41  ;;  %v4872_v38 = vmul.f32 %v10678_v9, %v4800_v49  ;;  %v9526_v11 = vadd.f32 %v4878_v30, %v4870_v13  ;;  %v6528_v52 = vpop.eup %6527 }
 0x7b3   : > { %v4803_v45 = vadd.f32 0.5, %v4795_v44  ;;  %v4873_v28 = vmul.f32 %v10679_v62, %v4801_v21  ;;  %v9530_v3 = vadd.f32 %v4879_v5, %v4871_v1  ;;  %6543 = vtanh.f32 %v9522_v46  ;;  %v6530_v5 = vpop.eup %6529 }
 0x7b4   : > { %v4804_v8 = vadd.f32 0.5, %v4796_v22  ;;  %v4874_v33 = vmul.f32 %v10680_v56, %v4802_v25  ;;  %v9535_v58 = vadd.f32 %v4880_v31, %v4872_v38  ;;  %6545 = vtanh.f32 %v9526_v11  ;;  %v6532_v31 = vpop.eup %6531 }
 0x7b5   : > { %v4875_v15 = vmul.f32 %v10681_v16, %v4803_v45  ;;  %v9542_v6 = vadd.f32 %v4881_v12, %v4873_v28  ;;  %6547 = vtanh.f32 %v9530_v3  ;;  %v4884_v40 = vmul.f32 %v9514_v37, %v4772_v2  ;;  %v6534_v0 = vpop.eup %6533 }
 0x7b6   : > { %v4876_v19 = vmul.f32 %v10682_v42, %v4804_v8  ;;  %v9547_v30 = vadd.f32 %v4882_v60, %v4874_v33  ;;  %6549 = vtanh.f32 %v9535_v58  ;;  %v6536_v61 = vpop.eup %6535  ;;  %v4829_v51 = vmul.f32 0.5, %v6534_v0 }
 0x7b7   : > { %v9550_v20 = vadd.f32 %v4883_v29, %v4875_v15  ;;  %6551 = vtanh.f32 %v9542_v6  ;;  %v6538_v36 = vpop.eup %6537  ;;  %v4830_v23 = vmul.f32 0.5, %v6536_v61  ;;  %v4831_v47 = vmul.f32 0.5, %v6528_v52 }
 0x7b8   : > { %v9554_v12 = vadd.f32 %v4884_v40, %v4876_v19  ;;  %6553 = vtanh.f32 %v9547_v30  ;;  %v6540_v26 = vpop.eup %6539  ;;  %v4832_v41 = vmul.f32 0.5, %v6530_v5  ;;  %v4833_v49 = vmul.f32 0.5, %v6532_v31 }
 0x7b9   : > { %6555 = vtanh.f32 %v9550_v20  ;;  %v6542_v14 = vpop.eup %6541  ;;  %v4834_v55 = vmul.f32 0.5, %v6538_v36  ;;  %v4835_v37 = vmul.f32 0.5, %v6540_v26  ;;  %v4837_v2 = vadd.f32 0.5, %v4829_v51 }
 0x7ba   : > { %6557 = vtanh.f32 %v9554_v12  ;;  %v4836_v13 = vmul.f32 0.5, %v6542_v14  ;;  %v4838_v18 = vadd.f32 0.5, %v4830_v23  ;;  %v4839_v57 = vadd.f32 0.5, %v4831_v47 }
 0x7bb   : > { %v4840_v1 = vadd.f32 0.5, %v4832_v41  ;;  %v4841_v9 = vadd.f32 0.5, %v4833_v49  ;;  %v4842_v38 = vadd.f32 0.5, %v4834_v55  ;;  %v4843_v45 = vadd.f32 0.5, %v4835_v37 }
 0x7bc   : > { %v4844_v56 = vadd.f32 0.5, %v4836_v13 }
 0x7c0   : > { %v6544_v60 = vpop.eup %6543 }
 0x7c1   : > { %v6546_v44 = vpop.eup %6545  ;;  %v9559_v21 = vmul.f32 %v6544_v60, %v4837_v2 }
 0x7c2   : > { %v6548_v22 = vpop.eup %6547  ;;  %v9561_v25 = vmul.f32 %v6546_v44, %v4838_v18 }
 0x7c3   : > { %v6550_v62 = vpop.eup %6549  ;;  %v5127_v28 = vrot.slane %v9559_v21, 6  ;;  %v4942_v8 = vmul.f32 %v9559_v21, %v9559_v21  ;;  %v9566_v33 = vmul.f32 %v6548_v22, %v4839_v57 }
 0x7c4   : > { %v6552_v52 = vpop.eup %6551  ;;  %v4917_v16 = vrot.slane %v9561_v25, 7  ;;  %v4943_v15 = vmul.f32 %v9561_v25, %v9561_v25  ;;  %v9571_v29 = vmul.f32 %v6550_v62, %v4840_v1  ;;  %v5128_v5 = vrot.slane %v9561_v25, 5 }
 0x7c5   : > { %v9574_v42 = vmul.f32 %v6552_v52, %v4841_v9  ;;  %v4919_v19 = vrot.slane %v9566_v33, 6  ;;  %v5130_v31 = vrot.slane %v9566_v33, 4  ;;  %v4944_v40 = vmul.f32 %v9566_v33, %v9566_v33  ;;  %v6554_v51 = vpop.eup %6553 }
 0x7c6   : > { %v4918_v0 = vsel %vm1127_vm7, %v4917_v16, %v9559_v21  ;;  %v4958_v61 = vrot.slane %v4943_v15, 7  ;;  %v4920_v36 = vrot.slane %v9571_v29, 5  ;;  %v5129_v26 = vsel %vm1109_vm1, %v5128_v5, %v5127_v28  ;;  %v6556_v49 = vpop.eup %6555 }
 0x7c7   : > { %v4933_v14 = vsel %vm4932_vm9, %v4918_v0, 0.0  ;;  %v4922_v23 = vrot.slane %v9574_v42, 4  ;;  %v5131_v47 = vsel %vm1112_vm2, %v5130_v31, %v5129_v26  ;;  %v5132_v41 = vrot.slane %v9571_v29, 3  ;;  %v6558_v60 = vpop.eup %6557 }
 0x7c8   : > { %4934 = vadd.xlane.f32.xlu1 %v4933_v14  ;;  %v4959_v55 = vsel %vm1127_vm7, %v4958_v61, %v4942_v8  ;;  %v9589_v37 = vmul.f32 %v6554_v51, %v4842_v38  ;;  %v4921_v2 = vsel %vm1109_vm1, %v4920_v36, %v4919_v19  ;;  %v5134_v13 = vrot.slane %v9574_v42, 2 }
 0x7c9   : > { %v4973_v18 = vsel %vm4932_vm9, %v4959_v55, 0.0  ;;  %v9594_v44 = vmul.f32 %v6556_v49, %v4843_v45  ;;  %v4923_v57 = vsel %vm1112_vm2, %v4922_v23, %v4921_v2  ;;  %v5133_v1 = vsel %vm1115_vm3, %v5132_v41, %v5131_v47 }
 0x7ca   : > { %v9598_v22 = vmul.f32 %v6558_v60, %v4844_v56  ;;  %v4924_v9 = vrot.slane %v9589_v37, 3  ;;  %v5135_v38 = vsel %vm1118_vm4, %v5134_v13, %v5133_v1  ;;  %v5136_v62 = vrot.slane %v9589_v37, 1 }
 0x7cb   : > { %v4926_v28 = vrot.slane %v9594_v44, 2  ;;  %v4945_v8 = vmul.f32 %v9571_v29, %v9571_v29  ;;  %v4946_v45 = vmul.f32 %v9574_v42, %v9574_v42  ;;  %v4947_v52 = vmul.f32 %v9589_v37, %v9589_v37 }
 0x7cc   : > { %4974 = vadd.xlane.f32.xlu1 %v4973_v18  ;;  %v4925_v56 = vsel %vm1115_vm3, %v4924_v9, %v4923_v57  ;;  %v4928_v16 = vrot.slane %v9598_v22, 1  ;;  %v5137_v15 = vsel %vm1121_vm5, %v5136_v62, %v5135_v38  ;;  %v5139_v5 = vrot.slane %v9598_v22, 7 }
 0x7cd   : > { %v4927_v19 = vsel %vm1118_vm4, %v4926_v28, %v4925_v56  ;;  %v5138_v31 = vsel %vm1124_vm6, %v9594_v44, %v5137_v15  ;;  %v4948_v0 = vmul.f32 %v9594_v44, %v9594_v44  ;;  %v4949_v61 = vmul.f32 %v9598_v22, %v9598_v22 }
 0x7ce   : > { %v4929_v36 = vsel %vm1121_vm5, %v4928_v16, %v4927_v19  ;;  %v5140_v26 = vsel %vm1127_vm7, %v5139_v5, %v5138_v31  ;;  %v4960_v51 = vrot.slane %v4944_v40, 6  ;;  %v4961_v14 = vrot.slane %v4945_v8, 5 }
 0x7cf   : > { %v4937_v23 = vsel %vm4936_vm10, %v4929_v36, 0.0  ;;  %5207 = vmatmul.mubr.f32.vlgmr.msra.gmra.mxu0 %v5140_v26  ;;  %5278 = vmatmul.mubr.f32.vlgmr.msra.gmra.mxu1 %v5140_v26  ;;  %v4963_v47 = vrot.slane %v4946_v45, 4  ;;  %v4965_v49 = vrot.slane %v4947_v52, 3  ;;  %v4967_v2 = vrot.slane %v4948_v0, 2 }
 0x7d0   : > { %4938 = vadd.xlane.f32.xlu0 %v4937_v23  ;;  %v4962_v41 = vsel %vm1109_vm1, %v4961_v14, %v4960_v51  ;;  %v4969_v60 = vrot.slane %v4949_v61, 1 }
 0x7d1   : > { %v4964_v55 = vsel %vm1112_vm2, %v4963_v47, %v4962_v41  ;;  %v9635_v47 = vld [vmem:[%s9878_s4] ss:$0 sm:$0xff] }
 0x7d2   : > { %v4966_v13 = vsel %vm1115_vm3, %v4965_v49, %v4964_v55 }
 0x7d3   : > { %v4968_v18 = vsel %vm1118_vm4, %v4967_v2, %v4966_v13 }
 0x7d4   : > { %v4970_v40 = vsel %vm1121_vm5, %v4969_v60, %v4968_v18 }
 0x7d5   : > { %v4976_v57 = vsel %vm4936_vm10, %v4970_v40, 0.0 }
 0x7d6   : > { %4977 = vadd.xlane.f32.xlu0 %v4976_v57 }
 0x851   : > { %v4935_v1 = vpop.xlane.xlu1 %4934 }
 0x852   : > { %v4940_v9 = vmul.f32 0.0078125, %v4935_v1 }
 0x854   : > { %v4981_v62 = vmul.f32 %v4940_v9, %v4940_v9  ;;  %v4987_v0 = vrot.slane %v4940_v9, 1  ;;  %v5002_v61 = vsub.f32 %v9559_v21, %v4940_v9  ;;  %v9642_v21 = vld [vmem:[%s9879_s5] ss:$0 sm:$0xff] }
 0x855   : > { %v4975_v38 = vpop.xlane.xlu1 %4974 }
 0x856   : > { %v4979_v28 = vmul.f32 0.0078125, %v4975_v38  ;;  %v5003_v26 = vsub.f32 %v9561_v25, %v4987_v0 }
 0x858   : > { %v4983_v8 = vsub.f32 %v4979_v28, %v4981_v62 }
 0x859   : > { %v4939_v45 = vpop.xlane.xlu0 %4938 }
 0x85a   : > { %v5010_v52 = vadd.f32 1e-05, %v4983_v8  ;;  %v4941_v56 = vmul.f32 0.0078125, %v4939_v45 }
 0x85c   : > { %6559 = vrsqrt.f32 %v5010_v52  ;;  %v4982_v15 = vmul.f32 %v4941_v56, %v4941_v56  ;;  %v4988_v55 = vrot.slane %v4941_v56, 2  ;;  %v4989_v2 = vrot.slane %v4941_v56, 3 }
 0x85d   : > { %v4990_v13 = vrot.slane %v4941_v56, 4  ;;  %v4991_v60 = vrot.slane %v4941_v56, 5  ;;  %v4992_v40 = vrot.slane %v4941_v56, 6  ;;  %v4993_v57 = vrot.slane %v4941_v56, 7 }
 0x85e   : > { %v5004_v9 = vsub.f32 %v9566_v33, %v4988_v55  ;;  %v5005_v38 = vsub.f32 %v9571_v29, %v4989_v2 }
 0x85f   : > { %v4978_v16 = vpop.xlane.xlu0 %4977  ;;  %v5006_v62 = vsub.f32 %v9574_v42, %v4990_v13  ;;  %v5007_v28 = vsub.f32 %v9589_v37, %v4991_v60 }
 0x860   : > { %v4980_v5 = vmul.f32 0.0078125, %v4978_v16 }
 0x862   : > { %v4984_v19 = vsub.f32 %v4980_v5, %v4982_v15  ;;  %v5008_v15 = vsub.f32 %v9594_v44, %v4992_v40  ;;  %v5009_v5 = vsub.f32 %v9598_v22, %v4993_v57 }
 0x864   : > { %v5011_v31 = vadd.f32 1e-05, %v4984_v19 }
 0x866   : > { %6561 = vrsqrt.f32 %v5011_v31 }
 0x869   : > { %v6560_v36 = vpop.eup %6559 }
 0x86a   : > { %v5016_v51 = vrot.slane %v6560_v36, 1  ;;  %v5031_v14 = vmul.f32 %v6560_v36, %v5002_v61 }
 0x86c   : > { %v5032_v23 = vmul.f32 %v5016_v51, %v5003_v26  ;;  %v5039_v41 = vmul.f32 %v9635_v47, %v5031_v14 }
 0x86e   : > { %v5040_v49 = vmul.f32 %v9635_v47, %v5032_v23  ;;  %v5047_v25 = vadd.f32 %v9642_v21, %v5039_v41 }
 0x870   : > { %v5048_v18 = vadd.f32 %v9642_v21, %v5040_v49  ;;  %5055 = vst [vmem:[%s7005_s26] sm:$0x40] %v5047_v25 }
 0x872   : > { %5056 = vst [vmem:[%s7005_s26 + $0x8] sm:$0x40] %v5048_v18 }
 0x873   : > { %v6562_v1 = vpop.eup %6561 }
 0x874   : > { %v5017_v8 = vrot.slane %v6562_v1, 2  ;;  %v5018_v45 = vrot.slane %v6562_v1, 3  ;;  %v5019_v52 = vrot.slane %v6562_v1, 4  ;;  %v5020_v16 = vrot.slane %v6562_v1, 5 }
 0x875   : > { %v5021_v19 = vrot.slane %v6562_v1, 6  ;;  %v5022_v56 = vrot.slane %v6562_v1, 7 }
 0x876   : > { %v5033_v31 = vmul.f32 %v5017_v8, %v5004_v9  ;;  %v5034_v0 = vmul.f32 %v5018_v45, %v5005_v38  ;;  %v5035_v61 = vmul.f32 %v5019_v52, %v5006_v62  ;;  %v5036_v33 = vmul.f32 %v5020_v16, %v5007_v28 }
 0x877   : > { %v5037_v29 = vmul.f32 %v5021_v19, %v5008_v15  ;;  %v5038_v42 = vmul.f32 %v5022_v56, %v5009_v5 }
 0x878   : > { %v5041_v37 = vmul.f32 %v9635_v47, %v5033_v31  ;;  %v5042_v36 = vmul.f32 %v9635_v47, %v5034_v0  ;;  %v5043_v44 = vmul.f32 %v9635_v47, %v5035_v61  ;;  %v5044_v22 = vmul.f32 %v9635_v47, %v5036_v33 }
 0x879   : > { %v5045_v26 = vmul.f32 %v9635_v47, %v5037_v29  ;;  %v5046_v51 = vmul.f32 %v9635_v47, %v5038_v42 }
 0x87a   : > { %v5049_v14 = vadd.f32 %v9642_v21, %v5041_v37  ;;  %v5050_v23 = vadd.f32 %v9642_v21, %v5042_v36  ;;  %v5051_v41 = vadd.f32 %v9642_v21, %v5043_v44  ;;  %v5052_v49 = vadd.f32 %v9642_v21, %v5044_v22 }
 0x87b   : > { %v5053_v25 = vadd.f32 %v9642_v21, %v5045_v26  ;;  %v5054_v55 = vadd.f32 %v9642_v21, %v5046_v51  ;;  %v5492_v37 = vrot.slane %v9522_v46, 7 }
 0x87c   : > { %5057 = vst [vmem:[%s7005_s26 + $0x10] sm:$0x40] %v5049_v14  ;;  %5058 = vst [vmem:[%s7005_s26 + $0x18] sm:$0x40] %v5050_v23 }
 0x87d   : > { %5059 = vst [vmem:[%s7005_s26 + $0x20] sm:$0x40] %v5051_v41  ;;  %5060 = vst [vmem:[%s7005_s26 + $0x28] sm:$0x40] %v5052_v49 }
 0x87e   : > { %5061 = vst [vmem:[%s7005_s26 + $0x30] sm:$0x40] %v5053_v25  ;;  %5062 = vst [vmem:[%s7005_s26 + $0x38] sm:$0x40] %v5054_v55 }
 0x88f   : > { %v5208_v2 = vpop.f32.mrf.mxu0  ;;  %v5279_v5 = vpop.f32.mrf.mxu1 }
 0x890   : > { %v5288_v13 = vrot.slane %v5208_v2, 1  ;;  %v5292_v60 = vrot.slane %v5208_v2, 2  ;;  %v5296_v18 = vrot.slane %v5208_v2, 3  ;;  %v5300_v40 = vrot.slane %v5208_v2, 4 }
 0x891   : > { %v5304_v57 = vrot.slane %v5208_v2, 5  ;;  %v5308_v1 = vrot.slane %v5208_v2, 6  ;;  %v5312_v9 = vrot.slane %v5208_v2, 7  ;;  %v5376_v38 = vadd.f32 %v5208_v2, %v10651_v53  ;;  %v5210_v29 = vpop.f32.mrf.mxu0 }
 0x892   : > { %v5348_v62 = vadd.f32 %v5288_v13, %v7346_v7  ;;  %v5352_v28 = vadd.f32 %v5292_v60, %v10646_v32  ;;  %v5356_v8 = vadd.f32 %v5296_v18, %v10647_v34  ;;  %v5360_v45 = vadd.f32 %v5300_v40, %v10648_v27  ;;  %v10683_v60 = vld [vmem:[#allocation25_spill] sm:$0xff] }
 0x893   : > { %v5364_v52 = vadd.f32 %v5304_v57, %v10649_v43  ;;  %v5368_v16 = vadd.f32 %v5308_v1, %v10650_v35  ;;  %v5387_v15 = vmul.f32 0.5, %v5376_v38  ;;  %v5372_v19 = vadd.f32 %v5312_v9, %v10487_v4 }
 0x894   : > { %v5380_v56 = vmul.f32 0.5, %v5348_v62  ;;  %v5381_v31 = vmul.f32 0.5, %v5352_v28  ;;  %v5382_v0 = vmul.f32 0.5, %v5356_v8  ;;  %v5383_v53 = vmul.f32 0.5, %v5360_v45  ;;  %v10688_v8 = vld [vmem:[#allocation40_spill] sm:$0xff] }
 0x895   : > { %v5384_v61 = vmul.f32 0.5, %v5364_v52  ;;  %6563 = vtanh.f32 %v5387_v15  ;;  %v5290_v7 = vrot.slane %v5279_v5, 1  ;;  %v5294_v32 = vrot.slane %v5279_v5, 2 }
 0x896   : > { %6565 = vtanh.f32 %v5380_v56  ;;  %v5298_v34 = vrot.slane %v5279_v5, 3  ;;  %v5385_v33 = vmul.f32 0.5, %v5368_v16  ;;  %v5386_v27 = vmul.f32 0.5, %v5372_v19  ;;  %v9699_v16 = vpop.f32.mrf.mxu1 }
 0x897   : > { %6567 = vtanh.f32 %v5381_v31  ;;  %v5302_v43 = vrot.slane %v5279_v5, 4  ;;  %v5306_v35 = vrot.slane %v5279_v5, 5  ;;  %v5310_v42 = vrot.slane %v5279_v5, 6 }
 0x898   : > { %6569 = vtanh.f32 %v5382_v0  ;;  %v5350_v4 = vadd.f32 %v5290_v7, %v10652_v54  ;;  %v5314_v36 = vrot.slane %v5279_v5, 7  ;;  %v5354_v44 = vadd.f32 %v5294_v32, %v10653_v63 }
 0x899   : > { %6571 = vtanh.f32 %v5383_v53  ;;  %v5358_v22 = vadd.f32 %v5298_v34, %v10654_v10  ;;  %v5289_v26 = vrot.slane %v5210_v29, 1  ;;  %v5293_v51 = vrot.slane %v5210_v29, 2 }
 0x89a   : > { %6573 = vtanh.f32 %v5384_v61  ;;  %v5297_v14 = vrot.slane %v5210_v29, 3  ;;  %v5362_v23 = vadd.f32 %v5302_v43, %v10655_v48  ;;  %v5366_v41 = vadd.f32 %v5306_v35, %v10656_v59  ;;  %v10684_v59 = vld [vmem:[#allocation39_spill] sm:$0xff] }
 0x89b   : > { %6575 = vtanh.f32 %v5385_v33  ;;  %v5301_v49 = vrot.slane %v5210_v29, 4  ;;  %v5370_v54 = vadd.f32 %v5310_v42, %v10658_v50  ;;  %v5305_v25 = vrot.slane %v5210_v29, 5  ;;  %v10685_v50 = vld [vmem:[#allocation33_spill] sm:$0xff] }
 0x89c   : > { %6577 = vtanh.f32 %v5386_v27  ;;  %v5349_v55 = vadd.f32 %v5289_v26, %v10657_v17  ;;  %v5309_v63 = vrot.slane %v5210_v29, 6  ;;  %v5313_v2 = vrot.slane %v5210_v29, 7  ;;  %v10686_v17 = vld [vmem:[#allocation35_spill] sm:$0xff] }
 0x89d   : > { %6579 = vtanh.f32 %v5350_v4  ;;  %v5353_v10 = vadd.f32 %v5293_v51, %v10659_v39  ;;  %v5374_v13 = vadd.f32 %v5314_v36, %v10660_v24  ;;  %v5357_v18 = vadd.f32 %v5297_v14, %v10683_v60  ;;  %v10687_v24 = vld [vmem:[#allocation37_spill] sm:$0xff] }
 0x89e   : > { %6581 = vtanh.f32 %v5354_v44  ;;  %v5493_v48 = vrot.slane %v9526_v11, 7  ;;  %v5378_v40 = vadd.f32 %v5279_v5, %v10684_v59  ;;  %v5361_v57 = vadd.f32 %v5301_v49, %v10685_v50  ;;  %v10689_v5 = vld [vmem:[#allocation41_spill] sm:$0xff]  ;;  %v10692_v50 = vld [vmem:[#allocation42_spill] sm:$0xff] }
 0x89f   : > { %6583 = vtanh.f32 %v5358_v22  ;;  %v5494_v1 = vrot.slane %v9530_v3, 7  ;;  %v5365_v9 = vadd.f32 %v5305_v25, %v10686_v17  ;;  %v5412_v38 = vmul.f32 0.5, %v5349_v55  ;;  %v10690_v25 = vld [vmem:[#allocation22_spill] sm:$0xff] }
 0x8a0   : > { %6585 = vtanh.f32 %v5362_v23  ;;  %v5495_v39 = vrot.slane %v9535_v58, 7  ;;  %v5369_v28 = vadd.f32 %v5309_v63, %v10687_v24  ;;  %v5373_v45 = vadd.f32 %v5313_v2, %v10688_v8 }
 0x8a1   : > { %6587 = vtanh.f32 %v5366_v41  ;;  %v5413_v52 = vmul.f32 0.5, %v5353_v10  ;;  %v5377_v19 = vadd.f32 %v5210_v29, %v10689_v5  ;;  %v5414_v56 = vmul.f32 0.5, %v5357_v18 }
 0x8a2   : > { %v6564_v62 = vpop.eup %6563  ;;  %6589 = vtanh.f32 %v5370_v54  ;;  %v5496_v31 = vrot.slane %v9542_v6, 7  ;;  %v5415_v53 = vmul.f32 0.5, %v5361_v57  ;;  %v5497_v61 = vrot.slane %v9547_v30, 7 }
 0x8a3   : > { %v6566_v15 = vpop.eup %6565  ;;  %6591 = vtanh.f32 %v5374_v13  ;;  %v5498_v7 = vrot.slane %v9550_v20, 7  ;;  %v5416_v34 = vmul.f32 0.5, %v5365_v9  ;;  %v5499_v33 = vrot.slane %v9554_v12, 7  ;;  %v10691_v13 = vld [vmem:[#allocation26_spill] sm:$0xff] }
 0x8a4   : > { %v6568_v0 = vpop.eup %6567  ;;  %6593 = vtanh.f32 %v5378_v40  ;;  %v5295_v27 = vrot.slane %v9699_v16, 2  ;;  %v5417_v35 = vmul.f32 0.5, %v5369_v28  ;;  %v5418_v29 = vmul.f32 0.5, %v5373_v45 }
 0x8a5   : > { %v6570_v32 = vpop.eup %6569  ;;  %6595 = vtanh.f32 %v5412_v38  ;;  %v5299_v42 = vrot.slane %v9699_v16, 3  ;;  %v5419_v36 = vmul.f32 0.5, %v5377_v19  ;;  %v5291_v44 = vrot.slane %v9699_v16, 1 }
 0x8a6   : > { %v6572_v43 = vpop.eup %6571  ;;  %6597 = vtanh.f32 %v5413_v52  ;;  %v5303_v22 = vrot.slane %v9699_v16, 4  ;;  %v5397_v51 = vmul.f32 0.5, %v6568_v0  ;;  %v5403_v14 = vmul.f32 0.5, %v6564_v62  ;;  %v10693_v62 = vld [vmem:[#allocation43_spill] sm:$0xff]  ;;  %v10694_v0 = vld [vmem:[#allocation44_spill] sm:$0xff] }
 0x8a7   : > { %v6574_v4 = vpop.eup %6573  ;;  %6599 = vtanh.f32 %v5414_v56  ;;  %v5307_v23 = vrot.slane %v9699_v16, 5  ;;  %v5398_v49 = vmul.f32 0.5, %v6570_v32  ;;  %v5311_v54 = vrot.slane %v9699_v16, 6 }
 0x8a8   : > { %v6576_v26 = vpop.eup %6575  ;;  %6601 = vtanh.f32 %v5415_v53  ;;  %v5355_v55 = vadd.f32 %v5295_v27, %v10690_v25  ;;  %v5399_v2 = vmul.f32 0.5, %v6572_v43  ;;  %v5315_v10 = vrot.slane %v9699_v16, 7 }
 0x8a9   : > { %v6578_v41 = vpop.eup %6577  ;;  %6603 = vtanh.f32 %v5416_v34  ;;  %v5359_v60 = vadd.f32 %v5299_v42, %v10691_v13  ;;  %v5396_v59 = vmul.f32 0.5, %v6566_v15  ;;  %v5400_v40 = vmul.f32 0.5, %v6574_v4  ;;  %v10695_v15 = vld [vmem:[#allocation45_spill] sm:$0xff]  ;;  %v10697_v4 = vld [vmem:[#allocation18_spill] sm:$0xff] }
 0x8aa   : > { %v6580_v63 = vpop.eup %6579  ;;  %6605 = vtanh.f32 %v5417_v35  ;;  %v5363_v57 = vadd.f32 %v5303_v22, %v10692_v50  ;;  %v5401_v9 = vmul.f32 0.5, %v6576_v26  ;;  %v5402_v38 = vmul.f32 0.5, %v6578_v41  ;;  %v10696_v35 = vld [vmem:[#allocation46_spill] sm:$0xff] }
 0x8ab   : > { %v6582_v18 = vpop.eup %6581  ;;  %6607 = vtanh.f32 %v5418_v29  ;;  %v5367_v24 = vadd.f32 %v5307_v23, %v10693_v62  ;;  %v5405_v8 = vadd.f32 0.5, %v5397_v51  ;;  %v5406_v45 = vadd.f32 0.5, %v5398_v49 }
 0x8ac   : > { %v6584_v17 = vpop.eup %6583  ;;  %6609 = vtanh.f32 %v5419_v36  ;;  %v5411_v52 = vadd.f32 0.5, %v5403_v14  ;;  %v5453_v5 = vmul.f32 0.5, %v5355_v55  ;;  %v5407_v56 = vadd.f32 0.5, %v5399_v2 }
 0x8ad   : > { %v6586_v28 = vpop.eup %6585  ;;  %v5371_v53 = vadd.f32 %v5311_v54, %v10694_v0  ;;  %v5375_v32 = vadd.f32 %v5315_v10, %v10695_v15  ;;  %v5454_v34 = vmul.f32 0.5, %v5359_v60  ;;  %v5408_v43 = vadd.f32 0.5, %v5400_v40 }
 0x8ae   : > { %v6588_v19 = vpop.eup %6587  ;;  %v5379_v29 = vadd.f32 %v9699_v16, %v10696_v35  ;;  %v5455_v42 = vmul.f32 0.5, %v5363_v57  ;;  %v5351_v36 = vadd.f32 %v5291_v44, %v10697_v4  ;;  %v5404_v26 = vadd.f32 0.5, %v5396_v59 }
 0x8af   : > { %v6590_v27 = vpop.eup %6589  ;;  %v5409_v51 = vadd.f32 0.5, %v5401_v9  ;;  %v5410_v14 = vadd.f32 0.5, %v5402_v38  ;;  %v5456_v23 = vmul.f32 0.5, %v5367_v24  ;;  %v5517_v49 = vmul.f32 %v6582_v18, %v5405_v8 }
 0x8b0   : > { %v6592_v22 = vpop.eup %6591  ;;  %v5518_v25 = vmul.f32 %v6584_v17, %v5406_v45  ;;  %6611 = vtanh.f32 %v5453_v5  ;;  %v5452_v54 = vmul.f32 0.5, %v5351_v36  ;;  %v5519_v2 = vmul.f32 %v6586_v28, %v5407_v56 }
 0x8b1   : > { %v6594_v41 = vpop.eup %6593  ;;  %v5457_v10 = vmul.f32 0.5, %v5371_v53  ;;  %v5458_v13 = vmul.f32 0.5, %v5375_v32  ;;  %6613 = vtanh.f32 %v5454_v34  ;;  %v5520_v40 = vmul.f32 %v6588_v19, %v5408_v43 }
 0x8b2   : > { %v6596_v55 = vpop.eup %6595  ;;  %v5459_v50 = vmul.f32 0.5, %v5379_v29  ;;  %6615 = vtanh.f32 %v5455_v42  ;;  %v5521_v57 = vmul.f32 %v6590_v27, %v5409_v51  ;;  %v5516_v9 = vmul.f32 %v6580_v63, %v5404_v26 }
 0x8b3   : > { %v6598_v60 = vpop.eup %6597  ;;  %v5428_v16 = vmul.f32 0.5, %v6596_v55  ;;  %6617 = vtanh.f32 %v5456_v23  ;;  %v5522_v62 = vmul.f32 %v6592_v22, %v5410_v14  ;;  %v5523_v45 = vmul.f32 %v6594_v41, %v5411_v52 }
 0x8b4   : > { %v6600_v44 = vpop.eup %6599  ;;  %v5429_v59 = vmul.f32 0.5, %v6598_v60  ;;  %6619 = vtanh.f32 %v5452_v54 }
 0x8b5   : > { %v6602_v38 = vpop.eup %6601  ;;  %v5430_v18 = vmul.f32 0.5, %v6600_v44  ;;  %v5436_v17 = vadd.f32 0.5, %v5428_v16  ;;  %6621 = vtanh.f32 %v5457_v10 }
 0x8b6   : > { %v6604_v24 = vpop.eup %6603  ;;  %v5431_v28 = vmul.f32 0.5, %v6602_v38  ;;  %v5437_v8 = vadd.f32 0.5, %v5429_v59  ;;  %6623 = vtanh.f32 %v5458_v13 }
 0x8b7   : > { %v6606_v5 = vpop.eup %6605  ;;  %v5432_v56 = vmul.f32 0.5, %v6604_v24  ;;  %v5438_v19 = vadd.f32 0.5, %v5430_v18  ;;  %v5508_v0 = vmul.f32 %v5492_v37, %v5436_v17  ;;  %6625 = vtanh.f32 %v5459_v50 }
 0x8b8   : > { %v6608_v53 = vpop.eup %6607  ;;  %v5433_v15 = vmul.f32 0.5, %v6606_v5  ;;  %v5439_v63 = vadd.f32 0.5, %v5431_v28  ;;  %v5509_v32 = vmul.f32 %v5493_v48, %v5437_v8 }
 0x8b9   : > { %v6610_v34 = vpop.eup %6609  ;;  %v5434_v27 = vmul.f32 0.5, %v6608_v53  ;;  %v5440_v43 = vadd.f32 0.5, %v5432_v56  ;;  %v5510_v52 = vmul.f32 %v5494_v1, %v5438_v19  ;;  %v5524_v35 = vadd.f32 %v5516_v9, %v5508_v0 }
 0x8ba   : > { %v5435_v29 = vmul.f32 0.5, %v6610_v34  ;;  %v5441_v42 = vadd.f32 0.5, %v5433_v15  ;;  %v5511_v46 = vmul.f32 %v5495_v39, %v5439_v63  ;;  %v5525_v37 = vadd.f32 %v5517_v49, %v5509_v32 }
 0x8bb   : > { %v5442_v4 = vadd.f32 0.5, %v5434_v27  ;;  %v5512_v36 = vmul.f32 %v5496_v31, %v5440_v43  ;;  %v5526_v11 = vadd.f32 %v5518_v25, %v5510_v52  ;;  %6627 = vtanh.f32 %v5524_v35  ;;  %5726 = vst [vmem:[#allocation3 - $0x7] sm:$0x80] %v5524_v35 }
 0x8bc   : > { %v5443_v48 = vadd.f32 0.5, %v5435_v29  ;;  %v5513_v22 = vmul.f32 %v5497_v61, %v5441_v42  ;;  %v5527_v3 = vadd.f32 %v5519_v2, %v5511_v46  ;;  %6629 = vtanh.f32 %v5525_v37 }
 0x8bd   : > { %v5514_v1 = vmul.f32 %v5498_v7, %v5442_v4  ;;  %v5528_v26 = vadd.f32 %v5520_v40, %v5512_v36  ;;  %6631 = vtanh.f32 %v5526_v11  ;;  %v5711_v58 = vrot.slane %v5525_v37, 7  ;;  %v6612_v39 = vpop.eup %6611 }
 0x8be   : > { %v5515_v6 = vmul.f32 %v5499_v33, %v5443_v48  ;;  %v5529_v31 = vadd.f32 %v5521_v57, %v5513_v22  ;;  %6633 = vtanh.f32 %v5527_v3  ;;  %v5712_v51 = vrot.slane %v5526_v11, 6  ;;  %v6614_v14 = vpop.eup %6613 }
 0x8bf   : > { %v5530_v23 = vadd.f32 %v5522_v62, %v5514_v1  ;;  %6635 = vtanh.f32 %v5528_v26  ;;  %v5714_v30 = vrot.slane %v5527_v3, 5  ;;  %v6616_v61 = vpop.eup %6615  ;;  %v5716_v7 = vrot.slane %v5528_v26, 4 }
 0x8c0   : > { %v5531_v41 = vadd.f32 %v5523_v45, %v5515_v6  ;;  %6637 = vtanh.f32 %v5529_v31  ;;  %v5713_v20 = vsel %vm1109_vm1, %v5712_v51, %v5711_v58  ;;  %v6618_v49 = vpop.eup %6617  ;;  %v5718_v54 = vrot.slane %v5529_v31, 3 }
 0x8c1   : > { %v5715_v25 = vsel %vm1112_vm2, %v5714_v30, %v5713_v20  ;;  %v6620_v55 = vpop.eup %6619  ;;  %v5720_v33 = vrot.slane %v5530_v23, 2  ;;  %v5469_v50 = vmul.f32 0.5, %v6612_v39  ;;  %v5470_v57 = vmul.f32 0.5, %v6614_v14 }
 0x8c2   : > { %v5717_v12 = vsel %vm1115_vm3, %v5716_v7, %v5715_v25  ;;  %v6622_v2 = vpop.eup %6621  ;;  %v5722_v13 = vrot.slane %v5531_v41, 1  ;;  %v5468_v60 = vmul.f32 0.5, %v6620_v55  ;;  %v5471_v9 = vmul.f32 0.5, %v6616_v61 }
 0x8c3   : > { %v5719_v10 = vsel %vm1118_vm4, %v5718_v54, %v5717_v12  ;;  %v6624_v16 = vpop.eup %6623  ;;  %6639 = vtanh.f32 %v5530_v23  ;;  %v5472_v18 = vmul.f32 0.5, %v6618_v49  ;;  %v5477_v62 = vadd.f32 0.5, %v5469_v50 }
 0x8c4   : > { %v5721_v40 = vsel %vm1121_vm5, %v5720_v33, %v5719_v10  ;;  %v6626_v44 = vpop.eup %6625  ;;  %v5476_v38 = vadd.f32 0.5, %v5468_v60  ;;  %6641 = vtanh.f32 %v5531_v41  ;;  %v5473_v24 = vmul.f32 0.5, %v6622_v2 }
 0x8c5   : > { %v5723_v59 = vsel %vm1124_vm6, %v5722_v13, %v5721_v40  ;;  %v5478_v8 = vadd.f32 0.5, %v5470_v57  ;;  %v5479_v56 = vadd.f32 0.5, %v5471_v9  ;;  %v5480_v15 = vadd.f32 0.5, %v5472_v18 }
 0x8c6   : > { %5727 = vst [vmem:[#allocation3 + $0x1] sm:$0x7f] %v5723_v59  ;;  %v5481_v34 = vadd.f32 0.5, %v5473_v24  ;;  %v5474_v29 = vmul.f32 0.5, %v6624_v16  ;;  %v5475_v22 = vmul.f32 0.5, %v6626_v44 }
 0x8c8   : > { %v6628_v17 = vpop.eup %6627  ;;  %v5482_v14 = vadd.f32 0.5, %v5474_v29  ;;  %v5483_v20 = vadd.f32 0.5, %v5475_v22 }
 0x8c9   : > { %v6630_v28 = vpop.eup %6629  ;;  %v9744_v45 = vmul.f32 %v6628_v17, %v5476_v38 }
 0x8ca   : > { %v6632_v5 = vpop.eup %6631  ;;  %v9746_v19 = vmul.f32 %v6630_v28, %v5477_v62 }
 0x8cb   : > { %v6634_v0 = vpop.eup %6633  ;;  %v5571_v53 = vsel %vm1127_vm7, %v9744_v45, 0.0  ;;  %5701 = vst [vmem:[#allocation2 - $0x7] sm:$0x80] %v9744_v45  ;;  %v9751_v63 = vmul.f32 %v6632_v5, %v5478_v8  ;;  %v5580_v38 = vmul.f32 %v9744_v45, %v9744_v45 }
 0x8cc   : > { %v6636_v32 = vpop.eup %6635  ;;  %5572 = vadd.xlane.f32.xlu1 %v5571_v53  ;;  %v9753_v27 = vmul.f32 %v6634_v0, %v5479_v56  ;;  %v5556_v43 = vrot.slane %v9746_v19, 7  ;;  %v5581_v52 = vmul.f32 %v9746_v19, %v9746_v19 }
 0x8cd   : > { %v6638_v35 = vpop.eup %6637  ;;  %v9758_v42 = vmul.f32 %v6636_v32, %v5480_v15  ;;  %v5557_v46 = vrot.slane %v9751_v63, 6  ;;  %v5582_v37 = vmul.f32 %v9751_v63, %v9751_v63  ;;  %v5611_v62 = vsel %vm1127_vm7, %v5580_v38, 0.0 }
 0x8ce   : > { %v9763_v4 = vmul.f32 %v6638_v35, %v5481_v34  ;;  %v5559_v36 = vrot.slane %v9753_v27, 5  ;;  %v5583_v11 = vmul.f32 %v9753_v27, %v9753_v27  ;;  %v5596_v48 = vrot.slane %v5581_v52, 7 }
 0x8cf   : > { %v5558_v3 = vsel %vm1109_vm1, %v5557_v46, %v5556_v43  ;;  %v5584_v1 = vmul.f32 %v9758_v42, %v9758_v42  ;;  %v5597_v26 = vrot.slane %v5582_v37, 6  ;;  %v5561_v39 = vrot.slane %v9758_v42, 4 }
 0x8d0   : > { %v5560_v58 = vsel %vm1112_vm2, %v5559_v36, %v5558_v3  ;;  %v5599_v6 = vrot.slane %v5583_v11, 5  ;;  %v5585_v31 = vmul.f32 %v9763_v4, %v9763_v4  ;;  %v6640_v41 = vpop.eup %6639  ;;  %v5563_v7 = vrot.slane %v9763_v4, 3 }
 0x8d1   : > { %v5598_v51 = vsel %vm1109_vm1, %v5597_v26, %v5596_v48  ;;  %v5562_v23 = vsel %vm1115_vm3, %v5561_v39, %v5560_v58  ;;  %v5601_v61 = vrot.slane %v5584_v1, 4  ;;  %v6642_v49 = vpop.eup %6641  ;;  %v5546_v25 = vmul.f32 %v6640_v41, %v5482_v14 }
 0x8d2   : > { %v5600_v30 = vsel %vm1112_vm2, %v5599_v6, %v5598_v51  ;;  %v5547_v55 = vmul.f32 %v6642_v49, %v5483_v20  ;;  %v5564_v12 = vsel %vm1118_vm4, %v5563_v7, %v5562_v23  ;;  %v5603_v33 = vrot.slane %v5585_v31, 3 }
 0x8d3   : > { %v5602_v54 = vsel %vm1115_vm3, %v5601_v61, %v5600_v30  ;;  %v5565_v2 = vrot.slane %v5546_v25, 2  ;;  %v5586_v10 = vmul.f32 %v5546_v25, %v5546_v25  ;;  %vm5574_vm1 = vcmask 1046528  }
 0x8d4   : > { %v5567_v13 = vrot.slane %v5547_v55, 1  ;;  %v5587_v60 = vmul.f32 %v5547_v55, %v5547_v55  ;;  %v5604_v16 = vsel %vm1118_vm4, %v5603_v33, %v5602_v54 }
 0x8d5   : > { %v5566_v40 = vsel %vm1121_vm5, %v5565_v2, %v5564_v12  ;;  %v5605_v50 = vrot.slane %v5586_v10, 2 }
 0x8d6   : > { %v5568_v44 = vsel %vm1124_vm6, %v5567_v13, %v5566_v40  ;;  %v5607_v59 = vrot.slane %v5587_v60, 1 }
 0x8d7   : > { %v5575_v57 = vsel %vm5574_vm1, %v5568_v44, 0.0  ;;  %5702 = vst [vmem:[#allocation2 + $0x1] sm:$0x7f] %v5568_v44  ;;  %v5606_v9 = vsel %vm1121_vm5, %v5605_v50, %v5604_v16 }
 0x8d8   : > { %5576 = vadd.xlane.f32.xlu1 %v5575_v57  ;;  %v5608_v18 = vsel %vm1124_vm6, %v5607_v59, %v5606_v9 }
 0x8d9   : > { %v5614_v17 = vsel %vm5574_vm1, %v5608_v18, 0.0 }
 0x8da   : > { %5615 = vadd.xlane.f32.xlu0 %v5614_v17 }
 0x8dc   : > { %5612 = vadd.xlane.f32.xlu1 %v5611_v62 }
 0x955   : > { %v5573_v24 = vpop.xlane.xlu1 %5572 }
 0x956   : > { %v5578_v5 = vmul.f32 0.0078125, %v5573_v24 }
 0x958   : > { %v5619_v32 = vmul.f32 %v5578_v5, %v5578_v5  ;;  %v5640_v1 = vsub.f32 %v9744_v45, %v5578_v5 }
 0x961   : > { %v5577_v28 = vpop.xlane.xlu1 %5576 }
 0x962   : > { %v5579_v8 = vmul.f32 0.0078125, %v5577_v28 }
 0x963   : > { %v5616_v56 = vpop.xlane.xlu0 %5615 }
 0x964   : > { %v5620_v0 = vmul.f32 %v5579_v8, %v5579_v8  ;;  %v5618_v15 = vmul.f32 0.0078125, %v5616_v56  ;;  %v5625_v46 = vrot.slane %v5579_v8, 1  ;;  %v5626_v37 = vrot.slane %v5579_v8, 2 }
 0x965   : > { %v5613_v53 = vpop.xlane.xlu1 %5612  ;;  %v5627_v36 = vrot.slane %v5579_v8, 3  ;;  %v5628_v11 = vrot.slane %v5579_v8, 4  ;;  %v5629_v48 = vrot.slane %v5579_v8, 5  ;;  %v5630_v22 = vrot.slane %v5579_v8, 6 }
 0x966   : > { %v5617_v34 = vmul.f32 0.0078125, %v5613_v53  ;;  %v5622_v43 = vsub.f32 %v5618_v15, %v5620_v0  ;;  %v5631_v3 = vrot.slane %v5579_v8, 7  ;;  %v5641_v26 = vsub.f32 %v9746_v19, %v5625_v46 }
 0x967   : > { %v5642_v58 = vsub.f32 %v9751_v63, %v5626_v37  ;;  %v5643_v39 = vsub.f32 %v9753_v27, %v5627_v36  ;;  %v5644_v31 = vsub.f32 %v9758_v42, %v5628_v11  ;;  %v5645_v51 = vsub.f32 %v9763_v4, %v5629_v48 }
 0x968   : > { %v5621_v52 = vsub.f32 %v5617_v34, %v5619_v32  ;;  %v5649_v35 = vadd.f32 1e-05, %v5622_v43  ;;  %v5646_v14 = vsub.f32 %v5546_v25, %v5630_v22  ;;  %v5647_v23 = vsub.f32 %v5547_v55, %v5631_v3 }
 0x96a   : > { %v5648_v29 = vadd.f32 1e-05, %v5621_v52  ;;  %6643 = vrsqrt.f32 %v5649_v35 }
 0x96c   : > { %6645 = vrsqrt.f32 %v5648_v29 }
 0x977   : > { %v6644_v6 = vpop.eup %6643 }
 0x978   : > { %v5654_v61 = vrot.slane %v6644_v6, 1  ;;  %v5655_v41 = vrot.slane %v6644_v6, 2  ;;  %v5656_v20 = vrot.slane %v6644_v6, 3  ;;  %v5657_v45 = vrot.slane %v6644_v6, 4 }
 0x979   : > { %v6646_v30 = vpop.eup %6645  ;;  %v5658_v7 = vrot.slane %v6644_v6, 5  ;;  %v5659_v19 = vrot.slane %v6644_v6, 6  ;;  %v5660_v49 = vrot.slane %v6644_v6, 7 }
 0x97a   : > { %v5669_v63 = vmul.f32 %v6646_v30, %v5640_v1  ;;  %v5670_v54 = vmul.f32 %v5654_v61, %v5641_v26  ;;  %v5671_v27 = vmul.f32 %v5655_v41, %v5642_v58  ;;  %v5672_v12 = vmul.f32 %v5656_v20, %v5643_v39 }
 0x97b   : > { %v5673_v33 = vmul.f32 %v5657_v45, %v5644_v31  ;;  %v5674_v42 = vmul.f32 %v5658_v7, %v5645_v51  ;;  %v5675_v4 = vmul.f32 %v5659_v19, %v5646_v14  ;;  %v5676_v2 = vmul.f32 %v5660_v49, %v5647_v23 }
 0x97c   : > { %v5677_v25 = vmul.f32 %v9635_v47, %v5669_v63  ;;  %v5678_v55 = vmul.f32 %v9635_v47, %v5670_v54  ;;  %v5679_v10 = vmul.f32 %v9635_v47, %v5671_v27  ;;  %v5680_v13 = vmul.f32 %v9635_v47, %v5672_v12 }
 0x97d   : > { %v5681_v60 = vmul.f32 %v9635_v47, %v5673_v33  ;;  %v5682_v16 = vmul.f32 %v9635_v47, %v5674_v42  ;;  %v5683_v40 = vmul.f32 %v9635_v47, %v5675_v4  ;;  %v5684_v50 = vmul.f32 %v9635_v47, %v5676_v2 }
 0x97e   : > { %v5685_v44 = vadd.f32 %v9642_v21, %v5677_v25  ;;  %v5686_v59 = vadd.f32 %v9642_v21, %v5678_v55  ;;  %v5687_v57 = vadd.f32 %v9642_v21, %v5679_v10  ;;  %v5688_v9 = vadd.f32 %v9642_v21, %v5680_v13 }
 0x97f   : > { %v5689_v38 = vadd.f32 %v9642_v21, %v5681_v60  ;;  %v5690_v47 = vadd.f32 %v9642_v21, %v5682_v16  ;;  %v5691_v18 = vadd.f32 %v9642_v21, %v5683_v40  ;;  %v5692_v17 = vadd.f32 %v9642_v21, %v5684_v50 }
 0x980   : > { %5693 = vst [vmem:[%s7005_s26] sm:$0x80] %v5685_v44  ;;  %5694 = vst [vmem:[%s7005_s26 + $0x8] sm:$0x80] %v5686_v59 }
 0x981   : > { %5695 = vst [vmem:[%s7005_s26 + $0x10] sm:$0x80] %v5687_v57  ;;  %5696 = vst [vmem:[%s7005_s26 + $0x18] sm:$0x80] %v5688_v9 }
 0x982   : > { %5697 = vst [vmem:[%s7005_s26 + $0x20] sm:$0x80] %v5689_v38  ;;  %5698 = vst [vmem:[%s7005_s26 + $0x28] sm:$0x80] %v5690_v47 }
 0x983   : > { %5699 = vst [vmem:[%s7005_s26 + $0x30] sm:$0x80] %v5691_v18  ;;  %5700 = vst [vmem:[%s7005_s26 + $0x38] sm:$0x80] %v5692_v17 }
 0x984   : > { %6746 = shalt.err (!%p6743_p4)
}
 0x985   : > { %s6747_s26 = scalar_lea.hbm %s9809_s30, 1024  ;;  %s6751_s9 = scalar_lea.hbm %s9880_s6, 2048 }
 0x986   : > { %p6748_p1 = scmp.ne.s32.totalorder %s9809_s30, %s6747_s26  ;;  %p6752_p10 = scmp.lt.s32.totalorder %s9809_s30, %s9880_s6 }
 0x987   : > { %p6753_p2 = scmp.lt.s32.totalorder %s6751_s9, %s6747_s26 }
 0x988   : > { %p6749_p9 = pnand %p6748_p1, %p10698_p3 }
 0x989   : > { %p6754_p12 = por %p6753_p2, %p6752_p10 }
 0x98a   : > { %p6750_p11 = pneg %p6749_p9 }
 0x98c   : > { %p6755_p8 = pnand %p6754_p12, %p6750_p11 }
 0x98e   : > { %6758 = shalt.err (!%p6755_p8)
}
 0x98f   : > { %s6830_s29 = smov 128   ;;  %s6831_s7 = smov 256  }
 0x990   : > { %s6832_s10 = smov 8  }
 0x991   : > { %5894 = dma.vmem_to_hbm [thread:$0]  (%p10698_p3), %s9815_s14, 1024, %s9809_s30, %s5729_s11, %s6830_s29, %s6831_s7, %s6832_s10  }
 0x992 PF: > { %s10699_s24 = sld [smem:[#allocation15_spill]]  ;;  %s5759_s18 = sand.u32 1, %s6797_s21  }
 0x993   : > { %s10700_s28 = sld [smem:[#allocation14_spill]]  ;;  %s5760_s19 = scalar_lea.sflag [#allocation6], %s5759_s18 }
 0x998   : > { %p10701_p6 = scmp.ne.s32.totalorder %s10699_s24, 0 }
 0x999   : > { %p10702_p0 = scmp.ge.s32.totalorder %s10700_s28, 2 }
 0x99b   : > { %p5908_p5 = pnand %p10702_p0, %p10701_p6 }
 0x99d   : > { %p5909_p7 = pneg %p5908_p5 }
 0x99f   : > { %6792 = dma.done.wait (%p5909_p7), %s5760_s19, 1024  }
 0x9a0   : > { %6794 = vsyncadd (%p5909_p7), %s5760_s19, 4294966272  ;;  %s23_s26 = sadd.s32 1, %s10700_s28   ;;  %s10703_s21 = smov %s6801_s22 }
 0x9a1   : > { %p20_p13 = scmp.ge.s32.totalorder %s23_s26, 4   ;;  %s10704_s22 = smov %s6805_s23 }
 0x9a2   : > { %s10705_s23 = smov %s6981_s16  ;;  %s10706_s24 = smov %s6813_s25 }
 0x9a3   : > { %s10707_s25 = smov %s10709_s15  ;;  %22 = sbr.rel (!%p20_p13) target bundleno = 10 (0xa), region = 101 }
 0x9a8   :  { %5765 = vsyncpa [#allocation5], 1 }
 0x9a9   :  { %5767 = vsyncpa [#allocation5 + $0x1], 1 }
 0x9aa   :  { %5768 = vsyncpa [#allocation8], 1 }
 0x9ab   :  { %5769 = vsyncpa [#allocation6], 1 }
 0x9ac   :  { %5771 = vsyncpa [#allocation6 + $0x1], 1 }

</bundles_post_ra>
